<compile_context>
chip_gen: v7x
topology: tpu7x:2x2x1
jax: 0.10.0
libtpu: 0.0.40
codegen_flags: <defaults>
</compile_context>

<pallas_src>
import jax
import jax.numpy as jnp
from jax import lax
from jax.experimental import pallas as pl
from jax.experimental.pallas import tpu as pltpu

NUM_CLASSES = 16
HIDDEN = 32          # hidden_size (module default is 64; small shape chosen)


# ---------- fused conv1+ReLU+pool -> conv2+ReLU+pool (single pallas_call) ----
def _conv_stack_kernel(x_ref, w1_ref, b1_ref, w2_ref, b2_ref, o_ref,
                       xp1_ref, xp2_ref):
    # x_ref : (nb, H, W, Cin)      unpadded NHWC batch block
    # w1_ref: (9, Cin, C1)         conv1 weights, (kh,kw) major
    # w2_ref: (9, C1, C2)          conv2 weights
    # b*_ref: (1, C*)
    # o_ref : (nb, H//4, W//4, C2) pooled output
    # xp1/xp2: zero-halo VMEM scratch for the two convolutions
    nb, H, W, cin = x_ref.shape
    c1 = w1_ref.shape[2]
    c2 = w2_ref.shape[2]
    H1, W1 = H // 2, W // 2
    H2, W2 = H1 // 2, W1 // 2

    # Halo pad folded into the kernel: zero the scratch, copy the interior.
    xp1_ref[...] = jnp.zeros_like(xp1_ref)
    xp1_ref[:, 1:H + 1, 1:W + 1, :] = x_ref[...]

    # conv1: nine shifted, lane-aligned K=Cin matmuls accumulated in registers
    acc = jnp.zeros((nb * H * W, c1), jnp.float32)
    for kh in range(3):
        for kw in range(3):
            patch = xp1_ref[:, kh:kh + H, kw:kw + W, :].reshape(nb * H * W, cin)
            acc += jnp.dot(patch, w1_ref[kh * 3 + kw],
                           preferred_element_type=jnp.float32)
    acc = jnp.maximum(acc + b1_ref[...], 0.0)                 # bias + ReLU
    y = jnp.max(acc.reshape(nb * H, W1, 2, c1), axis=2)       # pool along W
    y = jnp.max(y.reshape(nb * H1, 2, W1, c1), axis=1)        # pool along H
    y = y.reshape(nb, H1, W1, c1)

    # conv2 on the VMEM-resident intermediate (never touches HBM)
    xp2_ref[...] = jnp.zeros_like(xp2_ref)
    xp2_ref[:, 1:H1 + 1, 1:W1 + 1, :] = y

    acc2 = jnp.zeros((nb * H1 * W1, c2), jnp.float32)
    for kh in range(3):
        for kw in range(3):
            patch = xp2_ref[:, kh:kh + H1, kw:kw + W1, :].reshape(
                nb * H1 * W1, c1)
            acc2 += jnp.dot(patch, w2_ref[kh * 3 + kw],
                            preferred_element_type=jnp.float32)
    acc2 = jnp.maximum(acc2 + b2_ref[...], 0.0)
    y2 = jnp.max(acc2.reshape(nb * H1, W2, 2, c2), axis=2)
    y2 = jnp.max(y2.reshape(nb * H2, 2, W2, c2), axis=1)
    o_ref[...] = y2.reshape(nb, H2, W2, c2)


def _pick_batch_block(n, cap=8):
    for nb in range(min(n, cap), 0, -1):
        if n % nb == 0:
            return nb
    return 1


def conv_stack(x_nhwc, w1_hwio, b1, w2_hwio, b2):
    n, h, w, cin = x_nhwc.shape
    c1 = w1_hwio.shape[-1]
    c2 = w2_hwio.shape[-1]
    nb = _pick_batch_block(n)                 # several images per grid step
    w1r = w1_hwio.reshape(9, cin, c1)
    w2r = w2_hwio.reshape(9, c1, c2)
    return pl.pallas_call(
        _conv_stack_kernel,
        out_shape=jax.ShapeDtypeStruct((n, h // 4, w // 4, c2), jnp.float32),
        grid=(n // nb,),
        in_specs=[
            pl.BlockSpec((nb, h, w, cin), lambda i: (i, 0, 0, 0)),
            pl.BlockSpec((9, cin, c1), lambda i: (0, 0, 0)),
            pl.BlockSpec((1, c1), lambda i: (0, 0)),
            pl.BlockSpec((9, c1, c2), lambda i: (0, 0, 0)),
            pl.BlockSpec((1, c2), lambda i: (0, 0)),
        ],
        out_specs=pl.BlockSpec((nb, h // 4, w // 4, c2),
                               lambda i: (i, 0, 0, 0)),
        scratch_shapes=[
            pltpu.VMEM((nb, h + 2, w + 2, cin), jnp.float32),
            pltpu.VMEM((nb, h // 2 + 2, w // 2 + 2, c1), jnp.float32),
        ],
        compiler_params=pltpu.CompilerParams(
            dimension_semantics=("parallel",),
            vmem_limit_bytes=32 * 1024 * 1024),
    )(x_nhwc, w1r, b1, w2r, b2)


# -------------------- fc1 image-feature K-stream (dominant kernel) -----------
def _fc1_stream_kernel(x_ref, w_ref, o_ref):
    # x_ref: (n, tk) bf16; w_ref: (tk, 128) bf16; o_ref: (1, n, 128) f32
    # Output block stays VMEM-resident across the "arbitrary" K axis.
    k = pl.program_id(1)

    @pl.when(k == 0)
    def _():
        o_ref[...] = jnp.zeros_like(o_ref)

    o_ref[0] += jnp.dot(x_ref[...], w_ref[...],
                        preferred_element_type=jnp.float32)


def fc1_stream(x_img, w1_img, *, tk=512, num_splits=2):
    """Partial fc1 pre-activations: out[j] = x[:, Kj] @ W1[Kj, :] (bf16 stream).

    num_splits=2 gives the grid a leading "parallel" axis so both v7x
    TensorCores stream half of the fc1 weight each; on single-TC v5e/v6e it is
    just a loop.  The K axis is zero-padded to a multiple of num_splits*tk
    (zeros contribute nothing) instead of asserting divisibility.
    """
    n, ki = x_img.shape
    h1 = w1_img.shape[1]
    x_img = x_img.astype(w1_img.dtype)
    kp = num_splits * tk * pl.cdiv(ki, num_splits * tk)
    if kp != ki:
        x_img = jnp.pad(x_img, ((0, 0), (0, kp - ki)))
        w1_img = jnp.pad(w1_img, ((0, kp - ki), (0, 0)))
    steps = kp // (num_splits * tk)
    return pl.pallas_call(
        _fc1_stream_kernel,
        out_shape=jax.ShapeDtypeStruct((num_splits, n, h1), jnp.float32),
        grid=(num_splits, steps),
        in_specs=[
            pl.BlockSpec((n, tk), lambda j, k: (0, j * steps + k)),
            pl.BlockSpec((tk, h1), lambda j, k: (j * steps + k, 0)),
        ],
        out_specs=pl.BlockSpec((1, n, h1), lambda j, k: (j, 0, 0)),
        compiler_params=pltpu.CompilerParams(
            dimension_semantics=("parallel", "arbitrary"),
            vmem_limit_bytes=32 * 1024 * 1024),
    )(x_img, w1_img)


# ----------- head finalize: LSTM + combine partials + ReLU + fc2 (fused) -----
def _head_kernel(part_ref, lab_ref, wih_ref, whh_ref, bl_ref,
                 w1h_ref, b1_ref, w2_ref, b2_ref, o_ref):
    # part_ref: (S, n, 128) partial fc1 pre-activations from fc1_stream
    # lab_ref : (T, n, D) labels; LSTM gate columns ordered [i | f | o | g]
    T, n, d = lab_ref.shape
    hid = whh_ref.shape[0]

    # Hoist the input projection for all T steps out of the recurrence.
    xproj = jnp.dot(lab_ref[...].reshape(T * n, d), wih_ref[...],
                    preferred_element_type=jnp.float32) + bl_ref[...]
    xproj = xproj.reshape(T, n, 4 * hid)

    whh = whh_ref[...]
    h = jnp.zeros((n, hid), jnp.float32)
    c = jnp.zeros((n, hid), jnp.float32)
    for t in range(T):       # T is small & static: fully unrolled
        gates = xproj[t] + jnp.dot(h, whh, preferred_element_type=jnp.float32)
        sig = jax.nn.sigmoid(gates[:, :3 * hid])     # one contiguous sigmoid
        g = jnp.tanh(gates[:, 3 * hid:])             # one contiguous tanh
        i = sig[:, 0 * hid:1 * hid]
        f = sig[:, 1 * hid:2 * hid]
        o = sig[:, 2 * hid:3 * hid]
        c = f * c + i * g
        h = o * jnp.tanh(c)

    pre = (jnp.sum(part_ref[...], axis=0)
           + jnp.dot(h, w1h_ref[...], preferred_element_type=jnp.float32)
           + b1_ref[...])
    h1 = jnp.maximum(pre, 0.0)
    o_ref[...] = (jnp.dot(h1, w2_ref[...], preferred_element_type=jnp.float32)
                  + b2_ref[...])


def head_finalize(partials, labels_tnd, wih, whh, bl, w1_h, b1, w2, b2):
    s, n, h1 = partials.shape
    T, _, d = labels_tnd.shape
    hid = whh.shape[0]
    c = w2.shape[1]
    return pl.pallas_call(
        _head_kernel,
        out_shape=jax.ShapeDtypeStruct((n, c), jnp.float32),
        grid=(1,),
        in_specs=[
            pl.BlockSpec((s, n, h1), lambda i: (0, 0, 0)),
            pl.BlockSpec((T, n, d), lambda i: (0, 0, 0)),
            pl.BlockSpec((d, 4 * hid), lambda i: (0, 0)),
            pl.BlockSpec((hid, 4 * hid), lambda i: (0, 0)),
            pl.BlockSpec((1, 4 * hid), lambda i: (0, 0)),
            pl.BlockSpec((hid, h1), lambda i: (0, 0)),
            pl.BlockSpec((1, h1), lambda i: (0, 0)),
            pl.BlockSpec((h1, c), lambda i: (0, 0)),
            pl.BlockSpec((1, c), lambda i: (0, 0)),
        ],
        out_specs=pl.BlockSpec((n, c), lambda i: (0, 0)),
        compiler_params=pltpu.CompilerParams(
            dimension_semantics=("arbitrary",)),
    )(partials, labels_tnd, wih, whh, bl, w1_h, b1, w2, b2)


# ------------------------------- full forward -------------------------------
def forward(params, images_nchw, labels):
    x = jnp.transpose(images_nchw, (0, 2, 3, 1)).astype(jnp.float32)   # NHWC
    f2 = conv_stack(x, params["conv1_w"], params["conv1_b"],
                    params["conv2_w"], params["conv2_b"])
    # fc1_w_img rows are stored in NHWC-flatten order, so no NCHW transpose.
    img_feat = f2.reshape(f2.shape[0], -1).astype(jnp.bfloat16)
    partials = fc1_stream(img_feat, params["fc1_w_img"])
    return head_finalize(partials, jnp.transpose(labels, (1, 0, 2)),
                         params["lstm_wih"], params["lstm_whh"],
                         params["lstm_b"], params["fc1_w_h"],
                         params["fc1_b"], params["fc2_w"], params["fc2_b"])


# -------------------------- pure-JAX reference check ------------------------
def reference_forward(params, images_nchw, labels):
    x = jnp.transpose(images_nchw, (0, 2, 3, 1)).astype(jnp.float32)

    def conv_block(x, w, b):
        y = lax.conv_general_dilated(
            x, w, (1, 1), "SAME",
            dimension_numbers=("NHWC", "HWIO", "NHWC"))
        y = jnp.maximum(y + b.reshape(1, 1, 1, -1), 0.0)
        return lax.reduce_window(y, -jnp.inf, lax.max,
                                 (1, 2, 2, 1), (1, 2, 2, 1), "VALID")

    f1 = conv_block(x, params["conv1_w"], params["conv1_b"])
    f2 = conv_block(f1, params["conv2_w"], params["conv2_b"])
    img_feat = f2.reshape(f2.shape[0], -1)                  # NHWC flatten
    fc1_img = jnp.dot(img_feat.astype(jnp.bfloat16), params["fc1_w_img"],
                      preferred_element_type=jnp.float32)

    x_tnd = jnp.transpose(labels, (1, 0, 2))
    n = labels.shape[0]
    hid = params["lstm_whh"].shape[0]

    def step(carry, x_t):
        h, c = carry
        gates = (x_t @ params["lstm_wih"] + h @ params["lstm_whh"]
                 + params["lstm_b"][0])
        i = jax.nn.sigmoid(gates[:, 0 * hid:1 * hid])
        f = jax.nn.sigmoid(gates[:, 1 * hid:2 * hid])
        o = jax.nn.sigmoid(gates[:, 2 * hid:3 * hid])
        g = jnp.tanh(gates[:, 3 * hid:4 * hid])
        c = f * c + i * g
        h = o * jnp.tanh(c)
        return (h, c), None

    (hN, _), _ = lax.scan(step, (jnp.zeros((n, hid), jnp.float32),
                                 jnp.zeros((n, hid), jnp.float32)), x_tnd)
    h1 = jnp.maximum(fc1_img + hN @ params["fc1_w_h"] + params["fc1_b"], 0.0)
    return h1 @ params["fc2_w"] + params["fc2_b"]


# ------------------------------- parameter init ------------------------------
def init_params(key, img_hw=16, hidden=HIDDEN, num_classes=NUM_CLASSES):
    ks = jax.random.split(key, 12)
    feat = 64 * (img_hw // 4) * (img_hw // 4)

    def nrm(k, shape, scale=0.1):
        return scale * jax.random.normal(k, shape, dtype=jnp.float32)

    return {
        "conv1_w": nrm(ks[0], (3, 3, 3, 32)),          # HWIO
        "conv1_b": nrm(ks[1], (1, 32)),
        "conv2_w": nrm(ks[2], (3, 3, 32, 64)),
        "conv2_b": nrm(ks[3], (1, 64)),
        # LSTM weights fused over the 4 gates; column order [i | f | o | g]
        # (PyTorch order [i|f|g|o] with the 3rd/4th blocks swapped).
        "lstm_wih": nrm(ks[4], (5, 4 * hidden)),
        "lstm_whh": nrm(ks[5], (hidden, 4 * hidden)),
        "lstm_b": nrm(ks[6], (1, 4 * hidden)),         # b_ih + b_hh combined
        # fc1 rows for image features in NHWC-flatten (h,w,c) order; stored in
        # bf16 so the dominant HBM stream is halved (f32 accumulation).
        "fc1_w_img": nrm(ks[7], (feat, 128)).astype(jnp.bfloat16),
        "fc1_w_h": nrm(ks[8], (hidden, 128)),
        "fc1_b": nrm(ks[9], (1, 128)),
        "fc2_w": nrm(ks[10], (128, num_classes)),
        "fc2_b": nrm(ks[11], (1, num_classes)),
    }


if __name__ == "__main__":
    key = jax.random.PRNGKey(0)
    kp, ki, kl = jax.random.split(key, 3)
    params = init_params(kp, img_hw=16)

    # PyTorch-style inputs: images NCHW, labels batch_first (N, T, 5)
    images = jax.random.normal(ki, (2, 3, 16, 16), dtype=jnp.float32)
    labels = jax.random.normal(kl, (2, 8, 5), dtype=jnp.float32)

    out = jax.block_until_ready(forward(params, images, labels))
    assert out.shape == (2, NUM_CLASSES), out.shape

    ref = jax.block_until_ready(reference_forward(params, images, labels))
    err = float(jnp.max(jnp.abs(out - ref)))
    assert jnp.allclose(out, ref, atol=2e-2, rtol=2e-2), (
        "max abs diff %f" % err)

    print("KERNEL_OK")
</pallas_src>

<mosaic_0001>
module attributes {stable_mosaic.version = 11 : i64} {
  func.func @_conv_stack_kernel(%arg0: i32, %arg1: memref<2x16x16x3xf32, #tpu.memory_space<vmem>>, %arg2: memref<9x3x32xf32, #tpu.memory_space<vmem>>, %arg3: memref<1x32xf32, #tpu.memory_space<vmem>>, %arg4: memref<9x32x64xf32, #tpu.memory_space<vmem>>, %arg5: memref<1x64xf32, #tpu.memory_space<vmem>>, %arg6: memref<2x4x4x64xf32, #tpu.memory_space<vmem>>, %arg7: memref<2x18x18x3xf32, #tpu.memory_space<vmem>>, %arg8: memref<2x10x10x32xf32, #tpu.memory_space<vmem>>) attributes {dimension_semantics = [#tpu.dimension_semantics<parallel>], iteration_bounds = array<i64: 1>, scalar_prefetch = 0 : i64, scratch_operands = 2 : i64, tpu.core_type = #tpu.core_type<tc>, window_params = [{transform_indices = @transform_0, window_bounds = array<i64: 2, 16, 16, 3>}, {pipeline_mode = #tpu.pipeline_mode<synchronous>, transform_indices = @transform_1, window_bounds = array<i64: 9, 3, 32>}, {pipeline_mode = #tpu.pipeline_mode<synchronous>, transform_indices = @transform_2, window_bounds = array<i64: 1, 32>}, {pipeline_mode = #tpu.pipeline_mode<synchronous>, transform_indices = @transform_3, window_bounds = array<i64: 9, 32, 64>}, {pipeline_mode = #tpu.pipeline_mode<synchronous>, transform_indices = @transform_4, window_bounds = array<i64: 1, 64>}, {transform_indices = @transform_5, window_bounds = array<i64: 2, 4, 4, 64>}]} {
    %cst = arith.constant 0.000000e+00 : f32
    %0 = vector.broadcast %cst : f32 to vector<2x18x18x3xf32>
    %c0 = arith.constant 0 : index
    %c0_0 = arith.constant 0 : index
    %c0_1 = arith.constant 0 : index
    %c0_2 = arith.constant 0 : index
    %1 = vector.load %arg7[%c0, %c0_0, %c0_1, %c0_2] : memref<2x18x18x3xf32, #tpu.memory_space<vmem>>, vector<2x18x18x3xf32>
    tpu.vector_store %arg7[%c0, %c0_0, %c0_1, %c0_2], %0 {strides = array<i32>} : memref<2x18x18x3xf32, #tpu.memory_space<vmem>>, vector<2x18x18x3xf32>,
    %c0_3 = arith.constant 0 : index
    %c0_4 = arith.constant 0 : index
    %c0_5 = arith.constant 0 : index
    %c0_6 = arith.constant 0 : index
    %2 = vector.load %arg1[%c0_3, %c0_4, %c0_5, %c0_6] : memref<2x16x16x3xf32, #tpu.memory_space<vmem>>, vector<2x16x16x3xf32>
    %c0_7 = arith.constant 0 : index
    %c1 = arith.constant 1 : index
    %c1_8 = arith.constant 1 : index
    %c0_9 = arith.constant 0 : index
    %3 = vector.load %arg7[%c0_7, %c1, %c1_8, %c0_9] : memref<2x18x18x3xf32, #tpu.memory_space<vmem>>, vector<2x16x16x3xf32>
    tpu.vector_store %arg7[%c0_7, %c1, %c1_8, %c0_9], %2 {strides = array<i32>} : memref<2x18x18x3xf32, #tpu.memory_space<vmem>>, vector<2x16x16x3xf32>,
    %cst_10 = arith.constant 0.000000e+00 : f32
    %4 = vector.broadcast %cst_10 : f32 to vector<512x32xf32>
    %c0_11 = arith.constant 0 : index
    %c0_12 = arith.constant 0 : index
    %c0_13 = arith.constant 0 : index
    %c0_14 = arith.constant 0 : index
    %5 = vector.load %arg7[%c0_11, %c0_12, %c0_13, %c0_14] : memref<2x18x18x3xf32, #tpu.memory_space<vmem>>, vector<2x16x16x3xf32>
    %6 = vector.shape_cast %5 : vector<2x16x16x3xf32> to vector<512x3xf32>
    %c0_15 = arith.constant 0 : index
    %c0_16 = arith.constant 0 : index
    %c0_17 = arith.constant 0 : index
    %7 = vector.load %arg2[%c0_15, %c0_16, %c0_17] : memref<9x3x32xf32, #tpu.memory_space<vmem>>, vector<1x3x32xf32>
    %8 = vector.shape_cast %7 : vector<1x3x32xf32> to vector<3x32xf32>
    %cst_18 = arith.constant dense<0.000000e+00> : vector<512x32xf32>
    %9 = tpu.matmul %6, %8, %cst_18 {dimension_numbers = #tpu.dot_dimension_numbers<[1], [0], [0], [1], [0, 0, 1, 1], [], []>} : vector<512x3xf32>, vector<3x32xf32>, vector<512x32xf32> -> vector<512x32xf32>
    %10 = arith.addf %4, %9 : vector<512x32xf32>
    %c0_19 = arith.constant 0 : index
    %c0_20 = arith.constant 0 : index
    %c1_21 = arith.constant 1 : index
    %c0_22 = arith.constant 0 : index
    %11 = vector.load %arg7[%c0_19, %c0_20, %c1_21, %c0_22] : memref<2x18x18x3xf32, #tpu.memory_space<vmem>>, vector<2x16x16x3xf32>
    %12 = vector.shape_cast %11 : vector<2x16x16x3xf32> to vector<512x3xf32>
    %c1_23 = arith.constant 1 : index
    %c0_24 = arith.constant 0 : index
    %c0_25 = arith.constant 0 : index
    %13 = vector.load %arg2[%c1_23, %c0_24, %c0_25] : memref<9x3x32xf32, #tpu.memory_space<vmem>>, vector<1x3x32xf32>
    %14 = vector.shape_cast %13 : vector<1x3x32xf32> to vector<3x32xf32>
    %cst_26 = arith.constant dense<0.000000e+00> : vector<512x32xf32>
    %15 = tpu.matmul %12, %14, %cst_26 {dimension_numbers = #tpu.dot_dimension_numbers<[1], [0], [0], [1], [0, 0, 1, 1], [], []>} : vector<512x3xf32>, vector<3x32xf32>, vector<512x32xf32> -> vector<512x32xf32>
    %16 = arith.addf %10, %15 : vector<512x32xf32>
    %c0_27 = arith.constant 0 : index
    %c0_28 = arith.constant 0 : index
    %c2 = arith.constant 2 : index
    %c0_29 = arith.constant 0 : index
    %17 = vector.load %arg7[%c0_27, %c0_28, %c2, %c0_29] : memref<2x18x18x3xf32, #tpu.memory_space<vmem>>, vector<2x16x16x3xf32>
    %18 = vector.shape_cast %17 : vector<2x16x16x3xf32> to vector<512x3xf32>
    %c2_30 = arith.constant 2 : index
    %c0_31 = arith.constant 0 : index
    %c0_32 = arith.constant 0 : index
    %19 = vector.load %arg2[%c2_30, %c0_31, %c0_32] : memref<9x3x32xf32, #tpu.memory_space<vmem>>, vector<1x3x32xf32>
    %20 = vector.shape_cast %19 : vector<1x3x32xf32> to vector<3x32xf32>
    %cst_33 = arith.constant dense<0.000000e+00> : vector<512x32xf32>
    %21 = tpu.matmul %18, %20, %cst_33 {dimension_numbers = #tpu.dot_dimension_numbers<[1], [0], [0], [1], [0, 0, 1, 1], [], []>} : vector<512x3xf32>, vector<3x32xf32>, vector<512x32xf32> -> vector<512x32xf32>
    %22 = arith.addf %16, %21 : vector<512x32xf32>
    %c0_34 = arith.constant 0 : index
    %c1_35 = arith.constant 1 : index
    %c0_36 = arith.constant 0 : index
    %c0_37 = arith.constant 0 : index
    %23 = vector.load %arg7[%c0_34, %c1_35, %c0_36, %c0_37] : memref<2x18x18x3xf32, #tpu.memory_space<vmem>>, vector<2x16x16x3xf32>
    %24 = vector.shape_cast %23 : vector<2x16x16x3xf32> to vector<512x3xf32>
    %c3 = arith.constant 3 : index
    %c0_38 = arith.constant 0 : index
    %c0_39 = arith.constant 0 : index
    %25 = vector.load %arg2[%c3, %c0_38, %c0_39] : memref<9x3x32xf32, #tpu.memory_space<vmem>>, vector<1x3x32xf32>
    %26 = vector.shape_cast %25 : vector<1x3x32xf32> to vector<3x32xf32>
    %cst_40 = arith.constant dense<0.000000e+00> : vector<512x32xf32>
    %27 = tpu.matmul %24, %26, %cst_40 {dimension_numbers = #tpu.dot_dimension_numbers<[1], [0], [0], [1], [0, 0, 1, 1], [], []>} : vector<512x3xf32>, vector<3x32xf32>, vector<512x32xf32> -> vector<512x32xf32>
    %28 = arith.addf %22, %27 : vector<512x32xf32>
    %c0_41 = arith.constant 0 : index
    %c1_42 = arith.constant 1 : index
    %c1_43 = arith.constant 1 : index
    %c0_44 = arith.constant 0 : index
    %29 = vector.load %arg7[%c0_41, %c1_42, %c1_43, %c0_44] : memref<2x18x18x3xf32, #tpu.memory_space<vmem>>, vector<2x16x16x3xf32>
    %30 = vector.shape_cast %29 : vector<2x16x16x3xf32> to vector<512x3xf32>
    %c4 = arith.constant 4 : index
    %c0_45 = arith.constant 0 : index
    %c0_46 = arith.constant 0 : index
    %31 = vector.load %arg2[%c4, %c0_45, %c0_46] : memref<9x3x32xf32, #tpu.memory_space<vmem>>, vector<1x3x32xf32>
    %32 = vector.shape_cast %31 : vector<1x3x32xf32> to vector<3x32xf32>
    %cst_47 = arith.constant dense<0.000000e+00> : vector<512x32xf32>
    %33 = tpu.matmul %30, %32, %cst_47 {dimension_numbers = #tpu.dot_dimension_numbers<[1], [0], [0], [1], [0, 0, 1, 1], [], []>} : vector<512x3xf32>, vector<3x32xf32>, vector<512x32xf32> -> vector<512x32xf32>
    %34 = arith.addf %28, %33 : vector<512x32xf32>
    %c0_48 = arith.constant 0 : index
    %c1_49 = arith.constant 1 : index
    %c2_50 = arith.constant 2 : index
    %c0_51 = arith.constant 0 : index
    %35 = vector.load %arg7[%c0_48, %c1_49, %c2_50, %c0_51] : memref<2x18x18x3xf32, #tpu.memory_space<vmem>>, vector<2x16x16x3xf32>
    %36 = vector.shape_cast %35 : vector<2x16x16x3xf32> to vector<512x3xf32>
    %c5 = arith.constant 5 : index
    %c0_52 = arith.constant 0 : index
    %c0_53 = arith.constant 0 : index
    %37 = vector.load %arg2[%c5, %c0_52, %c0_53] : memref<9x3x32xf32, #tpu.memory_space<vmem>>, vector<1x3x32xf32>
    %38 = vector.shape_cast %37 : vector<1x3x32xf32> to vector<3x32xf32>
    %cst_54 = arith.constant dense<0.000000e+00> : vector<512x32xf32>
    %39 = tpu.matmul %36, %38, %cst_54 {dimension_numbers = #tpu.dot_dimension_numbers<[1], [0], [0], [1], [0, 0, 1, 1], [], []>} : vector<512x3xf32>, vector<3x32xf32>, vector<512x32xf32> -> vector<512x32xf32>
    %40 = arith.addf %34, %39 : vector<512x32xf32>
    %c0_55 = arith.constant 0 : index
    %c2_56 = arith.constant 2 : index
    %c0_57 = arith.constant 0 : index
    %c0_58 = arith.constant 0 : index
    %41 = vector.load %arg7[%c0_55, %c2_56, %c0_57, %c0_58] : memref<2x18x18x3xf32, #tpu.memory_space<vmem>>, vector<2x16x16x3xf32>
    %42 = vector.shape_cast %41 : vector<2x16x16x3xf32> to vector<512x3xf32>
    %c6 = arith.constant 6 : index
    %c0_59 = arith.constant 0 : index
    %c0_60 = arith.constant 0 : index
    %43 = vector.load %arg2[%c6, %c0_59, %c0_60] : memref<9x3x32xf32, #tpu.memory_space<vmem>>, vector<1x3x32xf32>
    %44 = vector.shape_cast %43 : vector<1x3x32xf32> to vector<3x32xf32>
    %cst_61 = arith.constant dense<0.000000e+00> : vector<512x32xf32>
    %45 = tpu.matmul %42, %44, %cst_61 {dimension_numbers = #tpu.dot_dimension_numbers<[1], [0], [0], [1], [0, 0, 1, 1], [], []>} : vector<512x3xf32>, vector<3x32xf32>, vector<512x32xf32> -> vector<512x32xf32>
    %46 = arith.addf %40, %45 : vector<512x32xf32>
    %c0_62 = arith.constant 0 : index
    %c2_63 = arith.constant 2 : index
    %c1_64 = arith.constant 1 : index
    %c0_65 = arith.constant 0 : index
    %47 = vector.load %arg7[%c0_62, %c2_63, %c1_64, %c0_65] : memref<2x18x18x3xf32, #tpu.memory_space<vmem>>, vector<2x16x16x3xf32>
    %48 = vector.shape_cast %47 : vector<2x16x16x3xf32> to vector<512x3xf32>
    %c7 = arith.constant 7 : index
    %c0_66 = arith.constant 0 : index
    %c0_67 = arith.constant 0 : index
    %49 = vector.load %arg2[%c7, %c0_66, %c0_67] : memref<9x3x32xf32, #tpu.memory_space<vmem>>, vector<1x3x32xf32>
    %50 = vector.shape_cast %49 : vector<1x3x32xf32> to vector<3x32xf32>
    %cst_68 = arith.constant dense<0.000000e+00> : vector<512x32xf32>
    %51 = tpu.matmul %48, %50, %cst_68 {dimension_numbers = #tpu.dot_dimension_numbers<[1], [0], [0], [1], [0, 0, 1, 1], [], []>} : vector<512x3xf32>, vector<3x32xf32>, vector<512x32xf32> -> vector<512x32xf32>
    %52 = arith.addf %46, %51 : vector<512x32xf32>
    %c0_69 = arith.constant 0 : index
    %c2_70 = arith.constant 2 : index
    %c2_71 = arith.constant 2 : index
    %c0_72 = arith.constant 0 : index
    %53 = vector.load %arg7[%c0_69, %c2_70, %c2_71, %c0_72] : memref<2x18x18x3xf32, #tpu.memory_space<vmem>>, vector<2x16x16x3xf32>
    %54 = vector.shape_cast %53 : vector<2x16x16x3xf32> to vector<512x3xf32>
    %c8 = arith.constant 8 : index
    %c0_73 = arith.constant 0 : index
    %c0_74 = arith.constant 0 : index
    %55 = vector.load %arg2[%c8, %c0_73, %c0_74] : memref<9x3x32xf32, #tpu.memory_space<vmem>>, vector<1x3x32xf32>
    %56 = vector.shape_cast %55 : vector<1x3x32xf32> to vector<3x32xf32>
    %cst_75 = arith.constant dense<0.000000e+00> : vector<512x32xf32>
    %57 = tpu.matmul %54, %56, %cst_75 {dimension_numbers = #tpu.dot_dimension_numbers<[1], [0], [0], [1], [0, 0, 1, 1], [], []>} : vector<512x3xf32>, vector<3x32xf32>, vector<512x32xf32> -> vector<512x32xf32>
    %58 = arith.addf %52, %57 : vector<512x32xf32>
    %c0_76 = arith.constant 0 : index
    %c0_77 = arith.constant 0 : index
    %59 = vector.load %arg3[%c0_76, %c0_77] : memref<1x32xf32, #tpu.memory_space<vmem>>, vector<1x32xf32>
    %60 = vector.broadcast %59 : vector<1x32xf32> to vector<512x32xf32>
    %61 = arith.addf %58, %60 : vector<512x32xf32>
    %cst_78 = arith.constant 0.000000e+00 : f32
    %62 = vector.broadcast %cst_78 : f32 to vector<512x32xf32>
    %63 = arith.maximumf %61, %62 : vector<512x32xf32>
    %64 = vector.shape_cast %63 : vector<512x32xf32> to vector<32x8x2x32xf32>
    %cst_79 = arith.constant dense<0xFF800000> : vector<32x8x32xf32>
    %65 = vector.multi_reduction <maximumf>, %64, %cst_79 [2] : vector<32x8x2x32xf32> to vector<32x8x32xf32>
    %66 = vector.shape_cast %65 : vector<32x8x32xf32> to vector<16x2x8x32xf32>
    %cst_80 = arith.constant dense<0xFF800000> : vector<16x8x32xf32>
    %67 = vector.multi_reduction <maximumf>, %66, %cst_80 [1] : vector<16x2x8x32xf32> to vector<16x8x32xf32>
    %68 = vector.shape_cast %67 : vector<16x8x32xf32> to vector<2x8x8x32xf32>
    %cst_81 = arith.constant 0.000000e+00 : f32
    %69 = vector.broadcast %cst_81 : f32 to vector<2x10x10x32xf32>
    %c0_82 = arith.constant 0 : index
    %c0_83 = arith.constant 0 : index
    %c0_84 = arith.constant 0 : index
    %c0_85 = arith.constant 0 : index
    %70 = vector.load %arg8[%c0_82, %c0_83, %c0_84, %c0_85] : memref<2x10x10x32xf32, #tpu.memory_space<vmem>>, vector<2x10x10x32xf32>
    tpu.vector_store %arg8[%c0_82, %c0_83, %c0_84, %c0_85], %69 {strides = array<i32>} : memref<2x10x10x32xf32, #tpu.memory_space<vmem>>, vector<2x10x10x32xf32>,
    %c0_86 = arith.constant 0 : index
    %c1_87 = arith.constant 1 : index
    %c1_88 = arith.constant 1 : index
    %c0_89 = arith.constant 0 : index
    %71 = vector.load %arg8[%c0_86, %c1_87, %c1_88, %c0_89] : memref<2x10x10x32xf32, #tpu.memory_space<vmem>>, vector<2x8x8x32xf32>
    tpu.vector_store %arg8[%c0_86, %c1_87, %c1_88, %c0_89], %68 {strides = array<i32>} : memref<2x10x10x32xf32, #tpu.memory_space<vmem>>, vector<2x8x8x32xf32>,
    %cst_90 = arith.constant 0.000000e+00 : f32
    %72 = vector.broadcast %cst_90 : f32 to vector<128x64xf32>
    %c0_91 = arith.constant 0 : index
    %c0_92 = arith.constant 0 : index
    %c0_93 = arith.constant 0 : index
    %c0_94 = arith.constant 0 : index
    %73 = vector.load %arg8[%c0_91, %c0_92, %c0_93, %c0_94] : memref<2x10x10x32xf32, #tpu.memory_space<vmem>>, vector<2x8x8x32xf32>
    %74 = vector.shape_cast %73 : vector<2x8x8x32xf32> to vector<128x32xf32>
    %c0_95 = arith.constant 0 : index
    %c0_96 = arith.constant 0 : index
    %c0_97 = arith.constant 0 : index
    %75 = vector.load %arg4[%c0_95, %c0_96, %c0_97] : memref<9x32x64xf32, #tpu.memory_space<vmem>>, vector<1x32x64xf32>
    %76 = vector.shape_cast %75 : vector<1x32x64xf32> to vector<32x64xf32>
    %cst_98 = arith.constant dense<0.000000e+00> : vector<128x64xf32>
    %77 = tpu.matmul %74, %76, %cst_98 {dimension_numbers = #tpu.dot_dimension_numbers<[1], [0], [0], [1], [0, 0, 1, 1], [], []>} : vector<128x32xf32>, vector<32x64xf32>, vector<128x64xf32> -> vector<128x64xf32>
    %78 = arith.addf %72, %77 : vector<128x64xf32>
    %c0_99 = arith.constant 0 : index
    %c0_100 = arith.constant 0 : index
    %c1_101 = arith.constant 1 : index
    %c0_102 = arith.constant 0 : index
    %79 = vector.load %arg8[%c0_99, %c0_100, %c1_101, %c0_102] : memref<2x10x10x32xf32, #tpu.memory_space<vmem>>, vector<2x8x8x32xf32>
    %80 = vector.shape_cast %79 : vector<2x8x8x32xf32> to vector<128x32xf32>
    %c1_103 = arith.constant 1 : index
    %c0_104 = arith.constant 0 : index
    %c0_105 = arith.constant 0 : index
    %81 = vector.load %arg4[%c1_103, %c0_104, %c0_105] : memref<9x32x64xf32, #tpu.memory_space<vmem>>, vector<1x32x64xf32>
    %82 = vector.shape_cast %81 : vector<1x32x64xf32> to vector<32x64xf32>
    %cst_106 = arith.constant dense<0.000000e+00> : vector<128x64xf32>
    %83 = tpu.matmul %80, %82, %cst_106 {dimension_numbers = #tpu.dot_dimension_numbers<[1], [0], [0], [1], [0, 0, 1, 1], [], []>} : vector<128x32xf32>, vector<32x64xf32>, vector<128x64xf32> -> vector<128x64xf32>
    %84 = arith.addf %78, %83 : vector<128x64xf32>
    %c0_107 = arith.constant 0 : index
    %c0_108 = arith.constant 0 : index
    %c2_109 = arith.constant 2 : index
    %c0_110 = arith.constant 0 : index
    %85 = vector.load %arg8[%c0_107, %c0_108, %c2_109, %c0_110] : memref<2x10x10x32xf32, #tpu.memory_space<vmem>>, vector<2x8x8x32xf32>
    %86 = vector.shape_cast %85 : vector<2x8x8x32xf32> to vector<128x32xf32>
    %c2_111 = arith.constant 2 : index
    %c0_112 = arith.constant 0 : index
    %c0_113 = arith.constant 0 : index
    %87 = vector.load %arg4[%c2_111, %c0_112, %c0_113] : memref<9x32x64xf32, #tpu.memory_space<vmem>>, vector<1x32x64xf32>
    %88 = vector.shape_cast %87 : vector<1x32x64xf32> to vector<32x64xf32>
    %cst_114 = arith.constant dense<0.000000e+00> : vector<128x64xf32>
    %89 = tpu.matmul %86, %88, %cst_114 {dimension_numbers = #tpu.dot_dimension_numbers<[1], [0], [0], [1], [0, 0, 1, 1], [], []>} : vector<128x32xf32>, vector<32x64xf32>, vector<128x64xf32> -> vector<128x64xf32>
    %90 = arith.addf %84, %89 : vector<128x64xf32>
    %c0_115 = arith.constant 0 : index
    %c1_116 = arith.constant 1 : index
    %c0_117 = arith.constant 0 : index
    %c0_118 = arith.constant 0 : index
    %91 = vector.load %arg8[%c0_115, %c1_116, %c0_117, %c0_118] : memref<2x10x10x32xf32, #tpu.memory_space<vmem>>, vector<2x8x8x32xf32>
    %92 = vector.shape_cast %91 : vector<2x8x8x32xf32> to vector<128x32xf32>
    %c3_119 = arith.constant 3 : index
    %c0_120 = arith.constant 0 : index
    %c0_121 = arith.constant 0 : index
    %93 = vector.load %arg4[%c3_119, %c0_120, %c0_121] : memref<9x32x64xf32, #tpu.memory_space<vmem>>, vector<1x32x64xf32>
    %94 = vector.shape_cast %93 : vector<1x32x64xf32> to vector<32x64xf32>
    %cst_122 = arith.constant dense<0.000000e+00> : vector<128x64xf32>
    %95 = tpu.matmul %92, %94, %cst_122 {dimension_numbers = #tpu.dot_dimension_numbers<[1], [0], [0], [1], [0, 0, 1, 1], [], []>} : vector<128x32xf32>, vector<32x64xf32>, vector<128x64xf32> -> vector<128x64xf32>
    %96 = arith.addf %90, %95 : vector<128x64xf32>
    %c0_123 = arith.constant 0 : index
    %c1_124 = arith.constant 1 : index
    %c1_125 = arith.constant 1 : index
    %c0_126 = arith.constant 0 : index
    %97 = vector.load %arg8[%c0_123, %c1_124, %c1_125, %c0_126] : memref<2x10x10x32xf32, #tpu.memory_space<vmem>>, vector<2x8x8x32xf32>
    %98 = vector.shape_cast %97 : vector<2x8x8x32xf32> to vector<128x32xf32>
    %c4_127 = arith.constant 4 : index
    %c0_128 = arith.constant 0 : index
    %c0_129 = arith.constant 0 : index
    %99 = vector.load %arg4[%c4_127, %c0_128, %c0_129] : memref<9x32x64xf32, #tpu.memory_space<vmem>>, vector<1x32x64xf32>
    %100 = vector.shape_cast %99 : vector<1x32x64xf32> to vector<32x64xf32>
    %cst_130 = arith.constant dense<0.000000e+00> : vector<128x64xf32>
    %101 = tpu.matmul %98, %100, %cst_130 {dimension_numbers = #tpu.dot_dimension_numbers<[1], [0], [0], [1], [0, 0, 1, 1], [], []>} : vector<128x32xf32>, vector<32x64xf32>, vector<128x64xf32> -> vector<128x64xf32>
    %102 = arith.addf %96, %101 : vector<128x64xf32>
    %c0_131 = arith.constant 0 : index
    %c1_132 = arith.constant 1 : index
    %c2_133 = arith.constant 2 : index
    %c0_134 = arith.constant 0 : index
    %103 = vector.load %arg8[%c0_131, %c1_132, %c2_133, %c0_134] : memref<2x10x10x32xf32, #tpu.memory_space<vmem>>, vector<2x8x8x32xf32>
    %104 = vector.shape_cast %103 : vector<2x8x8x32xf32> to vector<128x32xf32>
    %c5_135 = arith.constant 5 : index
    %c0_136 = arith.constant 0 : index
    %c0_137 = arith.constant 0 : index
    %105 = vector.load %arg4[%c5_135, %c0_136, %c0_137] : memref<9x32x64xf32, #tpu.memory_space<vmem>>, vector<1x32x64xf32>
    %106 = vector.shape_cast %105 : vector<1x32x64xf32> to vector<32x64xf32>
    %cst_138 = arith.constant dense<0.000000e+00> : vector<128x64xf32>
    %107 = tpu.matmul %104, %106, %cst_138 {dimension_numbers = #tpu.dot_dimension_numbers<[1], [0], [0], [1], [0, 0, 1, 1], [], []>} : vector<128x32xf32>, vector<32x64xf32>, vector<128x64xf32> -> vector<128x64xf32>
    %108 = arith.addf %102, %107 : vector<128x64xf32>
    %c0_139 = arith.constant 0 : index
    %c2_140 = arith.constant 2 : index
    %c0_141 = arith.constant 0 : index
    %c0_142 = arith.constant 0 : index
    %109 = vector.load %arg8[%c0_139, %c2_140, %c0_141, %c0_142] : memref<2x10x10x32xf32, #tpu.memory_space<vmem>>, vector<2x8x8x32xf32>
    %110 = vector.shape_cast %109 : vector<2x8x8x32xf32> to vector<128x32xf32>
    %c6_143 = arith.constant 6 : index
    %c0_144 = arith.constant 0 : index
    %c0_145 = arith.constant 0 : index
    %111 = vector.load %arg4[%c6_143, %c0_144, %c0_145] : memref<9x32x64xf32, #tpu.memory_space<vmem>>, vector<1x32x64xf32>
    %112 = vector.shape_cast %111 : vector<1x32x64xf32> to vector<32x64xf32>
    %cst_146 = arith.constant dense<0.000000e+00> : vector<128x64xf32>
    %113 = tpu.matmul %110, %112, %cst_146 {dimension_numbers = #tpu.dot_dimension_numbers<[1], [0], [0], [1], [0, 0, 1, 1], [], []>} : vector<128x32xf32>, vector<32x64xf32>, vector<128x64xf32> -> vector<128x64xf32>
    %114 = arith.addf %108, %113 : vector<128x64xf32>
    %c0_147 = arith.constant 0 : index
    %c2_148 = arith.constant 2 : index
    %c1_149 = arith.constant 1 : index
    %c0_150 = arith.constant 0 : index
    %115 = vector.load %arg8[%c0_147, %c2_148, %c1_149, %c0_150] : memref<2x10x10x32xf32, #tpu.memory_space<vmem>>, vector<2x8x8x32xf32>
    %116 = vector.shape_cast %115 : vector<2x8x8x32xf32> to vector<128x32xf32>
    %c7_151 = arith.constant 7 : index
    %c0_152 = arith.constant 0 : index
    %c0_153 = arith.constant 0 : index
    %117 = vector.load %arg4[%c7_151, %c0_152, %c0_153] : memref<9x32x64xf32, #tpu.memory_space<vmem>>, vector<1x32x64xf32>
    %118 = vector.shape_cast %117 : vector<1x32x64xf32> to vector<32x64xf32>
    %cst_154 = arith.constant dense<0.000000e+00> : vector<128x64xf32>
    %119 = tpu.matmul %116, %118, %cst_154 {dimension_numbers = #tpu.dot_dimension_numbers<[1], [0], [0], [1], [0, 0, 1, 1], [], []>} : vector<128x32xf32>, vector<32x64xf32>, vector<128x64xf32> -> vector<128x64xf32>
    %120 = arith.addf %114, %119 : vector<128x64xf32>
    %c0_155 = arith.constant 0 : index
    %c2_156 = arith.constant 2 : index
    %c2_157 = arith.constant 2 : index
    %c0_158 = arith.constant 0 : index
    %121 = vector.load %arg8[%c0_155, %c2_156, %c2_157, %c0_158] : memref<2x10x10x32xf32, #tpu.memory_space<vmem>>, vector<2x8x8x32xf32>
    %122 = vector.shape_cast %121 : vector<2x8x8x32xf32> to vector<128x32xf32>
    %c8_159 = arith.constant 8 : index
    %c0_160 = arith.constant 0 : index
    %c0_161 = arith.constant 0 : index
    %123 = vector.load %arg4[%c8_159, %c0_160, %c0_161] : memref<9x32x64xf32, #tpu.memory_space<vmem>>, vector<1x32x64xf32>
    %124 = vector.shape_cast %123 : vector<1x32x64xf32> to vector<32x64xf32>
    %cst_162 = arith.constant dense<0.000000e+00> : vector<128x64xf32>
    %125 = tpu.matmul %122, %124, %cst_162 {dimension_numbers = #tpu.dot_dimension_numbers<[1], [0], [0], [1], [0, 0, 1, 1], [], []>} : vector<128x32xf32>, vector<32x64xf32>, vector<128x64xf32> -> vector<128x64xf32>
    %126 = arith.addf %120, %125 : vector<128x64xf32>
    %c0_163 = arith.constant 0 : index
    %c0_164 = arith.constant 0 : index
    %127 = vector.load %arg5[%c0_163, %c0_164] : memref<1x64xf32, #tpu.memory_space<vmem>>, vector<1x64xf32>
    %128 = vector.broadcast %127 : vector<1x64xf32> to vector<128x64xf32>
    %129 = arith.addf %126, %128 : vector<128x64xf32>
    %cst_165 = arith.constant 0.000000e+00 : f32
    %130 = vector.broadcast %cst_165 : f32 to vector<128x64xf32>
    %131 = arith.maximumf %129, %130 : vector<128x64xf32>
    %132 = vector.shape_cast %131 : vector<128x64xf32> to vector<16x4x2x64xf32>
    %cst_166 = arith.constant dense<0xFF800000> : vector<16x4x64xf32>
    %133 = vector.multi_reduction <maximumf>, %132, %cst_166 [2] : vector<16x4x2x64xf32> to vector<16x4x64xf32>
    %134 = vector.shape_cast %133 : vector<16x4x64xf32> to vector<8x2x4x64xf32>
    %cst_167 = arith.constant dense<0xFF800000> : vector<8x4x64xf32>
    %135 = vector.multi_reduction <maximumf>, %134, %cst_167 [1] : vector<8x2x4x64xf32> to vector<8x4x64xf32>
    %136 = vector.shape_cast %135 : vector<8x4x64xf32> to vector<2x4x4x64xf32>
    %c0_168 = arith.constant 0 : index
    %c0_169 = arith.constant 0 : index
    %c0_170 = arith.constant 0 : index
    %c0_171 = arith.constant 0 : index
    %137 = vector.load %arg6[%c0_168, %c0_169, %c0_170, %c0_171] : memref<2x4x4x64xf32, #tpu.memory_space<vmem>>, vector<2x4x4x64xf32>
    tpu.vector_store %arg6[%c0_168, %c0_169, %c0_170, %c0_171], %136 {strides = array<i32>} : memref<2x4x4x64xf32, #tpu.memory_space<vmem>>, vector<2x4x4x64xf32>,
    return
  }
  func.func @transform_0(%arg0: i32) -> (i32, i32, i32, i32) {
    %c0_i32 = arith.constant 0 : i32
    %c0_i32_0 = arith.constant 0 : i32
    %c0_i32_1 = arith.constant 0 : i32
    %c0_i32_2 = arith.constant 0 : i32
    return %arg0, %c0_i32, %c0_i32_0, %c0_i32_1 : i32, i32, i32, i32
  }
  func.func @transform_1(%arg0: i32) -> (i32, i32, i32) {
    %c0_i32 = arith.constant 0 : i32
    %c0_i32_0 = arith.constant 0 : i32
    %c0_i32_1 = arith.constant 0 : i32
    %c0_i32_2 = arith.constant 0 : i32
    return %c0_i32, %c0_i32_0, %c0_i32_1 : i32, i32, i32
  }
  func.func @transform_2(%arg0: i32) -> (i32, i32) {
    %c0_i32 = arith.constant 0 : i32
    %c0_i32_0 = arith.constant 0 : i32
    %c0_i32_1 = arith.constant 0 : i32
    return %c0_i32, %c0_i32_0 : i32, i32
  }
  func.func @transform_3(%arg0: i32) -> (i32, i32, i32) {
    %c0_i32 = arith.constant 0 : i32
    %c0_i32_0 = arith.constant 0 : i32
    %c0_i32_1 = arith.constant 0 : i32
    %c0_i32_2 = arith.constant 0 : i32
    return %c0_i32, %c0_i32_0, %c0_i32_1 : i32, i32, i32
  }
  func.func @transform_4(%arg0: i32) -> (i32, i32) {
    %c0_i32 = arith.constant 0 : i32
    %c0_i32_0 = arith.constant 0 : i32
    %c0_i32_1 = arith.constant 0 : i32
    return %c0_i32, %c0_i32_0 : i32, i32
  }
  func.func @transform_5(%arg0: i32) -> (i32, i32, i32, i32) {
    %c0_i32 = arith.constant 0 : i32
    %c0_i32_0 = arith.constant 0 : i32
    %c0_i32_1 = arith.constant 0 : i32
    %c0_i32_2 = arith.constant 0 : i32
    return %arg0, %c0_i32, %c0_i32_0, %c0_i32_1 : i32, i32, i32, i32
  }
}

</mosaic_0001>

<bundles_post_ra>
// kernel: tpu_custom_call.1
= control target key start
LH: loop header
LB: loop body
LE: loop exit
PB: predicated region body
PF: predicated region fallthrough
CT: control target
= control target key end

     0   :  { %vm583_vm0 = vcmask 1042432   ;;  %vm21_vm1 = vcmask 23552   ;;  %vm24_vm2 = vcmask 17408   ;;  %v21826_v5 = vmov 0.0   ;;  %s21820_s0 = inlined_call_operand.vmem [shape: f32[2,16,16,3], index: 0, kind: input, shape index: {}]   ;;  %s21821_s1 = inlined_call_operand.vmem [shape: f32[9,3,32], index: 1, kind: input, shape index: {}]   ;;  %s21822_s2 = inlined_call_operand.vmem [shape: f32[1,32], index: 2, kind: input, shape index: {}]   ;;  %s21823_s3 = inlined_call_operand.vmem [shape: f32[9,32,64], index: 3, kind: input, shape index: {}]   ;;  %s21824_s4 = inlined_call_operand.vmem [shape: f32[1,64], index: 4, kind: input, shape index: {}]   ;;  %s21825_s5 = inlined_call_operand.hbm [shape: f32[2,4,4,64], index: 5, kind: output, shape index: {}]  }
   0x1   :  { %v13628_v0 = vld [vmem:[%s21821_s1 + $0x4] sm:$0x7]  ;;  %v17130_v1 = vld [vmem:[%s21821_s1 + $0xc] sm:$0x7]  ;;  %v17143_v3 = vld [vmem:[%s21821_s1 + $0x10] sm:$0x7] }
   0x2   :  { %15164 = vmatprep.subr.msk.mxu1 %vm583_vm0, %v13628_v0  ;;  %15458 = vmatprep.subr.msk.mxu0 %vm583_vm0, %v17130_v1  ;;  %v17138_v2 = vld [vmem:[%s21820_s0] sm:$0xff]  ;;  %v17148_v4 = vld [vmem:[%s21820_s0 + $0x8] sm:$0xff]  ;;  %22 = vst.msk [vmem:[#allocation2] sm:$0xff] %vm21_vm1, %v21826_v5  ;;  %23 = vst.msk [vmem:[#allocation2 + $0x8] sm:$0xff] %vm21_vm1, %v21826_v5 }
   0x3   :  { %15165 = vmatpush3.msk.msra.mxu1 %vm583_vm0, %v13628_v0  ;;  %26 = vst.msk [vmem:[#allocation2 + $0x18] sm:$0xff] %vm21_vm1, %v21826_v5  ;;  %27 = vst.msk [vmem:[#allocation2 + $0x20] sm:$0xff] %vm21_vm1, %v21826_v5  ;;  %15459 = vmatpush3.msk.msra.mxu0 %vm583_vm0, %v17130_v1  ;;  %v133_v6 = vld [vmem:[%s21820_s0 + $0x10] sm:$0xff]  ;;  %v134_v7 = vld [vmem:[%s21820_s0 + $0x18] sm:$0xff] }
   0x4   :  { %29 = vst.msk [vmem:[#allocation2 + $0x30] sm:$0xff] %vm21_vm1, %v21826_v5  ;;  %30 = vst.msk [vmem:[#allocation2 + $0x38] sm:$0xff] %vm21_vm1, %v21826_v5  ;;  %v135_v8 = vld [vmem:[%s21820_s0 + $0x20] sm:$0xff]  ;;  %15556 = vmatprep.subr.msk.mxu0 %vm583_vm0, %v17143_v3  ;;  %v136_v9 = vld [vmem:[%s21820_s0 + $0x28] sm:$0xff] }
   0x5   :  { %32 = vst.msk [vmem:[#allocation2 + $0x48] sm:$0xff] %vm21_vm1, %v21826_v5  ;;  %33 = vst.msk [vmem:[#allocation2 + $0x50] sm:$0xff] %vm21_vm1, %v21826_v5  ;;  %v137_v10 = vld [vmem:[%s21820_s0 + $0x30] sm:$0xff]  ;;  %v138_v11 = vld [vmem:[%s21820_s0 + $0x38] sm:$0xff] }
   0x6   :  { %35 = vst.msk [vmem:[#allocation2 + $0x60] sm:$0xff] %vm21_vm1, %v21826_v5  ;;  %36 = vst.msk [vmem:[#allocation2 + $0x68] sm:$0xff] %vm21_vm1, %v21826_v5  ;;  %v139_v12 = vld [vmem:[%s21820_s0 + $0x40] sm:$0xff]  ;;  %v140_v13 = vld [vmem:[%s21820_s0 + $0x48] sm:$0xff] }
   0x7   :  { %38 = vst.msk [vmem:[#allocation2 + $0x78] sm:$0xff] %vm21_vm1, %v21826_v5  ;;  %39 = vst.msk [vmem:[#allocation2 + $0x80] sm:$0xff] %vm21_vm1, %v21826_v5  ;;  %v141_v14 = vld [vmem:[%s21820_s0 + $0x50] sm:$0xff]  ;;  %v142_v15 = vld [vmem:[%s21820_s0 + $0x58] sm:$0xff] }
   0x8   :  { %41 = vst.msk [vmem:[#allocation2 + $0x90] sm:$0xff] %vm21_vm1, %v21826_v5  ;;  %42 = vst.msk [vmem:[#allocation2 + $0x98] sm:$0xff] %vm21_vm1, %v21826_v5  ;;  %v143_v16 = vld [vmem:[%s21820_s0 + $0x60] sm:$0xff]  ;;  %v144_v17 = vld [vmem:[%s21820_s0 + $0x68] sm:$0xff] }
   0x9   :  { %44 = vst.msk [vmem:[#allocation2 + $0xa8] sm:$0xff] %vm21_vm1, %v21826_v5  ;;  %45 = vst.msk [vmem:[#allocation2 + $0xb0] sm:$0xff] %vm21_vm1, %v21826_v5  ;;  %v145_v18 = vld [vmem:[%s21820_s0 + $0x70] sm:$0xff]  ;;  %v146_v19 = vld [vmem:[%s21820_s0 + $0x78] sm:$0xff] }
   0xa   :  { %47 = vst.msk [vmem:[#allocation2 + $0xc0] sm:$0xff] %vm21_vm1, %v21826_v5  ;;  %48 = vst.msk [vmem:[#allocation2 + $0xc8] sm:$0xff] %vm21_vm1, %v21826_v5  ;;  %v147_v20 = vld [vmem:[%s21820_s0 + $0x80] sm:$0xff]  ;;  %v148_v21 = vld [vmem:[%s21820_s0 + $0x88] sm:$0xff] }
   0xb   :  { %50 = vst.msk [vmem:[#allocation2 + $0xd8] sm:$0xff] %vm21_vm1, %v21826_v5  ;;  %51 = vst.msk [vmem:[#allocation2 + $0xe0] sm:$0xff] %vm21_vm1, %v21826_v5  ;;  %v149_v22 = vld [vmem:[%s21820_s0 + $0x90] sm:$0xff]  ;;  %v150_v23 = vld [vmem:[%s21820_s0 + $0x98] sm:$0xff] }
   0xc   :  { %53 = vst.msk [vmem:[#allocation2 + $0xf0] sm:$0xff] %vm21_vm1, %v21826_v5  ;;  %54 = vst.msk [vmem:[#allocation2 + $0xf8] sm:$0xff] %vm21_vm1, %v21826_v5  ;;  %v151_v24 = vld [vmem:[%s21820_s0 + $0xa0] sm:$0xff]  ;;  %v152_v25 = vld [vmem:[%s21820_s0 + $0xa8] sm:$0xff] }
   0xd   :  { %56 = vst.msk [vmem:[#allocation2 + $0x108] sm:$0xff] %vm21_vm1, %v21826_v5  ;;  %57 = vst.msk [vmem:[#allocation2 + $0x110] sm:$0xff] %vm21_vm1, %v21826_v5  ;;  %v153_v26 = vld [vmem:[%s21820_s0 + $0xb0] sm:$0xff]  ;;  %v325_v27 = vld [vmem:[#allocation2 + $0x1] sm:$0xff] }
   0xe   :  { %59 = vst.msk [vmem:[#allocation2 + $0x120] sm:$0xff] %vm21_vm1, %v21826_v5  ;;  %60 = vst.msk [vmem:[#allocation2 + $0x128] sm:$0xff] %vm21_vm1, %v21826_v5  ;;  %v154_v29 = vld [vmem:[%s21820_s0 + $0xb8] sm:$0xff]  ;;  %15166 = vmatprep.mubr.msk.f32.mxu1 %vm21_vm1, %v325_v27  ;;  %v155_v51 = vld [vmem:[%s21820_s0 + $0xc0] sm:$0xff] }
   0xf   :  { %62 = vst.msk [vmem:[#allocation2 + $0x138] sm:$0xff] %vm21_vm1, %v21826_v5  ;;  %63 = vst.msk [vmem:[#allocation2 + $0x140] sm:$0xff] %vm21_vm1, %v21826_v5  ;;  %v156_v52 = vld [vmem:[%s21820_s0 + $0xc8] sm:$0xff]  ;;  %v157_v53 = vld [vmem:[%s21820_s0 + $0xd0] sm:$0xff] }
  0x10   :  { %65 = vst.msk [vmem:[#allocation2 + $0x150] sm:$0xff] %vm21_vm1, %v21826_v5  ;;  %66 = vst.msk [vmem:[#allocation2 + $0x158] sm:$0xff] %vm21_vm1, %v21826_v5  ;;  %v158_v55 = vld [vmem:[%s21820_s0 + $0xd8] sm:$0xff]  ;;  %v159_v56 = vld [vmem:[%s21820_s0 + $0xe0] sm:$0xff] }
  0x11   :  { %68 = vst.msk [vmem:[#allocation2 + $0x168] sm:$0xff] %vm21_vm1, %v21826_v5  ;;  %69 = vst.msk [vmem:[#allocation2 + $0x170] sm:$0xff] %vm21_vm1, %v21826_v5  ;;  %v160_v57 = vld [vmem:[%s21820_s0 + $0xe8] sm:$0xff]  ;;  %v161_v59 = vld [vmem:[%s21820_s0 + $0xf0] sm:$0xff] }
  0x12   :  { %71 = vst.msk [vmem:[#allocation2 + $0x180] sm:$0xff] %vm21_vm1, %v21826_v5  ;;  %72 = vst.msk [vmem:[#allocation2 + $0x188] sm:$0xff] %vm21_vm1, %v21826_v5  ;;  %v162_v60 = vld [vmem:[%s21820_s0 + $0xf8] sm:$0xff]  ;;  %v163_v62 = vld [vmem:[%s21820_s0 + $0x100] sm:$0xff] }
  0x13   :  { %74 = vst.msk [vmem:[#allocation2 + $0x198] sm:$0xff] %vm21_vm1, %v21826_v5  ;;  %75 = vst.msk [vmem:[#allocation2 + $0x1a0] sm:$0xff] %vm21_vm1, %v21826_v5  ;;  %v164_v63 = vld [vmem:[%s21820_s0 + $0x108] sm:$0xff] }
  0x14   :  { %77 = vst.msk [vmem:[#allocation2 + $0x1b0] sm:$0xff] %vm21_vm1, %v21826_v5  ;;  %78 = vst.msk [vmem:[#allocation2 + $0x1b8] sm:$0xff] %vm21_vm1, %v21826_v5 }
  0x15   :  { %80 = vst.msk [vmem:[#allocation2 + $0x1c8] sm:$0xff] %vm21_vm1, %v21826_v5  ;;  %81 = vst.msk [vmem:[#allocation2 + $0x1d0] sm:$0xff] %vm21_vm1, %v21826_v5 }
  0x16   :  { %83 = vst.msk [vmem:[#allocation2 + $0x1e0] sm:$0xff] %vm21_vm1, %v21826_v5  ;;  %84 = vst.msk [vmem:[#allocation2 + $0x1e8] sm:$0xff] %vm21_vm1, %v21826_v5 }
  0x17   :  { %86 = vst.msk [vmem:[#allocation2 + $0x1f8] sm:$0xff] %vm21_vm1, %v21826_v5  ;;  %87 = vst.msk [vmem:[#allocation2 + $0x200] sm:$0xff] %vm21_vm1, %v21826_v5 }
  0x18   :  { %89 = vst.msk [vmem:[#allocation2 + $0x210] sm:$0xff] %vm21_vm1, %v21826_v5  ;;  %90 = vst.msk [vmem:[#allocation2 + $0x218] sm:$0xff] %vm21_vm1, %v21826_v5 }
  0x19   :  { %92 = vst.msk [vmem:[#allocation2 + $0x228] sm:$0xff] %vm21_vm1, %v21826_v5  ;;  %93 = vst.msk [vmem:[#allocation2 + $0x230] sm:$0xff] %vm21_vm1, %v21826_v5 }
  0x1a   :  { %95 = vst.msk [vmem:[#allocation2 + $0x240] sm:$0xff] %vm21_vm1, %v21826_v5  ;;  %96 = vst.msk [vmem:[#allocation2 + $0x248] sm:$0xff] %vm21_vm1, %v21826_v5 }
  0x1b   :  { %98 = vst.msk [vmem:[#allocation2 + $0x258] sm:$0xff] %vm21_vm1, %v21826_v5  ;;  %99 = vst.msk [vmem:[#allocation2 + $0x260] sm:$0xff] %vm21_vm1, %v21826_v5 }
  0x1c   :  { %101 = vst.msk [vmem:[#allocation2 + $0x270] sm:$0xff] %vm21_vm1, %v21826_v5  ;;  %102 = vst.msk [vmem:[#allocation2 + $0x278] sm:$0xff] %vm21_vm1, %v21826_v5 }
  0x1d   :  { %104 = vst.msk [vmem:[#allocation2 + $0x288] sm:$0xff] %vm21_vm1, %v21826_v5  ;;  %105 = vst.msk [vmem:[#allocation2 + $0x290] sm:$0xff] %vm21_vm1, %v21826_v5 }
  0x1e   :  { %107 = vst.msk [vmem:[#allocation2 + $0x2a0] sm:$0xff] %vm21_vm1, %v21826_v5  ;;  %108 = vst.msk [vmem:[#allocation2 + $0x2a8] sm:$0xff] %vm21_vm1, %v21826_v5 }
  0x1f   :  { %110 = vst.msk [vmem:[#allocation2 + $0x2b8] sm:$0xff] %vm21_vm1, %v21826_v5  ;;  %111 = vst.msk [vmem:[#allocation2 + $0x2c0] sm:$0xff] %vm21_vm1, %v21826_v5 }
  0x20   :  { %113 = vst.msk [vmem:[#allocation2 + $0x2d0] sm:$0xff] %vm21_vm1, %v21826_v5  ;;  %114 = vst.msk [vmem:[#allocation2 + $0x2d8] sm:$0xff] %vm21_vm1, %v21826_v5 }
  0x21   :  { %116 = vst.msk [vmem:[#allocation2 + $0x2e8] sm:$0xff] %vm21_vm1, %v21826_v5  ;;  %117 = vst.msk [vmem:[#allocation2 + $0x2f0] sm:$0xff] %vm21_vm1, %v21826_v5 }
  0x22   :  { %119 = vst.msk [vmem:[#allocation2 + $0x300] sm:$0xff] %vm21_vm1, %v21826_v5  ;;  %120 = vst.msk [vmem:[#allocation2 + $0x308] sm:$0xff] %vm21_vm1, %v21826_v5 }
  0x23   :  { %122 = vst.msk [vmem:[#allocation2 + $0x318] sm:$0xff] %vm21_vm1, %v21826_v5  ;;  %123 = vst.msk [vmem:[#allocation2 + $0x320] sm:$0xff] %vm21_vm1, %v21826_v5 }
  0x24   :  { %125 = vst.msk [vmem:[#allocation2 + $0x330] sm:$0xff] %vm21_vm1, %v21826_v5  ;;  %126 = vst.msk [vmem:[#allocation2 + $0x338] sm:$0xff] %vm21_vm1, %v21826_v5 }
  0x25   :  { %128 = vst.msk [vmem:[#allocation2 + $0x348] sm:$0xff] %vm21_vm1, %v21826_v5  ;;  %129 = vst.msk [vmem:[#allocation2 + $0x350] sm:$0xff] %vm21_vm1, %v21826_v5 }
  0x26   :  { %25 = vst.msk [vmem:[#allocation2 + $0x10] sm:$0x3] %vm24_vm2, %v21826_v5  ;;  %28 = vst.msk [vmem:[#allocation2 + $0x28] sm:$0x3] %vm24_vm2, %v21826_v5 }
  0x27   :  { %31 = vst.msk [vmem:[#allocation2 + $0x40] sm:$0x3] %vm24_vm2, %v21826_v5  ;;  %34 = vst.msk [vmem:[#allocation2 + $0x58] sm:$0x3] %vm24_vm2, %v21826_v5 }
  0x28   :  { %37 = vst.msk [vmem:[#allocation2 + $0x70] sm:$0x3] %vm24_vm2, %v21826_v5  ;;  %40 = vst.msk [vmem:[#allocation2 + $0x88] sm:$0x3] %vm24_vm2, %v21826_v5 }
  0x29   :  { %43 = vst.msk [vmem:[#allocation2 + $0xa0] sm:$0x3] %vm24_vm2, %v21826_v5  ;;  %46 = vst.msk [vmem:[#allocation2 + $0xb8] sm:$0x3] %vm24_vm2, %v21826_v5 }
  0x2a   :  { %49 = vst.msk [vmem:[#allocation2 + $0xd0] sm:$0x3] %vm24_vm2, %v21826_v5  ;;  %52 = vst.msk [vmem:[#allocation2 + $0xe8] sm:$0x3] %vm24_vm2, %v21826_v5 }
  0x2b   :  { %55 = vst.msk [vmem:[#allocation2 + $0x100] sm:$0x3] %vm24_vm2, %v21826_v5  ;;  %58 = vst.msk [vmem:[#allocation2 + $0x118] sm:$0x3] %vm24_vm2, %v21826_v5 }
  0x2c   :  { %61 = vst.msk [vmem:[#allocation2 + $0x130] sm:$0x3] %vm24_vm2, %v21826_v5  ;;  %64 = vst.msk [vmem:[#allocation2 + $0x148] sm:$0x3] %vm24_vm2, %v21826_v5 }
  0x2d   :  { %67 = vst.msk [vmem:[#allocation2 + $0x160] sm:$0x3] %vm24_vm2, %v21826_v5  ;;  %70 = vst.msk [vmem:[#allocation2 + $0x178] sm:$0x3] %vm24_vm2, %v21826_v5  ;;  %v326_v28 = vld [vmem:[#allocation2 + $0x9] sm:$0xff] }
  0x2e   :  { %73 = vst.msk [vmem:[#allocation2 + $0x190] sm:$0x3] %vm24_vm2, %v21826_v5  ;;  %76 = vst.msk [vmem:[#allocation2 + $0x1a8] sm:$0x3] %vm24_vm2, %v21826_v5  ;;  %15167 = vmatmul.mubr.msk.f32.vlgmr.msra.gmra.mrb[0].mxu1 %vm21_vm1, %v326_v28 }
  0x2f   :  { %79 = vst.msk [vmem:[#allocation2 + $0x1c0] sm:$0x3] %vm24_vm2, %v21826_v5  ;;  %82 = vst.msk [vmem:[#allocation2 + $0x1d8] sm:$0x3] %vm24_vm2, %v21826_v5 }
  0x30   :  { %85 = vst.msk [vmem:[#allocation2 + $0x1f0] sm:$0x3] %vm24_vm2, %v21826_v5  ;;  %88 = vst.msk [vmem:[#allocation2 + $0x208] sm:$0x3] %vm24_vm2, %v21826_v5 }
  0x31   :  { %91 = vst.msk [vmem:[#allocation2 + $0x220] sm:$0x3] %vm24_vm2, %v21826_v5  ;;  %94 = vst.msk [vmem:[#allocation2 + $0x238] sm:$0x3] %vm24_vm2, %v21826_v5 }
  0x32   :  { %97 = vst.msk [vmem:[#allocation2 + $0x250] sm:$0x3] %vm24_vm2, %v21826_v5  ;;  %100 = vst.msk [vmem:[#allocation2 + $0x268] sm:$0x3] %vm24_vm2, %v21826_v5 }
  0x33   :  { %103 = vst.msk [vmem:[#allocation2 + $0x280] sm:$0x3] %vm24_vm2, %v21826_v5  ;;  %106 = vst.msk [vmem:[#allocation2 + $0x298] sm:$0x3] %vm24_vm2, %v21826_v5 }
  0x34   :  { %109 = vst.msk [vmem:[#allocation2 + $0x2b0] sm:$0x3] %vm24_vm2, %v21826_v5  ;;  %112 = vst.msk [vmem:[#allocation2 + $0x2c8] sm:$0x3] %vm24_vm2, %v21826_v5 }
  0x35   :  { %115 = vst.msk [vmem:[#allocation2 + $0x2e0] sm:$0x3] %vm24_vm2, %v21826_v5  ;;  %118 = vst.msk [vmem:[#allocation2 + $0x2f8] sm:$0x3] %vm24_vm2, %v21826_v5 }
  0x36   :  { %121 = vst.msk [vmem:[#allocation2 + $0x310] sm:$0x3] %vm24_vm2, %v21826_v5  ;;  %124 = vst.msk [vmem:[#allocation2 + $0x328] sm:$0x3] %vm24_vm2, %v21826_v5 }
  0x37   :  { %127 = vst.msk [vmem:[#allocation2 + $0x340] sm:$0x3] %vm24_vm2, %v21826_v5  ;;  %130 = vst.msk [vmem:[#allocation2 + $0x358] sm:$0x3] %vm24_vm2, %v21826_v5 }
  0x38   :  { %196 = vst.msk [vmem:[#allocation2 + $0x19] sm:$0xff] %vm21_vm1, %v17138_v2  ;;  %197 = vst.msk [vmem:[#allocation2 + $0x21] sm:$0xff] %vm21_vm1, %v17148_v4  ;;  %v165_v2 = vld [vmem:[%s21820_s0 + $0x110] sm:$0xff]  ;;  %v167_v4 = vld [vmem:[%s21820_s0 + $0x120] sm:$0xff] }
  0x39   :  { %198 = vst.msk [vmem:[#allocation2 + $0x31] sm:$0xff] %vm21_vm1, %v133_v6  ;;  %199 = vst.msk [vmem:[#allocation2 + $0x39] sm:$0xff] %vm21_vm1, %v134_v7 }
  0x3a   :  { %200 = vst.msk [vmem:[#allocation2 + $0x49] sm:$0xff] %vm21_vm1, %v135_v8  ;;  %201 = vst.msk [vmem:[#allocation2 + $0x51] sm:$0xff] %vm21_vm1, %v136_v9  ;;  %v168_v8 = vld [vmem:[%s21820_s0 + $0x128] sm:$0xff]  ;;  %v169_v9 = vld [vmem:[%s21820_s0 + $0x130] sm:$0xff] }
  0x3b   :  { %202 = vst.msk [vmem:[#allocation2 + $0x61] sm:$0xff] %vm21_vm1, %v137_v10  ;;  %203 = vst.msk [vmem:[#allocation2 + $0x69] sm:$0xff] %vm21_vm1, %v138_v11  ;;  %v170_v10 = vld [vmem:[%s21820_s0 + $0x138] sm:$0xff]  ;;  %v17634_v11 = vld [vmem:[%s21821_s1 + $0x14] sm:$0x7] }
  0x3c   :  { %204 = vst.msk [vmem:[#allocation2 + $0x79] sm:$0xff] %vm21_vm1, %v139_v12  ;;  %205 = vst.msk [vmem:[#allocation2 + $0x81] sm:$0xff] %vm21_vm1, %v140_v13  ;;  %v171_v12 = vld [vmem:[%s21820_s0 + $0x140] sm:$0xff]  ;;  %v172_v13 = vld [vmem:[%s21820_s0 + $0x148] sm:$0xff] }
  0x3d   :  { %206 = vst.msk [vmem:[#allocation2 + $0x91] sm:$0xff] %vm21_vm1, %v141_v14  ;;  %207 = vst.msk [vmem:[#allocation2 + $0x99] sm:$0xff] %vm21_vm1, %v142_v15  ;;  %v173_v14 = vld [vmem:[%s21820_s0 + $0x150] sm:$0xff]  ;;  %v174_v15 = vld [vmem:[%s21820_s0 + $0x158] sm:$0xff] }
  0x3e   :  { %208 = vst.msk [vmem:[#allocation2 + $0xa9] sm:$0xff] %vm21_vm1, %v143_v16  ;;  %209 = vst.msk [vmem:[#allocation2 + $0xb1] sm:$0xff] %vm21_vm1, %v144_v17  ;;  %v175_v16 = vld [vmem:[%s21820_s0 + $0x160] sm:$0xff] }
  0x3f   :  { %210 = vst.msk [vmem:[#allocation2 + $0xc1] sm:$0xff] %vm21_vm1, %v145_v18  ;;  %211 = vst.msk [vmem:[#allocation2 + $0xc9] sm:$0xff] %vm21_vm1, %v146_v19  ;;  %v17463_v30 = vld [vmem:[#allocation2 + $0x18] sm:$0xff]  ;;  %v17465_v31 = vld [vmem:[#allocation2 + $0x20] sm:$0xff] }
  0x40   :  { %212 = vst.msk [vmem:[#allocation2 + $0xd9] sm:$0xff] %vm21_vm1, %v147_v20  ;;  %213 = vst.msk [vmem:[#allocation2 + $0xe1] sm:$0xff] %vm21_vm1, %v148_v21  ;;  %v17467_v32 = vld [vmem:[#allocation2 + $0x19] sm:$0xff]  ;;  %15460 = vmatprep.mubr.msk.f32.mxu0 %vm21_vm1, %v17463_v30  ;;  %v17473_v33 = vld [vmem:[#allocation2 + $0x30] sm:$0xff] }
  0x41   :  { %214 = vst.msk [vmem:[#allocation2 + $0xf1] sm:$0xff] %vm21_vm1, %v149_v22  ;;  %215 = vst.msk [vmem:[#allocation2 + $0xf9] sm:$0xff] %vm21_vm1, %v150_v23  ;;  %15461 = vmatmul.mubr.msk.f32.vlgmr.msra.gmra.mrb[0].mxu0 %vm21_vm1, %v17465_v31  ;;  %15169 = vmatprep.mubr.msk.f32.mxu1 %vm21_vm1, %v17467_v32  ;;  %v17479_v34 = vld [vmem:[#allocation2 + $0x21] sm:$0xff]  ;;  %v17485_v35 = vld [vmem:[#allocation2 + $0x38] sm:$0xff] }
  0x42   :  { %216 = vst.msk [vmem:[#allocation2 + $0x109] sm:$0xff] %vm21_vm1, %v151_v24  ;;  %217 = vst.msk [vmem:[#allocation2 + $0x111] sm:$0xff] %vm21_vm1, %v152_v25  ;;  %15557 = vmatpush3.msk.msra.mxu0 %vm583_vm0, %v17143_v3  ;;  %15463 = vmatprep.mubr.msk.f32.mxu0 %vm21_vm1, %v17473_v33  ;;  %v17487_v36 = vld [vmem:[#allocation2 + $0x31] sm:$0xff]  ;;  %v17489_v37 = vld [vmem:[#allocation2 + $0x48] sm:$0xff] }
  0x43   :  { %218 = vst.msk [vmem:[#allocation2 + $0x121] sm:$0xff] %vm21_vm1, %v153_v26  ;;  %219 = vst.msk [vmem:[#allocation2 + $0x129] sm:$0xff] %vm21_vm1, %v154_v29  ;;  %15170 = vmatmul.mubr.msk.f32.gmra.mrb[2].mxu1 %vm21_vm1, %v17479_v34  ;;  %v17497_v38 = vld [vmem:[#allocation2 + $0x39] sm:$0xff]  ;;  %v17501_v39 = vld [vmem:[#allocation2 + $0x50] sm:$0xff]  ;;  %15654 = vmatprep.subr.msk.mxu0 %vm583_vm0, %v17634_v11 }
  0x44   :  { %15172 = vmatprep.mubr.msk.f32.mxu1 %vm21_vm1, %v17487_v36  ;;  %v17503_v40 = vld [vmem:[#allocation2 + $0x49] sm:$0xff]  ;;  %v17505_v41 = vld [vmem:[#allocation2 + $0x60] sm:$0xff]  ;;  %v17513_v42 = vld [vmem:[#allocation2 + $0x51] sm:$0xff]  ;;  %220 = vst.msk [vmem:[#allocation2 + $0x139] sm:$0xff] %vm21_vm1, %v155_v51 }
  0x45   :  { %15464 = vmatmul.mubr.msk.f32.gmra.mrb[2].mxu0 %vm21_vm1, %v17485_v35  ;;  %v17517_v43 = vld [vmem:[#allocation2 + $0x68] sm:$0xff]  ;;  %v17521_v45 = vld [vmem:[#allocation2 + $0x78] sm:$0xff]  ;;  %v17533_v47 = vld [vmem:[#allocation2 + $0x80] sm:$0xff]  ;;  %221 = vst.msk [vmem:[#allocation2 + $0x141] sm:$0xff] %vm21_vm1, %v156_v52 }
  0x46   :  { %15466 = vmatprep.mubr.msk.f32.mxu0 %vm21_vm1, %v17489_v37  ;;  %v17519_v44 = vld [vmem:[#allocation2 + $0x61] sm:$0xff]  ;;  %v17529_v46 = vld [vmem:[#allocation2 + $0x69] sm:$0xff]  ;;  %v17535_v48 = vld [vmem:[#allocation2 + $0x79] sm:$0xff]  ;;  %222 = vst.msk [vmem:[#allocation2 + $0x151] sm:$0xff] %vm21_vm1, %v157_v53 }
  0x47   :  { %15173 = vmatmul.mubr.msk.f32.gmra.mrb[4].mxu1 %vm21_vm1, %v17497_v38  ;;  %v17537_v49 = vld [vmem:[#allocation2 + $0x90] sm:$0xff]  ;;  %v17539_v50 = vld [vmem:[#allocation2 + $0x81] sm:$0xff]  ;;  %v17552_v54 = vld [vmem:[#allocation2 + $0x98] sm:$0xff]  ;;  %223 = vst.msk [vmem:[#allocation2 + $0x159] sm:$0xff] %vm21_vm1, %v158_v55 }
  0x48   :  { %15175 = vmatprep.mubr.msk.f32.mxu1 %vm21_vm1, %v17503_v40  ;;  %v17570_v58 = vld [vmem:[#allocation2 + $0x91] sm:$0xff]  ;;  %224 = vst.msk [vmem:[#allocation2 + $0x169] sm:$0xff] %vm21_vm1, %v159_v56  ;;  %225 = vst.msk [vmem:[#allocation2 + $0x171] sm:$0xff] %vm21_vm1, %v160_v57  ;;  %v17583_v61 = vld [vmem:[#allocation2 + $0xa8] sm:$0xff] }
  0x49   :  { %15467 = vmatmul.mubr.msk.f32.gmra.mrb[4].mxu0 %vm21_vm1, %v17501_v39  ;;  %226 = vst.msk [vmem:[#allocation2 + $0x181] sm:$0xff] %vm21_vm1, %v161_v59  ;;  %227 = vst.msk [vmem:[#allocation2 + $0x189] sm:$0xff] %vm21_vm1, %v162_v60  ;;  %v17593_v0 = vld [vmem:[#allocation2 + $0x99] sm:$0xff]  ;;  %v17608_v6 = vld [vmem:[#allocation2 + $0xb0] sm:$0xff] }
  0x4a   :  { %15469 = vmatprep.mubr.msk.f32.mxu0 %vm21_vm1, %v17505_v41  ;;  %228 = vst.msk [vmem:[#allocation2 + $0x1c9] sm:$0xff] %vm21_vm1, %v163_v62  ;;  %229 = vst.msk [vmem:[#allocation2 + $0x1d1] sm:$0xff] %vm21_vm1, %v164_v63  ;;  %v166_v3 = vld [vmem:[%s21820_s0 + $0x118] sm:$0xff]  ;;  %v17610_v7 = vld [vmem:[#allocation2 + $0xa9] sm:$0xff] }
  0x4b   :  { %15176 = vmatmul.mubr.msk.f32.gmra.mrb[6].mxu1 %vm21_vm1, %v17513_v42  ;;  %230 = vst.msk [vmem:[#allocation2 + $0x1e1] sm:$0xff] %vm21_vm1, %v165_v2  ;;  %231 = vst.msk [vmem:[#allocation2 + $0x1e9] sm:$0xff] %vm21_vm1, %v166_v3  ;;  %v17657_v17 = vld [vmem:[#allocation2 + $0xc0] sm:$0xff]  ;;  %v17668_v18 = vld [vmem:[#allocation2 + $0xb1] sm:$0xff] }
  0x4c   :  { %15178 = vmatprep.mubr.msk.f32.mxu1 %vm21_vm1, %v17519_v44  ;;  %232 = vst.msk [vmem:[#allocation2 + $0x1f9] sm:$0xff] %vm21_vm1, %v167_v4  ;;  %233 = vst.msk [vmem:[#allocation2 + $0x201] sm:$0xff] %vm21_vm1, %v168_v8  ;;  %v17672_v19 = vld [vmem:[#allocation2 + $0xc8] sm:$0xff]  ;;  %v17676_v21 = vld [vmem:[#allocation2 + $0xd8] sm:$0xff] }
  0x4d   :  { %15470 = vmatmul.mubr.msk.f32.gmra.mrb[6].mxu0 %vm21_vm1, %v17517_v43  ;;  %234 = vst.msk [vmem:[#allocation2 + $0x211] sm:$0xff] %vm21_vm1, %v169_v9  ;;  %235 = vst.msk [vmem:[#allocation2 + $0x219] sm:$0xff] %vm21_vm1, %v170_v10  ;;  %v17674_v20 = vld [vmem:[#allocation2 + $0xc1] sm:$0xff]  ;;  %v17684_v22 = vld [vmem:[#allocation2 + $0xc9] sm:$0xff] }
  0x4e   :  { %15472 = vmatprep.mubr.msk.f32.mxu0 %vm21_vm1, %v17521_v45  ;;  %236 = vst.msk [vmem:[#allocation2 + $0x229] sm:$0xff] %vm21_vm1, %v171_v12  ;;  %237 = vst.msk [vmem:[#allocation2 + $0x231] sm:$0xff] %vm21_vm1, %v172_v13  ;;  %v17688_v23 = vld [vmem:[#allocation2 + $0xe0] sm:$0xff]  ;;  %v17692_v25 = vld [vmem:[#allocation2 + $0xf0] sm:$0xff] }
  0x4f   :  { %15179 = vmatmul.mubr.msk.f32.gmra.mrb[8].mxu1 %vm21_vm1, %v17529_v46  ;;  %238 = vst.msk [vmem:[#allocation2 + $0x241] sm:$0xff] %vm21_vm1, %v173_v14  ;;  %239 = vst.msk [vmem:[#allocation2 + $0x249] sm:$0xff] %vm21_vm1, %v174_v15  ;;  %v17690_v24 = vld [vmem:[#allocation2 + $0xd9] sm:$0xff]  ;;  %v17700_v26 = vld [vmem:[#allocation2 + $0xe1] sm:$0xff] }
  0x50   :  { %15181 = vmatprep.mubr.msk.f32.mxu1 %vm21_vm1, %v17535_v48  ;;  %240 = vst.msk [vmem:[#allocation2 + $0x259] sm:$0xff] %vm21_vm1, %v175_v16  ;;  %v17702_v27 = vld [vmem:[#allocation2 + $0xf8] sm:$0xff]  ;;  %v17708_v29 = vld [vmem:[#allocation2 + $0x108] sm:$0xff]  ;;  %v177_v53 = vld [vmem:[%s21820_s0 + $0x170] sm:$0xff] }
  0x51   :  { %15473 = vmatmul.mubr.msk.f32.gmra.mrb[8].mxu0 %vm21_vm1, %v17533_v47  ;;  %v17706_v28 = vld [vmem:[#allocation2 + $0xf1] sm:$0xff]  ;;  %v176_v51 = vld [vmem:[%s21820_s0 + $0x168] sm:$0xff]  ;;  %v17713_v52 = vld [vmem:[#allocation2 + $0xf9] sm:$0xff]  ;;  %242 = vst.msk [vmem:[#allocation2 + $0x271] sm:$0xff] %vm21_vm1, %v177_v53 }
  0x52   :  { %15475 = vmatprep.mubr.msk.f32.mxu0 %vm21_vm1, %v17537_v49  ;;  %241 = vst.msk [vmem:[#allocation2 + $0x261] sm:$0xff] %vm21_vm1, %v176_v51  ;;  %v178_v55 = vld [vmem:[%s21820_s0 + $0x178] sm:$0xff]  ;;  %v179_v56 = vld [vmem:[%s21820_s0 + $0x180] sm:$0xff]  ;;  %v17727_v57 = vld [vmem:[#allocation2 + $0x110] sm:$0xff] }
  0x53   :  { %15182 = vmatmul.mubr.msk.f32.gmra.mrb[10].mxu1 %vm21_vm1, %v17539_v50  ;;  %21845 = vst [vmem:[#allocation7_spill] sm:$0xff] %v17727_v57  ;;  %v17729_v59 = vld [vmem:[#allocation2 + $0x109] sm:$0xff]  ;;  %243 = vst.msk [vmem:[#allocation2 + $0x279] sm:$0xff] %vm21_vm1, %v178_v55  ;;  %v182_v63 = vld [vmem:[%s21820_s0 + $0x198] sm:$0xff] }
  0x54   :  { %15184 = vmatprep.mubr.msk.f32.mxu1 %vm21_vm1, %v17570_v58  ;;  %244 = vst.msk [vmem:[#allocation2 + $0x289] sm:$0xff] %vm21_vm1, %v179_v56  ;;  %v180_v60 = vld [vmem:[%s21820_s0 + $0x188] sm:$0xff]  ;;  %v181_v62 = vld [vmem:[%s21820_s0 + $0x190] sm:$0xff]  ;;  %v17747_v2 = vld [vmem:[#allocation2 + $0x120] sm:$0xff] }
  0x55   :  { %15476 = vmatmul.mubr.msk.f32.gmra.mrb[10].mxu0 %vm21_vm1, %v17552_v54  ;;  %21846 = vst [vmem:[#allocation8_spill] sm:$0xff] %v17747_v2  ;;  %245 = vst.msk [vmem:[#allocation2 + $0x291] sm:$0xff] %vm21_vm1, %v180_v60  ;;  %v183_v3 = vld [vmem:[%s21820_s0 + $0x1a0] sm:$0xff]  ;;  %v184_v4 = vld [vmem:[%s21820_s0 + $0x1a8] sm:$0xff] }
  0x56   :  { %15478 = vmatprep.mubr.msk.f32.mxu0 %vm21_vm1, %v17583_v61  ;;  %246 = vst.msk [vmem:[#allocation2 + $0x2a1] sm:$0xff] %vm21_vm1, %v181_v62  ;;  %247 = vst.msk [vmem:[#allocation2 + $0x2a9] sm:$0xff] %vm21_vm1, %v182_v63  ;;  %v185_v8 = vld [vmem:[%s21820_s0 + $0x1b0] sm:$0xff]  ;;  %v186_v9 = vld [vmem:[%s21820_s0 + $0x1b8] sm:$0xff] }
  0x57   :  { %15185 = vmatmul.mubr.msk.f32.gmra.mrb[12].mxu1 %vm21_vm1, %v17593_v0  ;;  %248 = vst.msk [vmem:[#allocation2 + $0x2b9] sm:$0xff] %vm21_vm1, %v183_v3  ;;  %249 = vst.msk [vmem:[#allocation2 + $0x2c1] sm:$0xff] %vm21_vm1, %v184_v4  ;;  %v187_v10 = vld [vmem:[%s21820_s0 + $0x1c0] sm:$0xff]  ;;  %v188_v12 = vld [vmem:[%s21820_s0 + $0x1c8] sm:$0xff] }
  0x58   :  { %15187 = vmatprep.mubr.msk.f32.mxu1 %vm21_vm1, %v17610_v7  ;;  %250 = vst.msk [vmem:[#allocation2 + $0x2d1] sm:$0xff] %vm21_vm1, %v185_v8  ;;  %251 = vst.msk [vmem:[#allocation2 + $0x2d9] sm:$0xff] %vm21_vm1, %v186_v9  ;;  %v189_v13 = vld [vmem:[%s21820_s0 + $0x1d0] sm:$0xff]  ;;  %v190_v14 = vld [vmem:[%s21820_s0 + $0x1d8] sm:$0xff] }
  0x59   :  { %15479 = vmatmul.mubr.msk.f32.gmra.mrb[12].mxu0 %vm21_vm1, %v17608_v6  ;;  %252 = vst.msk [vmem:[#allocation2 + $0x2e9] sm:$0xff] %vm21_vm1, %v187_v10  ;;  %253 = vst.msk [vmem:[#allocation2 + $0x2f1] sm:$0xff] %vm21_vm1, %v188_v12  ;;  %v191_v15 = vld [vmem:[%s21820_s0 + $0x1e0] sm:$0xff]  ;;  %v192_v16 = vld [vmem:[%s21820_s0 + $0x1e8] sm:$0xff] }
  0x5a   :  { %15481 = vmatprep.mubr.msk.f32.mxu0 %vm21_vm1, %v17657_v17  ;;  %254 = vst.msk [vmem:[#allocation2 + $0x301] sm:$0xff] %vm21_vm1, %v189_v13  ;;  %255 = vst.msk [vmem:[#allocation2 + $0x309] sm:$0xff] %vm21_vm1, %v190_v14  ;;  %v324_v51 = vld [vmem:[%s21821_s1] sm:$0x7]  ;;  %v17802_v53 = vld [vmem:[#allocation2 + $0x111] sm:$0xff] }
  0x5b   :  { %15188 = vmatmul.mubr.msk.f32.gmra.mrb[14].mxu1 %vm21_vm1, %v17668_v18  ;;  %256 = vst.msk [vmem:[#allocation2 + $0x319] sm:$0xff] %vm21_vm1, %v191_v15  ;;  %257 = vst.msk [vmem:[#allocation2 + $0x321] sm:$0xff] %vm21_vm1, %v192_v16  ;;  %v17807_v55 = vld [vmem:[#allocation2 + $0x128] sm:$0xff]  ;;  %15262 = vmatprep.subr.msk.mxu1 %vm583_vm0, %v324_v51 }
  0x5c   :  { %15190 = vmatprep.mubr.msk.f32.mxu1 %vm21_vm1, %v17674_v20  ;;  %21847 = vst [vmem:[#allocation9_spill] sm:$0xff] %v17807_v55  ;;  %v17809_v56 = vld [vmem:[#allocation2 + $0x121] sm:$0xff] }
  0x5d   :  { %15482 = vmatmul.mubr.msk.f32.gmra.mrb[14].mxu0 %vm21_vm1, %v17672_v19 }
  0x5e   :  { %15484 = vmatprep.mubr.msk.f32.mxu0 %vm21_vm1, %v17676_v21 }
  0x5f   :  { %15191 = vmatmul.mubr.msk.f32.gmra.mrb[16].mxu1 %vm21_vm1, %v17684_v22 }
  0x60   :  { %15193 = vmatprep.mubr.msk.f32.mxu1 %vm21_vm1, %v17690_v24 }
  0x61   :  { %15485 = vmatmul.mubr.msk.f32.gmra.mrb[16].mxu0 %vm21_vm1, %v17688_v23 }
  0x62   :  { %15487 = vmatprep.mubr.msk.f32.mxu0 %vm21_vm1, %v17692_v25 }
  0x63   :  { %15194 = vmatmul.mubr.msk.f32.gmra.mrb[18].mxu1 %vm21_vm1, %v17700_v26 }
  0x64   :  { %15196 = vmatprep.mubr.msk.f32.mxu1 %vm21_vm1, %v17706_v28 }
  0x65   :  { %15488 = vmatmul.mubr.msk.f32.gmra.mrb[18].mxu0 %vm21_vm1, %v17702_v27 }
  0x66   :  { %15490 = vmatprep.mubr.msk.f32.mxu0 %vm21_vm1, %v17708_v29 }
  0x67   :  { %15197 = vmatmul.mubr.msk.f32.gmra.mrb[20].mxu1 %vm21_vm1, %v17713_v52 }
  0x68   :  { %15199 = vmatprep.mubr.msk.f32.mxu1 %vm21_vm1, %v17729_v59 }
  0x69   :  { %15491 = vmatmul.mubr.msk.f32.gmra.mrb[20].mxu0 %vm21_vm1, %v17727_v57 }
  0x6a   :  { %15493 = vmatprep.mubr.msk.f32.mxu0 %vm21_vm1, %v17747_v2 }
  0x6b   :  { %10 = vsyncpa [#allocation5], 0  ;;  %v17812_v60 = vld [vmem:[#allocation2 + $0x138] sm:$0xff]  ;;  %15263 = vmatpush3.msk.msra.mxu1 %vm583_vm0, %v324_v51  ;;  %v17821_v62 = vld [vmem:[#allocation2 + $0x129] sm:$0xff]  ;;  %vm8066_vm3 = vcmask 254976   ;;  %vm9859_vm4 = vcmask 261120  }
  0x6c   :  { %21848 = vst [vmem:[#allocation10_spill] sm:$0xff] %v17812_v60  ;;  %15200 = vmatmul.mubr.msk.f32.gmra.mrb[22].mxu1 %vm21_vm1, %v17802_v53  ;;  %v17825_v63 = vld [vmem:[#allocation2 + $0x140] sm:$0xff]  ;;  %v17829_v4 = vld [vmem:[#allocation2 + $0x150] sm:$0xff]  ;;  %v17841_v9 = vld [vmem:[#allocation2 + $0x158] sm:$0xff]  ;;  %vm10412_vm5 = vcmask 1041409   ;;  %vm10414_vm6 = vcmask 1042434  }
  0x6d   :  { %15494 = vmatmul.mubr.msk.f32.gmra.mrb[22].mxu0 %vm21_vm1, %v17807_v55  ;;  %15202 = vmatprep.mubr.msk.f32.mxu1 %vm21_vm1, %v17809_v56  ;;  %21849 = vst [vmem:[#allocation11_spill] sm:$0xff] %v17825_v63  ;;  %v17827_v3 = vld [vmem:[#allocation2 + $0x139] sm:$0xff]  ;;  %21850 = vst [vmem:[#allocation12_spill] sm:$0xff] %v17829_v4  ;;  %v17837_v8 = vld [vmem:[#allocation2 + $0x141] sm:$0xff]  ;;  %vm10416_vm7 = vcmask 1043459   ;;  %vm10418_vm8 = vcmask 1044484  }
  0x6e   :  { %15496 = vmatprep.mubr.msk.f32.mxu0 %vm21_vm1, %v17812_v60  ;;  %21851 = vst [vmem:[#allocation13_spill] sm:$0xff] %v17841_v9  ;;  %v17843_v10 = vld [vmem:[#allocation2 + $0x151] sm:$0xff]  ;;  %v17845_v12 = vld [vmem:[#allocation2 + $0x168] sm:$0xff]  ;;  %v17853_v13 = vld [vmem:[#allocation2 + $0x159] sm:$0xff]  ;;  %vm10420_vm9 = vcmask 1045509   ;;  %vm10422_vm10 = vcmask 1046534  }
  0x6f   :  { %21852 = vst [vmem:[#allocation14_spill] sm:$0xff] %v17845_v12  ;;  %v17857_v14 = vld [vmem:[#allocation2 + $0x170] sm:$0xff]  ;;  %v2292_v16 = vld [vmem:[#allocation2 + $0x180] sm:$0xff]  ;;  %v2293_v5 = vld [vmem:[#allocation2 + $0x188] sm:$0xff]  ;;  %vm10424_vm11 = vcmask 1047559   ;;  %vm12993_vm12 = vcmask 517120  }
  0x70   :  { %15203 = vmatmul.mubr.msk.f32.gmra.mrb[24].mxu1 %vm21_vm1, %v17821_v62  ;;  %21853 = vst [vmem:[#allocation15_spill] sm:$0xff] %v17857_v14  ;;  %v17859_v15 = vld [vmem:[#allocation2 + $0x169] sm:$0xff]  ;;  %v17867_v51 = vld [vmem:[#allocation2 + $0x171] sm:$0xff]  ;;  %v17917_v55 = vld [vmem:[#allocation2 + $0x200] sm:$0xff]  ;;  %vm13442_vm13 = vcmask 523264   ;;  %vm13603_vm14 = vcmask 519168  }
  0x71   :  { %15497 = vmatmul.mubr.msk.f32.gmra.mrb[24].mxu0 %vm21_vm1, %v17825_v63  ;;  %15205 = vmatprep.mubr.msk.f32.mxu1 %vm21_vm1, %v17827_v3  ;;  %v17880_v63 = vld [vmem:[#allocation2 + $0x1c9] sm:$0xff]  ;;  %v17897_v60 = vld [vmem:[#allocation2 + $0x1f8] sm:$0xff]  ;;  %21859 = vst [vmem:[#allocation21_spill] sm:$0xff] %v17917_v55 }
  0x72   :  { %15499 = vmatprep.mubr.msk.f32.mxu0 %vm21_vm1, %v17829_v4  ;;  %v358_v4 = vld [vmem:[#allocation2 + $0x1b9] sm:$0xff]  ;;  %21858 = vst [vmem:[#allocation20_spill] sm:$0xff] %v17897_v60  ;;  %v17921_v2 = vld [vmem:[#allocation2 + $0x210] sm:$0xff] }
  0x73   :  { %21860 = vst [vmem:[#allocation22_spill] sm:$0xff] %v17921_v2  ;;  %v17947_v57 = vld [vmem:[#allocation2 + $0x229] sm:$0xff] }
  0x74   :  { %15206 = vmatmul.mubr.msk.f32.gmra.mrb[26].mxu1 %vm21_vm1, %v17837_v8 }
  0x75   :  { %15500 = vmatmul.mubr.msk.f32.gmra.mrb[26].mxu0 %vm21_vm1, %v17841_v9  ;;  %15208 = vmatprep.mubr.msk.f32.mxu1 %vm21_vm1, %v17843_v10  ;;  %v17870_v9 = vld [vmem:[#allocation2 + $0x1c8] sm:$0xff] }
  0x76   :  { %15502 = vmatprep.mubr.msk.f32.mxu0 %vm21_vm1, %v17845_v12  ;;  %v357_v12 = vld [vmem:[#allocation2 + $0x1b1] sm:$0xff]  ;;  %21854 = vst [vmem:[#allocation16_spill] sm:$0xff] %v17870_v9 }
  0x78   :  { %15209 = vmatmul.mubr.msk.f32.gmra.mrb[28].mxu1 %vm21_vm1, %v17853_v13 }
  0x79   :  { %15503 = vmatmul.mubr.msk.f32.gmra.mrb[28].mxu0 %vm21_vm1, %v17857_v14  ;;  %15211 = vmatprep.mubr.msk.f32.mxu1 %vm21_vm1, %v17859_v15  ;;  %v17878_v14 = vld [vmem:[#allocation2 + $0x1d0] sm:$0xff] }
  0x7a   :  { %15505 = vmatprep.mubr.msk.f32.mxu0 %vm21_vm1, %v2292_v16  ;;  %21855 = vst [vmem:[#allocation17_spill] sm:$0xff] %v17878_v14  ;;  %v17882_v16 = vld [vmem:[#allocation2 + $0x1e0] sm:$0xff] }
  0x7b   :  { %21856 = vst [vmem:[#allocation18_spill] sm:$0xff] %v17882_v16 }
  0x7c   :  { %15212 = vmatmul.mubr.msk.f32.gmra.mrb[30].mxu1 %vm21_vm1, %v17867_v51 }
  0x7d   :  { %15506 = vmatmul.mubr.msk.f32.gmra.mrb[30].mxu0 %vm21_vm1, %v2293_v5  ;;  %15214 = vmatprep.mubr.msk.f32.mxu1 %vm21_vm1, %v357_v12  ;;  %v17889_v5 = vld [vmem:[#allocation2 + $0x1d1] sm:$0xff]  ;;  %v17893_v12 = vld [vmem:[#allocation2 + $0x1e8] sm:$0xff] }
  0x7e   :  { %15508 = vmatprep.mubr.msk.f32.mxu0 %vm21_vm1, %v17870_v9  ;;  %21857 = vst [vmem:[#allocation19_spill] sm:$0xff] %v17893_v12  ;;  %v17895_v9 = vld [vmem:[#allocation2 + $0x1e1] sm:$0xff] }
  0x80   :  { %15215 = vmatmul.mubr.msk.f32.gmra.mrb[32].mxu1 %vm21_vm1, %v358_v4  ;;  %v193_v4 = vld [vmem:[%s21820_s0 + $0x1f0] sm:$0xff] }
  0x81   :  { %15509 = vmatmul.mubr.msk.f32.gmra.mrb[32].mxu0 %vm21_vm1, %v17878_v14  ;;  %15217 = vmatprep.mubr.msk.f32.mxu1 %vm21_vm1, %v17880_v63  ;;  %258 = vst.msk [vmem:[#allocation2 + $0x331] sm:$0xff] %vm21_vm1, %v193_v4  ;;  %v194_v14 = vld [vmem:[%s21820_s0 + $0x1f8] sm:$0xff] }
  0x82   :  { %15511 = vmatprep.mubr.msk.f32.mxu0 %vm21_vm1, %v17882_v16  ;;  %v17912_v16 = vld [vmem:[#allocation2 + $0x1e9] sm:$0xff]  ;;  %259 = vst.msk [vmem:[#allocation2 + $0x339] sm:$0xff] %vm21_vm1, %v194_v14  ;;  %v17919_v4 = vld [vmem:[#allocation2 + $0x1f9] sm:$0xff] }
  0x83   :  { %v17933_v14 = vld [vmem:[#allocation2 + $0x218] sm:$0xff] }
  0x84   :  { %15218 = vmatmul.mubr.msk.f32.gmra.mrb[34].mxu1 %vm21_vm1, %v17889_v5  ;;  %21861 = vst [vmem:[#allocation23_spill] sm:$0xff] %v17933_v14 }
  0x85   :  { %15512 = vmatmul.mubr.msk.f32.gmra.mrb[34].mxu0 %vm21_vm1, %v17893_v12  ;;  %15220 = vmatprep.mubr.msk.f32.mxu1 %vm21_vm1, %v17895_v9  ;;  %v17929_v12 = vld [vmem:[#allocation2 + $0x201] sm:$0xff] }
  0x86   :  { %15514 = vmatprep.mubr.msk.f32.mxu0 %vm21_vm1, %v17897_v60  ;;  %v17935_v60 = vld [vmem:[#allocation2 + $0x211] sm:$0xff] }
  0x88   :  { %15221 = vmatmul.mubr.msk.f32.gmra.mrb[36].mxu1 %vm21_vm1, %v17912_v16 }
  0x89   :  { %15515 = vmatmul.mubr.msk.f32.gmra.mrb[36].mxu0 %vm21_vm1, %v17917_v55  ;;  %15223 = vmatprep.mubr.msk.f32.mxu1 %vm21_vm1, %v17919_v4  ;;  %v17943_v55 = vld [vmem:[#allocation2 + $0x219] sm:$0xff] }
  0x8a   :  { %15517 = vmatprep.mubr.msk.f32.mxu0 %vm21_vm1, %v17921_v2  ;;  %v17954_v2 = vld [vmem:[%s21821_s1 + $0x18] sm:$0x7] }
  0x8c   :  { %15224 = vmatmul.mubr.msk.f32.gmra.mrb[38].mxu1 %vm21_vm1, %v17929_v12 }
  0x8d   :  { %15518 = vmatmul.mubr.msk.f32.gmra.mrb[38].mxu0 %vm21_vm1, %v17933_v14  ;;  %15226 = vmatprep.mubr.msk.f32.mxu1 %vm21_vm1, %v17935_v60  ;;  %v17960_v14 = vld [vmem:[#allocation2 + $0x231] sm:$0xff] }
  0x8e   :  { %15558 = vmatprep.mubr.msk.f32.mxu0 %vm21_vm1, %v17467_v32  ;;  %v17966_v32 = vld [vmem:[#allocation2 + $0x241] sm:$0xff] }
  0x90   :  { %15227 = vmatmul.mubr.msk.f32.gmra.mrb[40].mxu1 %vm21_vm1, %v17943_v55 }
  0x91   :  { %15559 = vmatmul.mubr.msk.f32.vlgmr.msra.gmra.mrb[0].mxu0 %vm21_vm1, %v17479_v34  ;;  %15229 = vmatprep.mubr.msk.f32.mxu1 %vm21_vm1, %v17947_v57  ;;  %v17976_v34 = vld [vmem:[#allocation2 + $0x249] sm:$0xff] }
  0x92   :  { %15655 = vmatpush3.msk.msra.mxu0 %vm583_vm0, %v17634_v11  ;;  %15561 = vmatprep.mubr.msk.f32.mxu0 %vm21_vm1, %v17487_v36  ;;  %v17980_v36 = vld [vmem:[#allocation2 + $0x259] sm:$0xff]  ;;  %v17992_v11 = vld [vmem:[#allocation2 + $0x271] sm:$0xff] }
  0x93   :  { %15752 = vmatprep.subr.msk.mxu0 %vm583_vm0, %v17954_v2 }
  0x94   :  { %15230 = vmatmul.mubr.msk.f32.gmra.mrb[42].mxu1 %vm21_vm1, %v17960_v14 }
  0x95   :  { %15562 = vmatmul.mubr.msk.f32.gmra.mrb[2].mxu0 %vm21_vm1, %v17497_v38  ;;  %15232 = vmatprep.mubr.msk.f32.mxu1 %vm21_vm1, %v17966_v32  ;;  %v17988_v38 = vld [vmem:[#allocation2 + $0x261] sm:$0xff] }
  0x96   :  { %15564 = vmatprep.mubr.msk.f32.mxu0 %vm21_vm1, %v17503_v40  ;;  %v18000_v40 = vld [vmem:[#allocation2 + $0x279] sm:$0xff] }
  0x98   :  { %15233 = vmatmul.mubr.msk.f32.gmra.mrb[44].mxu1 %vm21_vm1, %v17976_v34 }
  0x99   :  { %15565 = vmatmul.mubr.msk.f32.gmra.mrb[4].mxu0 %vm21_vm1, %v17513_v42  ;;  %15235 = vmatprep.mubr.msk.f32.mxu1 %vm21_vm1, %v17980_v36  ;;  %v18004_v42 = vld [vmem:[#allocation2 + $0x289] sm:$0xff] }
  0x9a   :  { %15567 = vmatprep.mubr.msk.f32.mxu0 %vm21_vm1, %v17519_v44  ;;  %v18012_v44 = vld [vmem:[#allocation2 + $0x291] sm:$0xff] }
  0x9c   :  { %15236 = vmatmul.mubr.msk.f32.gmra.mrb[46].mxu1 %vm21_vm1, %v17988_v38 }
  0x9d   :  { %15568 = vmatmul.mubr.msk.f32.gmra.mrb[6].mxu0 %vm21_vm1, %v17529_v46  ;;  %15238 = vmatprep.mubr.msk.f32.mxu1 %vm21_vm1, %v17992_v11  ;;  %v18016_v46 = vld [vmem:[#allocation2 + $0x2a1] sm:$0xff] }
  0x9e   :  { %15570 = vmatprep.mubr.msk.f32.mxu0 %vm21_vm1, %v17535_v48  ;;  %v18024_v48 = vld [vmem:[#allocation2 + $0x2a9] sm:$0xff] }
  0xa0   :  { %15239 = vmatmul.mubr.msk.f32.gmra.mrb[48].mxu1 %vm21_vm1, %v18000_v40 }
  0xa1   :  { %15571 = vmatmul.mubr.msk.f32.gmra.mrb[8].mxu0 %vm21_vm1, %v17539_v50  ;;  %15241 = vmatprep.mubr.msk.f32.mxu1 %vm21_vm1, %v18004_v42  ;;  %v18028_v50 = vld [vmem:[#allocation2 + $0x2b9] sm:$0xff] }
  0xa2   :  { %15573 = vmatprep.mubr.msk.f32.mxu0 %vm21_vm1, %v17570_v58  ;;  %v18036_v58 = vld [vmem:[#allocation2 + $0x2c1] sm:$0xff] }
  0xa4   :  { %15242 = vmatmul.mubr.msk.f32.gmra.mrb[50].mxu1 %vm21_vm1, %v18012_v44 }
  0xa5   :  { %15574 = vmatmul.mubr.msk.f32.gmra.mrb[10].mxu0 %vm21_vm1, %v17593_v0  ;;  %15244 = vmatprep.mubr.msk.f32.mxu1 %vm21_vm1, %v18016_v46  ;;  %v18040_v0 = vld [vmem:[#allocation2 + $0x2d1] sm:$0xff] }
  0xa6   :  { %15576 = vmatprep.mubr.msk.f32.mxu0 %vm21_vm1, %v17610_v7  ;;  %v18048_v7 = vld [vmem:[#allocation2 + $0x2d9] sm:$0xff] }
  0xa8   :  { %15245 = vmatmul.mubr.msk.f32.gmra.mrb[52].mxu1 %vm21_vm1, %v18024_v48 }
  0xa9   :  { %15577 = vmatmul.mubr.msk.f32.gmra.mrb[12].mxu0 %vm21_vm1, %v17668_v18  ;;  %15247 = vmatprep.mubr.msk.f32.mxu1 %vm21_vm1, %v18028_v50  ;;  %v18052_v18 = vld [vmem:[#allocation2 + $0x2e9] sm:$0xff] }
  0xaa   :  { %15579 = vmatprep.mubr.msk.f32.mxu0 %vm21_vm1, %v17674_v20  ;;  %v18060_v20 = vld [vmem:[#allocation2 + $0x2f1] sm:$0xff] }
  0xac   :  { %15248 = vmatmul.mubr.msk.f32.gmra.mrb[54].mxu1 %vm21_vm1, %v18036_v58 }
  0xad   :  { %15580 = vmatmul.mubr.msk.f32.gmra.mrb[14].mxu0 %vm21_vm1, %v17684_v22  ;;  %15250 = vmatprep.mubr.msk.f32.mxu1 %vm21_vm1, %v18040_v0  ;;  %v18064_v22 = vld [vmem:[#allocation2 + $0x301] sm:$0xff] }
  0xae   :  { %15582 = vmatprep.mubr.msk.f32.mxu0 %vm21_vm1, %v17690_v24  ;;  %v18072_v24 = vld [vmem:[#allocation2 + $0x309] sm:$0xff] }
  0xb0   :  { %15251 = vmatmul.mubr.msk.f32.gmra.mrb[56].mxu1 %vm21_vm1, %v18048_v7 }
  0xb1   :  { %15583 = vmatmul.mubr.msk.f32.gmra.mrb[16].mxu0 %vm21_vm1, %v17700_v26  ;;  %15253 = vmatprep.mubr.msk.f32.mxu1 %vm21_vm1, %v18052_v18  ;;  %v18076_v26 = vld [vmem:[#allocation2 + $0x319] sm:$0xff] }
  0xb2   :  { %15585 = vmatprep.mubr.msk.f32.mxu0 %vm21_vm1, %v17706_v28  ;;  %v18084_v28 = vld [vmem:[#allocation2 + $0x321] sm:$0xff] }
  0xb4   :  { %15254 = vmatmul.mubr.msk.f32.gmra.mrb[58].mxu1 %vm21_vm1, %v18060_v20 }
  0xb5   :  { %15586 = vmatmul.mubr.msk.f32.gmra.mrb[18].mxu0 %vm21_vm1, %v17713_v52  ;;  %15256 = vmatprep.mubr.msk.f32.mxu1 %vm21_vm1, %v18064_v22  ;;  %v260_v52 = vld [vmem:[#allocation2] sm:$0xff] }
  0xb6   :  { %15588 = vmatprep.mubr.msk.f32.mxu0 %vm21_vm1, %v17729_v59  ;;  %v261_v59 = vld [vmem:[#allocation2 + $0x8] sm:$0xff] }
  0xb8   :  { %15257 = vmatmul.mubr.msk.f32.gmra.mrb[60].mxu1 %vm21_vm1, %v18072_v24 }
  0xb9   :  { %15589 = vmatmul.mubr.msk.f32.gmra.mrb[20].mxu0 %vm21_vm1, %v17802_v53  ;;  %15259 = vmatprep.mubr.msk.f32.mxu1 %vm21_vm1, %v18076_v26  ;;  %v13759_v53 = vld [vmem:[%s21821_s1 + $0x8] sm:$0x7] }
  0xba   :  { %15591 = vmatprep.mubr.msk.f32.mxu0 %vm21_vm1, %v17809_v56  ;;  %15360 = vmatprep.subr.msk.mxu1 %vm583_vm0, %v13759_v53  ;;  %v18259_v56 = vld [vmem:[#allocation2 + $0x228] sm:$0xff] }
  0xbc   :  { %15260 = vmatmul.mubr.msk.f32.gmra.mrb[62].mxu1 %vm21_vm1, %v18084_v28 }
  0xbd   :  { %15592 = vmatmul.mubr.msk.f32.gmra.mrb[22].mxu0 %vm21_vm1, %v17821_v62  ;;  %15264 = vmatprep.mubr.msk.f32.mxu1 %vm21_vm1, %v260_v52  ;;  %v21878_v62 = vld [vmem:[#allocation23_spill] sm:$0xff] }
  0xbe   :  { %15594 = vmatprep.mubr.msk.f32.mxu0 %vm21_vm1, %v17827_v3  ;;  %v18274_v3 = vld [vmem:[#allocation2 + $0x230] sm:$0xff]  ;;  %v18410_v52 = vld [vmem:[#allocation2 + $0xfa] sm:$0xff] }
  0xc0   :  { %15265 = vmatmul.mubr.msk.f32.vlgmr.msra.gmra.mrb[0].mxu1 %vm21_vm1, %v261_v59  ;;  %v18412_v59 = vld [vmem:[#allocation2 + $0x300] sm:$0xff] }
  0xc1   :  { %15595 = vmatmul.mubr.msk.f32.gmra.mrb[24].mxu0 %vm21_vm1, %v17837_v8  ;;  %15267 = vmatprep.mubr.msk.f32.mxu1 %vm21_vm1, %v17463_v30  ;;  %v3002_v30 = vld [vmem:[#allocation2 + $0x181] sm:$0xff] }
  0xc2   :  { %15597 = vmatprep.mubr.msk.f32.mxu0 %vm21_vm1, %v17843_v10  ;;  %15361 = vmatpush3.msk.msra.mxu1 %vm583_vm0, %v13759_v53  ;;  %v18280_v8 = vld [vmem:[#allocation2 + $0x3a] sm:$0xff]  ;;  %v18284_v10 = vld [vmem:[#allocation2 + $0x4a] sm:$0xff] }
  0xc3   :  { %16406 = vmatprep.subr.msk.mxu1 %vm583_vm0, %v17130_v1  ;;  %v3003_v1 = vld [vmem:[#allocation2 + $0x189] sm:$0xff] }
  0xc4   :  { %15268 = vmatmul.mubr.msk.f32.gmra.mrb[2].mxu1 %vm21_vm1, %v17465_v31  ;;  %v21862_v31 = vld [vmem:[#allocation7_spill] sm:$0xff]  ;;  %v18414_v53 = vld [vmem:[#allocation2 + $0x10a] sm:$0xff] }
  0xc5   :  { %15598 = vmatmul.mubr.msk.f32.gmra.mrb[26].mxu0 %vm21_vm1, %v17853_v13  ;;  %15270 = vmatprep.mubr.msk.f32.mxu1 %vm21_vm1, %v17473_v33  ;;  %v21863_v33 = vld [vmem:[#allocation8_spill] sm:$0xff]  ;;  %v18298_v13 = vld [vmem:[#allocation2 + $0x52] sm:$0xff] }
  0xc6   :  { %15600 = vmatprep.mubr.msk.f32.mxu0 %vm21_vm1, %v17859_v15  ;;  %v18300_v15 = vld [vmem:[#allocation2 + $0x258] sm:$0xff] }
  0xc8   :  { %15271 = vmatmul.mubr.msk.f32.gmra.mrb[4].mxu1 %vm21_vm1, %v17485_v35  ;;  %v21864_v35 = vld [vmem:[#allocation9_spill] sm:$0xff] }
  0xc9   :  { %15601 = vmatmul.mubr.msk.f32.gmra.mrb[28].mxu0 %vm21_vm1, %v17867_v51  ;;  %15273 = vmatprep.mubr.msk.f32.mxu1 %vm21_vm1, %v17489_v37  ;;  %v21865_v37 = vld [vmem:[#allocation10_spill] sm:$0xff]  ;;  %v18302_v51 = vld [vmem:[#allocation2 + $0x62] sm:$0xff] }
  0xca   :  { %15603 = vmatprep.mubr.msk.f32.mxu0 %vm21_vm1, %v3002_v30  ;;  %v18422_v30 = vld [vmem:[#allocation2 + $0x308] sm:$0xff] }
  0xcc   :  { %15274 = vmatmul.mubr.msk.f32.gmra.mrb[6].mxu1 %vm21_vm1, %v17501_v39  ;;  %v21866_v39 = vld [vmem:[#allocation11_spill] sm:$0xff] }
  0xcd   :  { %15604 = vmatmul.mubr.msk.f32.gmra.mrb[30].mxu0 %vm21_vm1, %v3003_v1  ;;  %15276 = vmatprep.mubr.msk.f32.mxu1 %vm21_vm1, %v17505_v41  ;;  %v21867_v41 = vld [vmem:[#allocation12_spill] sm:$0xff]  ;;  %v18426_v1 = vld [vmem:[#allocation2 + $0x112] sm:$0xff] }
  0xce   :  { %15606 = vmatprep.mubr.msk.f32.mxu0 %vm21_vm1, %v17880_v63  ;;  %v18268_v63 = vld [vmem:[%s21821_s1 + $0x1c] sm:$0x7] }
  0xd0   :  { %15277 = vmatmul.mubr.msk.f32.gmra.mrb[8].mxu1 %vm21_vm1, %v17517_v43  ;;  %v21868_v43 = vld [vmem:[#allocation13_spill] sm:$0xff] }
  0xd1   :  { %15607 = vmatmul.mubr.msk.f32.gmra.mrb[32].mxu0 %vm21_vm1, %v17889_v5  ;;  %15279 = vmatprep.mubr.msk.f32.mxu1 %vm21_vm1, %v17521_v45  ;;  %v21869_v45 = vld [vmem:[#allocation14_spill] sm:$0xff]  ;;  %v18314_v5 = vld [vmem:[#allocation2 + $0x6a] sm:$0xff] }
  0xd2   :  { %15609 = vmatprep.mubr.msk.f32.mxu0 %vm21_vm1, %v17895_v9  ;;  %v18282_v9 = vld [vmem:[#allocation2 + $0x240] sm:$0xff] }
  0xd4   :  { %15280 = vmatmul.mubr.msk.f32.gmra.mrb[10].mxu1 %vm21_vm1, %v17533_v47  ;;  %v292_v47 = vld [vmem:[#allocation2 + $0x1b0] sm:$0xff] }
  0xd5   :  { %15610 = vmatmul.mubr.msk.f32.gmra.mrb[34].mxu0 %vm21_vm1, %v17912_v16  ;;  %15282 = vmatprep.mubr.msk.f32.mxu1 %vm21_vm1, %v17537_v49  ;;  %v21870_v49 = vld [vmem:[#allocation15_spill] sm:$0xff] }
  0xd6   :  { %15612 = vmatprep.mubr.msk.f32.mxu0 %vm21_vm1, %v17919_v4  ;;  %v18310_v16 = vld [vmem:[#allocation2 + $0x260] sm:$0xff] }
  0xd7   :  { %v18318_v4 = vld [vmem:[#allocation2 + $0x7a] sm:$0xff] }
  0xd8   :  { %15283 = vmatmul.mubr.msk.f32.gmra.mrb[12].mxu1 %vm21_vm1, %v17552_v54  ;;  %v293_v54 = vld [vmem:[#allocation2 + $0x1b8] sm:$0xff] }
  0xd9   :  { %15613 = vmatmul.mubr.msk.f32.gmra.mrb[36].mxu0 %vm21_vm1, %v17929_v12  ;;  %15285 = vmatprep.mubr.msk.f32.mxu1 %vm21_vm1, %v17583_v61  ;;  %v21871_v61 = vld [vmem:[#allocation16_spill] sm:$0xff]  ;;  %v18316_v12 = vld [vmem:[#allocation2 + $0x270] sm:$0xff] }
  0xda   :  { %15615 = vmatprep.mubr.msk.f32.mxu0 %vm21_vm1, %v17935_v60  ;;  %v18261_v60 = vld [vmem:[#allocation2 + $0x32] sm:$0xff] }
  0xdc   :  { %15286 = vmatmul.mubr.msk.f32.gmra.mrb[14].mxu1 %vm21_vm1, %v17608_v6  ;;  %v21872_v6 = vld [vmem:[#allocation17_spill] sm:$0xff] }
  0xdd   :  { %15616 = vmatmul.mubr.msk.f32.gmra.mrb[38].mxu0 %vm21_vm1, %v17943_v55  ;;  %15288 = vmatprep.mubr.msk.f32.mxu1 %vm21_vm1, %v17657_v17  ;;  %v21873_v17 = vld [vmem:[#allocation18_spill] sm:$0xff]  ;;  %v18257_v55 = vld [vmem:[#allocation2 + $0x22] sm:$0xff] }
  0xde   :  { %15618 = vmatprep.mubr.msk.f32.mxu0 %vm21_vm1, %v17947_v57  ;;  %v21877_v57 = vld [vmem:[#allocation22_spill] sm:$0xff] }
  0xe0   :  { %15289 = vmatmul.mubr.msk.f32.gmra.mrb[16].mxu1 %vm21_vm1, %v17672_v19  ;;  %v3034_v19 = vld [vmem:[#allocation2 + $0x331] sm:$0xff] }
  0xe1   :  { %15619 = vmatmul.mubr.msk.f32.gmra.mrb[40].mxu0 %vm21_vm1, %v17960_v14  ;;  %15291 = vmatprep.mubr.msk.f32.mxu1 %vm21_vm1, %v17676_v21  ;;  %v21874_v21 = vld [vmem:[#allocation19_spill] sm:$0xff]  ;;  %v18326_v14 = vld [vmem:[#allocation2 + $0x278] sm:$0xff] }
  0xe2   :  { %15621 = vmatprep.mubr.msk.f32.mxu0 %vm21_vm1, %v17966_v32  ;;  %v18330_v32 = vld [vmem:[#allocation2 + $0x82] sm:$0xff] }
  0xe4   :  { %15292 = vmatmul.mubr.msk.f32.gmra.mrb[18].mxu1 %vm21_vm1, %v17688_v23  ;;  %v21875_v23 = vld [vmem:[#allocation20_spill] sm:$0xff] }
  0xe5   :  { %15622 = vmatmul.mubr.msk.f32.gmra.mrb[42].mxu0 %vm21_vm1, %v17976_v34  ;;  %15294 = vmatprep.mubr.msk.f32.mxu1 %vm21_vm1, %v17692_v25  ;;  %v3035_v25 = vld [vmem:[#allocation2 + $0x339] sm:$0xff]  ;;  %v18332_v34 = vld [vmem:[#allocation2 + $0x288] sm:$0xff] }
  0xe6   :  { %15624 = vmatprep.mubr.msk.f32.mxu0 %vm21_vm1, %v17980_v36  ;;  %v18334_v36 = vld [vmem:[#allocation2 + $0x92] sm:$0xff] }
  0xe8   :  { %15295 = vmatmul.mubr.msk.f32.gmra.mrb[20].mxu1 %vm21_vm1, %v17702_v27  ;;  %v18248_v27 = vld [vmem:[#allocation2 + $0x1a] sm:$0xff] }
  0xe9   :  { %15625 = vmatmul.mubr.msk.f32.gmra.mrb[44].mxu0 %vm21_vm1, %v17988_v38  ;;  %15297 = vmatprep.mubr.msk.f32.mxu1 %vm21_vm1, %v17708_v29  ;;  %v21876_v29 = vld [vmem:[#allocation21_spill] sm:$0xff] }
  0xea   :  { %15627 = vmatprep.mubr.msk.f32.mxu0 %vm21_vm1, %v17992_v11  ;;  %v18342_v38 = vld [vmem:[#allocation2 + $0x290] sm:$0xff]  ;;  %v18346_v11 = vld [vmem:[#allocation2 + $0x9a] sm:$0xff] }
  0xec   :  { %15298 = vmatmul.mubr.msk.f32.gmra.mrb[22].mxu1 %vm21_vm1, %v21862_v31  ;;  %v18428_v31 = vld [vmem:[#allocation2 + $0x318] sm:$0xff] }
  0xed   :  { %15628 = vmatmul.mubr.msk.f32.gmra.mrb[46].mxu0 %vm21_vm1, %v18000_v40  ;;  %15300 = vmatprep.mubr.msk.f32.mxu1 %vm21_vm1, %v21863_v33  ;;  %v18348_v40 = vld [vmem:[#allocation2 + $0x2a0] sm:$0xff] }
  0xee   :  { %15630 = vmatprep.mubr.msk.f32.mxu0 %vm21_vm1, %v18004_v42  ;;  %v18350_v42 = vld [vmem:[#allocation2 + $0xaa] sm:$0xff]  ;;  %v18430_v33 = vld [vmem:[#allocation2 + $0x122] sm:$0xff] }
  0xf0   :  { %15301 = vmatmul.mubr.msk.f32.gmra.mrb[24].mxu1 %vm21_vm1, %v21864_v35  ;;  %v18438_v35 = vld [vmem:[#allocation2 + $0x320] sm:$0xff] }
  0xf1   :  { %15631 = vmatmul.mubr.msk.f32.gmra.mrb[48].mxu0 %vm21_vm1, %v18012_v44  ;;  %15303 = vmatprep.mubr.msk.f32.mxu1 %vm21_vm1, %v21865_v37  ;;  %v18358_v44 = vld [vmem:[#allocation2 + $0x2a8] sm:$0xff] }
  0xf2   :  { %15633 = vmatprep.mubr.msk.f32.mxu0 %vm21_vm1, %v18016_v46  ;;  %v18362_v46 = vld [vmem:[#allocation2 + $0xb2] sm:$0xff]  ;;  %v18442_v37 = vld [vmem:[#allocation2 + $0x12a] sm:$0xff] }
  0xf4   :  { %15304 = vmatmul.mubr.msk.f32.gmra.mrb[26].mxu1 %vm21_vm1, %v21866_v39  ;;  %v1552_v39 = vld [vmem:[#allocation2 + $0x2] sm:$0xff] }
  0xf5   :  { %15634 = vmatmul.mubr.msk.f32.gmra.mrb[50].mxu0 %vm21_vm1, %v18024_v48  ;;  %15306 = vmatprep.mubr.msk.f32.mxu1 %vm21_vm1, %v21867_v41  ;;  %v18364_v48 = vld [vmem:[#allocation2 + $0x2b8] sm:$0xff] }
  0xf6   :  { %15636 = vmatprep.mubr.msk.f32.mxu0 %vm21_vm1, %v18028_v50  ;;  %v18366_v50 = vld [vmem:[#allocation2 + $0xc2] sm:$0xff]  ;;  %v18444_v41 = vld [vmem:[#allocation2 + $0x13a] sm:$0xff] }
  0xf8   :  { %15307 = vmatmul.mubr.msk.f32.gmra.mrb[28].mxu1 %vm21_vm1, %v21868_v43  ;;  %v1553_v43 = vld [vmem:[#allocation2 + $0xa] sm:$0xff] }
  0xf9   :  { %15637 = vmatmul.mubr.msk.f32.gmra.mrb[52].mxu0 %vm21_vm1, %v18036_v58  ;;  %15309 = vmatprep.mubr.msk.f32.mxu1 %vm21_vm1, %v21869_v45  ;;  %v18374_v58 = vld [vmem:[#allocation2 + $0x2c0] sm:$0xff] }
  0xfa   :  { %15639 = vmatprep.mubr.msk.f32.mxu0 %vm21_vm1, %v18040_v0  ;;  %v18378_v0 = vld [vmem:[#allocation2 + $0xca] sm:$0xff]  ;;  %v18453_v45 = vld [vmem:[#allocation2 + $0x142] sm:$0xff] }
  0xfc   :  { %15310 = vmatmul.mubr.msk.f32.gmra.mrb[30].mxu1 %vm21_vm1, %v21870_v49  ;;  %v18464_v49 = vld [vmem:[#allocation2 + $0x15a] sm:$0xff] }
  0xfd   :  { %15640 = vmatmul.mubr.msk.f32.gmra.mrb[54].mxu0 %vm21_vm1, %v18048_v7  ;;  %15312 = vmatprep.mubr.msk.f32.mxu1 %vm21_vm1, %v292_v47  ;;  %v18380_v7 = vld [vmem:[#allocation2 + $0x2d0] sm:$0xff] }
  0xfe   :  { %15642 = vmatprep.mubr.msk.f32.mxu0 %vm21_vm1, %v18052_v18  ;;  %v18382_v18 = vld [vmem:[#allocation2 + $0xda] sm:$0xff]  ;;  %v18455_v47 = vld [vmem:[#allocation2 + $0x152] sm:$0xff] }
 0x100   :  { %15313 = vmatmul.mubr.msk.f32.gmra.mrb[32].mxu1 %vm21_vm1, %v293_v54  ;;  %v17053_v54 = vld [vmem:[%s21821_s1 + $0xc] sm:$0x7] }
 0x101   :  { %15643 = vmatmul.mubr.msk.f32.gmra.mrb[56].mxu0 %vm21_vm1, %v18060_v20  ;;  %15315 = vmatprep.mubr.msk.f32.mxu1 %vm21_vm1, %v21871_v61  ;;  %v18390_v20 = vld [vmem:[#allocation2 + $0x2d8] sm:$0xff]  ;;  %v18470_v61 = vld [vmem:[#allocation2 + $0x16a] sm:$0xff] }
 0x102   :  { %15645 = vmatprep.mubr.msk.f32.mxu0 %vm21_vm1, %v18064_v22  ;;  %v18394_v22 = vld [vmem:[#allocation2 + $0xe2] sm:$0xff] }
 0x104   :  { %15316 = vmatmul.mubr.msk.f32.gmra.mrb[34].mxu1 %vm21_vm1, %v21872_v6  ;;  %v18480_v6 = vld [vmem:[#allocation2 + $0x172] sm:$0xff] }
 0x105   :  { %15646 = vmatmul.mubr.msk.f32.gmra.mrb[58].mxu0 %vm21_vm1, %v18072_v24  ;;  %15318 = vmatprep.mubr.msk.f32.mxu1 %vm21_vm1, %v21873_v17  ;;  %v18396_v24 = vld [vmem:[#allocation2 + $0x2e8] sm:$0xff] }
 0x106   :  { %15648 = vmatprep.mubr.msk.f32.mxu0 %vm21_vm1, %v18076_v26  ;;  %v18398_v26 = vld [vmem:[#allocation2 + $0xf2] sm:$0xff]  ;;  %v3712_v17 = vld [vmem:[#allocation2 + $0x182] sm:$0xff] }
 0x108   :  { %15319 = vmatmul.mubr.msk.f32.gmra.mrb[36].mxu1 %vm21_vm1, %v21874_v21  ;;  %v18489_v21 = vld [vmem:[#allocation2 + $0x1ca] sm:$0xff] }
 0x109   :  { %15649 = vmatmul.mubr.msk.f32.gmra.mrb[60].mxu0 %vm21_vm1, %v18084_v28  ;;  %15321 = vmatprep.mubr.msk.f32.mxu1 %vm21_vm1, %v21875_v23  ;;  %v18406_v28 = vld [vmem:[#allocation2 + $0x2f0] sm:$0xff] }
 0x10a   :  { %15651 = vmatprep.mubr.msk.f32.mxu0 %vm21_vm1, %v3034_v19  ;;  %v3713_v19 = vld [vmem:[#allocation2 + $0x18a] sm:$0xff]  ;;  %v18498_v23 = vld [vmem:[#allocation2 + $0x1d2] sm:$0xff] }
 0x10c   :  { %15322 = vmatmul.mubr.msk.f32.gmra.mrb[38].mxu1 %vm21_vm1, %v21876_v29  ;;  %v18512_v29 = vld [vmem:[#allocation2 + $0x1fa] sm:$0xff] }
 0x10d   :  { %15652 = vmatmul.mubr.msk.f32.gmra.mrb[62].mxu0 %vm21_vm1, %v3035_v25  ;;  %15324 = vmatprep.mubr.msk.f32.mxu1 %vm21_vm1, %v21877_v57  ;;  %v18500_v25 = vld [vmem:[#allocation2 + $0x1e2] sm:$0xff] }
 0x10e   :  { %15656 = vmatprep.mubr.msk.f32.mxu0 %vm21_vm1, %v18248_v27  ;;  %v18522_v57 = vld [vmem:[#allocation2 + $0x202] sm:$0xff] }
 0x110   :  { %15325 = vmatmul.mubr.msk.f32.gmra.mrb[40].mxu1 %vm21_vm1, %v21878_v62  ;;  %v18536_v62 = vld [vmem:[#allocation2 + $0x22a] sm:$0xff] }
 0x111   :  { %15657 = vmatmul.mubr.msk.f32.vlgmr.msra.gmra.mrb[0].mxu0 %vm21_vm1, %v18257_v55  ;;  %15327 = vmatprep.mubr.msk.f32.mxu1 %vm21_vm1, %v18259_v56 }
 0x112   :  { %15753 = vmatpush3.msk.msra.mxu0 %vm583_vm0, %v17954_v2  ;;  %15659 = vmatprep.mubr.msk.f32.mxu0 %vm21_vm1, %v18261_v60  ;;  %v18294_v2 = vld [vmem:[#allocation2 + $0x248] sm:$0xff] }
 0x113   :  { %15850 = vmatprep.subr.msk.mxu0 %vm583_vm0, %v18268_v63 }
 0x114   :  { %15328 = vmatmul.mubr.msk.f32.gmra.mrb[42].mxu1 %vm21_vm1, %v18274_v3 }
 0x115   :  { %15660 = vmatmul.mubr.msk.f32.gmra.mrb[2].mxu0 %vm21_vm1, %v18280_v8  ;;  %15330 = vmatprep.mubr.msk.f32.mxu1 %vm21_vm1, %v18282_v9 }
 0x116   :  { %15662 = vmatprep.mubr.msk.f32.mxu0 %vm21_vm1, %v18284_v10 }
 0x118   :  { %15331 = vmatmul.mubr.msk.f32.gmra.mrb[44].mxu1 %vm21_vm1, %v18294_v2 }
 0x119   :  { %15663 = vmatmul.mubr.msk.f32.gmra.mrb[4].mxu0 %vm21_vm1, %v18298_v13  ;;  %15333 = vmatprep.mubr.msk.f32.mxu1 %vm21_vm1, %v18300_v15 }
 0x11a   :  { %15665 = vmatprep.mubr.msk.f32.mxu0 %vm21_vm1, %v18302_v51 }
 0x11c   :  { %15334 = vmatmul.mubr.msk.f32.gmra.mrb[46].mxu1 %vm21_vm1, %v18310_v16 }
 0x11d   :  { %15666 = vmatmul.mubr.msk.f32.gmra.mrb[6].mxu0 %vm21_vm1, %v18314_v5  ;;  %15336 = vmatprep.mubr.msk.f32.mxu1 %vm21_vm1, %v18316_v12 }
 0x11e   :  { %15668 = vmatprep.mubr.msk.f32.mxu0 %vm21_vm1, %v18318_v4 }
 0x120   :  { %15337 = vmatmul.mubr.msk.f32.gmra.mrb[48].mxu1 %vm21_vm1, %v18326_v14 }
 0x121   :  { %15669 = vmatmul.mubr.msk.f32.gmra.mrb[8].mxu0 %vm21_vm1, %v18330_v32  ;;  %15339 = vmatprep.mubr.msk.f32.mxu1 %vm21_vm1, %v18332_v34 }
 0x122   :  { %15671 = vmatprep.mubr.msk.f32.mxu0 %vm21_vm1, %v18334_v36 }
 0x124   :  { %15340 = vmatmul.mubr.msk.f32.gmra.mrb[50].mxu1 %vm21_vm1, %v18342_v38 }
 0x125   :  { %15672 = vmatmul.mubr.msk.f32.gmra.mrb[10].mxu0 %vm21_vm1, %v18346_v11  ;;  %15342 = vmatprep.mubr.msk.f32.mxu1 %vm21_vm1, %v18348_v40 }
 0x126   :  { %15674 = vmatprep.mubr.msk.f32.mxu0 %vm21_vm1, %v18350_v42 }
 0x128   :  { %15343 = vmatmul.mubr.msk.f32.gmra.mrb[52].mxu1 %vm21_vm1, %v18358_v44 }
 0x129   :  { %15675 = vmatmul.mubr.msk.f32.gmra.mrb[12].mxu0 %vm21_vm1, %v18362_v46  ;;  %15345 = vmatprep.mubr.msk.f32.mxu1 %vm21_vm1, %v18364_v48 }
 0x12a   :  { %15677 = vmatprep.mubr.msk.f32.mxu0 %vm21_vm1, %v18366_v50 }
 0x12c   :  { %15346 = vmatmul.mubr.msk.f32.gmra.mrb[54].mxu1 %vm21_vm1, %v18374_v58 }
 0x12d   :  { %15678 = vmatmul.mubr.msk.f32.gmra.mrb[14].mxu0 %vm21_vm1, %v18378_v0  ;;  %15348 = vmatprep.mubr.msk.f32.mxu1 %vm21_vm1, %v18380_v7 }
 0x12e   :  { %15680 = vmatprep.mubr.msk.f32.mxu0 %vm21_vm1, %v18382_v18 }
 0x130   :  { %15349 = vmatmul.mubr.msk.f32.gmra.mrb[56].mxu1 %vm21_vm1, %v18390_v20 }
 0x131   :  { %15681 = vmatmul.mubr.msk.f32.gmra.mrb[16].mxu0 %vm21_vm1, %v18394_v22  ;;  %15351 = vmatprep.mubr.msk.f32.mxu1 %vm21_vm1, %v18396_v24 }
 0x132   :  { %15683 = vmatprep.mubr.msk.f32.mxu0 %vm21_vm1, %v18398_v26 }
 0x134   :  { %15352 = vmatmul.mubr.msk.f32.gmra.mrb[58].mxu1 %vm21_vm1, %v18406_v28 }
 0x135   :  { %15684 = vmatmul.mubr.msk.f32.gmra.mrb[18].mxu0 %vm21_vm1, %v18410_v52  ;;  %15354 = vmatprep.mubr.msk.f32.mxu1 %vm21_vm1, %v18412_v59 }
 0x136   :  { %15686 = vmatprep.mubr.msk.f32.mxu0 %vm21_vm1, %v18414_v53 }
 0x138   :  { %15355 = vmatmul.mubr.msk.f32.gmra.mrb[60].mxu1 %vm21_vm1, %v18422_v30 }
 0x139   :  { %15687 = vmatmul.mubr.msk.f32.gmra.mrb[20].mxu0 %vm21_vm1, %v18426_v1  ;;  %15357 = vmatprep.mubr.msk.f32.mxu1 %vm21_vm1, %v18428_v31 }
 0x13a   :  { %15689 = vmatprep.mubr.msk.f32.mxu0 %vm21_vm1, %v18430_v33 }
 0x13c   :  { %15358 = vmatmul.mubr.msk.f32.gmra.mrb[62].mxu1 %vm21_vm1, %v18438_v35 }
 0x13d   :  { %15690 = vmatmul.mubr.msk.f32.gmra.mrb[22].mxu0 %vm21_vm1, %v18442_v37  ;;  %15362 = vmatprep.mubr.msk.f32.mxu1 %vm21_vm1, %v1552_v39  ;;  %v18654_v39 = vld [vmem:[#allocation2 + $0x31a] sm:$0xff] }
 0x13e   :  { %15692 = vmatprep.mubr.msk.f32.mxu0 %vm21_vm1, %v18444_v41 }
 0x140   :  { %15363 = vmatmul.mubr.msk.f32.vlgmr.msra.gmra.mrb[0].mxu1 %vm21_vm1, %v1553_v43  ;;  %v3744_v43 = vld [vmem:[#allocation2 + $0x332] sm:$0xff] }
 0x141   :  { %15693 = vmatmul.mubr.msk.f32.gmra.mrb[24].mxu0 %vm21_vm1, %v18453_v45  ;;  %15365 = vmatprep.mubr.msk.f32.mxu1 %vm21_vm1, %v18248_v27  ;;  %v18510_v27 = vld [vmem:[#allocation2 + $0x1ea] sm:$0xff] }
 0x142   :  { %15695 = vmatprep.mubr.msk.f32.mxu0 %vm21_vm1, %v18455_v47  ;;  %16407 = vmatpush3.msk.msra.mxu1 %vm583_vm0, %v17053_v54  ;;  %v4395_v54 = vld [vmem:[#allocation2 + $0x48] sm:$0xff] }
 0x144   :  { %15366 = vmatmul.mubr.msk.f32.gmra.mrb[2].mxu1 %vm21_vm1, %v18257_v55  ;;  %v18524_v55 = vld [vmem:[#allocation2 + $0x212] sm:$0xff] }
 0x145   :  { %15696 = vmatmul.mubr.msk.f32.gmra.mrb[26].mxu0 %vm21_vm1, %v18464_v49  ;;  %15368 = vmatprep.mubr.msk.f32.mxu1 %vm21_vm1, %v18261_v60  ;;  %v18534_v60 = vld [vmem:[#allocation2 + $0x21a] sm:$0xff] }
 0x146   :  { %15698 = vmatprep.mubr.msk.f32.mxu0 %vm21_vm1, %v18470_v61 }
 0x148   :  { %15369 = vmatmul.mubr.msk.f32.gmra.mrb[4].mxu1 %vm21_vm1, %v18280_v8  ;;  %v18546_v8 = vld [vmem:[#allocation2 + $0x232] sm:$0xff] }
 0x149   :  { %15699 = vmatmul.mubr.msk.f32.gmra.mrb[28].mxu0 %vm21_vm1, %v18480_v6  ;;  %15371 = vmatprep.mubr.msk.f32.mxu1 %vm21_vm1, %v18284_v10  ;;  %v18548_v10 = vld [vmem:[#allocation2 + $0x242] sm:$0xff] }
 0x14a   :  { %15701 = vmatprep.mubr.msk.f32.mxu0 %vm21_vm1, %v3712_v17  ;;  %v4397_v17 = vld [vmem:[#allocation2 + $0x60] sm:$0xff] }
 0x14c   :  { %15372 = vmatmul.mubr.msk.f32.gmra.mrb[6].mxu1 %vm21_vm1, %v18298_v13  ;;  %v18558_v13 = vld [vmem:[#allocation2 + $0x24a] sm:$0xff] }
 0x14d   :  { %15702 = vmatmul.mubr.msk.f32.gmra.mrb[30].mxu0 %vm21_vm1, %v3713_v19  ;;  %15374 = vmatprep.mubr.msk.f32.mxu1 %vm21_vm1, %v18302_v51  ;;  %v18560_v51 = vld [vmem:[#allocation2 + $0x25a] sm:$0xff]  ;;  %v4398_v19 = vld [vmem:[#allocation2 + $0x68] sm:$0xff] }
 0x14e   :  { %15704 = vmatprep.mubr.msk.f32.mxu0 %vm21_vm1, %v18489_v21 }
 0x150   :  { %15375 = vmatmul.mubr.msk.f32.gmra.mrb[8].mxu1 %vm21_vm1, %v18314_v5  ;;  %v18570_v5 = vld [vmem:[#allocation2 + $0x262] sm:$0xff] }
 0x151   :  { %15705 = vmatmul.mubr.msk.f32.gmra.mrb[32].mxu0 %vm21_vm1, %v18498_v23  ;;  %15377 = vmatprep.mubr.msk.f32.mxu1 %vm21_vm1, %v18318_v4  ;;  %v18572_v4 = vld [vmem:[#allocation2 + $0x272] sm:$0xff] }
 0x152   :  { %15707 = vmatprep.mubr.msk.f32.mxu0 %vm21_vm1, %v18500_v25 }
 0x154   :  { %15378 = vmatmul.mubr.msk.f32.gmra.mrb[10].mxu1 %vm21_vm1, %v18330_v32  ;;  %v18582_v32 = vld [vmem:[#allocation2 + $0x27a] sm:$0xff] }
 0x155   :  { %15708 = vmatmul.mubr.msk.f32.gmra.mrb[34].mxu0 %vm21_vm1, %v18510_v27  ;;  %15380 = vmatprep.mubr.msk.f32.mxu1 %vm21_vm1, %v18334_v36  ;;  %v18584_v36 = vld [vmem:[#allocation2 + $0x28a] sm:$0xff] }
 0x156   :  { %15710 = vmatprep.mubr.msk.f32.mxu0 %vm21_vm1, %v18512_v29 }
 0x158   :  { %15381 = vmatmul.mubr.msk.f32.gmra.mrb[12].mxu1 %vm21_vm1, %v18346_v11  ;;  %v18594_v11 = vld [vmem:[#allocation2 + $0x292] sm:$0xff] }
 0x159   :  { %15711 = vmatmul.mubr.msk.f32.gmra.mrb[36].mxu0 %vm21_vm1, %v18522_v57  ;;  %15383 = vmatprep.mubr.msk.f32.mxu1 %vm21_vm1, %v18350_v42  ;;  %v18596_v42 = vld [vmem:[#allocation2 + $0x2a2] sm:$0xff] }
 0x15a   :  { %15713 = vmatprep.mubr.msk.f32.mxu0 %vm21_vm1, %v18524_v55 }
 0x15c   :  { %15384 = vmatmul.mubr.msk.f32.gmra.mrb[14].mxu1 %vm21_vm1, %v18362_v46  ;;  %v18606_v46 = vld [vmem:[#allocation2 + $0x2aa] sm:$0xff] }
 0x15d   :  { %15714 = vmatmul.mubr.msk.f32.gmra.mrb[38].mxu0 %vm21_vm1, %v18534_v60  ;;  %15386 = vmatprep.mubr.msk.f32.mxu1 %vm21_vm1, %v18366_v50  ;;  %v18608_v50 = vld [vmem:[#allocation2 + $0x2ba] sm:$0xff] }
 0x15e   :  { %15716 = vmatprep.mubr.msk.f32.mxu0 %vm21_vm1, %v18536_v62 }
 0x160   :  { %15387 = vmatmul.mubr.msk.f32.gmra.mrb[16].mxu1 %vm21_vm1, %v18378_v0  ;;  %v18618_v0 = vld [vmem:[#allocation2 + $0x2c2] sm:$0xff] }
 0x161   :  { %15717 = vmatmul.mubr.msk.f32.gmra.mrb[40].mxu0 %vm21_vm1, %v18546_v8  ;;  %15389 = vmatprep.mubr.msk.f32.mxu1 %vm21_vm1, %v18382_v18  ;;  %v18620_v18 = vld [vmem:[#allocation2 + $0x2d2] sm:$0xff] }
 0x162   :  { %15719 = vmatprep.mubr.msk.f32.mxu0 %vm21_vm1, %v18548_v10 }
 0x164   :  { %15390 = vmatmul.mubr.msk.f32.gmra.mrb[18].mxu1 %vm21_vm1, %v18394_v22  ;;  %v18630_v22 = vld [vmem:[#allocation2 + $0x2da] sm:$0xff] }
 0x165   :  { %15720 = vmatmul.mubr.msk.f32.gmra.mrb[42].mxu0 %vm21_vm1, %v18558_v13  ;;  %15392 = vmatprep.mubr.msk.f32.mxu1 %vm21_vm1, %v18398_v26  ;;  %v1584_v26 = vld [vmem:[#allocation2 + $0x1b2] sm:$0xff] }
 0x166   :  { %15722 = vmatprep.mubr.msk.f32.mxu0 %vm21_vm1, %v18560_v51 }
 0x168   :  { %15393 = vmatmul.mubr.msk.f32.gmra.mrb[20].mxu1 %vm21_vm1, %v18410_v52  ;;  %v18632_v52 = vld [vmem:[#allocation2 + $0x2ea] sm:$0xff] }
 0x169   :  { %15723 = vmatmul.mubr.msk.f32.gmra.mrb[44].mxu0 %vm21_vm1, %v18570_v5  ;;  %15395 = vmatprep.mubr.msk.f32.mxu1 %vm21_vm1, %v18414_v53  ;;  %v1585_v53 = vld [vmem:[#allocation2 + $0x1ba] sm:$0xff] }
 0x16a   :  { %15725 = vmatprep.mubr.msk.f32.mxu0 %vm21_vm1, %v18572_v4 }
 0x16c   :  { %15396 = vmatmul.mubr.msk.f32.gmra.mrb[22].mxu1 %vm21_vm1, %v18426_v1  ;;  %v18641_v1 = vld [vmem:[#allocation2 + $0x2f2] sm:$0xff] }
 0x16d   :  { %15726 = vmatmul.mubr.msk.f32.gmra.mrb[46].mxu0 %vm21_vm1, %v18582_v32  ;;  %15398 = vmatprep.mubr.msk.f32.mxu1 %vm21_vm1, %v18430_v33  ;;  %v18643_v33 = vld [vmem:[#allocation2 + $0x302] sm:$0xff] }
 0x16e   :  { %15728 = vmatprep.mubr.msk.f32.mxu0 %vm21_vm1, %v18584_v36 }
 0x170   :  { %15399 = vmatmul.mubr.msk.f32.gmra.mrb[24].mxu1 %vm21_vm1, %v18442_v37  ;;  %v18652_v37 = vld [vmem:[#allocation2 + $0x30a] sm:$0xff] }
 0x171   :  { %15729 = vmatmul.mubr.msk.f32.gmra.mrb[48].mxu0 %vm21_vm1, %v18594_v11  ;;  %15401 = vmatprep.mubr.msk.f32.mxu1 %vm21_vm1, %v18444_v41  ;;  %v18664_v41 = vld [vmem:[#allocation2 + $0x322] sm:$0xff] }
 0x172   :  { %15731 = vmatprep.mubr.msk.f32.mxu0 %vm21_vm1, %v18596_v42 }
 0x174   :  { %15402 = vmatmul.mubr.msk.f32.gmra.mrb[26].mxu1 %vm21_vm1, %v18453_v45  ;;  %v3745_v45 = vld [vmem:[#allocation2 + $0x33a] sm:$0xff] }
 0x175   :  { %15732 = vmatmul.mubr.msk.f32.gmra.mrb[50].mxu0 %vm21_vm1, %v18606_v46  ;;  %15404 = vmatprep.mubr.msk.f32.mxu1 %vm21_vm1, %v18455_v47  ;;  %v4393_v47 = vld [vmem:[#allocation2 + $0x30] sm:$0xff] }
 0x176   :  { %15734 = vmatprep.mubr.msk.f32.mxu0 %vm21_vm1, %v18608_v50 }
 0x178   :  { %15405 = vmatmul.mubr.msk.f32.gmra.mrb[28].mxu1 %vm21_vm1, %v18464_v49  ;;  %v4394_v49 = vld [vmem:[#allocation2 + $0x38] sm:$0xff] }
 0x179   :  { %15735 = vmatmul.mubr.msk.f32.gmra.mrb[52].mxu0 %vm21_vm1, %v18618_v0  ;;  %15407 = vmatprep.mubr.msk.f32.mxu1 %vm21_vm1, %v18470_v61  ;;  %v18684_v61 = vld [vmem:[%s21821_s1 + $0x20] sm:$0x7] }
 0x17a   :  { %15737 = vmatprep.mubr.msk.f32.mxu0 %vm21_vm1, %v18620_v18 }
 0x17c   :  { %15408 = vmatmul.mubr.msk.f32.gmra.mrb[30].mxu1 %vm21_vm1, %v18480_v6  ;;  %v4396_v6 = vld [vmem:[#allocation2 + $0x50] sm:$0xff] }
 0x17d   :  { %15738 = vmatmul.mubr.msk.f32.gmra.mrb[54].mxu0 %vm21_vm1, %v18630_v22  ;;  %15410 = vmatprep.mubr.msk.f32.mxu1 %vm21_vm1, %v1584_v26  ;;  %v4424_v26 = vld [vmem:[#allocation2 + $0x1a0] sm:$0xff] }
 0x17e   :  { %15740 = vmatprep.mubr.msk.f32.mxu0 %vm21_vm1, %v18632_v52 }
 0x180   :  { %15411 = vmatmul.mubr.msk.f32.gmra.mrb[32].mxu1 %vm21_vm1, %v1585_v53  ;;  %v4426_v53 = vld [vmem:[#allocation2 + $0x1e8] sm:$0xff] }
 0x181   :  { %15741 = vmatmul.mubr.msk.f32.gmra.mrb[56].mxu0 %vm21_vm1, %v18641_v1  ;;  %15413 = vmatprep.mubr.msk.f32.mxu1 %vm21_vm1, %v18489_v21  ;;  %v4399_v21 = vld [vmem:[#allocation2 + $0x78] sm:$0xff] }
 0x182   :  { %15743 = vmatprep.mubr.msk.f32.mxu0 %vm21_vm1, %v18643_v33 }
 0x184   :  { %15414 = vmatmul.mubr.msk.f32.gmra.mrb[34].mxu1 %vm21_vm1, %v18498_v23  ;;  %v4401_v23 = vld [vmem:[#allocation2 + $0x90] sm:$0xff] }
 0x185   :  { %15744 = vmatmul.mubr.msk.f32.gmra.mrb[58].mxu0 %vm21_vm1, %v18652_v37  ;;  %15416 = vmatprep.mubr.msk.f32.mxu1 %vm21_vm1, %v18500_v25  ;;  %v4402_v25 = vld [vmem:[#allocation2 + $0x98] sm:$0xff] }
 0x186   :  { %15746 = vmatprep.mubr.msk.f32.mxu0 %vm21_vm1, %v18654_v39 }
 0x188   :  { %15417 = vmatmul.mubr.msk.f32.gmra.mrb[36].mxu1 %vm21_vm1, %v18510_v27  ;;  %v4403_v27 = vld [vmem:[#allocation2 + $0xa8] sm:$0xff] }
 0x189   :  { %15747 = vmatmul.mubr.msk.f32.gmra.mrb[60].mxu0 %vm21_vm1, %v18664_v41  ;;  %15419 = vmatprep.mubr.msk.f32.mxu1 %vm21_vm1, %v18512_v29  ;;  %v4404_v29 = vld [vmem:[#allocation2 + $0xb0] sm:$0xff] }
 0x18a   :  { %15749 = vmatprep.mubr.msk.f32.mxu0 %vm21_vm1, %v3744_v43  ;;  %v5114_v43 = vld [vmem:[#allocation2 + $0xb1] sm:$0xff] }
 0x18c   :  { %15420 = vmatmul.mubr.msk.f32.gmra.mrb[38].mxu1 %vm21_vm1, %v18522_v57  ;;  %v4405_v57 = vld [vmem:[#allocation2 + $0xc0] sm:$0xff] }
 0x18d   :  { %15750 = vmatmul.mubr.msk.f32.gmra.mrb[62].mxu0 %vm21_vm1, %v3745_v45  ;;  %15422 = vmatprep.mubr.msk.f32.mxu1 %vm21_vm1, %v18524_v55  ;;  %v4406_v55 = vld [vmem:[#allocation2 + $0xc8] sm:$0xff] }
 0x18e   :  { %15754 = vmatprep.mubr.msk.f32.mxu0 %vm21_vm1, %v4393_v47  ;;  %v5115_v45 = vld [vmem:[#allocation2 + $0xc1] sm:$0xff] }
 0x190   :  { %15423 = vmatmul.mubr.msk.f32.gmra.mrb[40].mxu1 %vm21_vm1, %v18534_v60  ;;  %v4407_v60 = vld [vmem:[#allocation2 + $0xd8] sm:$0xff] }
 0x191   :  { %15755 = vmatmul.mubr.msk.f32.vlgmr.msra.gmra.mrb[0].mxu0 %vm21_vm1, %v4394_v49  ;;  %15425 = vmatprep.mubr.msk.f32.mxu1 %vm21_vm1, %v18536_v62  ;;  %v4408_v62 = vld [vmem:[#allocation2 + $0xe0] sm:$0xff] }
 0x192   :  { %15851 = vmatpush3.msk.msra.mxu0 %vm583_vm0, %v18268_v63  ;;  %15757 = vmatprep.mubr.msk.f32.mxu0 %vm21_vm1, %v4395_v54  ;;  %v4400_v63 = vld [vmem:[#allocation2 + $0x80] sm:$0xff]  ;;  %v5116_v54 = vld [vmem:[#allocation2 + $0xc9] sm:$0xff] }
 0x193   :  { %15948 = vmatprep.subr.msk.mxu0 %vm583_vm0, %v18684_v61 }
 0x194   :  { %15426 = vmatmul.mubr.msk.f32.gmra.mrb[42].mxu1 %vm21_vm1, %v18546_v8  ;;  %v4409_v8 = vld [vmem:[#allocation2 + $0xf0] sm:$0xff] }
 0x195   :  { %15758 = vmatmul.mubr.msk.f32.gmra.mrb[2].mxu0 %vm21_vm1, %v4396_v6  ;;  %15428 = vmatprep.mubr.msk.f32.mxu1 %vm21_vm1, %v18548_v10  ;;  %v4410_v10 = vld [vmem:[#allocation2 + $0xf8] sm:$0xff] }
 0x196   :  { %15760 = vmatprep.mubr.msk.f32.mxu0 %vm21_vm1, %v4397_v17 }
 0x198   :  { %15429 = vmatmul.mubr.msk.f32.gmra.mrb[44].mxu1 %vm21_vm1, %v18558_v13  ;;  %v4411_v13 = vld [vmem:[#allocation2 + $0x108] sm:$0xff] }
 0x199   :  { %15761 = vmatmul.mubr.msk.f32.gmra.mrb[4].mxu0 %vm21_vm1, %v4398_v19  ;;  %15431 = vmatprep.mubr.msk.f32.mxu1 %vm21_vm1, %v18560_v51  ;;  %v4412_v51 = vld [vmem:[#allocation2 + $0x110] sm:$0xff]  ;;  %v5118_v19 = vld [vmem:[#allocation2 + $0xe1] sm:$0xff] }
 0x19a   :  { %15763 = vmatprep.mubr.msk.f32.mxu0 %vm21_vm1, %v4399_v21  ;;  %v5119_v21 = vld [vmem:[#allocation2 + $0xf1] sm:$0xff] }
 0x19c   :  { %15432 = vmatmul.mubr.msk.f32.gmra.mrb[46].mxu1 %vm21_vm1, %v18570_v5  ;;  %v4413_v5 = vld [vmem:[#allocation2 + $0x120] sm:$0xff] }
 0x19d   :  { %15764 = vmatmul.mubr.msk.f32.gmra.mrb[6].mxu0 %vm21_vm1, %v4400_v63  ;;  %15434 = vmatprep.mubr.msk.f32.mxu1 %vm21_vm1, %v18572_v4  ;;  %v4414_v4 = vld [vmem:[#allocation2 + $0x128] sm:$0xff] }
 0x19e   :  { %15766 = vmatprep.mubr.msk.f32.mxu0 %vm21_vm1, %v4401_v23 }
 0x1a0   :  { %15435 = vmatmul.mubr.msk.f32.gmra.mrb[48].mxu1 %vm21_vm1, %v18582_v32  ;;  %v4415_v32 = vld [vmem:[#allocation2 + $0x138] sm:$0xff] }
 0x1a1   :  { %15767 = vmatmul.mubr.msk.f32.gmra.mrb[8].mxu0 %vm21_vm1, %v4402_v25  ;;  %15437 = vmatprep.mubr.msk.f32.mxu1 %vm21_vm1, %v18584_v36  ;;  %v4416_v36 = vld [vmem:[#allocation2 + $0x140] sm:$0xff] }
 0x1a2   :  { %15769 = vmatprep.mubr.msk.f32.mxu0 %vm21_vm1, %v4403_v27  ;;  %v5120_v25 = vld [vmem:[#allocation2 + $0xf9] sm:$0xff]  ;;  %v5121_v27 = vld [vmem:[#allocation2 + $0x109] sm:$0xff] }
 0x1a4   :  { %15438 = vmatmul.mubr.msk.f32.gmra.mrb[50].mxu1 %vm21_vm1, %v18594_v11  ;;  %v4417_v11 = vld [vmem:[#allocation2 + $0x150] sm:$0xff] }
 0x1a5   :  { %15770 = vmatmul.mubr.msk.f32.gmra.mrb[10].mxu0 %vm21_vm1, %v4404_v29  ;;  %15440 = vmatprep.mubr.msk.f32.mxu1 %vm21_vm1, %v18596_v42  ;;  %v4418_v42 = vld [vmem:[#allocation2 + $0x158] sm:$0xff] }
 0x1a6   :  { %15772 = vmatprep.mubr.msk.f32.mxu0 %vm21_vm1, %v4405_v57 }
 0x1a8   :  { %15441 = vmatmul.mubr.msk.f32.gmra.mrb[52].mxu1 %vm21_vm1, %v18606_v46  ;;  %v4419_v46 = vld [vmem:[#allocation2 + $0x168] sm:$0xff] }
 0x1a9   :  { %15773 = vmatmul.mubr.msk.f32.gmra.mrb[12].mxu0 %vm21_vm1, %v4406_v55  ;;  %15443 = vmatprep.mubr.msk.f32.mxu1 %vm21_vm1, %v18608_v50  ;;  %v4420_v50 = vld [vmem:[#allocation2 + $0x170] sm:$0xff] }
 0x1aa   :  { %15775 = vmatprep.mubr.msk.f32.mxu0 %vm21_vm1, %v4407_v60  ;;  %v5122_v55 = vld [vmem:[#allocation2 + $0x111] sm:$0xff]  ;;  %v5123_v60 = vld [vmem:[#allocation2 + $0x121] sm:$0xff] }
 0x1ac   :  { %15444 = vmatmul.mubr.msk.f32.gmra.mrb[54].mxu1 %vm21_vm1, %v18618_v0  ;;  %v4421_v0 = vld [vmem:[#allocation2 + $0x180] sm:$0xff] }
 0x1ad   :  { %15776 = vmatmul.mubr.msk.f32.gmra.mrb[14].mxu0 %vm21_vm1, %v4408_v62  ;;  %15446 = vmatprep.mubr.msk.f32.mxu1 %vm21_vm1, %v18620_v18  ;;  %v4422_v18 = vld [vmem:[#allocation2 + $0x188] sm:$0xff] }
 0x1ae   :  { %15778 = vmatprep.mubr.msk.f32.mxu0 %vm21_vm1, %v4409_v8 }
 0x1b0   :  { %15447 = vmatmul.mubr.msk.f32.gmra.mrb[56].mxu1 %vm21_vm1, %v18630_v22  ;;  %v4423_v22 = vld [vmem:[#allocation2 + $0x198] sm:$0xff] }
 0x1b1   :  { %15779 = vmatmul.mubr.msk.f32.gmra.mrb[16].mxu0 %vm21_vm1, %v4410_v10  ;;  %15449 = vmatprep.mubr.msk.f32.mxu1 %vm21_vm1, %v18632_v52  ;;  %v4425_v52 = vld [vmem:[#allocation2 + $0x1e0] sm:$0xff]  ;;  %v5124_v10 = vld [vmem:[#allocation2 + $0x129] sm:$0xff] }
 0x1b2   :  { %15781 = vmatprep.mubr.msk.f32.mxu0 %vm21_vm1, %v4411_v13  ;;  %v5125_v13 = vld [vmem:[#allocation2 + $0x139] sm:$0xff] }
 0x1b4   :  { %15450 = vmatmul.mubr.msk.f32.gmra.mrb[58].mxu1 %vm21_vm1, %v18641_v1  ;;  %v4427_v1 = vld [vmem:[#allocation2 + $0x1f8] sm:$0xff] }
 0x1b5   :  { %15782 = vmatmul.mubr.msk.f32.gmra.mrb[18].mxu0 %vm21_vm1, %v4412_v51  ;;  %15452 = vmatprep.mubr.msk.f32.mxu1 %vm21_vm1, %v18643_v33  ;;  %v4428_v33 = vld [vmem:[#allocation2 + $0x200] sm:$0xff] }
 0x1b6   :  { %15784 = vmatprep.mubr.msk.f32.mxu0 %vm21_vm1, %v4413_v5 }
 0x1b8   :  { %15453 = vmatmul.mubr.msk.f32.gmra.mrb[60].mxu1 %vm21_vm1, %v18652_v37  ;;  %v4429_v37 = vld [vmem:[#allocation2 + $0x210] sm:$0xff] }
 0x1b9   :  { %15785 = vmatmul.mubr.msk.f32.gmra.mrb[20].mxu0 %vm21_vm1, %v4414_v4  ;;  %15455 = vmatprep.mubr.msk.f32.mxu1 %vm21_vm1, %v18654_v39  ;;  %v4430_v39 = vld [vmem:[#allocation2 + $0x218] sm:$0xff]  ;;  %v5126_v4 = vld [vmem:[#allocation2 + $0x141] sm:$0xff] }
 0x1ba   :  { %15787 = vmatprep.mubr.msk.f32.mxu0 %vm21_vm1, %v4415_v32  ;;  %v5127_v32 = vld [vmem:[#allocation2 + $0x151] sm:$0xff] }
 0x1bc   :  { %15456 = vmatmul.mubr.msk.f32.gmra.mrb[62].mxu1 %vm21_vm1, %v18664_v41 }
 0x1bd   :  { %15788 = vmatmul.mubr.msk.f32.gmra.mrb[22].mxu0 %vm21_vm1, %v4416_v36  ;;  %15520 = vmatprep.mubr.msk.f32.mxu1 %vm21_vm1, %v18259_v56 }
 0x1be   :  { %15790 = vmatprep.mubr.msk.f32.mxu0 %vm21_vm1, %v4417_v11 }
 0x1c0   :  { %15521 = vmatmul.mubr.msk.f32.vlgmr.msra.gmra.mrb[40].mxu1 %vm21_vm1, %v18274_v3 }
 0x1c1   :  { %15791 = vmatmul.mubr.msk.f32.gmra.mrb[24].mxu0 %vm21_vm1, %v4418_v42  ;;  %15523 = vmatprep.mubr.msk.f32.mxu1 %vm21_vm1, %v18282_v9  ;;  %v5128_v42 = vld [vmem:[#allocation2 + $0x159] sm:$0xff] }
 0x1c2   :  { %15793 = vmatprep.mubr.msk.f32.mxu0 %vm21_vm1, %v4419_v46  ;;  %v5129_v46 = vld [vmem:[#allocation2 + $0x169] sm:$0xff] }
 0x1c4   :  { %15524 = vmatmul.mubr.msk.f32.gmra.mrb[42].mxu1 %vm21_vm1, %v18294_v2 }
 0x1c5   :  { %15794 = vmatmul.mubr.msk.f32.gmra.mrb[26].mxu0 %vm21_vm1, %v4420_v50  ;;  %15526 = vmatprep.mubr.msk.f32.mxu1 %vm21_vm1, %v18300_v15 }
 0x1c6   :  { %15796 = vmatprep.mubr.msk.f32.mxu0 %vm21_vm1, %v4421_v0 }
 0x1c8   :  { %15527 = vmatmul.mubr.msk.f32.gmra.mrb[44].mxu1 %vm21_vm1, %v18310_v16 }
 0x1c9   :  { %15797 = vmatmul.mubr.msk.f32.gmra.mrb[28].mxu0 %vm21_vm1, %v4422_v18  ;;  %15529 = vmatprep.mubr.msk.f32.mxu1 %vm21_vm1, %v18316_v12  ;;  %v5130_v18 = vld [vmem:[#allocation2 + $0x171] sm:$0xff] }
 0x1ca   :  { %15799 = vmatprep.mubr.msk.f32.mxu0 %vm21_vm1, %v4423_v22  ;;  %v5131_v22 = vld [vmem:[#allocation2 + $0x181] sm:$0xff] }
 0x1cc   :  { %15530 = vmatmul.mubr.msk.f32.gmra.mrb[46].mxu1 %vm21_vm1, %v18326_v14 }
 0x1cd   :  { %15800 = vmatmul.mubr.msk.f32.gmra.mrb[30].mxu0 %vm21_vm1, %v4424_v26  ;;  %15532 = vmatprep.mubr.msk.f32.mxu1 %vm21_vm1, %v18332_v34 }
 0x1ce   :  { %15802 = vmatprep.mubr.msk.f32.mxu0 %vm21_vm1, %v4425_v52 }
 0x1d0   :  { %15533 = vmatmul.mubr.msk.f32.gmra.mrb[48].mxu1 %vm21_vm1, %v18342_v38 }
 0x1d1   :  { %15803 = vmatmul.mubr.msk.f32.gmra.mrb[32].mxu0 %vm21_vm1, %v4426_v53  ;;  %15535 = vmatprep.mubr.msk.f32.mxu1 %vm21_vm1, %v18348_v40  ;;  %v5132_v53 = vld [vmem:[#allocation2 + $0x189] sm:$0xff] }
 0x1d2   :  { %15805 = vmatprep.mubr.msk.f32.mxu0 %vm21_vm1, %v4427_v1  ;;  %v5133_v1 = vld [vmem:[#allocation2 + $0x199] sm:$0xff] }
 0x1d4   :  { %15536 = vmatmul.mubr.msk.f32.gmra.mrb[50].mxu1 %vm21_vm1, %v18358_v44 }
 0x1d5   :  { %15806 = vmatmul.mubr.msk.f32.gmra.mrb[34].mxu0 %vm21_vm1, %v4428_v33  ;;  %15538 = vmatprep.mubr.msk.f32.mxu1 %vm21_vm1, %v18364_v48 }
 0x1d6   :  { %15808 = vmatprep.mubr.msk.f32.mxu0 %vm21_vm1, %v4429_v37 }
 0x1d8   :  { %15539 = vmatmul.mubr.msk.f32.gmra.mrb[52].mxu1 %vm21_vm1, %v18374_v58 }
 0x1d9   :  { %15809 = vmatmul.mubr.msk.f32.gmra.mrb[36].mxu0 %vm21_vm1, %v4430_v39  ;;  %15541 = vmatprep.mubr.msk.f32.mxu1 %vm21_vm1, %v18380_v7  ;;  %v5134_v39 = vld [vmem:[#allocation2 + $0x1a1] sm:$0xff] }
 0x1da   :  { %15811 = vmatprep.mubr.msk.f32.mxu0 %vm21_vm1, %v18259_v56  ;;  %v2324_v56 = vld [vmem:[#allocation2 + $0x330] sm:$0xff] }
 0x1dc   :  { %15542 = vmatmul.mubr.msk.f32.gmra.mrb[54].mxu1 %vm21_vm1, %v18390_v20 }
 0x1dd   :  { %15812 = vmatmul.mubr.msk.f32.gmra.mrb[38].mxu0 %vm21_vm1, %v18274_v3  ;;  %15544 = vmatprep.mubr.msk.f32.mxu1 %vm21_vm1, %v18396_v24  ;;  %v2325_v3 = vld [vmem:[#allocation2 + $0x338] sm:$0xff] }
 0x1de   :  { %15814 = vmatprep.mubr.msk.f32.mxu0 %vm21_vm1, %v18282_v9  ;;  %v4455_v9 = vld [vmem:[#allocation2 + $0x348] sm:$0xff] }
 0x1e0   :  { %15545 = vmatmul.mubr.msk.f32.gmra.mrb[56].mxu1 %vm21_vm1, %v18406_v28 }
 0x1e1   :  { %15815 = vmatmul.mubr.msk.f32.gmra.mrb[40].mxu0 %vm21_vm1, %v18294_v2  ;;  %15547 = vmatprep.mubr.msk.f32.mxu1 %vm21_vm1, %v18412_v59  ;;  %v4456_v2 = vld [vmem:[#allocation2 + $0x350] sm:$0xff] }
 0x1e2   :  { %15817 = vmatprep.mubr.msk.f32.mxu0 %vm21_vm1, %v18300_v15  ;;  %v5103_v15 = vld [vmem:[#allocation2 + $0x31] sm:$0xff] }
 0x1e4   :  { %15548 = vmatmul.mubr.msk.f32.gmra.mrb[58].mxu1 %vm21_vm1, %v18422_v30 }
 0x1e5   :  { %15818 = vmatmul.mubr.msk.f32.gmra.mrb[42].mxu0 %vm21_vm1, %v18310_v16  ;;  %15550 = vmatprep.mubr.msk.f32.mxu1 %vm21_vm1, %v18428_v31  ;;  %v5104_v16 = vld [vmem:[#allocation2 + $0x39] sm:$0xff] }
 0x1e6   :  { %15820 = vmatprep.mubr.msk.f32.mxu0 %vm21_vm1, %v18316_v12  ;;  %v5105_v12 = vld [vmem:[#allocation2 + $0x49] sm:$0xff] }
 0x1e8   :  { %15551 = vmatmul.mubr.msk.f32.gmra.mrb[60].mxu1 %vm21_vm1, %v18438_v35 }
 0x1e9   :  { %15821 = vmatmul.mubr.msk.f32.gmra.mrb[44].mxu0 %vm21_vm1, %v18326_v14  ;;  %15553 = vmatprep.mubr.msk.f32.mxu1 %vm21_vm1, %v2324_v56  ;;  %v5106_v14 = vld [vmem:[#allocation2 + $0x51] sm:$0xff] }
 0x1ea   :  { %15823 = vmatprep.mubr.msk.f32.mxu0 %vm21_vm1, %v18332_v34  ;;  %v5107_v34 = vld [vmem:[#allocation2 + $0x61] sm:$0xff] }
 0x1ec   :  { %15554 = vmatmul.mubr.msk.f32.gmra.mrb[62].mxu1 %vm21_vm1, %v2325_v3 }
 0x1ed   :  { %15824 = vmatmul.mubr.msk.f32.gmra.mrb[46].mxu0 %vm21_vm1, %v18342_v38 }
 0x1ee   :  { %15826 = vmatprep.mubr.msk.f32.mxu0 %vm21_vm1, %v18348_v40 }
 0x1f1   :  { %15827 = vmatmul.mubr.msk.f32.gmra.mrb[48].mxu0 %vm21_vm1, %v18358_v44  ;;  %v5108_v44 = vld [vmem:[#allocation2 + $0x69] sm:$0xff] }
 0x1f2   :  { %15829 = vmatprep.mubr.msk.f32.mxu0 %vm21_vm1, %v18364_v48  ;;  %v5109_v48 = vld [vmem:[#allocation2 + $0x79] sm:$0xff] }
 0x1f5   :  { %15830 = vmatmul.mubr.msk.f32.gmra.mrb[50].mxu0 %vm21_vm1, %v18374_v58 }
 0x1f6   :  { %15832 = vmatprep.mubr.msk.f32.mxu0 %vm21_vm1, %v18380_v7 }
 0x1f9   :  { %15833 = vmatmul.mubr.msk.f32.gmra.mrb[52].mxu0 %vm21_vm1, %v18390_v20  ;;  %v5110_v20 = vld [vmem:[#allocation2 + $0x81] sm:$0xff] }
 0x1fa   :  { %15835 = vmatprep.mubr.msk.f32.mxu0 %vm21_vm1, %v18396_v24  ;;  %v5111_v24 = vld [vmem:[#allocation2 + $0x91] sm:$0xff] }
 0x1fd   :  { %15836 = vmatmul.mubr.msk.f32.gmra.mrb[54].mxu0 %vm21_vm1, %v18406_v28 }
 0x1fe   :  { %15838 = vmatprep.mubr.msk.f32.mxu0 %vm21_vm1, %v18412_v59 }
 0x201   :  { %15839 = vmatmul.mubr.msk.f32.gmra.mrb[56].mxu0 %vm21_vm1, %v18422_v30  ;;  %v5112_v30 = vld [vmem:[#allocation2 + $0x99] sm:$0xff] }
 0x202   :  { %15841 = vmatprep.mubr.msk.f32.mxu0 %vm21_vm1, %v18428_v31  ;;  %v5113_v31 = vld [vmem:[#allocation2 + $0xa9] sm:$0xff] }
 0x205   :  { %15842 = vmatmul.mubr.msk.f32.gmra.mrb[58].mxu0 %vm21_vm1, %v18438_v35 }
 0x206   :  { %15844 = vmatprep.mubr.msk.f32.mxu0 %vm21_vm1, %v2324_v56  ;;  %v5135_v56 = vld [vmem:[#allocation2 + $0x1e1] sm:$0xff] }
 0x209   :  { %15845 = vmatmul.mubr.msk.f32.gmra.mrb[60].mxu0 %vm21_vm1, %v2325_v3 }
 0x20a   :  { %15847 = vmatprep.mubr.msk.f32.mxu0 %vm21_vm1, %v4455_v9 }
 0x20d   :  { %15848 = vmatmul.mubr.msk.f32.gmra.mrb[62].mxu0 %vm21_vm1, %v4456_v2  ;;  %v5136_v2 = vld [vmem:[#allocation2 + $0x1e9] sm:$0xff] }
 0x20e   :  { %15852 = vmatprep.mubr.msk.f32.mxu0 %vm21_vm1, %v5103_v15  ;;  %v5137_v15 = vld [vmem:[#allocation2 + $0x1f9] sm:$0xff] }
 0x211   :  { %15853 = vmatmul.mubr.msk.f32.vlgmr.msra.gmra.mrb[0].mxu0 %vm21_vm1, %v5104_v16 }
 0x212   :  { %15949 = vmatpush3.msk.msra.mxu0 %vm583_vm0, %v18684_v61  ;;  %15855 = vmatprep.mubr.msk.f32.mxu0 %vm21_vm1, %v5105_v12  ;;  %v5117_v61 = vld [vmem:[#allocation2 + $0xd9] sm:$0xff] }
 0x213   :  { %v18870_v38 = vpop.f32.mrb[0].mxu1 }
 0x214   :  { %v18872_v40 = vpop.f32.mrb[1].mxu1 }
 0x215   :  { %15856 = vmatmul.mubr.msk.f32.gmra.mrb[2].mxu0 %vm21_vm1, %v5106_v14  ;;  %v5138_v14 = vld [vmem:[#allocation2 + $0x201] sm:$0xff] }
 0x216   :  { %15858 = vmatprep.mubr.msk.f32.mxu0 %vm21_vm1, %v5107_v34  ;;  %v5139_v34 = vld [vmem:[#allocation2 + $0x211] sm:$0xff] }
 0x217   :  { %v18876_v58 = vpop.f32.mrb[2].mxu1 }
 0x218   :  { %v18878_v7 = vpop.f32.mrb[3].mxu1 }
 0x219   :  { %15859 = vmatmul.mubr.msk.f32.gmra.mrb[4].mxu0 %vm21_vm1, %v5108_v44 }
 0x21a   :  { %15861 = vmatprep.mubr.msk.f32.mxu0 %vm21_vm1, %v5109_v48 }
 0x21b   :  { %v18882_v28 = vpop.f32.mrb[4].mxu1 }
 0x21c   :  { %v18884_v59 = vpop.f32.mrb[5].mxu1 }
 0x21d   :  { %15862 = vmatmul.mubr.msk.f32.gmra.mrb[6].mxu0 %vm21_vm1, %v5110_v20  ;;  %v5140_v20 = vld [vmem:[#allocation2 + $0x219] sm:$0xff] }
 0x21e   :  { %15864 = vmatprep.mubr.msk.f32.mxu0 %vm21_vm1, %v5111_v24  ;;  %v5141_v24 = vld [vmem:[#allocation2 + $0x229] sm:$0xff] }
 0x21f   :  { %v18888_v35 = vpop.f32.mrb[6].mxu1 }
 0x220   :  { %v18890_v41 = vpop.f32.mrb[7].mxu1 }
 0x221   :  { %15865 = vmatmul.mubr.msk.f32.gmra.mrb[8].mxu0 %vm21_vm1, %v5112_v30 }
 0x222   :  { %15867 = vmatprep.mubr.msk.f32.mxu0 %vm21_vm1, %v5113_v31 }
 0x223   :  { %v18894_v47 = vpop.f32.mrb[8].mxu1 }
 0x224   :  { %v18896_v49 = vpop.f32.mrb[9].mxu1 }
 0x225   :  { %15868 = vmatmul.mubr.msk.f32.gmra.mrb[10].mxu0 %vm21_vm1, %v5114_v43  ;;  %v5142_v43 = vld [vmem:[#allocation2 + $0x231] sm:$0xff] }
 0x226   :  { %15870 = vmatprep.mubr.msk.f32.mxu0 %vm21_vm1, %v5115_v45  ;;  %v5143_v45 = vld [vmem:[#allocation2 + $0x241] sm:$0xff] }
 0x227   :  { %v18900_v6 = vpop.f32.mrb[10].mxu1 }
 0x228   :  { %v18902_v17 = vpop.f32.mrb[11].mxu1 }
 0x229   :  { %15871 = vmatmul.mubr.msk.f32.gmra.mrb[12].mxu0 %vm21_vm1, %v5116_v54 }
 0x22a   :  { %15873 = vmatprep.mubr.msk.f32.mxu0 %vm21_vm1, %v5117_v61 }
 0x22b   :  { %v18906_v63 = vpop.f32.mrb[12].mxu1 }
 0x22c   :  { %v18908_v23 = vpop.f32.mrb[13].mxu1 }
 0x22d   :  { %15874 = vmatmul.mubr.msk.f32.gmra.mrb[14].mxu0 %vm21_vm1, %v5118_v19  ;;  %v5144_v19 = vld [vmem:[#allocation2 + $0x249] sm:$0xff] }
 0x22e   :  { %15876 = vmatprep.mubr.msk.f32.mxu0 %vm21_vm1, %v5119_v21  ;;  %v5145_v21 = vld [vmem:[#allocation2 + $0x259] sm:$0xff] }
 0x22f   :  { %v18912_v29 = vpop.f32.mrb[14].mxu1 }
 0x230   :  { %v18914_v57 = vpop.f32.mrb[15].mxu1 }
 0x231   :  { %15877 = vmatmul.mubr.msk.f32.gmra.mrb[16].mxu0 %vm21_vm1, %v5120_v25 }
 0x232   :  { %15879 = vmatprep.mubr.msk.f32.mxu0 %vm21_vm1, %v5121_v27 }
 0x233   :  { %v18918_v62 = vpop.f32.mrb[16].mxu1 }
 0x234   :  { %21879 = vst [vmem:[#allocation7_spill] sm:$0xff] %v18918_v62  ;;  %v18920_v8 = vpop.f32.mrb[17].mxu1 }
 0x235   :  { %21880 = vst [vmem:[#allocation8_spill] sm:$0xff] %v18920_v8  ;;  %15880 = vmatmul.mubr.msk.f32.gmra.mrb[18].mxu0 %vm21_vm1, %v5122_v55  ;;  %v5146_v55 = vld [vmem:[#allocation2 + $0x261] sm:$0xff] }
 0x236   :  { %15882 = vmatprep.mubr.msk.f32.mxu0 %vm21_vm1, %v5123_v60  ;;  %v5147_v60 = vld [vmem:[#allocation2 + $0x271] sm:$0xff] }
 0x237   :  { %v18924_v51 = vpop.f32.mrb[18].mxu1 }
 0x238   :  { %21881 = vst [vmem:[#allocation9_spill] sm:$0xff] %v18924_v51  ;;  %v18926_v5 = vpop.f32.mrb[19].mxu1 }
 0x239   :  { %21882 = vst [vmem:[#allocation10_spill] sm:$0xff] %v18926_v5  ;;  %15883 = vmatmul.mubr.msk.f32.gmra.mrb[20].mxu0 %vm21_vm1, %v5124_v10  ;;  %v5148_v10 = vld [vmem:[#allocation2 + $0x279] sm:$0xff] }
 0x23a   :  { %15885 = vmatprep.mubr.msk.f32.mxu0 %vm21_vm1, %v5125_v13  ;;  %v5149_v13 = vld [vmem:[#allocation2 + $0x289] sm:$0xff] }
 0x23b   :  { %v18930_v36 = vpop.f32.mrb[20].mxu1 }
 0x23c   :  { %21883 = vst [vmem:[#allocation11_spill] sm:$0xff] %v18930_v36  ;;  %v18932_v11 = vpop.f32.mrb[21].mxu1 }
 0x23d   :  { %21884 = vst [vmem:[#allocation12_spill] sm:$0xff] %v18932_v11  ;;  %15886 = vmatmul.mubr.msk.f32.gmra.mrb[22].mxu0 %vm21_vm1, %v5126_v4  ;;  %v5150_v4 = vld [vmem:[#allocation2 + $0x291] sm:$0xff] }
 0x23e   :  { %15888 = vmatprep.mubr.msk.f32.mxu0 %vm21_vm1, %v5127_v32  ;;  %v5151_v32 = vld [vmem:[#allocation2 + $0x2a1] sm:$0xff] }
 0x23f   :  { %v18936_v50 = vpop.f32.mrb[22].mxu1 }
 0x240   :  { %21885 = vst [vmem:[#allocation13_spill] sm:$0xff] %v18936_v50  ;;  %v18938_v0 = vpop.f32.mrb[23].mxu1 }
 0x241   :  { %21886 = vst [vmem:[#allocation14_spill] sm:$0xff] %v18938_v0  ;;  %15889 = vmatmul.mubr.msk.f32.gmra.mrb[24].mxu0 %vm21_vm1, %v5128_v42  ;;  %v5152_v42 = vld [vmem:[#allocation2 + $0x2a9] sm:$0xff] }
 0x242   :  { %15891 = vmatprep.mubr.msk.f32.mxu0 %vm21_vm1, %v5129_v46  ;;  %v5153_v46 = vld [vmem:[#allocation2 + $0x2b9] sm:$0xff] }
 0x243   :  { %v18942_v26 = vpop.f32.mrb[24].mxu1 }
 0x244   :  { %21887 = vst [vmem:[#allocation15_spill] sm:$0xff] %v18942_v26  ;;  %v18944_v52 = vpop.f32.mrb[25].mxu1 }
 0x245   :  { %21888 = vst [vmem:[#allocation16_spill] sm:$0xff] %v18944_v52  ;;  %15892 = vmatmul.mubr.msk.f32.gmra.mrb[26].mxu0 %vm21_vm1, %v5130_v18  ;;  %v5154_v18 = vld [vmem:[#allocation2 + $0x2c1] sm:$0xff] }
 0x246   :  { %15894 = vmatprep.mubr.msk.f32.mxu0 %vm21_vm1, %v5131_v22  ;;  %v5155_v22 = vld [vmem:[#allocation2 + $0x2d1] sm:$0xff] }
 0x247   :  { %v18948_v33 = vpop.f32.mrb[26].mxu1 }
 0x248   :  { %21889 = vst [vmem:[#allocation17_spill] sm:$0xff] %v18948_v33  ;;  %v18950_v37 = vpop.f32.mrb[27].mxu1 }
 0x249   :  { %21890 = vst [vmem:[#allocation18_spill] sm:$0xff] %v18950_v37  ;;  %15895 = vmatmul.mubr.msk.f32.gmra.mrb[28].mxu0 %vm21_vm1, %v5132_v53  ;;  %v5156_v53 = vld [vmem:[#allocation2 + $0x2d9] sm:$0xff] }
 0x24a   :  { %15897 = vmatprep.mubr.msk.f32.mxu0 %vm21_vm1, %v5133_v1  ;;  %v5157_v1 = vld [vmem:[#allocation2 + $0x2e9] sm:$0xff] }
 0x24b   :  { %v18954_v3 = vpop.f32.mrb[28].mxu1 }
 0x24c   :  { %21891 = vst [vmem:[#allocation19_spill] sm:$0xff] %v18954_v3  ;;  %v18956_v9 = vpop.f32.mrb[29].mxu1 }
 0x24d   :  { %21892 = vst [vmem:[#allocation20_spill] sm:$0xff] %v18956_v9  ;;  %15898 = vmatmul.mubr.msk.f32.gmra.mrb[30].mxu0 %vm21_vm1, %v5134_v39  ;;  %v5158_v39 = vld [vmem:[#allocation2 + $0x2f1] sm:$0xff] }
 0x24e   :  { %15900 = vmatprep.mubr.msk.f32.mxu0 %vm21_vm1, %v5135_v56  ;;  %v5159_v56 = vld [vmem:[#allocation2 + $0x301] sm:$0xff] }
 0x24f   :  { %v18960_v16 = vpop.f32.mrb[30].mxu1 }
 0x250   :  { %21893 = vst [vmem:[#allocation21_spill] sm:$0xff] %v18960_v16  ;;  %v18962_v12 = vpop.f32.mrb[31].mxu1 }
 0x251   :  { %21894 = vst [vmem:[#allocation22_spill] sm:$0xff] %v18962_v12  ;;  %15901 = vmatmul.mubr.msk.f32.gmra.mrb[32].mxu0 %vm21_vm1, %v5136_v2  ;;  %v5160_v2 = vld [vmem:[#allocation2 + $0x309] sm:$0xff] }
 0x252   :  { %15903 = vmatprep.mubr.msk.f32.mxu0 %vm21_vm1, %v5137_v15  ;;  %v5161_v15 = vld [vmem:[#allocation2 + $0x319] sm:$0xff] }
 0x253   :  { %v18966_v44 = vpop.f32.mrb[32].mxu1 }
 0x254   :  { %21895 = vst [vmem:[#allocation23_spill] sm:$0xff] %v18966_v44  ;;  %v18968_v48 = vpop.f32.mrb[33].mxu1 }
 0x255   :  { %21896 = vst [vmem:[#allocation24_spill] sm:$0xff] %v18968_v48  ;;  %15904 = vmatmul.mubr.msk.f32.gmra.mrb[34].mxu0 %vm21_vm1, %v5138_v14  ;;  %v5162_v14 = vld [vmem:[#allocation2 + $0x321] sm:$0xff] }
 0x256   :  { %15906 = vmatprep.mubr.msk.f32.mxu0 %vm21_vm1, %v5139_v34  ;;  %v5163_v34 = vld [vmem:[#allocation2 + $0x331] sm:$0xff] }
 0x257   :  { %v18972_v30 = vpop.f32.mrb[34].mxu1 }
 0x258   :  { %21897 = vst [vmem:[#allocation25_spill] sm:$0xff] %v18972_v30  ;;  %v18974_v31 = vpop.f32.mrb[35].mxu1 }
 0x259   :  { %21898 = vst [vmem:[#allocation26_spill] sm:$0xff] %v18974_v31  ;;  %15907 = vmatmul.mubr.msk.f32.gmra.mrb[36].mxu0 %vm21_vm1, %v5140_v20  ;;  %v5164_v20 = vld [vmem:[#allocation2 + $0x339] sm:$0xff] }
 0x25a   :  { %15909 = vmatprep.mubr.msk.f32.mxu0 %vm21_vm1, %v5141_v24  ;;  %v5165_v24 = vld [vmem:[#allocation2 + $0x349] sm:$0xff] }
 0x25b   :  { %v18978_v54 = vpop.f32.mrb[36].mxu1 }
 0x25c   :  { %21899 = vst [vmem:[#allocation27_spill] sm:$0xff] %v18978_v54  ;;  %v18980_v61 = vpop.f32.mrb[37].mxu1 }
 0x25d   :  { %21900 = vst [vmem:[#allocation28_spill] sm:$0xff] %v18980_v61  ;;  %15910 = vmatmul.mubr.msk.f32.gmra.mrb[38].mxu0 %vm21_vm1, %v5142_v43  ;;  %v5166_v43 = vld [vmem:[#allocation2 + $0x351] sm:$0xff] }
 0x25e   :  { %15912 = vmatprep.mubr.msk.f32.mxu0 %vm21_vm1, %v5143_v45  ;;  %v5813_v45 = vld [vmem:[#allocation2 + $0x32] sm:$0xff] }
 0x25f   :  { %v18984_v25 = vpop.f32.mrb[38].mxu1 }
 0x260   :  { %21901 = vst [vmem:[#allocation29_spill] sm:$0xff] %v18984_v25  ;;  %v18986_v27 = vpop.f32.mrb[39].mxu1 }
 0x261   :  { %21902 = vst [vmem:[#allocation30_spill] sm:$0xff] %v18986_v27  ;;  %15913 = vmatmul.mubr.msk.f32.gmra.mrb[40].mxu0 %vm21_vm1, %v5144_v19  ;;  %v5814_v19 = vld [vmem:[#allocation2 + $0x3a] sm:$0xff] }
 0x262   :  { %15915 = vmatprep.mubr.msk.f32.mxu0 %vm21_vm1, %v5145_v21  ;;  %v5815_v21 = vld [vmem:[#allocation2 + $0x4a] sm:$0xff] }
 0x265   :  { %15916 = vmatmul.mubr.msk.f32.gmra.mrb[42].mxu0 %vm21_vm1, %v5146_v55  ;;  %v5816_v55 = vld [vmem:[#allocation2 + $0x52] sm:$0xff] }
 0x266   :  { %15918 = vmatprep.mubr.msk.f32.mxu0 %vm21_vm1, %v5147_v60 }
 0x269   :  { %15919 = vmatmul.mubr.msk.f32.gmra.mrb[44].mxu0 %vm21_vm1, %v5148_v10  ;;  %v5817_v10 = vld [vmem:[#allocation2 + $0x62] sm:$0xff] }
 0x26a   :  { %15921 = vmatprep.mubr.msk.f32.mxu0 %vm21_vm1, %v5149_v13 }
 0x26d   :  { %15922 = vmatmul.mubr.msk.f32.gmra.mrb[46].mxu0 %vm21_vm1, %v5150_v4  ;;  %v5818_v4 = vld [vmem:[#allocation2 + $0x6a] sm:$0xff] }
 0x26e   :  { %15924 = vmatprep.mubr.msk.f32.mxu0 %vm21_vm1, %v5151_v32 }
 0x271   :  { %15925 = vmatmul.mubr.msk.f32.gmra.mrb[48].mxu0 %vm21_vm1, %v5152_v42  ;;  %v5819_v42 = vld [vmem:[#allocation2 + $0x7a] sm:$0xff] }
 0x272   :  { %15927 = vmatprep.mubr.msk.f32.mxu0 %vm21_vm1, %v5153_v46 }
 0x275   :  { %15928 = vmatmul.mubr.msk.f32.gmra.mrb[50].mxu0 %vm21_vm1, %v5154_v18  ;;  %v5820_v18 = vld [vmem:[#allocation2 + $0x82] sm:$0xff] }
 0x276   :  { %15930 = vmatprep.mubr.msk.f32.mxu0 %vm21_vm1, %v5155_v22 }
 0x279   :  { %15931 = vmatmul.mubr.msk.f32.gmra.mrb[52].mxu0 %vm21_vm1, %v5156_v53  ;;  %v5821_v53 = vld [vmem:[#allocation2 + $0x92] sm:$0xff] }
 0x27a   :  { %15933 = vmatprep.mubr.msk.f32.mxu0 %vm21_vm1, %v5157_v1 }
 0x27d   :  { %15934 = vmatmul.mubr.msk.f32.gmra.mrb[54].mxu0 %vm21_vm1, %v5158_v39  ;;  %v5822_v39 = vld [vmem:[#allocation2 + $0x9a] sm:$0xff] }
 0x27e   :  { %15936 = vmatprep.mubr.msk.f32.mxu0 %vm21_vm1, %v5159_v56 }
 0x281   :  { %15937 = vmatmul.mubr.msk.f32.gmra.mrb[56].mxu0 %vm21_vm1, %v5160_v2  ;;  %v5823_v2 = vld [vmem:[#allocation2 + $0xaa] sm:$0xff] }
 0x282   :  { %15939 = vmatprep.mubr.msk.f32.mxu0 %vm21_vm1, %v5161_v15 }
 0x285   :  { %15940 = vmatmul.mubr.msk.f32.gmra.mrb[58].mxu0 %vm21_vm1, %v5162_v14  ;;  %v5824_v14 = vld [vmem:[#allocation2 + $0xb2] sm:$0xff] }
 0x286   :  { %15942 = vmatprep.mubr.msk.f32.mxu0 %vm21_vm1, %v5163_v34 }
 0x289   :  { %15943 = vmatmul.mubr.msk.f32.gmra.mrb[60].mxu0 %vm21_vm1, %v5164_v20  ;;  %v5825_v20 = vld [vmem:[#allocation2 + $0xc2] sm:$0xff] }
 0x28a   :  { %15945 = vmatprep.mubr.msk.f32.mxu0 %vm21_vm1, %v5165_v24 }
 0x28d   :  { %15946 = vmatmul.mubr.msk.f32.gmra.mrb[62].mxu0 %vm21_vm1, %v5166_v43  ;;  %v5826_v43 = vld [vmem:[#allocation2 + $0xca] sm:$0xff] }
 0x28e   :  { %15950 = vmatprep.mubr.msk.f32.mxu0 %vm21_vm1, %v5813_v45 }
 0x291   :  { %15951 = vmatmul.mubr.msk.f32.vlgmr.msra.gmra.mrb[0].mxu0 %vm21_vm1, %v5814_v19  ;;  %v5827_v19 = vld [vmem:[#allocation2 + $0xda] sm:$0xff] }
 0x292   :  { %15953 = vmatprep.mubr.msk.f32.mxu0 %vm21_vm1, %v5815_v21 }
 0x293   :  { %v19014_v60 = vpop.f32.mrb[40].mxu1 }
 0x294   :  { %21903 = vst [vmem:[#allocation31_spill] sm:$0xff] %v19014_v60  ;;  %v19016_v13 = vpop.f32.mrb[41].mxu1 }
 0x295   :  { %21904 = vst [vmem:[#allocation32_spill] sm:$0xff] %v19016_v13  ;;  %15954 = vmatmul.mubr.msk.f32.gmra.mrb[2].mxu0 %vm21_vm1, %v5816_v55  ;;  %v5828_v55 = vld [vmem:[#allocation2 + $0xe2] sm:$0xff] }
 0x296   :  { %15956 = vmatprep.mubr.msk.f32.mxu0 %vm21_vm1, %v5817_v10 }
 0x297   :  { %v19020_v32 = vpop.f32.mrb[42].mxu1 }
 0x298   :  { %21905 = vst [vmem:[#allocation33_spill] sm:$0xff] %v19020_v32  ;;  %v19022_v46 = vpop.f32.mrb[43].mxu1 }
 0x299   :  { %21906 = vst [vmem:[#allocation34_spill] sm:$0xff] %v19022_v46  ;;  %15957 = vmatmul.mubr.msk.f32.gmra.mrb[4].mxu0 %vm21_vm1, %v5818_v4  ;;  %v5829_v4 = vld [vmem:[#allocation2 + $0xf2] sm:$0xff] }
 0x29a   :  { %15959 = vmatprep.mubr.msk.f32.mxu0 %vm21_vm1, %v5819_v42 }
 0x29b   :  { %v19026_v22 = vpop.f32.mrb[44].mxu1 }
 0x29c   :  { %21907 = vst [vmem:[#allocation35_spill] sm:$0xff] %v19026_v22  ;;  %v19028_v1 = vpop.f32.mrb[45].mxu1 }
 0x29d   :  { %21908 = vst [vmem:[#allocation36_spill] sm:$0xff] %v19028_v1  ;;  %15960 = vmatmul.mubr.msk.f32.gmra.mrb[6].mxu0 %vm21_vm1, %v5820_v18  ;;  %v5830_v18 = vld [vmem:[#allocation2 + $0xfa] sm:$0xff] }
 0x29e   :  { %15962 = vmatprep.mubr.msk.f32.mxu0 %vm21_vm1, %v5821_v53 }
 0x29f   :  { %v19032_v56 = vpop.f32.mrb[46].mxu1 }
 0x2a0   :  { %21909 = vst [vmem:[#allocation37_spill] sm:$0xff] %v19032_v56  ;;  %v19034_v15 = vpop.f32.mrb[47].mxu1 }
 0x2a1   :  { %21910 = vst [vmem:[#allocation38_spill] sm:$0xff] %v19034_v15  ;;  %15963 = vmatmul.mubr.msk.f32.gmra.mrb[8].mxu0 %vm21_vm1, %v5822_v39  ;;  %v5831_v39 = vld [vmem:[#allocation2 + $0x10a] sm:$0xff] }
 0x2a2   :  { %15965 = vmatprep.mubr.msk.f32.mxu0 %vm21_vm1, %v5823_v2 }
 0x2a3   :  { %v19038_v34 = vpop.f32.mrb[48].mxu1 }
 0x2a4   :  { %21911 = vst [vmem:[#allocation39_spill] sm:$0xff] %v19038_v34  ;;  %v19040_v24 = vpop.f32.mrb[49].mxu1 }
 0x2a5   :  { %21912 = vst [vmem:[#allocation40_spill] sm:$0xff] %v19040_v24  ;;  %15966 = vmatmul.mubr.msk.f32.gmra.mrb[10].mxu0 %vm21_vm1, %v5824_v14  ;;  %v5832_v14 = vld [vmem:[#allocation2 + $0x112] sm:$0xff] }
 0x2a6   :  { %15968 = vmatprep.mubr.msk.f32.mxu0 %vm21_vm1, %v5825_v20 }
 0x2a7   :  { %v19044_v45 = vpop.f32.mrb[50].mxu1 }
 0x2a8   :  { %21913 = vst [vmem:[#allocation41_spill] sm:$0xff] %v19044_v45  ;;  %v19046_v21 = vpop.f32.mrb[51].mxu1 }
 0x2a9   :  { %21914 = vst [vmem:[#allocation42_spill] sm:$0xff] %v19046_v21  ;;  %15969 = vmatmul.mubr.msk.f32.gmra.mrb[12].mxu0 %vm21_vm1, %v5826_v43  ;;  %v5833_v43 = vld [vmem:[#allocation2 + $0x122] sm:$0xff] }
 0x2aa   :  { %15971 = vmatprep.mubr.msk.f32.mxu0 %vm21_vm1, %v5827_v19 }
 0x2ab   :  { %v19050_v10 = vpop.f32.mrb[52].mxu1 }
 0x2ac   :  { %21915 = vst [vmem:[#allocation43_spill] sm:$0xff] %v19050_v10  ;;  %v19052_v42 = vpop.f32.mrb[53].mxu1 }
 0x2ad   :  { %21916 = vst [vmem:[#allocation44_spill] sm:$0xff] %v19052_v42  ;;  %15972 = vmatmul.mubr.msk.f32.gmra.mrb[14].mxu0 %vm21_vm1, %v5828_v55  ;;  %v5834_v55 = vld [vmem:[#allocation2 + $0x12a] sm:$0xff] }
 0x2ae   :  { %15974 = vmatprep.mubr.msk.f32.mxu0 %vm21_vm1, %v5829_v4 }
 0x2af   :  { %v19056_v53 = vpop.f32.mrb[54].mxu1 }
 0x2b0   :  { %21917 = vst [vmem:[#allocation45_spill] sm:$0xff] %v19056_v53  ;;  %v19058_v2 = vpop.f32.mrb[55].mxu1  ;;  %v5835_v53 = vld [vmem:[#allocation2 + $0x13a] sm:$0xff] }
 0x2b1   :  { %21918 = vst [vmem:[#allocation46_spill] sm:$0xff] %v19058_v2  ;;  %15975 = vmatmul.mubr.msk.f32.gmra.mrb[16].mxu0 %vm21_vm1, %v5830_v18  ;;  %v5836_v18 = vld [vmem:[#allocation2 + $0x142] sm:$0xff] }
 0x2b2   :  { %15977 = vmatprep.mubr.msk.f32.mxu0 %vm21_vm1, %v5831_v39 }
 0x2b3   :  { %v19062_v20 = vpop.f32.mrb[56].mxu1 }
 0x2b4   :  { %21919 = vst [vmem:[#allocation47_spill] sm:$0xff] %v19062_v20  ;;  %v19064_v19 = vpop.f32.mrb[57].mxu1  ;;  %v5837_v20 = vld [vmem:[#allocation2 + $0x152] sm:$0xff] }
 0x2b5   :  { %21920 = vst [vmem:[#allocation48_spill] sm:$0xff] %v19064_v19  ;;  %15978 = vmatmul.mubr.msk.f32.gmra.mrb[18].mxu0 %vm21_vm1, %v5832_v14  ;;  %v5838_v14 = vld [vmem:[#allocation2 + $0x15a] sm:$0xff] }
 0x2b6   :  { %15980 = vmatprep.mubr.msk.f32.mxu0 %vm21_vm1, %v5833_v43 }
 0x2b7   :  { %v19068_v4 = vpop.f32.mrb[58].mxu1 }
 0x2b8   :  { %21921 = vst [vmem:[#allocation49_spill] sm:$0xff] %v19068_v4  ;;  %v19070_v42 = vpop.f32.mrb[59].mxu1  ;;  %v5839_v4 = vld [vmem:[#allocation2 + $0x16a] sm:$0xff] }
 0x2b9   :  { %21922 = vst [vmem:[#allocation50_spill] sm:$0xff] %v19070_v42  ;;  %15981 = vmatmul.mubr.msk.f32.gmra.mrb[20].mxu0 %vm21_vm1, %v5834_v55  ;;  %v5841_v55 = vld [vmem:[#allocation2 + $0x182] sm:$0xff] }
 0x2ba   :  { %15983 = vmatprep.mubr.msk.f32.mxu0 %vm21_vm1, %v5835_v53  ;;  %v5840_v53 = vld [vmem:[#allocation2 + $0x172] sm:$0xff] }
 0x2bb   :  { %v19074_v39 = vpop.f32.mrb[60].mxu1 }
 0x2bc   :  { %21923 = vst [vmem:[#allocation51_spill] sm:$0xff] %v19074_v39  ;;  %v19076_v2 = vpop.f32.mrb[61].mxu1 }
 0x2bd   :  { %21924 = vst [vmem:[#allocation52_spill] sm:$0xff] %v19076_v2  ;;  %15984 = vmatmul.mubr.msk.f32.gmra.mrb[22].mxu0 %vm21_vm1, %v5836_v18  ;;  %v5842_v2 = vld [vmem:[#allocation2 + $0x18a] sm:$0xff]  ;;  %v5843_v18 = vld [vmem:[#allocation2 + $0x19a] sm:$0xff] }
 0x2be   :  { %15986 = vmatprep.mubr.msk.f32.mxu0 %vm21_vm1, %v5837_v20  ;;  %v5844_v20 = vld [vmem:[#allocation2 + $0x1a2] sm:$0xff] }
 0x2bf   :  { %v19080_v43 = vpop.f32.mrb[62].mxu1 }
 0x2c0   :  { %21925 = vst [vmem:[#allocation53_spill] sm:$0xff] %v19080_v43  ;;  %v19082_v19 = vpop.f32.mrb[63].mxu1  ;;  %v5845_v43 = vld [vmem:[#allocation2 + $0x1e2] sm:$0xff] }
 0x2c1   :  { %21926 = vst [vmem:[#allocation54_spill] sm:$0xff] %v19082_v19  ;;  %15987 = vmatmul.mubr.msk.f32.gmra.mrb[24].mxu0 %vm21_vm1, %v5838_v14  ;;  %v5846_v14 = vld [vmem:[#allocation2 + $0x1ea] sm:$0xff] }
 0x2c2   :  { %15989 = vmatprep.mubr.msk.f32.mxu0 %vm21_vm1, %v5839_v4  ;;  %v5847_v4 = vld [vmem:[#allocation2 + $0x1fa] sm:$0xff]  ;;  %v5875_v19 = vld [vmem:[#allocation2 + $0x34a] sm:$0xff] }
 0x2c5   :  { %15990 = vmatmul.mubr.msk.f32.gmra.mrb[26].mxu0 %vm21_vm1, %v5840_v53  ;;  %v5848_v53 = vld [vmem:[#allocation2 + $0x202] sm:$0xff] }
 0x2c6   :  { %15992 = vmatprep.mubr.msk.f32.mxu0 %vm21_vm1, %v5841_v55  ;;  %v5849_v55 = vld [vmem:[#allocation2 + $0x212] sm:$0xff] }
 0x2c9   :  { %15993 = vmatmul.mubr.msk.f32.gmra.mrb[28].mxu0 %vm21_vm1, %v5842_v2  ;;  %v5850_v2 = vld [vmem:[#allocation2 + $0x21a] sm:$0xff] }
 0x2ca   :  { %15995 = vmatprep.mubr.msk.f32.mxu0 %vm21_vm1, %v5843_v18  ;;  %v5851_v18 = vld [vmem:[#allocation2 + $0x22a] sm:$0xff] }
 0x2cd   :  { %15996 = vmatmul.mubr.msk.f32.gmra.mrb[30].mxu0 %vm21_vm1, %v5844_v20  ;;  %v5852_v20 = vld [vmem:[#allocation2 + $0x232] sm:$0xff] }
 0x2ce   :  { %15998 = vmatprep.mubr.msk.f32.mxu0 %vm21_vm1, %v5845_v43  ;;  %v5853_v43 = vld [vmem:[#allocation2 + $0x242] sm:$0xff] }
 0x2d1   :  { %15999 = vmatmul.mubr.msk.f32.gmra.mrb[32].mxu0 %vm21_vm1, %v5846_v14  ;;  %v5854_v14 = vld [vmem:[#allocation2 + $0x24a] sm:$0xff] }
 0x2d2   :  { %16001 = vmatprep.mubr.msk.f32.mxu0 %vm21_vm1, %v5847_v4  ;;  %v5855_v4 = vld [vmem:[#allocation2 + $0x25a] sm:$0xff] }
 0x2d5   :  { %16002 = vmatmul.mubr.msk.f32.gmra.mrb[34].mxu0 %vm21_vm1, %v5848_v53  ;;  %v5856_v53 = vld [vmem:[#allocation2 + $0x262] sm:$0xff] }
 0x2d6   :  { %16004 = vmatprep.mubr.msk.f32.mxu0 %vm21_vm1, %v5849_v55  ;;  %v5857_v55 = vld [vmem:[#allocation2 + $0x272] sm:$0xff] }
 0x2d9   :  { %16005 = vmatmul.mubr.msk.f32.gmra.mrb[36].mxu0 %vm21_vm1, %v5850_v2  ;;  %v5858_v2 = vld [vmem:[#allocation2 + $0x27a] sm:$0xff] }
 0x2da   :  { %16007 = vmatprep.mubr.msk.f32.mxu0 %vm21_vm1, %v5851_v18  ;;  %v5859_v18 = vld [vmem:[#allocation2 + $0x28a] sm:$0xff] }
 0x2dd   :  { %16008 = vmatmul.mubr.msk.f32.gmra.mrb[38].mxu0 %vm21_vm1, %v5852_v20  ;;  %v5860_v20 = vld [vmem:[#allocation2 + $0x292] sm:$0xff] }
 0x2de   :  { %16010 = vmatprep.mubr.msk.f32.mxu0 %vm21_vm1, %v5853_v43  ;;  %v5861_v43 = vld [vmem:[#allocation2 + $0x2a2] sm:$0xff] }
 0x2e1   :  { %16011 = vmatmul.mubr.msk.f32.gmra.mrb[40].mxu0 %vm21_vm1, %v5854_v14  ;;  %v21927_v14 = vmov 0.0  }
 0x2e2   :  { %16013 = vmatprep.mubr.msk.f32.mxu0 %vm21_vm1, %v5855_v4  ;;  %10245 = vst.msk [vmem:[#allocation3 + $0x8] sm:$0x3] %vm8066_vm3, %v21927_v14  ;;  %10247 = vst.msk [vmem:[#allocation3 + $0x18] sm:$0x3] %vm8066_vm3, %v21927_v14  ;;  %v5862_v4 = vld [vmem:[#allocation2 + $0x2aa] sm:$0xff] }
 0x2e3   :  { %10249 = vst.msk [vmem:[#allocation3 + $0x28] sm:$0x3] %vm8066_vm3, %v21927_v14  ;;  %10251 = vst.msk [vmem:[#allocation3 + $0x38] sm:$0x3] %vm8066_vm3, %v21927_v14 }
 0x2e4   :  { %10253 = vst.msk [vmem:[#allocation3 + $0x48] sm:$0x3] %vm8066_vm3, %v21927_v14  ;;  %10255 = vst.msk [vmem:[#allocation3 + $0x58] sm:$0x3] %vm8066_vm3, %v21927_v14 }
 0x2e5   :  { %16014 = vmatmul.mubr.msk.f32.gmra.mrb[42].mxu0 %vm21_vm1, %v5856_v53  ;;  %10257 = vst.msk [vmem:[#allocation3 + $0x68] sm:$0x3] %vm8066_vm3, %v21927_v14  ;;  %10259 = vst.msk [vmem:[#allocation3 + $0x78] sm:$0x3] %vm8066_vm3, %v21927_v14  ;;  %v5863_v53 = vld [vmem:[#allocation2 + $0x2ba] sm:$0xff] }
 0x2e6   :  { %16016 = vmatprep.mubr.msk.f32.mxu0 %vm21_vm1, %v5857_v55  ;;  %10261 = vst.msk [vmem:[#allocation3 + $0x88] sm:$0x3] %vm8066_vm3, %v21927_v14  ;;  %10263 = vst.msk [vmem:[#allocation3 + $0x98] sm:$0x3] %vm8066_vm3, %v21927_v14  ;;  %v5864_v55 = vld [vmem:[#allocation2 + $0x2c2] sm:$0xff] }
 0x2e7   :  { %10265 = vst.msk [vmem:[#allocation3 + $0xa8] sm:$0x3] %vm8066_vm3, %v21927_v14  ;;  %10267 = vst.msk [vmem:[#allocation3 + $0xb8] sm:$0x3] %vm8066_vm3, %v21927_v14 }
 0x2e8   :  { %10269 = vst.msk [vmem:[#allocation3 + $0xc8] sm:$0x3] %vm8066_vm3, %v21927_v14  ;;  %10271 = vst.msk [vmem:[#allocation3 + $0xd8] sm:$0x3] %vm8066_vm3, %v21927_v14 }
 0x2e9   :  { %16017 = vmatmul.mubr.msk.f32.gmra.mrb[44].mxu0 %vm21_vm1, %v5858_v2  ;;  %10273 = vst.msk [vmem:[#allocation3 + $0xe8] sm:$0x3] %vm8066_vm3, %v21927_v14  ;;  %10275 = vst.msk [vmem:[#allocation3 + $0xf8] sm:$0x3] %vm8066_vm3, %v21927_v14  ;;  %v5865_v2 = vld [vmem:[#allocation2 + $0x2d2] sm:$0xff] }
 0x2ea   :  { %16019 = vmatprep.mubr.msk.f32.mxu0 %vm21_vm1, %v5859_v18  ;;  %10277 = vst.msk [vmem:[#allocation3 + $0x108] sm:$0x3] %vm8066_vm3, %v21927_v14  ;;  %10279 = vst.msk [vmem:[#allocation3 + $0x118] sm:$0x3] %vm8066_vm3, %v21927_v14  ;;  %v5866_v18 = vld [vmem:[#allocation2 + $0x2da] sm:$0xff] }
 0x2eb   :  { %10281 = vst.msk [vmem:[#allocation3 + $0x128] sm:$0x3] %vm8066_vm3, %v21927_v14  ;;  %10283 = vst.msk [vmem:[#allocation3 + $0x138] sm:$0x3] %vm8066_vm3, %v21927_v14 }
 0x2ec   :  { %10244 = vst.msk [vmem:[#allocation3] sm:$0xff] %vm9859_vm4, %v21927_v14  ;;  %10246 = vst.msk [vmem:[#allocation3 + $0x10] sm:$0xff] %vm9859_vm4, %v21927_v14 }
 0x2ed   :  { %16020 = vmatmul.mubr.msk.f32.gmra.mrb[46].mxu0 %vm21_vm1, %v5860_v20  ;;  %v5867_v20 = vld [vmem:[#allocation2 + $0x2ea] sm:$0xff]  ;;  %10248 = vst.msk [vmem:[#allocation3 + $0x20] sm:$0xff] %vm9859_vm4, %v21927_v14  ;;  %10250 = vst.msk [vmem:[#allocation3 + $0x30] sm:$0xff] %vm9859_vm4, %v21927_v14 }
 0x2ee   :  { %16022 = vmatprep.mubr.msk.f32.mxu0 %vm21_vm1, %v5861_v43  ;;  %v5868_v43 = vld [vmem:[#allocation2 + $0x2f2] sm:$0xff]  ;;  %10252 = vst.msk [vmem:[#allocation3 + $0x40] sm:$0xff] %vm9859_vm4, %v21927_v14  ;;  %10254 = vst.msk [vmem:[#allocation3 + $0x50] sm:$0xff] %vm9859_vm4, %v21927_v14 }
 0x2ef   :  { %10256 = vst.msk [vmem:[#allocation3 + $0x60] sm:$0xff] %vm9859_vm4, %v21927_v14  ;;  %10258 = vst.msk [vmem:[#allocation3 + $0x70] sm:$0xff] %vm9859_vm4, %v21927_v14 }
 0x2f0   :  { %10260 = vst.msk [vmem:[#allocation3 + $0x80] sm:$0xff] %vm9859_vm4, %v21927_v14  ;;  %10262 = vst.msk [vmem:[#allocation3 + $0x90] sm:$0xff] %vm9859_vm4, %v21927_v14 }
 0x2f1   :  { %16023 = vmatmul.mubr.msk.f32.gmra.mrb[48].mxu0 %vm21_vm1, %v5862_v4  ;;  %10264 = vst.msk [vmem:[#allocation3 + $0xa0] sm:$0xff] %vm9859_vm4, %v21927_v14  ;;  %10266 = vst.msk [vmem:[#allocation3 + $0xb0] sm:$0xff] %vm9859_vm4, %v21927_v14  ;;  %v5869_v4 = vld [vmem:[#allocation2 + $0x302] sm:$0xff] }
 0x2f2   :  { %16025 = vmatprep.mubr.msk.f32.mxu0 %vm21_vm1, %v5863_v53  ;;  %10268 = vst.msk [vmem:[#allocation3 + $0xc0] sm:$0xff] %vm9859_vm4, %v21927_v14  ;;  %10270 = vst.msk [vmem:[#allocation3 + $0xd0] sm:$0xff] %vm9859_vm4, %v21927_v14  ;;  %v5870_v53 = vld [vmem:[#allocation2 + $0x30a] sm:$0xff] }
 0x2f3   :  { %10272 = vst.msk [vmem:[#allocation3 + $0xe0] sm:$0xff] %vm9859_vm4, %v21927_v14  ;;  %10274 = vst.msk [vmem:[#allocation3 + $0xf0] sm:$0xff] %vm9859_vm4, %v21927_v14 }
 0x2f4   :  { %10276 = vst.msk [vmem:[#allocation3 + $0x100] sm:$0xff] %vm9859_vm4, %v21927_v14  ;;  %10278 = vst.msk [vmem:[#allocation3 + $0x110] sm:$0xff] %vm9859_vm4, %v21927_v14 }
 0x2f5   :  { %16026 = vmatmul.mubr.msk.f32.gmra.mrb[50].mxu0 %vm21_vm1, %v5864_v55  ;;  %10280 = vst.msk [vmem:[#allocation3 + $0x120] sm:$0xff] %vm9859_vm4, %v21927_v14  ;;  %10282 = vst.msk [vmem:[#allocation3 + $0x130] sm:$0xff] %vm9859_vm4, %v21927_v14  ;;  %v5871_v55 = vld [vmem:[#allocation2 + $0x31a] sm:$0xff]  ;;  %v5876_v14 = vld [vmem:[#allocation2 + $0x352] sm:$0xff] }
 0x2f6   :  { %16028 = vmatprep.mubr.msk.f32.mxu0 %vm21_vm1, %v5865_v2  ;;  %v5872_v2 = vld [vmem:[#allocation2 + $0x322] sm:$0xff] }
 0x2f9   :  { %16029 = vmatmul.mubr.msk.f32.gmra.mrb[52].mxu0 %vm21_vm1, %v5866_v18  ;;  %v5873_v18 = vld [vmem:[#allocation2 + $0x332] sm:$0xff] }
 0x2fa   :  { %16031 = vmatprep.mubr.msk.f32.mxu0 %vm21_vm1, %v5867_v20  ;;  %v5874_v20 = vld [vmem:[#allocation2 + $0x33a] sm:$0xff] }
 0x2fd   :  { %16032 = vmatmul.mubr.msk.f32.gmra.mrb[54].mxu0 %vm21_vm1, %v5868_v43  ;;  %v17090_v43 = vmov 1983009808  }
 0x2fe   :  { %16034 = vmatprep.mubr.msk.f32.mxu0 %vm21_vm1, %v5869_v4  ;;  %v6724_v4 = vunpack.c.l.s4 %v17090_v43 }
 0x300   :  { %v6725_v39 = vunpack.c.0.s8 %v6724_v4 }
 0x301   :  { %16035 = vmatmul.mubr.msk.f32.gmra.mrb[56].mxu0 %vm21_vm1, %v5870_v53  ;;  %v6726_v53 = vlaneseq }
 0x302   :  { %16037 = vmatprep.mubr.msk.f32.mxu0 %vm21_vm1, %v5871_v55 }
 0x303   :  { %v6727_v55 = vshrl.u32 %v6726_v53, 7 }
 0x305   :  { %16038 = vmatmul.mubr.msk.f32.gmra.mrb[58].mxu0 %vm21_vm1, %v5872_v2  ;;  %v19206_v2 = vld [vmem:[%s21822_s2] ss:$0 sm:$0xff]  ;;  %v19211_v21 = vsub.s32 %v6725_v39, %v6727_v55 }
 0x306   :  { %16040 = vmatprep.mubr.msk.f32.mxu0 %vm21_vm1, %v5873_v18 }
 0x309   :  { %16041 = vmatmul.mubr.msk.f32.gmra.mrb[60].mxu0 %vm21_vm1, %v5874_v20 }
 0x30a   :  { %16043 = vmatprep.mubr.msk.f32.mxu0 %vm21_vm1, %v5875_v19 }
 0x30d   :  { %16044 = vmatmul.mubr.msk.f32.gmra.mrb[62].mxu0 %vm21_vm1, %v5876_v14 }
 0x364   :  { %v15952_v42 = vpop.f32.mrb[0].mxu0 }
 0x365   :  { %v16408_v18 = vadd.f32 %v15952_v42, %v18870_v38  ;;  %v6140_v10 = vpop.f32.mrb[1].mxu0 }
 0x366   :  { %v16409_v20 = vadd.f32 %v6140_v10, %v18872_v40 }
 0x367   :  { %v6531_v19 = vadd.f32 %v16408_v18, %v19206_v2 }
 0x368   :  { %v6530_v14 = vadd.f32 %v16409_v20, %v19206_v2  ;;  %v15955_v43 = vpop.f32.mrb[2].mxu0 }
 0x369   :  { %v6595_v4 = vmax.f32 %v6531_v19, 0.0  ;;  %v16410_v53 = vadd.f32 %v15955_v43, %v18876_v58  ;;  %v6150_v45 = vpop.f32.mrb[3].mxu0 }
 0x36a   :  { %v6594_v24 = vmax.f32 %v6530_v14, 0.0  ;;  %v16411_v34 = vadd.f32 %v6150_v45, %v18878_v7 }
 0x36b   :  { %v6739_v15 = vcombine.high %v6595_v4, %v6595_v4  ;;  %v6746_v38 = vrot.slane %v6595_v4, %v19211_v21  ;;  %v6533_v42 = vadd.f32 %v16410_v53, %v19206_v2 }
 0x36c   :  { %v6722_v40 = vcombine.high %v6594_v24, %v6594_v24  ;;  %v6729_v10 = vrot.slane %v6594_v24, %v19211_v21  ;;  %v19220_v39 = vadd.f32 %v16411_v34, %v19206_v2  ;;  %v19222_v55 = vpop.f32.mrb[4].mxu0 }
 0x36d   :  { %v6753_v18 = vrot.slane %v6739_v15, %v19211_v21  ;;  %v6754_v58 = vcombine.high %v6746_v38, %v6746_v38  ;;  %v8095_v20 = vsel %vm8066_vm3, %v6746_v38, -inf  ;;  %v19226_v19 = vmax.f32 %v6533_v42, 0.0  ;;  %v19228_v7 = vpop.f32.mrb[5].mxu0 }
 0x36e   :  { %v8096_v45 = vrot.slane %v8095_v20, 4  ;;  %v6736_v14 = vrot.slane %v6722_v40, %v19211_v21  ;;  %v6737_v43 = vcombine.high %v6729_v10, %v6729_v10  ;;  %v8067_v24 = vsel %vm8066_vm3, %v6729_v10, -inf }
 0x36f   :  { %v6755_v4 = vcombine.high %v6753_v18, %v6753_v18  ;;  %v8102_v34 = vsel %vm8066_vm3, %v6754_v58, -inf  ;;  %v8109_v53 = vsel %vm8066_vm3, %v6753_v18, -inf  ;;  %v8068_v56 = vrot.slane %v8067_v24, 4 }
 0x370   :  { %v8097_v15 = vmax.f32 %v8095_v20, %v8096_v45  ;;  %v8103_v1 = vrot.slane %v8102_v34, 4  ;;  %v8110_v22 = vrot.slane %v8109_v53, 4  ;;  %v6738_v38 = vcombine.high %v6736_v14, %v6736_v14  ;;  %v19234_v42 = vpop.f32.mrb[6].mxu0 }
 0x371   :  { %v8116_v46 = vsel %vm8066_vm3, %v6755_v4, -inf  ;;  %v8069_v32 = vmax.f32 %v8067_v24, %v8068_v56  ;;  %v8074_v40 = vsel %vm8066_vm3, %v6737_v43, -inf  ;;  %v8081_v13 = vsel %vm8066_vm3, %v6736_v14, -inf  ;;  %v19239_v10 = vpop.f32.mrb[7].mxu0 }
 0x372   :  { %v8098_v60 = vrot.slane %v8097_v15, 2  ;;  %v8104_v58 = vmax.f32 %v8102_v34, %v8103_v1  ;;  %v8111_v27 = vmax.f32 %v8109_v53, %v8110_v22  ;;  %v8117_v18 = vrot.slane %v8116_v46, 4 }
 0x373   :  { %v8070_v25 = vrot.slane %v8069_v32, 2  ;;  %v8075_v20 = vrot.slane %v8074_v40, 4  ;;  %v8082_v45 = vrot.slane %v8081_v13, 4  ;;  %v8088_v61 = vsel %vm8066_vm3, %v6738_v38, -inf }
 0x374   :  { %v8099_v54 = vmax.f32 %v8097_v15, %v8098_v60  ;;  %v8105_v31 = vrot.slane %v8104_v58, 2  ;;  %v8112_v30 = vrot.slane %v8111_v27, 2  ;;  %v8118_v4 = vmax.f32 %v8116_v46, %v8117_v18  ;;  %v19242_v56 = vpop.f32.mrb[8].mxu0 }
 0x375   :  { %v8071_v43 = vmax.f32 %v8069_v32, %v8070_v25  ;;  %v8076_v24 = vmax.f32 %v8074_v40, %v8075_v20  ;;  %v8083_v14 = vmax.f32 %v8081_v13, %v8082_v45  ;;  %v8089_v48 = vrot.slane %v8088_v61, 4  ;;  %v19244_v44 = vpop.f32.mrb[9].mxu0 }
 0x376   :  { %v8100_v1 = vrot.slane %v8099_v54, 1  ;;  %v8106_v22 = vmax.f32 %v8104_v58, %v8105_v31  ;;  %v8113_v34 = vmax.f32 %v8111_v27, %v8112_v30  ;;  %v8119_v53 = vrot.slane %v8118_v4, 2 }
 0x377   :  { %v8072_v12 = vrot.slane %v8071_v43, 1  ;;  %v8077_v16 = vrot.slane %v8076_v24, 2  ;;  %v8084_v9 = vrot.slane %v8083_v14, 2  ;;  %v8090_v38 = vmax.f32 %v8088_v61, %v8089_v48 }
 0x378   :  { %v8101_v60 = vmax.f32 %v8099_v54, %v8100_v1  ;;  %v8107_v15 = vrot.slane %v8106_v22, 1  ;;  %v8114_v3 = vrot.slane %v8113_v34, 1  ;;  %v8120_v46 = vmax.f32 %v8118_v4, %v8119_v53  ;;  %v19246_v18 = vpop.f32.mrb[10].mxu0 }
 0x379   :  { %v8073_v25 = vmax.f32 %v8071_v43, %v8072_v12  ;;  %v8078_v32 = vmax.f32 %v8076_v24, %v8077_v16  ;;  %v8085_v13 = vmax.f32 %v8083_v14, %v8084_v9  ;;  %v8091_v40 = vrot.slane %v8090_v38, 2  ;;  %v19248_v20 = vpop.f32.mrb[11].mxu0 }
 0x37a   :  { %v8108_v45 = vmax.f32 %v8106_v22, %v8107_v15  ;;  %v8115_v31 = vmax.f32 %v8113_v34, %v8114_v3  ;;  %v8121_v30 = vrot.slane %v8120_v46, 1  ;;  %v19251_v27 = vsel %vm9859_vm4, %v8101_v60, -inf }
 0x37b   :  { %v8079_v58 = vrot.slane %v8078_v32, 1  ;;  %v8086_v48 = vrot.slane %v8085_v13, 1  ;;  %v8092_v54 = vmax.f32 %v8090_v38, %v8091_v40  ;;  %v19254_v61 = vsel %vm9859_vm4, %v8073_v25, -inf }
 0x37c   :  { %v8122_v4 = vmax.f32 %v8120_v46, %v8121_v30  ;;  %v19257_v12 = vsel %vm9859_vm4, %v8108_v45, -inf  ;;  %v19260_v9 = vsel %vm9859_vm4, %v8115_v31, -inf  ;;  %v6773_v3 = vcombine.high %v19226_v19, %v19226_v19  ;;  %v19264_v16 = vpop.f32.mrb[12].mxu0 }
 0x37d   :  { %v8080_v43 = vmax.f32 %v8078_v32, %v8079_v58  ;;  %v8087_v24 = vmax.f32 %v8085_v13, %v8086_v48  ;;  %v8093_v14 = vrot.slane %v8092_v54, 1  ;;  %v6780_v1 = vrot.slane %v19226_v19, %v19211_v21  ;;  %v19268_v22 = vpop.f32.mrb[13].mxu0 }
 0x37e   :  { %v19271_v34 = vsel %vm9859_vm4, %v8122_v4, -inf  ;;  %v6787_v53 = vrot.slane %v6773_v3, %v19211_v21  ;;  %v6596_v38 = vmax.f32 %v19220_v39, 0.0  ;;  %v16412_v60 = vadd.f32 %v19222_v55, %v18882_v28 }
 0x37f   :  { %v8094_v15 = vmax.f32 %v8092_v54, %v8093_v14  ;;  %v19278_v46 = vsel %vm9859_vm4, %v8080_v43, -inf  ;;  %v19281_v25 = vsel %vm9859_vm4, %v8087_v24, -inf  ;;  %v6788_v19 = vcombine.high %v6780_v1, %v6780_v1 }
 0x380   :  { %v6789_v32 = vcombine.high %v6787_v53, %v6787_v53  ;;  %v8151_v13 = vsel %vm8066_vm3, %v6780_v1, -inf  ;;  %v8165_v40 = vsel %vm8066_vm3, %v6787_v53, -inf  ;;  %v6756_v45 = vcombine.high %v6596_v38, %v6596_v38  ;;  %v19285_v31 = vpop.f32.mrb[14].mxu0 }
 0x381   :  { %v19288_v39 = vsel %vm9859_vm4, %v8094_v15, -inf  ;;  %v8152_v28 = vrot.slane %v8151_v13, 4  ;;  %v8158_v55 = vsel %vm8066_vm3, %v6788_v19, -inf  ;;  %v8166_v30 = vrot.slane %v8165_v40, 4  ;;  %v19291_v58 = vpop.f32.mrb[15].mxu0 }
 0x382   :  { %21928 = vst [vmem:[#allocation55_spill] sm:$0xff] %v19291_v58  ;;  %v8159_v48 = vrot.slane %v8158_v55, 4  ;;  %v8172_v54 = vsel %vm8066_vm3, %v6789_v32, -inf  ;;  %v6763_v4 = vrot.slane %v6596_v38, %v19211_v21  ;;  %v6770_v3 = vrot.slane %v6756_v45, %v19211_v21 }
 0x383   :  { %v8153_v43 = vmax.f32 %v8151_v13, %v8152_v28  ;;  %v8167_v24 = vmax.f32 %v8165_v40, %v8166_v30  ;;  %v8173_v14 = vrot.slane %v8172_v54, 4  ;;  %v6535_v1 = vadd.f32 %v16412_v60, %v19206_v2 }
 0x384   :  { %v8160_v53 = vmax.f32 %v8158_v55, %v8159_v48  ;;  %v6771_v15 = vcombine.high %v6763_v4, %v6763_v4  ;;  %v6772_v37 = vcombine.high %v6770_v3, %v6770_v3  ;;  %v8123_v19 = vsel %vm8066_vm3, %v6763_v4, -inf  ;;  %v19298_v33 = vpop.f32.mrb[16].mxu0 }
 0x385   :  { %21929 = vst [vmem:[#allocation56_spill] sm:$0xff] %v19298_v33  ;;  %v8154_v52 = vrot.slane %v8153_v43, 2  ;;  %v8168_v26 = vrot.slane %v8167_v24, 2  ;;  %v8174_v0 = vmax.f32 %v8172_v54, %v8173_v14  ;;  %v8124_v32 = vrot.slane %v8123_v19, 4 }
 0x386   :  { %v8161_v50 = vrot.slane %v8160_v53, 2  ;;  %v8130_v38 = vsel %vm8066_vm3, %v6771_v15, -inf  ;;  %v8137_v13 = vsel %vm8066_vm3, %v6770_v3, -inf  ;;  %v8144_v40 = vsel %vm8066_vm3, %v6772_v37, -inf }
 0x387   :  { %v8155_v45 = vmax.f32 %v8153_v43, %v8154_v52  ;;  %v8169_v60 = vmax.f32 %v8167_v24, %v8168_v26  ;;  %v8175_v28 = vrot.slane %v8174_v0, 2  ;;  %v8125_v55 = vmax.f32 %v8123_v19, %v8124_v32 }
 0x388   :  { %v8162_v30 = vmax.f32 %v8160_v53, %v8161_v50  ;;  %v8131_v48 = vrot.slane %v8130_v38, 4  ;;  %v8138_v4 = vrot.slane %v8137_v13, 4  ;;  %v8145_v11 = vrot.slane %v8144_v40, 4 }
 0x389   :  { %v8156_v36 = vrot.slane %v8155_v45, 1  ;;  %v8170_v5 = vrot.slane %v8169_v60, 1  ;;  %v8176_v51 = vmax.f32 %v8174_v0, %v8175_v28  ;;  %v8126_v54 = vrot.slane %v8125_v55, 2 }
 0x38a   :  { %v8163_v14 = vrot.slane %v8162_v30, 1  ;;  %v8132_v8 = vmax.f32 %v8130_v38, %v8131_v48  ;;  %v8139_v33 = vmax.f32 %v8137_v13, %v8138_v4  ;;  %v8146_v15 = vmax.f32 %v8144_v40, %v8145_v11  ;;  %v19311_v38 = vpop.f32.mrb[17].mxu0 }
 0x38b   :  { %v8157_v62 = vmax.f32 %v8155_v45, %v8156_v36  ;;  %v8171_v3 = vmax.f32 %v8169_v60, %v8170_v5  ;;  %v8177_v58 = vrot.slane %v8176_v51, 1  ;;  %v8127_v37 = vmax.f32 %v8125_v55, %v8126_v54 }
 0x38c   :  { %v8164_v52 = vmax.f32 %v8162_v30, %v8163_v14  ;;  %v8133_v26 = vrot.slane %v8132_v8, 2  ;;  %v8140_v43 = vrot.slane %v8139_v33, 2  ;;  %v8147_v24 = vrot.slane %v8146_v15, 2 }
 0x38d   :  { %v8178_v50 = vmax.f32 %v8176_v51, %v8177_v58  ;;  %v9873_v53 = vsel %vm9859_vm4, %v8157_v62, -inf  ;;  %v19305_v19 = vsel %vm9859_vm4, %v8171_v3, -inf  ;;  %v8128_v0 = vrot.slane %v8127_v37, 1 }
 0x38e   :  { %v9874_v32 = vmax.f32 %v19251_v27, %v9873_v53  ;;  %v9876_v36 = vsel %vm9859_vm4, %v8164_v52, -inf  ;;  %v9880_v5 = vmax.f32 %v19260_v9, %v19305_v19  ;;  %v8134_v11 = vmax.f32 %v8132_v8, %v8133_v26 }
 0x38f   :  { %v9877_v51 = vmax.f32 %v19257_v12, %v9876_v36  ;;  %v9882_v62 = vsel %vm9859_vm4, %v8178_v50, -inf  ;;  %v8129_v58 = vmax.f32 %v8127_v37, %v8128_v0  ;;  %v8141_v13 = vmax.f32 %v8139_v33, %v8140_v43 }
 0x390   :  { %v9883_v40 = vmax.f32 %v19271_v34, %v9882_v62  ;;  %v8135_v45 = vrot.slane %v8134_v11, 1  ;;  %v8148_v27 = vmax.f32 %v8146_v15, %v8147_v24  ;;  %v6599_v60 = vmax.f32 %v6535_v1, 0.0 }
 0x391   :  { %v8142_v28 = vrot.slane %v8141_v13, 1  ;;  %v9861_v9 = vsel %vm9859_vm4, %v8129_v58, -inf  ;;  %v16413_v8 = vadd.f32 %v19228_v7, %v18884_v59  ;;  %v16414_v12 = vadd.f32 %v19234_v42, %v18888_v35 }
 0x392   :  { %v8136_v55 = vmax.f32 %v8134_v11, %v8135_v45  ;;  %v8149_v30 = vrot.slane %v8148_v27, 1  ;;  %v9862_v33 = vmax.f32 %v19254_v61, %v9861_v9  ;;  %v6807_v34 = vcombine.high %v6599_v60, %v6599_v60 }
 0x393   :  { %v8143_v48 = vmax.f32 %v8141_v13, %v8142_v28  ;;  %v6814_v4 = vrot.slane %v6599_v60, %v19211_v21  ;;  %v6534_v1 = vadd.f32 %v16413_v8, %v19206_v2  ;;  %v6537_v54 = vadd.f32 %v16414_v12, %v19206_v2 }
 0x394   :  { %v8150_v14 = vmax.f32 %v8148_v27, %v8149_v30  ;;  %v9864_v15 = vsel %vm9859_vm4, %v8136_v55, -inf  ;;  %v6821_v59 = vrot.slane %v6807_v34, %v19211_v21  ;;  %v19329_v35 = vadd.f32 %v19239_v10, %v18890_v41 }
 0x395   :  { %v9865_v7 = vmax.f32 %v19278_v46, %v9864_v15  ;;  %v9867_v42 = vsel %vm9859_vm4, %v8143_v48, -inf  ;;  %v6822_v61 = vcombine.high %v6814_v4, %v6814_v4  ;;  %v8207_v3 = vsel %vm8066_vm3, %v6814_v4, -inf }
 0x396   :  { %v9868_v37 = vmax.f32 %v19281_v25, %v9867_v42  ;;  %v9870_v52 = vsel %vm9859_vm4, %v8150_v14, -inf  ;;  %v6823_v26 = vcombine.high %v6821_v59, %v6821_v59  ;;  %v8208_v43 = vrot.slane %v8207_v3, 4  ;;  %v19351_v14 = vpop.f32.mrb[18].mxu0 }
 0x397   :  { %v9871_v24 = vmax.f32 %v19288_v39, %v9870_v52  ;;  %v10413_v50 = vsel %vm10412_vm5, %v9865_v7, %v9862_v33  ;;  %v8214_v41 = vsel %vm8066_vm3, %v6822_v61, -inf  ;;  %v8221_v10 = vsel %vm8066_vm3, %v6821_v59, -inf }
 0x398   :  { %v10415_v46 = vsel %vm10414_vm6, %v9868_v37, %v10413_v50  ;;  %v8209_v53 = vmax.f32 %v8207_v3, %v8208_v43  ;;  %v8215_v19 = vrot.slane %v8214_v41, 4  ;;  %v8222_v0 = vrot.slane %v8221_v10, 4 }
 0x399   :  { %v10417_v36 = vsel %vm10416_vm7, %v9871_v24, %v10415_v46  ;;  %v8228_v25 = vsel %vm8066_vm3, %v6823_v26, -inf  ;;  %v6598_v11 = vmax.f32 %v6534_v1, 0.0  ;;  %v6601_v62 = vmax.f32 %v6537_v54, 0.0  ;;  %v19356_v24 = vpop.f32.mrb[19].mxu0 }
 0x39a   :  { %v10419_v58 = vsel %vm10418_vm8, %v9874_v32, %v10417_v36  ;;  %v8210_v39 = vrot.slane %v8209_v53, 2  ;;  %v8216_v13 = vmax.f32 %v8214_v41, %v8215_v19  ;;  %v8223_v45 = vmax.f32 %v8221_v10, %v8222_v0 }
 0x39b   :  { %v10421_v27 = vsel %vm10420_vm9, %v9877_v51, %v10419_v58  ;;  %v8229_v60 = vrot.slane %v8228_v25, 4  ;;  %v6790_v28 = vcombine.high %v6598_v11, %v6598_v11  ;;  %v6797_v9 = vrot.slane %v6598_v11, %v19211_v21 }
 0x39c   :  { %v10423_v8 = vsel %vm10422_vm10, %v9880_v5, %v10421_v27  ;;  %v8211_v12 = vmax.f32 %v8209_v53, %v8210_v39  ;;  %v8217_v55 = vrot.slane %v8216_v13, 2  ;;  %v8224_v30 = vrot.slane %v8223_v45, 2 }
 0x39d   :  { %v10425_v33 = vsel %vm10424_vm11, %v9883_v40, %v10423_v8  ;;  %v8230_v34 = vmax.f32 %v8228_v25, %v8229_v60  ;;  %v6804_v48 = vrot.slane %v6790_v28, %v19211_v21  ;;  %v6805_v32 = vcombine.high %v6797_v9, %v6797_v9 }
 0x39e   :  { %10548 = vst.msk [vmem:[#allocation3 + $0x11] sm:$0xff] %vm9859_vm4, %v10425_v33  ;;  %v8212_v4 = vrot.slane %v8211_v12, 1  ;;  %v8218_v1 = vmax.f32 %v8216_v13, %v8217_v55  ;;  %v8225_v51 = vmax.f32 %v8223_v45, %v8224_v30  ;;  %v8179_v54 = vsel %vm8066_vm3, %v6797_v9, -inf }
 0x39f   :  { %v8231_v15 = vrot.slane %v8230_v34, 2  ;;  %v6806_v5 = vcombine.high %v6804_v48, %v6804_v48  ;;  %v8180_v59 = vrot.slane %v8179_v54, 4  ;;  %v8186_v7 = vsel %vm8066_vm3, %v6805_v32, -inf }
 0x3a0   :  { %v8213_v42 = vmax.f32 %v8211_v12, %v8212_v4  ;;  %v8219_v40 = vrot.slane %v8218_v1, 1  ;;  %v8226_v61 = vrot.slane %v8225_v51, 1  ;;  %v8187_v3 = vrot.slane %v8186_v7, 4 }
 0x3a1   :  { %v8232_v37 = vmax.f32 %v8230_v34, %v8231_v15  ;;  %v8181_v52 = vmax.f32 %v8179_v54, %v8180_v59  ;;  %v8193_v26 = vsel %vm8066_vm3, %v6804_v48, -inf  ;;  %v8200_v43 = vsel %vm8066_vm3, %v6806_v5, -inf }
 0x3a2   :  { %v8220_v50 = vmax.f32 %v8218_v1, %v8219_v40  ;;  %v8227_v41 = vmax.f32 %v8225_v51, %v8226_v61  ;;  %v19359_v10 = vsel %vm9859_vm4, %v8213_v42, -inf  ;;  %v8188_v46 = vmax.f32 %v8186_v7, %v8187_v3 }
 0x3a3   :  { %v8233_v53 = vrot.slane %v8232_v37, 1  ;;  %v8182_v19 = vrot.slane %v8181_v52, 2  ;;  %v8194_v0 = vrot.slane %v8193_v26, 4  ;;  %v8201_v36 = vrot.slane %v8200_v43, 4 }
 0x3a4   :  { %v19362_v25 = vsel %vm9859_vm4, %v8220_v50, -inf  ;;  %v19365_v11 = vsel %vm9859_vm4, %v8227_v41, -inf  ;;  %v8189_v58 = vrot.slane %v8188_v46, 2  ;;  %v6841_v39 = vcombine.high %v6601_v62, %v6601_v62 }
 0x3a5   :  { %v8234_v13 = vmax.f32 %v8232_v37, %v8233_v53  ;;  %v8183_v45 = vmax.f32 %v8181_v52, %v8182_v19  ;;  %v8195_v27 = vmax.f32 %v8193_v26, %v8194_v0  ;;  %v8202_v60 = vmax.f32 %v8200_v43, %v8201_v36 }
 0x3a6   :  { %v8190_v28 = vmax.f32 %v8188_v46, %v8189_v58  ;;  %v6848_v9 = vrot.slane %v6601_v62, %v19211_v21  ;;  %v6855_v8 = vrot.slane %v6841_v39, %v19211_v21  ;;  %v6536_v12 = vadd.f32 %v19329_v35, %v19206_v2 }
 0x3a7   :  { %v19372_v55 = vsel %vm9859_vm4, %v8234_v13, -inf  ;;  %v8184_v30 = vrot.slane %v8183_v45, 1  ;;  %v8196_v33 = vrot.slane %v8195_v27, 2  ;;  %v8203_v34 = vrot.slane %v8202_v60, 2 }
 0x3a8   :  { %v8191_v48 = vrot.slane %v8190_v28, 1  ;;  %v6856_v32 = vcombine.high %v6848_v9, %v6848_v9  ;;  %v6857_v4 = vcombine.high %v6855_v8, %v6855_v8  ;;  %v8263_v1 = vsel %vm8066_vm3, %v6848_v9, -inf }
 0x3a9   :  { %v8185_v51 = vmax.f32 %v8183_v45, %v8184_v30  ;;  %v8197_v54 = vmax.f32 %v8195_v27, %v8196_v33  ;;  %v8204_v15 = vmax.f32 %v8202_v60, %v8203_v34  ;;  %v8264_v62 = vrot.slane %v8263_v1, 4 }
 0x3aa   :  { %v8192_v5 = vmax.f32 %v8190_v28, %v8191_v48  ;;  %v8270_v59 = vsel %vm8066_vm3, %v6856_v32, -inf  ;;  %v8277_v35 = vsel %vm8066_vm3, %v6855_v8, -inf  ;;  %v8284_v7 = vsel %vm8066_vm3, %v6857_v4, -inf }
 0x3ab   :  { %v8198_v42 = vrot.slane %v8197_v54, 1  ;;  %v8205_v40 = vrot.slane %v8204_v15, 1  ;;  %v19379_v61 = vsel %vm9859_vm4, %v8185_v51, -inf  ;;  %v8265_v3 = vmax.f32 %v8263_v1, %v8264_v62 }
 0x3ac   :  { %v19382_v37 = vsel %vm9859_vm4, %v8192_v5, -inf  ;;  %v8271_v52 = vrot.slane %v8270_v59, 4  ;;  %v8278_v26 = vrot.slane %v8277_v35, 4  ;;  %v8285_v43 = vrot.slane %v8284_v7, 4 }
 0x3ad   :  { %v8199_v50 = vmax.f32 %v8197_v54, %v8198_v42  ;;  %v8206_v41 = vmax.f32 %v8204_v15, %v8205_v40  ;;  %v8266_v46 = vrot.slane %v8265_v3, 2  ;;  %v6600_v53 = vmax.f32 %v6536_v12, 0.0 }
 0x3ae   :  { %v8272_v19 = vmax.f32 %v8270_v59, %v8271_v52  ;;  %v8279_v0 = vmax.f32 %v8277_v35, %v8278_v26  ;;  %v8286_v36 = vmax.f32 %v8284_v7, %v8285_v43  ;;  %v16416_v58 = vadd.f32 %v19242_v56, %v18894_v47 }
 0x3af   :  { %v19387_v39 = vsel %vm9859_vm4, %v8199_v50, -inf  ;;  %v19390_v13 = vsel %vm9859_vm4, %v8206_v41, -inf  ;;  %v8267_v45 = vmax.f32 %v8265_v3, %v8266_v46  ;;  %v6824_v27 = vcombine.high %v6600_v53, %v6600_v53 }
 0x3b0   :  { %v8273_v60 = vrot.slane %v8272_v19, 2  ;;  %v8280_v28 = vrot.slane %v8279_v0, 2  ;;  %v8287_v9 = vrot.slane %v8286_v36, 2  ;;  %v6831_v8 = vrot.slane %v6600_v53, %v19211_v21 }
 0x3b1   :  { %v8268_v12 = vrot.slane %v8267_v45, 1  ;;  %v6838_v30 = vrot.slane %v6824_v27, %v19211_v21  ;;  %v6539_v33 = vadd.f32 %v16416_v58, %v19206_v2  ;;  %v16417_v47 = vadd.f32 %v19244_v44, %v18896_v49 }
 0x3b2   :  { %v8274_v56 = vmax.f32 %v8272_v19, %v8273_v60  ;;  %v8281_v34 = vmax.f32 %v8279_v0, %v8280_v28  ;;  %v8288_v48 = vmax.f32 %v8286_v36, %v8287_v9  ;;  %v6839_v32 = vcombine.high %v6831_v8, %v6831_v8  ;;  %v19415_v36 = vpop.f32.mrb[20].mxu0 }
 0x3b3   :  { %v8269_v4 = vmax.f32 %v8267_v45, %v8268_v12  ;;  %v6840_v1 = vcombine.high %v6838_v30, %v6838_v30  ;;  %v8235_v51 = vsel %vm8066_vm3, %v6831_v8, -inf  ;;  %v8249_v54 = vsel %vm8066_vm3, %v6838_v30, -inf  ;;  %v19423_v28 = vpop.f32.mrb[21].mxu0 }
 0x3b4   :  { %v8275_v15 = vrot.slane %v8274_v56, 1  ;;  %v8282_v62 = vrot.slane %v8281_v34, 1  ;;  %v8289_v5 = vrot.slane %v8288_v48, 1  ;;  %v8236_v59 = vrot.slane %v8235_v51, 4 }
 0x3b5   :  { %v19400_v35 = vsel %vm9859_vm4, %v8269_v4, -inf  ;;  %v8242_v7 = vsel %vm8066_vm3, %v6839_v32, -inf  ;;  %v8250_v49 = vrot.slane %v8249_v54, 4  ;;  %v8256_v44 = vsel %vm8066_vm3, %v6840_v1, -inf }
 0x3b6   :  { %v8276_v42 = vmax.f32 %v8274_v56, %v8275_v15  ;;  %v8283_v40 = vmax.f32 %v8281_v34, %v8282_v62  ;;  %v8290_v3 = vmax.f32 %v8288_v48, %v8289_v5  ;;  %v9898_v52 = vmax.f32 %v19359_v10, %v19400_v35 }
 0x3b7   :  { %v8237_v26 = vmax.f32 %v8235_v51, %v8236_v59  ;;  %v8243_v43 = vrot.slane %v8242_v7, 4  ;;  %v8251_v50 = vmax.f32 %v8249_v54, %v8250_v49  ;;  %v8257_v41 = vrot.slane %v8256_v44, 4 }
 0x3b8   :  { %v19407_v46 = vsel %vm9859_vm4, %v8276_v42, -inf  ;;  %v19410_v53 = vsel %vm9859_vm4, %v8283_v40, -inf  ;;  %v19413_v19 = vsel %vm9859_vm4, %v8290_v3, -inf  ;;  %v6603_v0 = vmax.f32 %v6539_v33, 0.0 }
 0x3b9   :  { %v9901_v58 = vmax.f32 %v19362_v25, %v19407_v46  ;;  %v9904_v45 = vmax.f32 %v19365_v11, %v19410_v53  ;;  %v9907_v27 = vmax.f32 %v19372_v55, %v19413_v19  ;;  %v8238_v60 = vrot.slane %v8237_v26, 2 }
 0x3ba   :  { %v8244_v9 = vmax.f32 %v8242_v7, %v8243_v43  ;;  %v8252_v8 = vrot.slane %v8251_v50, 2  ;;  %v8258_v12 = vmax.f32 %v8256_v44, %v8257_v41  ;;  %v6875_v30 = vcombine.high %v6603_v0, %v6603_v0 }
 0x3bb   :  { %v8239_v56 = vmax.f32 %v8237_v26, %v8238_v60  ;;  %v6882_v33 = vrot.slane %v6603_v0, %v19211_v21  ;;  %v6538_v34 = vadd.f32 %v16417_v47, %v19206_v2  ;;  %v16418_v48 = vadd.f32 %v19246_v18, %v18900_v6 }
 0x3bc   :  { %v8245_v32 = vrot.slane %v8244_v9, 2  ;;  %v8253_v4 = vmax.f32 %v8251_v50, %v8252_v8  ;;  %v8259_v1 = vrot.slane %v8258_v12, 2  ;;  %v6889_v51 = vrot.slane %v6875_v30, %v19211_v21 }
 0x3bd   :  { %v8240_v54 = vrot.slane %v8239_v56, 1  ;;  %v6890_v15 = vcombine.high %v6882_v33, %v6882_v33  ;;  %v8319_v62 = vsel %vm8066_vm3, %v6882_v33, -inf  ;;  %v6602_v5 = vmax.f32 %v6538_v34, 0.0 }
 0x3be   :  { %v8246_v59 = vmax.f32 %v8244_v9, %v8245_v32  ;;  %v8254_v7 = vrot.slane %v8253_v4, 1  ;;  %v8260_v49 = vmax.f32 %v8258_v12, %v8259_v1  ;;  %v6891_v44 = vcombine.high %v6889_v51, %v6889_v51 }
 0x3bf   :  { %v8241_v42 = vmax.f32 %v8239_v56, %v8240_v54  ;;  %v8320_v40 = vrot.slane %v8319_v62, 4  ;;  %v8326_v47 = vsel %vm8066_vm3, %v6890_v15, -inf  ;;  %v8333_v6 = vsel %vm8066_vm3, %v6889_v51, -inf }
 0x3c0   :  { %v8247_v18 = vrot.slane %v8246_v59, 1  ;;  %v8255_v3 = vmax.f32 %v8253_v4, %v8254_v7  ;;  %v8261_v26 = vrot.slane %v8260_v49, 1  ;;  %v8327_v43 = vrot.slane %v8326_v47, 4 }
 0x3c1   :  { %v9885_v50 = vsel %vm9859_vm4, %v8241_v42, -inf  ;;  %v8321_v41 = vmax.f32 %v8319_v62, %v8320_v40  ;;  %v8334_v0 = vrot.slane %v8333_v6, 4  ;;  %v8340_v60 = vsel %vm8066_vm3, %v6891_v44, -inf }
 0x3c2   :  { %v8248_v9 = vmax.f32 %v8246_v59, %v8247_v18  ;;  %v8262_v8 = vmax.f32 %v8260_v49, %v8261_v26  ;;  %v9886_v12 = vmax.f32 %v19379_v61, %v9885_v50  ;;  %v9891_v30 = vsel %vm9859_vm4, %v8255_v3, -inf }
 0x3c3   :  { %v9892_v56 = vmax.f32 %v19387_v39, %v9891_v30  ;;  %v8322_v33 = vrot.slane %v8321_v41, 2  ;;  %v8328_v34 = vmax.f32 %v8326_v47, %v8327_v43  ;;  %v8335_v32 = vmax.f32 %v8333_v6, %v8334_v0  ;;  %v19448_v0 = vpop.f32.mrb[22].mxu0 }
 0x3c4   :  { %v9888_v4 = vsel %vm9859_vm4, %v8248_v9, -inf  ;;  %v9894_v1 = vsel %vm9859_vm4, %v8262_v8, -inf  ;;  %v8341_v51 = vrot.slane %v8340_v60, 4  ;;  %v6858_v54 = vcombine.high %v6602_v5, %v6602_v5 }
 0x3c5   :  { %v9889_v15 = vmax.f32 %v19382_v37, %v9888_v4  ;;  %v9895_v62 = vmax.f32 %v19390_v13, %v9894_v1  ;;  %v8323_v59 = vmax.f32 %v8321_v41, %v8322_v33  ;;  %v8329_v7 = vrot.slane %v8328_v34, 2 }
 0x3c6   :  { %v8336_v61 = vrot.slane %v8335_v32, 2  ;;  %v8342_v49 = vmax.f32 %v8340_v60, %v8341_v51  ;;  %v6865_v44 = vrot.slane %v6602_v5, %v19211_v21  ;;  %v6872_v39 = vrot.slane %v6858_v54, %v19211_v21 }
 0x3c7   :  { %v10426_v42 = vsel %vm10412_vm5, %v9889_v15, %v9886_v12  ;;  %v8324_v40 = vrot.slane %v8323_v59, 1  ;;  %v8330_v47 = vmax.f32 %v8328_v34, %v8329_v7  ;;  %v6541_v6 = vadd.f32 %v16418_v48, %v19206_v2 }
 0x3c8   :  { %v10427_v18 = vsel %vm10414_vm6, %v9892_v56, %v10426_v42  ;;  %v8337_v3 = vmax.f32 %v8335_v32, %v8336_v61  ;;  %v8343_v37 = vrot.slane %v8342_v49, 2  ;;  %v6873_v26 = vcombine.high %v6865_v44, %v6865_v44 }
 0x3c9   :  { %v10428_v13 = vsel %vm10416_vm7, %v9895_v62, %v10427_v18  ;;  %v8325_v43 = vmax.f32 %v8323_v59, %v8324_v40  ;;  %v8331_v50 = vrot.slane %v8330_v47, 1  ;;  %v6874_v41 = vcombine.high %v6872_v39, %v6872_v39 }
 0x3ca   :  { %v10429_v5 = vsel %vm10418_vm8, %v9898_v52, %v10428_v13  ;;  %v8338_v60 = vrot.slane %v8337_v3, 1  ;;  %v8344_v9 = vmax.f32 %v8342_v49, %v8343_v37  ;;  %v8291_v48 = vsel %vm8066_vm3, %v6865_v44, -inf }
 0x3cb   :  { %v10430_v8 = vsel %vm10420_vm9, %v9901_v58, %v10429_v5  ;;  %v8332_v12 = vmax.f32 %v8330_v47, %v8331_v50  ;;  %v19460_v30 = vsel %vm9859_vm4, %v8325_v43, -inf  ;;  %v8292_v56 = vrot.slane %v8291_v48, 4 }
 0x3cc   :  { %v10431_v10 = vsel %vm10422_vm10, %v9904_v45, %v10430_v8  ;;  %v8339_v35 = vmax.f32 %v8337_v3, %v8338_v60  ;;  %v8345_v52 = vrot.slane %v8344_v9, 1  ;;  %v8298_v33 = vsel %vm8066_vm3, %v6873_v26, -inf  ;;  %v19492_v3 = vpop.f32.mrb[23].mxu0 }
 0x3cd   :  { %v10432_v25 = vsel %vm10424_vm11, %v9907_v27, %v10431_v10  ;;  %v19472_v46 = vsel %vm9859_vm4, %v8332_v12, -inf  ;;  %v8293_v58 = vmax.f32 %v8291_v48, %v8292_v56  ;;  %v8299_v34 = vrot.slane %v8298_v33, 4 }
 0x3ce   :  { %10549 = vst.msk [vmem:[#allocation3 + $0x21] sm:$0xff] %vm9859_vm4, %v10432_v25  ;;  %v8346_v32 = vmax.f32 %v8344_v9, %v8345_v52  ;;  %v19476_v11 = vsel %vm9859_vm4, %v8339_v35, -inf  ;;  %v8305_v53 = vsel %vm8066_vm3, %v6872_v39, -inf  ;;  %v8312_v45 = vsel %vm8066_vm3, %v6874_v41, -inf }
 0x3cf   :  { %v8294_v4 = vrot.slane %v8293_v58, 2  ;;  %v8300_v1 = vmax.f32 %v8298_v33, %v8299_v34  ;;  %v8306_v55 = vrot.slane %v8305_v53, 4  ;;  %v8313_v19 = vrot.slane %v8312_v45, 4  ;;  %v10584_v34 = vld [vmem:[#allocation3 + $0x1] sm:$0xff] }
 0x3d0   :  { %v19481_v27 = vsel %vm9859_vm4, %v8346_v32, -inf  ;;  %v6605_v51 = vmax.f32 %v6541_v6, 0.0  ;;  %v16419_v54 = vadd.f32 %v19248_v20, %v18902_v17  ;;  %v16420_v15 = vadd.f32 %v19264_v16, %v18906_v63  ;;  %16054 = vmatprep.mubr.msk.f32.mxu1 %vm9859_vm4, %v10584_v34 }
 0x3d1   :  { %v8295_v62 = vmax.f32 %v8293_v58, %v8294_v4  ;;  %v8301_v59 = vrot.slane %v8300_v1, 2  ;;  %v8307_v7 = vmax.f32 %v8305_v53, %v8306_v55  ;;  %v8314_v61 = vmax.f32 %v8312_v45, %v8313_v19 }
 0x3d2   :  { %v6909_v49 = vcombine.high %v6605_v51, %v6605_v51  ;;  %v6916_v44 = vrot.slane %v6605_v51, %v19211_v21  ;;  %v6540_v39 = vadd.f32 %v16419_v54, %v19206_v2  ;;  %v6543_v42 = vadd.f32 %v16420_v15, %v19206_v2 }
 0x3d3   :  { %v8296_v40 = vrot.slane %v8295_v62, 1  ;;  %v8302_v47 = vmax.f32 %v8300_v1, %v8301_v59  ;;  %v8308_v6 = vrot.slane %v8307_v7, 2  ;;  %v8315_v18 = vrot.slane %v8314_v61, 2 }
 0x3d4   :  { %v6923_v17 = vrot.slane %v6909_v49, %v19211_v21  ;;  %v6924_v20 = vcombine.high %v6916_v44, %v6916_v44  ;;  %v8375_v63 = vsel %vm8066_vm3, %v6916_v44, -inf  ;;  %v6604_v16 = vmax.f32 %v6540_v39, 0.0 }
 0x3d5   :  { %v8297_v37 = vmax.f32 %v8295_v62, %v8296_v40  ;;  %v8303_v26 = vrot.slane %v8302_v47, 1  ;;  %v8309_v13 = vmax.f32 %v8307_v7, %v8308_v6  ;;  %v8316_v43 = vmax.f32 %v8314_v61, %v8315_v18  ;;  %v19512_v7 = vpop.f32.mrb[24].mxu0 }
 0x3d6   :  { %v6925_v50 = vcombine.high %v6923_v17, %v6923_v17  ;;  %v8376_v41 = vrot.slane %v8375_v63, 4  ;;  %v8382_v2 = vsel %vm8066_vm3, %v6924_v20, -inf  ;;  %v8389_v5 = vsel %vm8066_vm3, %v6923_v17, -inf }
 0x3d7   :  { %v8304_v60 = vmax.f32 %v8302_v47, %v8303_v26  ;;  %v8310_v9 = vrot.slane %v8309_v13, 1  ;;  %v8317_v48 = vrot.slane %v8316_v43, 1  ;;  %v19497_v8 = vsel %vm9859_vm4, %v8297_v37, -inf }
 0x3d8   :  { %v8377_v12 = vmax.f32 %v8375_v63, %v8376_v41  ;;  %v8383_v56 = vrot.slane %v8382_v2, 4  ;;  %v8390_v10 = vrot.slane %v8389_v5, 4  ;;  %v8396_v35 = vsel %vm8066_vm3, %v6925_v50, -inf }
 0x3d9   :  { %v8311_v52 = vmax.f32 %v8309_v13, %v8310_v9  ;;  %v8318_v33 = vmax.f32 %v8316_v43, %v8317_v48  ;;  %v19501_v25 = vsel %vm9859_vm4, %v8304_v60, -inf  ;;  %v8397_v58 = vrot.slane %v8396_v35, 4 }
 0x3da   :  { %v8378_v32 = vrot.slane %v8377_v12, 2  ;;  %v8384_v53 = vmax.f32 %v8382_v2, %v8383_v56  ;;  %v8391_v45 = vmax.f32 %v8389_v5, %v8390_v10  ;;  %v6892_v4 = vcombine.high %v6604_v16, %v6604_v16 }
 0x3db   :  { %v19505_v1 = vsel %vm9859_vm4, %v8311_v52, -inf  ;;  %v19508_v55 = vsel %vm9859_vm4, %v8318_v33, -inf  ;;  %v8398_v19 = vmax.f32 %v8396_v35, %v8397_v58  ;;  %v6899_v51 = vrot.slane %v6604_v16, %v19211_v21 }
 0x3dc   :  { %v8379_v54 = vmax.f32 %v8377_v12, %v8378_v32  ;;  %v8385_v15 = vrot.slane %v8384_v53, 2  ;;  %v8392_v62 = vrot.slane %v8391_v45, 2  ;;  %v6906_v59 = vrot.slane %v6892_v4, %v19211_v21 }
 0x3dd   :  { %v8399_v61 = vrot.slane %v8398_v19, 2  ;;  %v6907_v49 = vcombine.high %v6899_v51, %v6899_v51  ;;  %v8347_v44 = vsel %vm8066_vm3, %v6899_v51, -inf  ;;  %v6607_v39 = vmax.f32 %v6543_v42, 0.0 }
 0x3de   :  { %v8380_v40 = vrot.slane %v8379_v54, 1  ;;  %v8386_v47 = vmax.f32 %v8384_v53, %v8385_v15  ;;  %v8393_v6 = vmax.f32 %v8391_v45, %v8392_v62  ;;  %v6908_v18 = vcombine.high %v6906_v59, %v6906_v59 }
 0x3df   :  { %v8400_v17 = vmax.f32 %v8398_v19, %v8399_v61  ;;  %v8348_v20 = vrot.slane %v8347_v44, 4  ;;  %v8354_v63 = vsel %vm8066_vm3, %v6907_v49, -inf  ;;  %v8361_v16 = vsel %vm8066_vm3, %v6906_v59, -inf }
 0x3e0   :  { %v8381_v37 = vmax.f32 %v8379_v54, %v8380_v40  ;;  %v8387_v26 = vrot.slane %v8386_v47, 1  ;;  %v8394_v13 = vrot.slane %v8393_v6, 1  ;;  %v8355_v43 = vrot.slane %v8354_v63, 4 }
 0x3e1   :  { %v8401_v50 = vrot.slane %v8400_v17, 1  ;;  %v8349_v41 = vmax.f32 %v8347_v44, %v8348_v20  ;;  %v8362_v2 = vrot.slane %v8361_v16, 4  ;;  %v8368_v5 = vsel %vm8066_vm3, %v6908_v18, -inf }
 0x3e2   :  { %v8388_v42 = vmax.f32 %v8386_v47, %v8387_v26  ;;  %v8395_v60 = vmax.f32 %v8393_v6, %v8394_v13  ;;  %v19519_v9 = vsel %vm9859_vm4, %v8381_v37, -inf  ;;  %v8356_v48 = vmax.f32 %v8354_v63, %v8355_v43 }
 0x3e3   :  { %v8402_v12 = vmax.f32 %v8400_v17, %v8401_v50  ;;  %v9922_v56 = vmax.f32 %v19460_v30, %v19519_v9  ;;  %v8350_v10 = vrot.slane %v8349_v41, 2  ;;  %v8363_v35 = vmax.f32 %v8361_v16, %v8362_v2  ;;  %v19545_v16 = vpop.f32.mrb[25].mxu0 }
 0x3e4   :  { %v19524_v52 = vsel %vm9859_vm4, %v8388_v42, -inf  ;;  %v19527_v33 = vsel %vm9859_vm4, %v8395_v60, -inf  ;;  %v8357_v58 = vrot.slane %v8356_v48, 2  ;;  %v8369_v34 = vrot.slane %v8368_v5, 4 }
 0x3e5   :  { %v9925_v32 = vmax.f32 %v19472_v46, %v19524_v52  ;;  %v9928_v53 = vmax.f32 %v19476_v11, %v19527_v33  ;;  %v19534_v45 = vsel %vm9859_vm4, %v8402_v12, -inf  ;;  %v8351_v4 = vmax.f32 %v8349_v41, %v8350_v10 }
 0x3e6   :  { %v9931_v19 = vmax.f32 %v19481_v27, %v19534_v45  ;;  %v8358_v51 = vmax.f32 %v8356_v48, %v8357_v58  ;;  %v8364_v54 = vrot.slane %v8363_v35, 2  ;;  %v8370_v15 = vmax.f32 %v8368_v5, %v8369_v34  ;;  %v19558_v58 = vld [vmem:[%s21822_s2] ss:$0 sm:$0xff] }
 0x3e7   :  { %v8352_v62 = vrot.slane %v8351_v4, 1  ;;  %v6943_v59 = vcombine.high %v6607_v39, %v6607_v39  ;;  %v6950_v61 = vrot.slane %v6607_v39, %v19211_v21  ;;  %v16421_v49 = vadd.f32 %v19268_v22, %v18908_v23 }
 0x3e8   :  { %v8359_v44 = vrot.slane %v8358_v51, 1  ;;  %v8365_v40 = vmax.f32 %v8363_v35, %v8364_v54  ;;  %v8371_v47 = vrot.slane %v8370_v15, 2  ;;  %v16422_v6 = vadd.f32 %v19285_v31, %v18912_v29 }
 0x3e9   :  { %v8353_v18 = vmax.f32 %v8351_v4, %v8352_v62  ;;  %v6957_v17 = vrot.slane %v6943_v59, %v19211_v21  ;;  %v6958_v20 = vcombine.high %v6950_v61, %v6950_v61  ;;  %v8431_v63 = vsel %vm8066_vm3, %v6950_v61, -inf }
 0x3ea   :  { %v8360_v37 = vmax.f32 %v8358_v51, %v8359_v44  ;;  %v8366_v26 = vrot.slane %v8365_v40, 1  ;;  %v8372_v39 = vmax.f32 %v8370_v15, %v8371_v47  ;;  %v8432_v13 = vrot.slane %v8431_v63, 4 }
 0x3eb   :  { %v9909_v23 = vsel %vm9859_vm4, %v8353_v18, -inf  ;;  %v6959_v22 = vcombine.high %v6957_v17, %v6957_v17  ;;  %v8438_v43 = vsel %vm8066_vm3, %v6958_v20, -inf  ;;  %v8445_v50 = vsel %vm8066_vm3, %v6957_v17, -inf }
 0x3ec   :  { %v8367_v29 = vmax.f32 %v8365_v40, %v8366_v26  ;;  %v8373_v31 = vrot.slane %v8372_v39, 1  ;;  %v9910_v41 = vmax.f32 %v19497_v8, %v9909_v23  ;;  %v9912_v2 = vsel %vm9859_vm4, %v8360_v37, -inf }
 0x3ed   :  { %v9913_v5 = vmax.f32 %v19501_v25, %v9912_v2  ;;  %v8433_v42 = vmax.f32 %v8431_v63, %v8432_v13  ;;  %v8439_v60 = vrot.slane %v8438_v43, 4  ;;  %v8446_v48 = vrot.slane %v8445_v50, 4 }
 0x3ee   :  { %v8374_v12 = vmax.f32 %v8372_v39, %v8373_v31  ;;  %v9915_v10 = vsel %vm9859_vm4, %v8367_v29, -inf  ;;  %v8452_v35 = vsel %vm8066_vm3, %v6959_v22, -inf  ;;  %v6542_v34 = vadd.f32 %v19558_v58, %v16421_v49  ;;  %v19569_v39 = vpop.f32.mrb[26].mxu0 }
 0x3ef   :  { %v9916_v8 = vmax.f32 %v19505_v1, %v9915_v10  ;;  %v10433_v4 = vsel %vm10412_vm5, %v9913_v5, %v9910_v41  ;;  %v8434_v25 = vrot.slane %v8433_v42, 2  ;;  %v8440_v51 = vmax.f32 %v8438_v43, %v8439_v60 }
 0x3f0   :  { %v9918_v54 = vsel %vm9859_vm4, %v8374_v12, -inf  ;;  %v8447_v15 = vmax.f32 %v8445_v50, %v8446_v48  ;;  %v8453_v62 = vrot.slane %v8452_v35, 4  ;;  %v6606_v59 = vmax.f32 %v6542_v34, 0.0 }
 0x3f1   :  { %v9919_v61 = vmax.f32 %v19508_v55, %v9918_v54  ;;  %v10434_v44 = vsel %vm10414_vm6, %v9916_v8, %v10433_v4  ;;  %v8435_v40 = vmax.f32 %v8433_v42, %v8434_v25  ;;  %v8441_v47 = vrot.slane %v8440_v51, 2  ;;  %v21930_v8 = vld [vmem:[#allocation55_spill] sm:$0xff] }
 0x3f2   :  { %v8448_v18 = vrot.slane %v8447_v15, 2  ;;  %v8454_v17 = vmax.f32 %v8452_v35, %v8453_v62  ;;  %v6926_v49 = vcombine.high %v6606_v59, %v6606_v59  ;;  %v6933_v1 = vrot.slane %v6606_v59, %v19211_v21  ;;  %v21932_v62 = vld [vmem:[#allocation56_spill] sm:$0xff] }
 0x3f3   :  { %v10435_v20 = vsel %vm10416_vm7, %v9919_v61, %v10434_v44  ;;  %v8436_v63 = vrot.slane %v8435_v40, 1  ;;  %v8442_v37 = vmax.f32 %v8440_v51, %v8441_v47  ;;  %v6545_v26 = vadd.f32 %v19558_v58, %v16422_v6 }
 0x3f4   :  { %v10436_v55 = vsel %vm10418_vm8, %v9922_v56, %v10435_v20  ;;  %v8449_v13 = vmax.f32 %v8447_v15, %v8448_v18  ;;  %v8455_v23 = vrot.slane %v8454_v17, 2  ;;  %v6940_v22 = vrot.slane %v6926_v49, %v19211_v21  ;;  %v21931_v15 = vld [vmem:[#allocation7_spill] sm:$0xff] }
 0x3f5   :  { %v10437_v43 = vsel %vm10420_vm9, %v9925_v32, %v10436_v55  ;;  %v8437_v50 = vmax.f32 %v8435_v40, %v8436_v63  ;;  %v8443_v29 = vrot.slane %v8442_v37, 1  ;;  %v6941_v31 = vcombine.high %v6933_v1, %v6933_v1 }
 0x3f6   :  { %v10438_v6 = vsel %vm10422_vm10, %v9928_v53, %v10437_v43  ;;  %v8450_v30 = vrot.slane %v8449_v13, 1  ;;  %v8456_v9 = vmax.f32 %v8454_v17, %v8455_v23  ;;  %v6942_v56 = vcombine.high %v6940_v22, %v6940_v22 }
 0x3f7   :  { %v10439_v41 = vsel %vm10424_vm11, %v9931_v19, %v10438_v6  ;;  %v8444_v2 = vmax.f32 %v8442_v37, %v8443_v29  ;;  %v19589_v46 = vsel %vm9859_vm4, %v8437_v50, -inf  ;;  %v8403_v52 = vsel %vm8066_vm3, %v6933_v1, -inf }
 0x3f8   :  { %10550 = vst.msk [vmem:[#allocation3 + $0x31] sm:$0xff] %vm9859_vm4, %v10439_v41  ;;  %v8451_v32 = vmax.f32 %v8449_v13, %v8450_v30  ;;  %v8457_v11 = vrot.slane %v8456_v9, 1  ;;  %v8404_v33 = vrot.slane %v8403_v52, 4  ;;  %v8410_v53 = vsel %vm8066_vm3, %v6941_v31, -inf }
 0x3f9   :  { %v19595_v5 = vsel %vm9859_vm4, %v8444_v2, -inf  ;;  %v8411_v42 = vrot.slane %v8410_v53, 4  ;;  %v8417_v27 = vsel %vm8066_vm3, %v6940_v22, -inf  ;;  %v8424_v45 = vsel %vm8066_vm3, %v6942_v56, -inf }
 0x3fa   :  { %v8458_v19 = vmax.f32 %v8456_v9, %v8457_v11  ;;  %v19600_v60 = vsel %vm9859_vm4, %v8451_v32, -inf  ;;  %v8405_v48 = vmax.f32 %v8403_v52, %v8404_v33  ;;  %v8418_v12 = vrot.slane %v8417_v27, 4 }
 0x3fb   :  { %v8412_v10 = vmax.f32 %v8410_v53, %v8411_v42  ;;  %v8425_v35 = vrot.slane %v8424_v45, 4  ;;  %v6609_v34 = vmax.f32 %v6545_v26, 0.0  ;;  %v16423_v4 = vadd.f32 %v21930_v8, %v18914_v57  ;;  %v19613_v26 = vpop.f32.mrb[27].mxu0 }
 0x3fc   :  { %v19605_v25 = vsel %vm9859_vm4, %v8458_v19, -inf  ;;  %v8406_v51 = vrot.slane %v8405_v48, 2  ;;  %v8419_v54 = vmax.f32 %v8417_v27, %v8418_v12  ;;  %v16424_v59 = vadd.f32 %v21932_v62, %v21931_v15  ;;  %v19632_v15 = vpop.f32.mrb[28].mxu0 }
 0x3fd   :  { %v8413_v61 = vrot.slane %v8412_v10, 2  ;;  %v8426_v44 = vmax.f32 %v8424_v45, %v8425_v35  ;;  %v6977_v40 = vcombine.high %v6609_v34, %v6609_v34  ;;  %v6984_v47 = vrot.slane %v6609_v34, %v19211_v21 }
 0x3fe   :  { %v8407_v18 = vmax.f32 %v8405_v48, %v8406_v51  ;;  %v8420_v17 = vrot.slane %v8419_v54, 2  ;;  %v6544_v49 = vadd.f32 %v19558_v58, %v16423_v4  ;;  %v6547_v1 = vadd.f32 %v19558_v58, %v16424_v59 }
 0x3ff   :  { %v8414_v57 = vmax.f32 %v8412_v10, %v8413_v61  ;;  %v8427_v20 = vrot.slane %v8426_v44, 2  ;;  %v6991_v63 = vrot.slane %v6977_v40, %v19211_v21  ;;  %v6992_v37 = vcombine.high %v6984_v47, %v6984_v47 }
 0x400   :  { %v8408_v55 = vrot.slane %v8407_v18, 1  ;;  %v8421_v13 = vmax.f32 %v8419_v54, %v8420_v17  ;;  %v8487_v23 = vsel %vm8066_vm3, %v6984_v47, -inf  ;;  %v6608_v22 = vmax.f32 %v6544_v49, 0.0 }
 0x401   :  { %v8415_v43 = vrot.slane %v8414_v57, 1  ;;  %v8428_v50 = vmax.f32 %v8426_v44, %v8427_v20  ;;  %v6993_v29 = vcombine.high %v6991_v63, %v6991_v63  ;;  %v8488_v31 = vrot.slane %v8487_v23, 4 }
 0x402   :  { %v8409_v6 = vmax.f32 %v8407_v18, %v8408_v55  ;;  %v8422_v30 = vrot.slane %v8421_v13, 1  ;;  %v8494_v9 = vsel %vm8066_vm3, %v6992_v37, -inf  ;;  %v8501_v56 = vsel %vm8066_vm3, %v6991_v63, -inf }
 0x403   :  { %v8416_v41 = vmax.f32 %v8414_v57, %v8415_v43  ;;  %v8429_v2 = vrot.slane %v8428_v50, 1  ;;  %v8489_v52 = vmax.f32 %v8487_v23, %v8488_v31  ;;  %v8495_v32 = vrot.slane %v8494_v9, 4 }
 0x404   :  { %v8423_v11 = vmax.f32 %v8421_v13, %v8422_v30  ;;  %v19619_v33 = vsel %vm9859_vm4, %v8409_v6, -inf  ;;  %v8502_v53 = vrot.slane %v8501_v56, 4  ;;  %v8508_v42 = vsel %vm8066_vm3, %v6993_v29, -inf }
 0x405   :  { %v8430_v27 = vmax.f32 %v8428_v50, %v8429_v2  ;;  %v19623_v45 = vsel %vm9859_vm4, %v8416_v41, -inf  ;;  %v8490_v19 = vrot.slane %v8489_v52, 2  ;;  %v8496_v48 = vmax.f32 %v8494_v9, %v8495_v32 }
 0x406   :  { %v19626_v12 = vsel %vm9859_vm4, %v8423_v11, -inf  ;;  %v8503_v10 = vmax.f32 %v8501_v56, %v8502_v53  ;;  %v8509_v35 = vrot.slane %v8508_v42, 4  ;;  %v6960_v34 = vcombine.high %v6608_v22, %v6608_v22 }
 0x407   :  { %v19629_v8 = vsel %vm9859_vm4, %v8430_v27, -inf  ;;  %v8491_v4 = vmax.f32 %v8489_v52, %v8490_v19  ;;  %v8497_v51 = vrot.slane %v8496_v48, 2  ;;  %v6967_v54 = vrot.slane %v6608_v22, %v19211_v21 }
 0x408   :  { %v8504_v62 = vrot.slane %v8503_v10, 2  ;;  %v8510_v59 = vmax.f32 %v8508_v42, %v8509_v35  ;;  %v6974_v61 = vrot.slane %v6960_v34, %v19211_v21  ;;  %v6611_v44 = vmax.f32 %v6547_v1, 0.0 }
 0x409   :  { %v8492_v40 = vrot.slane %v8491_v4, 1  ;;  %v8498_v47 = vmax.f32 %v8496_v48, %v8497_v51  ;;  %v6975_v18 = vcombine.high %v6967_v54, %v6967_v54  ;;  %v8459_v17 = vsel %vm8066_vm3, %v6967_v54, -inf }
 0x40a   :  { %v8505_v49 = vmax.f32 %v8503_v10, %v8504_v62  ;;  %v8511_v57 = vrot.slane %v8510_v59, 2  ;;  %v6976_v20 = vcombine.high %v6974_v61, %v6974_v61  ;;  %v8460_v63 = vrot.slane %v8459_v17, 4 }
 0x40b   :  { %v8493_v37 = vmax.f32 %v8491_v4, %v8492_v40  ;;  %v8499_v55 = vrot.slane %v8498_v47, 1  ;;  %v8466_v13 = vsel %vm8066_vm3, %v6975_v18, -inf  ;;  %v8473_v23 = vsel %vm8066_vm3, %v6974_v61, -inf }
 0x40c   :  { %v8506_v22 = vrot.slane %v8505_v49, 1  ;;  %v8512_v43 = vmax.f32 %v8510_v59, %v8511_v57  ;;  %v8461_v50 = vmax.f32 %v8459_v17, %v8460_v63  ;;  %v8467_v29 = vrot.slane %v8466_v13, 4  ;;  %v19660_v17 = vpop.f32.mrb[29].mxu0 }
 0x40d   :  { %v8500_v1 = vmax.f32 %v8498_v47, %v8499_v55  ;;  %v19639_v31 = vsel %vm9859_vm4, %v8493_v37, -inf  ;;  %v8474_v6 = vrot.slane %v8473_v23, 4  ;;  %v8480_v30 = vsel %vm8066_vm3, %v6976_v20, -inf }
 0x40e   :  { %v8507_v9 = vmax.f32 %v8505_v49, %v8506_v22  ;;  %v8513_v56 = vrot.slane %v8512_v43, 1  ;;  %v9946_v41 = vmax.f32 %v19589_v46, %v19639_v31  ;;  %v8462_v2 = vrot.slane %v8461_v50, 2 }
 0x40f   :  { %v19645_v52 = vsel %vm9859_vm4, %v8500_v1, -inf  ;;  %v8468_v32 = vmax.f32 %v8466_v13, %v8467_v29  ;;  %v8475_v11 = vmax.f32 %v8473_v23, %v8474_v6  ;;  %v8481_v53 = vrot.slane %v8480_v30, 4 }
 0x410   :  { %v8514_v42 = vmax.f32 %v8512_v43, %v8513_v56  ;;  %v9949_v27 = vmax.f32 %v19595_v5, %v19645_v52  ;;  %v19650_v19 = vsel %vm9859_vm4, %v8507_v9, -inf  ;;  %v8463_v48 = vmax.f32 %v8461_v50, %v8462_v2 }
 0x411   :  { %v9952_v10 = vmax.f32 %v19600_v60, %v19650_v19  ;;  %v8469_v35 = vrot.slane %v8468_v32, 2  ;;  %v8476_v34 = vrot.slane %v8475_v11, 2  ;;  %v8482_v4 = vmax.f32 %v8480_v30, %v8481_v53 }
 0x412   :  { %v19655_v51 = vsel %vm9859_vm4, %v8514_v42, -inf  ;;  %v8464_v54 = vrot.slane %v8463_v48, 1  ;;  %v7011_v62 = vcombine.high %v6611_v44, %v6611_v44  ;;  %v7018_v59 = vrot.slane %v6611_v44, %v19211_v21 }
 0x413   :  { %v9955_v61 = vmax.f32 %v19605_v25, %v19655_v51  ;;  %v8470_v40 = vmax.f32 %v8468_v32, %v8469_v35  ;;  %v8477_v47 = vmax.f32 %v8475_v11, %v8476_v34  ;;  %v8483_v18 = vrot.slane %v8482_v4, 2  ;;  %v21935_v51 = vld [vmem:[#allocation10_spill] sm:$0xff] }
 0x414   :  { %v8465_v49 = vmax.f32 %v8463_v48, %v8464_v54  ;;  %v7025_v57 = vrot.slane %v7011_v62, %v19211_v21  ;;  %v7026_v20 = vcombine.high %v7018_v59, %v7018_v59  ;;  %v8543_v63 = vsel %vm8066_vm3, %v7018_v59, -inf }
 0x415   :  { %v8471_v37 = vrot.slane %v8470_v40, 1  ;;  %v8478_v55 = vrot.slane %v8477_v47, 1  ;;  %v8484_v13 = vmax.f32 %v8482_v4, %v8483_v18  ;;  %v8544_v23 = vrot.slane %v8543_v63, 4 }
 0x416   :  { %v9933_v44 = vsel %vm9859_vm4, %v8465_v49, -inf  ;;  %v7027_v22 = vcombine.high %v7025_v57, %v7025_v57  ;;  %v8550_v43 = vsel %vm8066_vm3, %v7026_v20, -inf  ;;  %v8557_v50 = vsel %vm8066_vm3, %v7025_v57, -inf }
 0x417   :  { %v8472_v29 = vmax.f32 %v8470_v40, %v8471_v37  ;;  %v8479_v1 = vmax.f32 %v8477_v47, %v8478_v55  ;;  %v8485_v6 = vrot.slane %v8484_v13, 1  ;;  %v9934_v30 = vmax.f32 %v19619_v33, %v9933_v44  ;;  %v21933_v40 = vld [vmem:[#allocation8_spill] sm:$0xff]  ;;  %v21934_v44 = vld [vmem:[#allocation9_spill] sm:$0xff] }
 0x418   :  { %v8545_v9 = vmax.f32 %v8543_v63, %v8544_v23  ;;  %v8551_v56 = vrot.slane %v8550_v43, 4  ;;  %v8558_v2 = vrot.slane %v8557_v50, 4  ;;  %v8564_v32 = vsel %vm8066_vm3, %v7027_v22, -inf }
 0x419   :  { %v8486_v11 = vmax.f32 %v8484_v13, %v8485_v6  ;;  %v9936_v53 = vsel %vm9859_vm4, %v8472_v29, -inf  ;;  %v9939_v42 = vsel %vm9859_vm4, %v8479_v1, -inf  ;;  %v8565_v48 = vrot.slane %v8564_v32, 4 }
 0x41a   :  { %v9937_v35 = vmax.f32 %v19623_v45, %v9936_v53  ;;  %v9940_v34 = vmax.f32 %v19626_v12, %v9939_v42  ;;  %v8546_v4 = vrot.slane %v8545_v9, 2  ;;  %v8552_v54 = vmax.f32 %v8550_v43, %v8551_v56 }
 0x41b   :  { %v9942_v62 = vsel %vm9859_vm4, %v8486_v11, -inf  ;;  %v8559_v33 = vmax.f32 %v8557_v50, %v8558_v2  ;;  %v8566_v59 = vmax.f32 %v8564_v32, %v8565_v48  ;;  %v16425_v47 = vadd.f32 %v19311_v38, %v21933_v40 }
 0x41c   :  { %v9943_v18 = vmax.f32 %v19629_v8, %v9942_v62  ;;  %v10440_v49 = vsel %vm10412_vm5, %v9937_v35, %v9934_v30  ;;  %v8547_v57 = vmax.f32 %v8545_v9, %v8546_v4  ;;  %v8553_v20 = vrot.slane %v8552_v54, 2  ;;  %v19692_v9 = vpop.f32.mrb[30].mxu0 }
 0x41d   :  { %v10441_v63 = vsel %vm10414_vm6, %v9940_v34, %v10440_v49  ;;  %v8560_v45 = vrot.slane %v8559_v33, 2  ;;  %v8567_v37 = vrot.slane %v8566_v59, 2  ;;  %v6546_v12 = vadd.f32 %v19558_v58, %v16425_v47 }
 0x41e   :  { %v10442_v55 = vsel %vm10416_vm7, %v9943_v18, %v10441_v63  ;;  %v8548_v13 = vrot.slane %v8547_v57, 1  ;;  %v8554_v23 = vmax.f32 %v8552_v54, %v8553_v20  ;;  %v16426_v22 = vadd.f32 %v19351_v14, %v21934_v44 }
 0x41f   :  { %v10443_v38 = vsel %vm10418_vm8, %v9946_v41, %v10442_v55  ;;  %v8561_v8 = vmax.f32 %v8559_v33, %v8560_v45  ;;  %v8568_v43 = vmax.f32 %v8566_v59, %v8567_v37  ;;  %v6610_v50 = vmax.f32 %v6546_v12, 0.0  ;;  %v19728_v12 = vpop.f32.mrb[31].mxu0 }
 0x420   :  { %v10444_v29 = vsel %vm10420_vm9, %v9949_v27, %v10443_v38  ;;  %v8549_v1 = vmax.f32 %v8547_v57, %v8548_v13  ;;  %v8555_v6 = vrot.slane %v8554_v23, 1  ;;  %v6549_v30 = vadd.f32 %v19558_v58, %v16426_v22 }
 0x421   :  { %v10445_v14 = vsel %vm10422_vm10, %v9952_v10, %v10444_v29  ;;  %v8562_v46 = vrot.slane %v8561_v8, 1  ;;  %v8569_v31 = vrot.slane %v8568_v43, 1  ;;  %v6994_v41 = vcombine.high %v6610_v50, %v6610_v50 }
 0x422   :  { %v10446_v5 = vsel %vm10424_vm11, %v9955_v61, %v10445_v14  ;;  %v8556_v52 = vmax.f32 %v8554_v23, %v8555_v6  ;;  %v19703_v27 = vsel %vm9859_vm4, %v8549_v1, -inf  ;;  %v7001_v56 = vrot.slane %v6610_v50, %v19211_v21 }
 0x423   :  { %10551 = vst.msk [vmem:[#allocation3 + $0x41] sm:$0xff] %vm9859_vm4, %v10446_v5  ;;  %v8563_v2 = vmax.f32 %v8561_v8, %v8562_v46  ;;  %v8570_v60 = vmax.f32 %v8568_v43, %v8569_v31  ;;  %v7008_v19 = vrot.slane %v6994_v41, %v19211_v21  ;;  %v6613_v10 = vmax.f32 %v6549_v30, 0.0 }
 0x424   :  { %v19709_v32 = vsel %vm9859_vm4, %v8556_v52, -inf  ;;  %v7009_v11 = vcombine.high %v7001_v56, %v7001_v56  ;;  %v8515_v25 = vsel %vm8066_vm3, %v7001_v56, -inf  ;;  %v19714_v61 = vadd.f32 %v19356_v24, %v21935_v51 }
 0x425   :  { %v19717_v53 = vsel %vm9859_vm4, %v8563_v2, -inf  ;;  %v19720_v42 = vsel %vm9859_vm4, %v8570_v60, -inf  ;;  %v7010_v48 = vcombine.high %v7008_v19, %v7008_v19  ;;  %v8516_v35 = vrot.slane %v8515_v25, 4 }
 0x426   :  { %v8522_v34 = vsel %vm8066_vm3, %v7009_v11, -inf  ;;  %v8529_v4 = vsel %vm8066_vm3, %v7008_v19, -inf  ;;  %v7045_v54 = vcombine.high %v6613_v10, %v6613_v10  ;;  %v7052_v62 = vrot.slane %v6613_v10, %v19211_v21 }
 0x427   :  { %v8517_v33 = vmax.f32 %v8515_v25, %v8516_v35  ;;  %v8523_v59 = vrot.slane %v8522_v34, 4  ;;  %v8530_v40 = vrot.slane %v8529_v4, 4  ;;  %v8536_v24 = vsel %vm8066_vm3, %v7010_v48, -inf }
 0x428   :  { %v8537_v47 = vrot.slane %v8536_v24, 4  ;;  %v7059_v18 = vrot.slane %v7045_v54, %v19211_v21  ;;  %v7060_v49 = vcombine.high %v7052_v62, %v7052_v62  ;;  %v8599_v57 = vsel %vm8066_vm3, %v7052_v62, -inf }
 0x429   :  { %v8518_v20 = vrot.slane %v8517_v33, 2  ;;  %v8524_v63 = vmax.f32 %v8522_v34, %v8523_v59  ;;  %v8531_v45 = vmax.f32 %v8529_v4, %v8530_v40  ;;  %v8600_v37 = vrot.slane %v8599_v57, 4 }
 0x42a   :  { %v8538_v55 = vmax.f32 %v8536_v24, %v8537_v47  ;;  %v7061_v13 = vcombine.high %v7059_v18, %v7059_v18  ;;  %v8606_v23 = vsel %vm8066_vm3, %v7060_v49, -inf  ;;  %v8613_v44 = vsel %vm8066_vm3, %v7059_v18, -inf  ;;  %v14222_v24 = vld [vmem:[%s21823_s3 + $0x20] sm:$0xff]  ;;  %v14223_v47 = vld [vmem:[%s21823_s3 + $0x28] sm:$0xff] }
 0x42b   :  { %v8519_v22 = vmax.f32 %v8517_v33, %v8518_v20  ;;  %v8525_v38 = vrot.slane %v8524_v63, 2  ;;  %v8532_v8 = vrot.slane %v8531_v45, 2  ;;  %v8601_v43 = vmax.f32 %v8599_v57, %v8600_v37 }
 0x42c   :  { %v8539_v50 = vrot.slane %v8538_v55, 2  ;;  %v8607_v29 = vrot.slane %v8606_v23, 4  ;;  %v8614_v1 = vrot.slane %v8613_v44, 4  ;;  %v8620_v6 = vsel %vm8066_vm3, %v7061_v13, -inf }
 0x42d   :  { %v8520_v30 = vrot.slane %v8519_v22, 1  ;;  %v8526_v14 = vmax.f32 %v8524_v63, %v8525_v38  ;;  %v8533_v46 = vmax.f32 %v8531_v45, %v8532_v8  ;;  %v8602_v31 = vrot.slane %v8601_v43, 2  ;;  %v14224_v8 = vld [vmem:[%s21823_s3 + $0x30] sm:$0xff] }
 0x42e   :  { %v8540_v41 = vmax.f32 %v8538_v55, %v8539_v50  ;;  %v8608_v5 = vmax.f32 %v8606_v23, %v8607_v29  ;;  %v8615_v52 = vmax.f32 %v8613_v44, %v8614_v1  ;;  %v8621_v56 = vrot.slane %v8620_v6, 4 }
 0x42f   :  { %v8521_v2 = vmax.f32 %v8519_v22, %v8520_v30  ;;  %v8527_v60 = vrot.slane %v8526_v14, 1  ;;  %v8534_v19 = vrot.slane %v8533_v46, 1  ;;  %v8603_v10 = vmax.f32 %v8601_v43, %v8602_v31  ;;  %v21936_v22 = vld [vmem:[#allocation11_spill] sm:$0xff]  ;;  %v19764_v43 = vpop.f32.mrb[32].mxu0 }
 0x430   :  { %v8541_v11 = vrot.slane %v8540_v41, 1  ;;  %v8609_v25 = vrot.slane %v8608_v5, 2  ;;  %v8616_v51 = vrot.slane %v8615_v52, 2  ;;  %v8622_v48 = vmax.f32 %v8620_v6, %v8621_v56 }
 0x431   :  { %v8528_v35 = vmax.f32 %v8526_v14, %v8527_v60  ;;  %v8535_v34 = vmax.f32 %v8533_v46, %v8534_v19  ;;  %v19734_v4 = vsel %vm9859_vm4, %v8521_v2, -inf  ;;  %v8604_v54 = vrot.slane %v8603_v10, 1  ;;  %v21937_v46 = vld [vmem:[#allocation12_spill] sm:$0xff] }
 0x432   :  { %v8542_v62 = vmax.f32 %v8540_v41, %v8541_v11  ;;  %v8610_v33 = vmax.f32 %v8608_v5, %v8609_v25  ;;  %v8617_v59 = vmax.f32 %v8615_v52, %v8616_v51  ;;  %v8623_v40 = vrot.slane %v8622_v48, 2 }
 0x433   :  { %v19743_v18 = vsel %vm9859_vm4, %v8528_v35, -inf  ;;  %v19746_v49 = vsel %vm9859_vm4, %v8535_v34, -inf  ;;  %v8605_v57 = vmax.f32 %v8603_v10, %v8604_v54  ;;  %v6548_v20 = vadd.f32 %v19558_v58, %v19714_v61  ;;  %v14225_v61 = vld [vmem:[%s21823_s3 + $0x38] sm:$0xff] }
 0x434   :  { %v19751_v63 = vsel %vm9859_vm4, %v8542_v62, -inf  ;;  %v8611_v45 = vrot.slane %v8610_v33, 1  ;;  %v8618_v37 = vrot.slane %v8617_v59, 1  ;;  %v8624_v55 = vmax.f32 %v8622_v48, %v8623_v40 }
 0x435   :  { %v19754_v13 = vsel %vm9859_vm4, %v8605_v57, -inf  ;;  %v6612_v23 = vmax.f32 %v6548_v20, 0.0  ;;  %v16334_v44 = vpack.c.bf16 %v14223_v47, %v14222_v24  ;;  %v16428_v38 = vadd.f32 %v19415_v36, %v21936_v22  ;;  %v10585_v24 = vld [vmem:[#allocation3 + $0x11] sm:$0xff] }
 0x436   :  { %v8612_v50 = vmax.f32 %v8610_v33, %v8611_v45  ;;  %v8619_v29 = vmax.f32 %v8617_v59, %v8618_v37  ;;  %v8625_v1 = vrot.slane %v8624_v55, 1  ;;  %v9970_v6 = vmax.f32 %v19703_v27, %v19754_v13  ;;  %v10586_v37 = vld [vmem:[#allocation3 + $0x21] sm:$0xff] }
 0x437   :  { %v7028_v30 = vcombine.high %v6612_v23, %v6612_v23  ;;  %v7035_v14 = vrot.slane %v6612_v23, %v19211_v21  ;;  %16335 = vmatprep.subr.bf16.mxu1 %v16334_v44  ;;  %v6551_v36 = vadd.f32 %v19558_v58, %v16428_v38  ;;  %v16429_v31 = vadd.f32 %v19423_v28, %v21937_v46  ;;  %v10587_v46 = vld [vmem:[#allocation3 + $0x31] sm:$0xff] }
 0x438   :  { %v8626_v41 = vmax.f32 %v8624_v55, %v8625_v1  ;;  %v19773_v5 = vsel %vm9859_vm4, %v8612_v50, -inf  ;;  %v19776_v52 = vsel %vm9859_vm4, %v8619_v29, -inf  ;;  %16337 = vmatpush3.bf16.msra.mxu1 %v16334_v44  ;;  %v16338_v56 = vpack.c.bf16 %v14225_v61, %v14224_v8  ;;  %v19796_v55 = vpop.f32.mrb[33].mxu0 }
 0x439   :  { %v9973_v2 = vmax.f32 %v19709_v32, %v19773_v5  ;;  %v9976_v60 = vmax.f32 %v19717_v53, %v19776_v52  ;;  %v7042_v19 = vrot.slane %v7028_v30, %v19211_v21  ;;  %v7043_v10 = vcombine.high %v7035_v14, %v7035_v14 }
 0x43a   :  { %v19784_v28 = vsel %vm9859_vm4, %v8626_v41, -inf  ;;  %v8571_v11 = vsel %vm8066_vm3, %v7035_v14, -inf  ;;  %v6615_v25 = vmax.f32 %v6551_v36, 0.0  ;;  %v6550_v51 = vadd.f32 %v19558_v58, %v16429_v31  ;;  %16339 = vmatprep.subr.bf16.mxu1 %v16338_v56 }
 0x43b   :  { %v9979_v48 = vmax.f32 %v19720_v42, %v19784_v28  ;;  %v7044_v35 = vcombine.high %v7042_v19, %v7042_v19  ;;  %v8572_v34 = vrot.slane %v8571_v11, 4  ;;  %v8578_v54 = vsel %vm8066_vm3, %v7043_v10, -inf  ;;  %v21939_v42 = vld [vmem:[#allocation14_spill] sm:$0xff] }
 0x43c   :  { %v8579_v62 = vrot.slane %v8578_v54, 4  ;;  %v8585_v33 = vsel %vm8066_vm3, %v7042_v19, -inf  ;;  %v7079_v59 = vcombine.high %v6615_v25, %v6615_v25  ;;  %v7086_v40 = vrot.slane %v6615_v25, %v19211_v21  ;;  %16341 = vmatpush3.bf16.msra.mxu1 %v16338_v56 }
 0x43d   :  { %v8573_v47 = vmax.f32 %v8571_v11, %v8572_v34  ;;  %v8586_v57 = vrot.slane %v8585_v33, 4  ;;  %v8592_v20 = vsel %vm8066_vm3, %v7044_v35, -inf  ;;  %v19794_v45 = vmax.f32 %v6550_v51, 0.0 }
 0x43e   :  { %v8580_v23 = vmax.f32 %v8578_v54, %v8579_v62  ;;  %v8593_v44 = vrot.slane %v8592_v20, 4  ;;  %v7093_v22 = vrot.slane %v7079_v59, %v19211_v21  ;;  %v7094_v38 = vcombine.high %v7086_v40, %v7086_v40 }
 0x43f   :  { %v8574_v8 = vrot.slane %v8573_v47, 2  ;;  %v8587_v61 = vmax.f32 %v8585_v33, %v8586_v57  ;;  %v8655_v50 = vsel %vm8066_vm3, %v7086_v40, -inf  ;;  %v7062_v29 = vcombine.high %v19794_v45, %v19794_v45  ;;  %16055 = vmatmul.mubr.msk.f32.vlgmr.msra.gmra.mrb[64].mxu1 %vm9859_vm4, %v10585_v24 }
 0x440   :  { %v8581_v1 = vrot.slane %v8580_v23, 2  ;;  %v8594_v30 = vmax.f32 %v8592_v20, %v8593_v44  ;;  %v7095_v14 = vcombine.high %v7093_v22, %v7093_v22  ;;  %v8656_v36 = vrot.slane %v8655_v50, 4  ;;  %16057 = vmatprep.mubr.msk.f32.mxu1 %vm9859_vm4, %v10586_v37 }
 0x441   :  { %v8575_v31 = vmax.f32 %v8573_v47, %v8574_v8  ;;  %v8588_v41 = vrot.slane %v8587_v61, 2  ;;  %v8662_v56 = vsel %vm8066_vm3, %v7094_v38, -inf  ;;  %v8669_v19 = vsel %vm8066_vm3, %v7093_v22, -inf }
 0x442   :  { %v8582_v10 = vmax.f32 %v8580_v23, %v8581_v1  ;;  %v8595_v11 = vrot.slane %v8594_v30, 2  ;;  %v8657_v25 = vmax.f32 %v8655_v50, %v8656_v36  ;;  %v8663_v51 = vrot.slane %v8662_v56, 4 }
 0x443   :  { %v8576_v35 = vrot.slane %v8575_v31, 1  ;;  %v8589_v34 = vmax.f32 %v8587_v61, %v8588_v41  ;;  %v8670_v54 = vrot.slane %v8669_v19, 4  ;;  %v8676_v62 = vsel %vm8066_vm3, %v7095_v14, -inf  ;;  %16058 = vmatmul.mubr.msk.f32.gmra.mrb[66].mxu1 %vm9859_vm4, %v10587_v46 }
 0x444   :  { %v8583_v33 = vrot.slane %v8582_v10, 1  ;;  %v8596_v59 = vmax.f32 %v8594_v30, %v8595_v11  ;;  %v8658_v40 = vrot.slane %v8657_v25, 2  ;;  %v8664_v24 = vmax.f32 %v8662_v56, %v8663_v51 }
 0x445   :  { %v8577_v47 = vmax.f32 %v8575_v31, %v8576_v35  ;;  %v8590_v57 = vrot.slane %v8589_v34, 1  ;;  %v8671_v20 = vmax.f32 %v8669_v19, %v8670_v54  ;;  %v8677_v37 = vrot.slane %v8676_v62, 4 }
 0x446   :  { %v8584_v44 = vmax.f32 %v8582_v10, %v8583_v33  ;;  %v8597_v23 = vrot.slane %v8596_v59, 1  ;;  %v8659_v22 = vmax.f32 %v8657_v25, %v8658_v40  ;;  %v8665_v38 = vrot.slane %v8664_v24, 2 }
 0x447   :  { %v8591_v8 = vmax.f32 %v8589_v34, %v8590_v57  ;;  %v9957_v61 = vsel %vm9859_vm4, %v8577_v47, -inf  ;;  %v8672_v50 = vrot.slane %v8671_v20, 2  ;;  %v8678_v1 = vmax.f32 %v8676_v62, %v8677_v37 }
 0x448   :  { %v8598_v14 = vmax.f32 %v8596_v59, %v8597_v23  ;;  %v9958_v36 = vmax.f32 %v19734_v4, %v9957_v61  ;;  %v9960_v30 = vsel %vm9859_vm4, %v8584_v44, -inf  ;;  %v8660_v46 = vrot.slane %v8659_v22, 1  ;;  %v19830_v44 = vpop.f32.mrb[34].mxu0 }
 0x449   :  { %v9961_v31 = vmax.f32 %v19743_v18, %v9960_v30  ;;  %v9963_v41 = vsel %vm9859_vm4, %v8591_v8, -inf  ;;  %v8666_v56 = vmax.f32 %v8664_v24, %v8665_v38  ;;  %v8673_v19 = vmax.f32 %v8671_v20, %v8672_v50  ;;  %v19863_v30 = vpop.f32.mrb[35].mxu0 }
 0x44a   :  { %v9964_v10 = vmax.f32 %v19746_v49, %v9963_v41  ;;  %v9966_v11 = vsel %vm9859_vm4, %v8598_v14, -inf  ;;  %v8661_v25 = vmax.f32 %v8659_v22, %v8660_v46  ;;  %v8679_v51 = vrot.slane %v8678_v1, 2 }
 0x44b   :  { %v9967_v35 = vmax.f32 %v19751_v63, %v9966_v11  ;;  %v10447_v34 = vsel %vm10412_vm5, %v9961_v31, %v9958_v36  ;;  %v8667_v4 = vrot.slane %v8666_v56, 1  ;;  %v8674_v54 = vrot.slane %v8673_v19, 1 }
 0x44c   :  { %v10448_v62 = vsel %vm10414_vm6, %v9964_v10, %v10447_v34  ;;  %v8680_v33 = vmax.f32 %v8678_v1, %v8679_v51  ;;  %v19819_v18 = vsel %vm9859_vm4, %v8661_v25, -inf  ;;  %v7069_v59 = vrot.slane %v19794_v45, %v19211_v21  ;;  %v21938_v1 = vld [vmem:[#allocation13_spill] sm:$0xff] }
 0x44d   :  { %v10449_v49 = vsel %vm10416_vm7, %v9967_v35, %v10448_v62  ;;  %v8668_v40 = vmax.f32 %v8666_v56, %v8667_v4  ;;  %v8675_v24 = vmax.f32 %v8673_v19, %v8674_v54  ;;  %v7076_v47 = vrot.slane %v7062_v29, %v19211_v21  ;;  %v21941_v56 = vld [vmem:[#allocation16_spill] sm:$0xff] }
 0x44e   :  { %v10450_v63 = vsel %vm10418_vm8, %v9970_v6, %v10449_v49  ;;  %v8681_v57 = vrot.slane %v8680_v33, 1  ;;  %v7077_v20 = vcombine.high %v7069_v59, %v7069_v59  ;;  %v8627_v37 = vsel %vm8066_vm3, %v7069_v59, -inf }
 0x44f   :  { %v10451_v45 = vsel %vm10420_vm9, %v9973_v2, %v10450_v63  ;;  %v19837_v23 = vsel %vm9859_vm4, %v8668_v40, -inf  ;;  %v19840_v29 = vsel %vm9859_vm4, %v8675_v24, -inf  ;;  %v7078_v27 = vcombine.high %v7076_v47, %v7076_v47 }
 0x450   :  { %v10452_v13 = vsel %vm10422_vm10, %v9976_v60, %v10451_v45  ;;  %v8682_v6 = vmax.f32 %v8680_v33, %v8681_v57  ;;  %v8628_v22 = vrot.slane %v8627_v37, 4  ;;  %v8634_v38 = vsel %vm8066_vm3, %v7077_v20, -inf }
 0x451   :  { %v10453_v32 = vsel %vm10424_vm11, %v9979_v48, %v10452_v13  ;;  %v8635_v5 = vrot.slane %v8634_v38, 4  ;;  %v8641_v2 = vsel %vm8066_vm3, %v7076_v47, -inf  ;;  %v8648_v8 = vsel %vm8066_vm3, %v7078_v27, -inf  ;;  %v21940_v48 = vld [vmem:[#allocation15_spill] sm:$0xff] }
 0x452   :  { %10552 = vst.msk [vmem:[#allocation3 + $0x51] sm:$0xff] %vm9859_vm4, %v10453_v32  ;;  %v19855_v53 = vsel %vm9859_vm4, %v8682_v6, -inf  ;;  %v8629_v52 = vmax.f32 %v8627_v37, %v8628_v22  ;;  %v8642_v60 = vrot.slane %v8641_v2, 4  ;;  %v8649_v61 = vrot.slane %v8648_v8, 4 }
 0x453   :  { %v8636_v50 = vmax.f32 %v8634_v38, %v8635_v5  ;;  %v16430_v14 = vadd.f32 %v19448_v0, %v21938_v1  ;;  %v16431_v28 = vadd.f32 %v19492_v3, %v21939_v42  ;;  %v16432_v36 = vadd.f32 %v19512_v7, %v21940_v48  ;;  %v10588_v42 = vld [vmem:[#allocation3 + $0x41] sm:$0xff] }
 0x454   :  { %v8630_v46 = vrot.slane %v8629_v52, 2  ;;  %v8643_v31 = vmax.f32 %v8641_v2, %v8642_v60  ;;  %v8650_v41 = vmax.f32 %v8648_v8, %v8649_v61  ;;  %v16433_v19 = vadd.f32 %v19545_v16, %v21941_v56  ;;  %16060 = vmatprep.mubr.msk.f32.mxu1 %vm9859_vm4, %v10588_v42 }
 0x455   :  { %v8637_v10 = vrot.slane %v8636_v50, 2  ;;  %v6553_v11 = vadd.f32 %v19558_v58, %v16430_v14  ;;  %v6552_v25 = vadd.f32 %v19558_v58, %v16431_v28  ;;  %v6555_v0 = vadd.f32 %v19558_v58, %v16432_v36 }
 0x456   :  { %v8631_v51 = vmax.f32 %v8629_v52, %v8630_v46  ;;  %v8644_v3 = vrot.slane %v8643_v31, 2  ;;  %v8651_v35 = vrot.slane %v8650_v41, 2  ;;  %v6554_v7 = vadd.f32 %v19558_v58, %v16433_v19 }
 0x457   :  { %v8638_v34 = vmax.f32 %v8636_v50, %v8637_v10  ;;  %v6617_v4 = vmax.f32 %v6553_v11, 0.0  ;;  %v6616_v54 = vmax.f32 %v6552_v25, 0.0  ;;  %v19871_v62 = vmax.f32 %v6555_v0, 0.0  ;;  %v19897_v10 = vpop.f32.mrb[36].mxu0 }
 0x458   :  { %v8632_v33 = vrot.slane %v8631_v51, 1  ;;  %v8645_v59 = vmax.f32 %v8643_v31, %v8644_v3  ;;  %v8652_v16 = vmax.f32 %v8650_v41, %v8651_v35  ;;  %v19873_v49 = vmax.f32 %v6554_v7, 0.0 }
 0x459   :  { %v8639_v40 = vrot.slane %v8638_v34, 1  ;;  %v7113_v24 = vcombine.high %v6617_v4, %v6617_v4  ;;  %v7120_v47 = vrot.slane %v6617_v4, %v19211_v21  ;;  %v7096_v63 = vcombine.high %v6616_v54, %v6616_v54 }
 0x45a   :  { %v8633_v57 = vmax.f32 %v8631_v51, %v8632_v33  ;;  %v8646_v20 = vrot.slane %v8645_v59, 1  ;;  %v8653_v37 = vrot.slane %v8652_v16, 1  ;;  %v7103_v58 = vrot.slane %v6616_v54, %v19211_v21 }
 0x45b   :  { %v8640_v45 = vmax.f32 %v8638_v34, %v8639_v40  ;;  %v7127_v27 = vrot.slane %v7113_v24, %v19211_v21  ;;  %v7128_v13 = vcombine.high %v7120_v47, %v7120_v47  ;;  %v8711_v6 = vsel %vm8066_vm3, %v7120_v47, -inf }
 0x45c   :  { %v8647_v22 = vmax.f32 %v8645_v59, %v8646_v20  ;;  %v8654_v38 = vmax.f32 %v8652_v16, %v8653_v37  ;;  %v19880_v32 = vsel %vm9859_vm4, %v8633_v57, -inf  ;;  %v8712_v5 = vrot.slane %v8711_v6, 4 }
 0x45d   :  { %v19883_v2 = vsel %vm9859_vm4, %v8640_v45, -inf  ;;  %v7129_v8 = vcombine.high %v7127_v27, %v7127_v27  ;;  %v8718_v52 = vsel %vm8066_vm3, %v7128_v13, -inf  ;;  %v8725_v60 = vsel %vm8066_vm3, %v7127_v27, -inf }
 0x45e   :  { %v19888_v61 = vsel %vm9859_vm4, %v8647_v22, -inf  ;;  %v19891_v50 = vsel %vm9859_vm4, %v8654_v38, -inf  ;;  %v8713_v1 = vmax.f32 %v8711_v6, %v8712_v5  ;;  %v8719_v14 = vrot.slane %v8718_v52, 4 }
 0x45f   :  { %v8726_v28 = vrot.slane %v8725_v60, 4  ;;  %v8732_v48 = vsel %vm8066_vm3, %v7129_v8, -inf  ;;  %v7110_v36 = vrot.slane %v7096_v63, %v19211_v21  ;;  %v7111_v46 = vcombine.high %v7103_v58, %v7103_v58 }
 0x460   :  { %v8714_v31 = vrot.slane %v8713_v1, 2  ;;  %v8720_v41 = vmax.f32 %v8718_v52, %v8719_v14  ;;  %v8733_v56 = vrot.slane %v8732_v48, 4  ;;  %v8683_v19 = vsel %vm8066_vm3, %v7103_v58, -inf }
 0x461   :  { %v8727_v11 = vmax.f32 %v8725_v60, %v8726_v28  ;;  %v7112_v25 = vcombine.high %v7110_v36, %v7110_v36  ;;  %v8684_v0 = vrot.slane %v8683_v19, 4  ;;  %v8690_v51 = vsel %vm8066_vm3, %v7111_v46, -inf }
 0x462   :  { %v8715_v3 = vmax.f32 %v8713_v1, %v8714_v31  ;;  %v8721_v35 = vrot.slane %v8720_v41, 2  ;;  %v8734_v7 = vmax.f32 %v8732_v48, %v8733_v56  ;;  %v8691_v34 = vrot.slane %v8690_v51, 4  ;;  %v19905_v56 = vpop.f32.mrb[37].mxu0 }
 0x463   :  { %v8728_v4 = vrot.slane %v8727_v11, 2  ;;  %v8685_v54 = vmax.f32 %v8683_v19, %v8684_v0  ;;  %v8697_v33 = vsel %vm8066_vm3, %v7110_v36, -inf  ;;  %v8704_v59 = vsel %vm8066_vm3, %v7112_v25, -inf }
 0x464   :  { %v8716_v16 = vrot.slane %v8715_v3, 1  ;;  %v8722_v40 = vmax.f32 %v8720_v41, %v8721_v35  ;;  %v8735_v24 = vrot.slane %v8734_v7, 2  ;;  %v8692_v47 = vmax.f32 %v8690_v51, %v8691_v34 }
 0x465   :  { %v8729_v63 = vmax.f32 %v8727_v11, %v8728_v4  ;;  %v8686_v57 = vrot.slane %v8685_v54, 2  ;;  %v8698_v20 = vrot.slane %v8697_v33, 4  ;;  %v8705_v37 = vrot.slane %v8704_v59, 4 }
 0x466   :  { %v8717_v58 = vmax.f32 %v8715_v3, %v8716_v16  ;;  %v8723_v45 = vrot.slane %v8722_v40, 1  ;;  %v8736_v27 = vmax.f32 %v8734_v7, %v8735_v24  ;;  %v8693_v13 = vrot.slane %v8692_v47, 2 }
 0x467   :  { %v8730_v6 = vrot.slane %v8729_v63, 1  ;;  %v8687_v22 = vmax.f32 %v8685_v54, %v8686_v57  ;;  %v8699_v38 = vmax.f32 %v8697_v33, %v8698_v20  ;;  %v8706_v5 = vmax.f32 %v8704_v59, %v8705_v37 }
 0x468   :  { %v8724_v8 = vmax.f32 %v8722_v40, %v8723_v45  ;;  %v8737_v52 = vrot.slane %v8736_v27, 1  ;;  %v9993_v60 = vsel %vm9859_vm4, %v8717_v58, -inf  ;;  %v8694_v1 = vmax.f32 %v8692_v47, %v8693_v13 }
 0x469   :  { %v8731_v14 = vmax.f32 %v8729_v63, %v8730_v6  ;;  %v9994_v42 = vmax.f32 %v19819_v18, %v9993_v60  ;;  %v8688_v28 = vrot.slane %v8687_v22, 1  ;;  %v8700_v48 = vrot.slane %v8699_v38, 2 }
 0x46a   :  { %v8738_v36 = vmax.f32 %v8736_v27, %v8737_v52  ;;  %v9996_v46 = vsel %vm9859_vm4, %v8724_v8, -inf  ;;  %v8695_v31 = vrot.slane %v8694_v1, 1  ;;  %v8707_v41 = vrot.slane %v8706_v5, 2 }
 0x46b   :  { %v9997_v19 = vmax.f32 %v19837_v23, %v9996_v46  ;;  %v9999_v11 = vsel %vm9859_vm4, %v8731_v14, -inf  ;;  %v8689_v25 = vmax.f32 %v8687_v22, %v8688_v28  ;;  %v8701_v0 = vmax.f32 %v8699_v38, %v8700_v48 }
 0x46c   :  { %v10000_v51 = vmax.f32 %v19840_v29, %v9999_v11  ;;  %v10002_v3 = vsel %vm9859_vm4, %v8738_v36, -inf  ;;  %v8696_v18 = vmax.f32 %v8694_v1, %v8695_v31  ;;  %v8708_v35 = vmax.f32 %v8706_v5, %v8707_v41 }
 0x46d   :  { %v10003_v7 = vmax.f32 %v19855_v53, %v10002_v3  ;;  %v8702_v34 = vrot.slane %v8701_v0, 1  ;;  %v9981_v4 = vsel %vm9859_vm4, %v8689_v25, -inf  ;;  %v7147_v54 = vcombine.high %v19871_v62, %v19871_v62 }
 0x46e   :  { %v8709_v33 = vrot.slane %v8708_v35, 1  ;;  %v9982_v23 = vmax.f32 %v19880_v32, %v9981_v4  ;;  %v9984_v59 = vsel %vm9859_vm4, %v8696_v18, -inf  ;;  %v7154_v29 = vrot.slane %v19871_v62, %v19211_v21 }
 0x46f   :  { %v8703_v16 = vmax.f32 %v8701_v0, %v8702_v34  ;;  %v9985_v40 = vmax.f32 %v19883_v2, %v9984_v59  ;;  %v7161_v24 = vrot.slane %v7147_v54, %v19211_v21  ;;  %v7130_v53 = vcombine.high %v19873_v49, %v19873_v49  ;;  %v19942_v34 = vpop.f32.mrb[38].mxu0 }
 0x470   :  { %v8710_v47 = vmax.f32 %v8708_v35, %v8709_v33  ;;  %v7162_v63 = vcombine.high %v7154_v29, %v7154_v29  ;;  %v8767_v57 = vsel %vm8066_vm3, %v7154_v29, -inf  ;;  %v7137_v32 = vrot.slane %v19873_v49, %v19211_v21 }
 0x471   :  { %v9987_v20 = vsel %vm9859_vm4, %v8703_v16, -inf  ;;  %v10454_v37 = vsel %vm10412_vm5, %v9985_v40, %v9982_v23  ;;  %v7163_v62 = vcombine.high %v7161_v24, %v7161_v24  ;;  %v8768_v58 = vrot.slane %v8767_v57, 4 }
 0x472   :  { %v9988_v2 = vmax.f32 %v19888_v61, %v9987_v20  ;;  %v9990_v45 = vsel %vm9859_vm4, %v8710_v47, -inf  ;;  %v8774_v27 = vsel %vm8066_vm3, %v7162_v63, -inf  ;;  %v8781_v13 = vsel %vm8066_vm3, %v7161_v24, -inf }
 0x473   :  { %v9991_v6 = vmax.f32 %v19891_v50, %v9990_v45  ;;  %v8769_v22 = vmax.f32 %v8767_v57, %v8768_v58  ;;  %v8775_v38 = vrot.slane %v8774_v27, 4  ;;  %v8782_v5 = vrot.slane %v8781_v13, 4 }
 0x474   :  { %v10455_v49 = vsel %vm10414_vm6, %v9988_v2, %v10454_v37  ;;  %v8788_v8 = vsel %vm8066_vm3, %v7163_v62, -inf  ;;  %v7144_v52 = vrot.slane %v7130_v53, %v19211_v21  ;;  %v7145_v60 = vcombine.high %v7137_v32, %v7137_v32 }
 0x475   :  { %v10456_v61 = vsel %vm10416_vm7, %v9991_v6, %v10455_v49  ;;  %v8770_v1 = vrot.slane %v8769_v22, 2  ;;  %v8776_v14 = vmax.f32 %v8774_v27, %v8775_v38  ;;  %v8783_v28 = vmax.f32 %v8781_v13, %v8782_v5 }
 0x476   :  { %v10457_v48 = vsel %vm10418_vm8, %v9994_v42, %v10456_v61  ;;  %v8789_v36 = vrot.slane %v8788_v8, 4  ;;  %v7146_v46 = vcombine.high %v7144_v52, %v7144_v52  ;;  %v8739_v50 = vsel %vm8066_vm3, %v7137_v32, -inf  ;;  %v19962_v61 = vld [vmem:[%s21822_s2] ss:$0 sm:$0xff] }
 0x477   :  { %v10458_v31 = vsel %vm10420_vm9, %v9997_v19, %v10457_v48  ;;  %v8771_v41 = vmax.f32 %v8769_v22, %v8770_v1  ;;  %v8777_v11 = vrot.slane %v8776_v14, 2  ;;  %v8784_v25 = vrot.slane %v8783_v28, 2  ;;  %v21942_v22 = vld [vmem:[#allocation17_spill] sm:$0xff]  ;;  %v21944_v48 = vld [vmem:[#allocation19_spill] sm:$0xff] }
 0x478   :  { %v10459_v0 = vsel %vm10422_vm10, %v10000_v51, %v10458_v31  ;;  %v8790_v3 = vmax.f32 %v8788_v8, %v8789_v36  ;;  %v8740_v18 = vrot.slane %v8739_v50, 4  ;;  %v8746_v35 = vsel %vm8066_vm3, %v7145_v60, -inf }
 0x479   :  { %v10460_v4 = vsel %vm10424_vm11, %v10003_v7, %v10459_v0  ;;  %v8772_v42 = vrot.slane %v8771_v41, 1  ;;  %v8778_v54 = vmax.f32 %v8776_v14, %v8777_v11  ;;  %v8785_v33 = vmax.f32 %v8783_v28, %v8784_v25  ;;  %v21943_v14 = vld [vmem:[#allocation18_spill] sm:$0xff] }
 0x47a   :  { %10553 = vst.msk [vmem:[#allocation3 + $0x61] sm:$0xff] %vm9859_vm4, %v10460_v4  ;;  %v8791_v23 = vrot.slane %v8790_v3, 2  ;;  %v8741_v19 = vmax.f32 %v8739_v50, %v8740_v18  ;;  %v8747_v59 = vrot.slane %v8746_v35, 4  ;;  %v8753_v29 = vsel %vm8066_vm3, %v7144_v52, -inf }
 0x47b   :  { %v8773_v16 = vmax.f32 %v8771_v41, %v8772_v42  ;;  %v8779_v51 = vrot.slane %v8778_v54, 1  ;;  %v8786_v40 = vrot.slane %v8785_v33, 1  ;;  %v8754_v24 = vrot.slane %v8753_v29, 4  ;;  %v19972_v41 = vpop.f32.mrb[39].mxu0 }
 0x47c   :  { %v8792_v53 = vmax.f32 %v8790_v3, %v8791_v23  ;;  %v8742_v47 = vrot.slane %v8741_v19, 2  ;;  %v8748_v63 = vmax.f32 %v8746_v35, %v8747_v59  ;;  %v8760_v57 = vsel %vm8066_vm3, %v7146_v46, -inf }
 0x47d   :  { %v8780_v7 = vmax.f32 %v8778_v54, %v8779_v51  ;;  %v8787_v32 = vmax.f32 %v8785_v33, %v8786_v40  ;;  %v19949_v20 = vsel %vm9859_vm4, %v8773_v16, -inf  ;;  %v8755_v37 = vmax.f32 %v8753_v29, %v8754_v24 }
 0x47e   :  { %v8793_v62 = vrot.slane %v8792_v53, 1  ;;  %v8743_v58 = vmax.f32 %v8741_v19, %v8742_v47  ;;  %v8749_v2 = vrot.slane %v8748_v63, 2  ;;  %v8761_v45 = vrot.slane %v8760_v57, 4 }
 0x47f   :  { %v19952_v27 = vsel %vm9859_vm4, %v8780_v7, -inf  ;;  %v19955_v13 = vsel %vm9859_vm4, %v8787_v32, -inf  ;;  %v8756_v6 = vrot.slane %v8755_v37, 2  ;;  %v16434_v38 = vadd.f32 %v19569_v39, %v21942_v22 }
 0x480   :  { %v8794_v5 = vmax.f32 %v8792_v53, %v8793_v62  ;;  %v8744_v49 = vrot.slane %v8743_v58, 1  ;;  %v8750_v8 = vmax.f32 %v8748_v63, %v8749_v2  ;;  %v8762_v52 = vmax.f32 %v8760_v57, %v8761_v45 }
 0x481   :  { %v8757_v60 = vmax.f32 %v8755_v37, %v8756_v6  ;;  %v6557_v1 = vadd.f32 %v19962_v61, %v16434_v38  ;;  %v16435_v28 = vadd.f32 %v19613_v26, %v21943_v14  ;;  %v16436_v36 = vadd.f32 %v19632_v15, %v21944_v48  ;;  %v21945_v15 = vld [vmem:[#allocation20_spill] sm:$0xff] }
 0x482   :  { %v19970_v39 = vsel %vm9859_vm4, %v8794_v5, -inf  ;;  %v8745_v46 = vmax.f32 %v8743_v58, %v8744_v49  ;;  %v8751_v50 = vrot.slane %v8750_v8, 1  ;;  %v8763_v31 = vrot.slane %v8762_v52, 2  ;;  %v10589_v58 = vld [vmem:[#allocation3 + $0x51] sm:$0xff] }
 0x483   :  { %v8758_v11 = vrot.slane %v8757_v60, 1  ;;  %v6621_v25 = vmax.f32 %v6557_v1, 0.0  ;;  %v6556_v0 = vadd.f32 %v19962_v61, %v16435_v28  ;;  %v6559_v3 = vadd.f32 %v19962_v61, %v16436_v36  ;;  %16061 = vmatmul.mubr.msk.f32.gmra.mrb[68].mxu1 %vm9859_vm4, %v10589_v58 }
 0x484   :  { %v8752_v18 = vmax.f32 %v8750_v8, %v8751_v50  ;;  %v8764_v35 = vmax.f32 %v8762_v52, %v8763_v31  ;;  %v19977_v26 = vsel %vm9859_vm4, %v8745_v46, -inf  ;;  %v16437_v4 = vadd.f32 %v19660_v17, %v21945_v15  ;;  %v20007_v52 = vpop.f32.mrb[40].mxu0 }
 0x485   :  { %v8759_v42 = vmax.f32 %v8757_v60, %v8758_v11  ;;  %v7181_v54 = vcombine.high %v6621_v25, %v6621_v25  ;;  %v7188_v33 = vrot.slane %v6621_v25, %v19211_v21  ;;  %v6620_v23 = vmax.f32 %v6556_v0, 0.0 }
 0x486   :  { %v8765_v19 = vrot.slane %v8764_v35, 1  ;;  %v19983_v59 = vsel %vm9859_vm4, %v8752_v18, -inf  ;;  %v19985_v29 = vmax.f32 %v6559_v3, 0.0  ;;  %v19988_v16 = vadd.f32 %v19962_v61, %v16437_v4 }
 0x487   :  { %v19991_v51 = vsel %vm9859_vm4, %v8759_v42, -inf  ;;  %v7195_v40 = vrot.slane %v7181_v54, %v19211_v21  ;;  %v7196_v17 = vcombine.high %v7188_v33, %v7188_v33  ;;  %v8823_v24 = vsel %vm8066_vm3, %v7188_v33, -inf }
 0x488   :  { %v8766_v53 = vmax.f32 %v8764_v35, %v8765_v19  ;;  %v8824_v47 = vrot.slane %v8823_v24, 4  ;;  %v7164_v63 = vcombine.high %v6620_v23, %v6620_v23  ;;  %v7171_v57 = vrot.slane %v6620_v23, %v19211_v21 }
 0x489   :  { %v7197_v7 = vcombine.high %v7195_v40, %v7195_v40  ;;  %v8830_v32 = vsel %vm8066_vm3, %v7196_v17, -inf  ;;  %v8837_v37 = vsel %vm8066_vm3, %v7195_v40, -inf  ;;  %v7215_v62 = vcombine.high %v19985_v29, %v19985_v29 }
 0x48a   :  { %v20001_v2 = vsel %vm9859_vm4, %v8766_v53, -inf  ;;  %v8825_v45 = vmax.f32 %v8823_v24, %v8824_v47  ;;  %v8831_v6 = vrot.slane %v8830_v32, 4  ;;  %v8838_v22 = vrot.slane %v8837_v37, 4 }
 0x48b   :  { %v8844_v38 = vsel %vm8066_vm3, %v7197_v7, -inf  ;;  %v7178_v5 = vrot.slane %v7164_v63, %v19211_v21  ;;  %v7179_v49 = vcombine.high %v7171_v57, %v7171_v57  ;;  %v8795_v8 = vsel %vm8066_vm3, %v7171_v57, -inf }
 0x48c   :  { %v8826_v60 = vrot.slane %v8825_v45, 2  ;;  %v8832_v1 = vmax.f32 %v8830_v32, %v8831_v6  ;;  %v8839_v14 = vmax.f32 %v8837_v37, %v8838_v22  ;;  %v8845_v28 = vrot.slane %v8844_v38, 4 }
 0x48d   :  { %v7180_v48 = vcombine.high %v7178_v5, %v7178_v5  ;;  %v8796_v36 = vrot.slane %v8795_v8, 4  ;;  %v8802_v46 = vsel %vm8066_vm3, %v7179_v49, -inf  ;;  %v8809_v50 = vsel %vm8066_vm3, %v7178_v5, -inf }
 0x48e   :  { %v8827_v31 = vmax.f32 %v8825_v45, %v8826_v60  ;;  %v8833_v11 = vrot.slane %v8832_v1, 2  ;;  %v8840_v25 = vrot.slane %v8839_v14, 2  ;;  %v8846_v0 = vmax.f32 %v8844_v38, %v8845_v28 }
 0x48f   :  { %v8797_v3 = vmax.f32 %v8795_v8, %v8796_v36  ;;  %v8803_v18 = vrot.slane %v8802_v46, 4  ;;  %v8810_v35 = vrot.slane %v8809_v50, 4  ;;  %v8816_v15 = vsel %vm8066_vm3, %v7180_v48, -inf }
 0x490   :  { %v8828_v4 = vrot.slane %v8827_v31, 1  ;;  %v8834_v42 = vmax.f32 %v8832_v1, %v8833_v11  ;;  %v8841_v54 = vmax.f32 %v8839_v14, %v8840_v25  ;;  %v8847_v33 = vrot.slane %v8846_v0, 2 }
 0x491   :  { %v8798_v23 = vrot.slane %v8797_v3, 2  ;;  %v8804_v19 = vmax.f32 %v8802_v46, %v8803_v18  ;;  %v8811_v40 = vmax.f32 %v8809_v50, %v8810_v35  ;;  %v8817_v17 = vrot.slane %v8816_v15, 4 }
 0x492   :  { %v8829_v24 = vmax.f32 %v8827_v31, %v8828_v4  ;;  %v8835_v53 = vrot.slane %v8834_v42, 1  ;;  %v8842_v47 = vrot.slane %v8841_v54, 1  ;;  %v8848_v63 = vmax.f32 %v8846_v0, %v8847_v33  ;;  %v20018_v31 = vpop.f32.mrb[41].mxu0 }
 0x493   :  { %v8799_v57 = vmax.f32 %v8797_v3, %v8798_v23  ;;  %v8805_v7 = vrot.slane %v8804_v19, 2  ;;  %v8812_v32 = vrot.slane %v8811_v40, 2  ;;  %v8818_v37 = vmax.f32 %v8816_v15, %v8817_v17 }
 0x494   :  { %v8836_v58 = vmax.f32 %v8834_v42, %v8835_v53  ;;  %v8843_v45 = vmax.f32 %v8841_v54, %v8842_v47  ;;  %v8849_v6 = vrot.slane %v8848_v63, 1  ;;  %v10017_v22 = vsel %vm9859_vm4, %v8829_v24, -inf }
 0x495   :  { %v10018_v38 = vmax.f32 %v19949_v20, %v10017_v22  ;;  %v8800_v5 = vrot.slane %v8799_v57, 1  ;;  %v8806_v49 = vmax.f32 %v8804_v19, %v8805_v7  ;;  %v8813_v8 = vmax.f32 %v8811_v40, %v8812_v32  ;;  %v21946_v22 = vld [vmem:[#allocation21_spill] sm:$0xff] }
 0x496   :  { %v8850_v60 = vmax.f32 %v8848_v63, %v8849_v6  ;;  %v10020_v1 = vsel %vm9859_vm4, %v8836_v58, -inf  ;;  %v10023_v14 = vsel %vm9859_vm4, %v8843_v45, -inf  ;;  %v8819_v28 = vrot.slane %v8818_v37, 2 }
 0x497   :  { %v10021_v48 = vmax.f32 %v19952_v27, %v10020_v1  ;;  %v10024_v36 = vmax.f32 %v19955_v13, %v10023_v14  ;;  %v8801_v46 = vmax.f32 %v8799_v57, %v8800_v5  ;;  %v8807_v50 = vrot.slane %v8806_v49, 1  ;;  %v21947_v1 = vld [vmem:[#allocation22_spill] sm:$0xff] }
 0x498   :  { %v10026_v11 = vsel %vm9859_vm4, %v8850_v60, -inf  ;;  %v8814_v20 = vrot.slane %v8813_v8, 1  ;;  %v8820_v25 = vmax.f32 %v8818_v37, %v8819_v28  ;;  %v7222_v0 = vrot.slane %v19985_v29, %v19211_v21 }
 0x499   :  { %v10027_v3 = vmax.f32 %v19970_v39, %v10026_v11  ;;  %v8808_v18 = vmax.f32 %v8806_v49, %v8807_v50  ;;  %v10005_v35 = vsel %vm9859_vm4, %v8801_v46, -inf  ;;  %v7229_v27 = vrot.slane %v7215_v62, %v19211_v21 }
 0x49a   :  { %v8815_v13 = vmax.f32 %v8813_v8, %v8814_v20  ;;  %v8821_v15 = vrot.slane %v8820_v25, 1  ;;  %v10006_v4 = vmax.f32 %v19977_v26, %v10005_v35  ;;  %v7230_v42 = vcombine.high %v7222_v0, %v7222_v0 }
 0x49b   :  { %v10008_v54 = vsel %vm9859_vm4, %v8808_v18, -inf  ;;  %v7231_v33 = vcombine.high %v7229_v27, %v7229_v27  ;;  %v8879_v23 = vsel %vm8066_vm3, %v7222_v0, -inf  ;;  %v8893_v39 = vsel %vm8066_vm3, %v7229_v27, -inf  ;;  %v20051_v0 = vpop.f32.mrb[42].mxu0 }
 0x49c   :  { %v8822_v19 = vmax.f32 %v8820_v25, %v8821_v15  ;;  %v10009_v40 = vmax.f32 %v19983_v59, %v10008_v54  ;;  %v10011_v17 = vsel %vm9859_vm4, %v8815_v13, -inf  ;;  %v8880_v24 = vrot.slane %v8879_v23, 4 }
 0x49d   :  { %v10012_v29 = vmax.f32 %v19991_v51, %v10011_v17  ;;  %v8886_v62 = vsel %vm8066_vm3, %v7230_v42, -inf  ;;  %v8894_v53 = vrot.slane %v8893_v39, 4  ;;  %v8900_v26 = vsel %vm8066_vm3, %v7231_v33, -inf }
 0x49e   :  { %v10014_v47 = vsel %vm9859_vm4, %v8822_v19, -inf  ;;  %v10461_v63 = vsel %vm10412_vm5, %v10009_v40, %v10006_v4  ;;  %v8881_v57 = vmax.f32 %v8879_v23, %v8880_v24  ;;  %v8887_v7 = vrot.slane %v8886_v62, 4 }
 0x49f   :  { %v10015_v32 = vmax.f32 %v20001_v2, %v10014_v47  ;;  %v10462_v59 = vsel %vm10414_vm6, %v10012_v29, %v10461_v63  ;;  %v8895_v37 = vmax.f32 %v8893_v39, %v8894_v53  ;;  %v8901_v58 = vrot.slane %v8900_v26, 4 }
 0x4a0   :  { %v8882_v45 = vrot.slane %v8881_v57, 2  ;;  %v8888_v6 = vmax.f32 %v8886_v62, %v8887_v7  ;;  %v6622_v51 = vmax.f32 %v19988_v16, 0.0  ;;  %v16438_v5 = vadd.f32 %v19692_v9, %v21946_v22 }
 0x4a1   :  { %v10463_v49 = vsel %vm10416_vm7, %v10015_v32, %v10462_v59  ;;  %v8896_v8 = vrot.slane %v8895_v37, 2  ;;  %v8902_v60 = vmax.f32 %v8900_v26, %v8901_v58  ;;  %v16439_v14 = vadd.f32 %v19728_v12, %v21947_v1  ;;  %v21949_v1 = vld [vmem:[#allocation24_spill] sm:$0xff] }
 0x4a2   :  { %v10464_v2 = vsel %vm10418_vm8, %v10018_v38, %v10463_v49  ;;  %v8883_v28 = vmax.f32 %v8881_v57, %v8882_v45  ;;  %v8889_v46 = vrot.slane %v8888_v6, 2  ;;  %v7198_v50 = vcombine.high %v6622_v51, %v6622_v51 }
 0x4a3   :  { %v10465_v11 = vsel %vm10420_vm9, %v10021_v48, %v10464_v2  ;;  %v8897_v20 = vmax.f32 %v8895_v37, %v8896_v8  ;;  %v8903_v25 = vrot.slane %v8902_v60, 2  ;;  %v7205_v16 = vrot.slane %v6622_v51, %v19211_v21  ;;  %v21948_v51 = vld [vmem:[#allocation23_spill] sm:$0xff] }
 0x4a4   :  { %v10466_v9 = vsel %vm10422_vm10, %v10024_v36, %v10465_v11  ;;  %v8884_v18 = vrot.slane %v8883_v28, 1  ;;  %v8890_v35 = vmax.f32 %v8888_v6, %v8889_v46  ;;  %v7212_v27 = vrot.slane %v7198_v50, %v19211_v21 }
 0x4a5   :  { %v10467_v12 = vsel %vm10424_vm11, %v10027_v3, %v10466_v9  ;;  %v8898_v38 = vrot.slane %v8897_v20, 1  ;;  %v8904_v13 = vmax.f32 %v8902_v60, %v8903_v25  ;;  %v7213_v15 = vcombine.high %v7205_v16, %v7205_v16 }
 0x4a6   :  { %10554 = vst.msk [vmem:[#allocation3 + $0x71] sm:$0xff] %vm9859_vm4, %v10467_v12  ;;  %v8885_v48 = vmax.f32 %v8883_v28, %v8884_v18  ;;  %v8891_v4 = vrot.slane %v8890_v35, 1  ;;  %v7214_v42 = vcombine.high %v7212_v27, %v7212_v27  ;;  %v8851_v54 = vsel %vm8066_vm3, %v7205_v16, -inf }
 0x4a7   :  { %v8899_v33 = vmax.f32 %v8897_v20, %v8898_v38  ;;  %v8905_v23 = vrot.slane %v8904_v13, 1  ;;  %v8852_v39 = vrot.slane %v8851_v54, 4  ;;  %v8858_v36 = vsel %vm8066_vm3, %v7213_v15, -inf }
 0x4a8   :  { %v8892_v19 = vmax.f32 %v8890_v35, %v8891_v4  ;;  %v20060_v40 = vsel %vm9859_vm4, %v8885_v48, -inf  ;;  %v8859_v3 = vrot.slane %v8858_v36, 4  ;;  %v8865_v17 = vsel %vm8066_vm3, %v7212_v27, -inf }
 0x4a9   :  { %v8906_v24 = vmax.f32 %v8904_v13, %v8905_v23  ;;  %v20064_v29 = vsel %vm9859_vm4, %v8899_v33, -inf  ;;  %v8853_v62 = vmax.f32 %v8851_v54, %v8852_v39  ;;  %v8866_v53 = vrot.slane %v8865_v17, 4 }
 0x4aa   :  { %v20067_v26 = vsel %vm9859_vm4, %v8892_v19, -inf  ;;  %v8860_v47 = vmax.f32 %v8858_v36, %v8859_v3  ;;  %v8872_v63 = vsel %vm8066_vm3, %v7214_v42, -inf  ;;  %v6561_v57 = vadd.f32 %v19962_v61, %v16438_v5  ;;  %v20081_v5 = vpop.f32.mrb[43].mxu0 }
 0x4ab   :  { %v20072_v7 = vsel %vm9859_vm4, %v8906_v24, -inf  ;;  %v8854_v32 = vrot.slane %v8853_v62, 2  ;;  %v8867_v59 = vmax.f32 %v8865_v17, %v8866_v53  ;;  %v8873_v37 = vrot.slane %v8872_v63, 4 }
 0x4ac   :  { %v8861_v58 = vrot.slane %v8860_v47, 2  ;;  %v6625_v45 = vmax.f32 %v6561_v57, 0.0  ;;  %v6560_v6 = vadd.f32 %v19962_v61, %v16439_v14  ;;  %v16440_v22 = vadd.f32 %v19764_v43, %v21948_v51  ;;  %v20104_v51 = vpop.f32.mrb[44].mxu0 }
 0x4ad   :  { %v8855_v49 = vmax.f32 %v8853_v62, %v8854_v32  ;;  %v8868_v8 = vrot.slane %v8867_v59, 2  ;;  %v8874_v60 = vmax.f32 %v8872_v63, %v8873_v37  ;;  %v20079_v2 = vadd.f32 %v19796_v55, %v21949_v1 }
 0x4ae   :  { %v8862_v28 = vmax.f32 %v8860_v47, %v8861_v58  ;;  %v7249_v46 = vcombine.high %v6625_v45, %v6625_v45  ;;  %v7256_v50 = vrot.slane %v6625_v45, %v19211_v21  ;;  %v6624_v11 = vmax.f32 %v6560_v6, 0.0  ;;  %v10590_v47 = vld [vmem:[#allocation3 + $0x61] sm:$0xff] }
 0x4af   :  { %v8856_v20 = vrot.slane %v8855_v49, 1  ;;  %v8869_v25 = vmax.f32 %v8867_v59, %v8868_v8  ;;  %v8875_v14 = vrot.slane %v8874_v60, 2  ;;  %v6563_v16 = vadd.f32 %v19962_v61, %v16440_v22  ;;  %16063 = vmatprep.mubr.msk.f32.mxu1 %vm9859_vm4, %v10590_v47 }
 0x4b0   :  { %v8863_v43 = vrot.slane %v8862_v28, 1  ;;  %v7263_v9 = vrot.slane %v7249_v46, %v19211_v21  ;;  %v7264_v18 = vcombine.high %v7256_v50, %v7256_v50  ;;  %v8935_v35 = vsel %vm8066_vm3, %v7256_v50, -inf }
 0x4b1   :  { %v8857_v55 = vmax.f32 %v8855_v49, %v8856_v20  ;;  %v8870_v27 = vrot.slane %v8869_v25, 1  ;;  %v8876_v12 = vmax.f32 %v8874_v60, %v8875_v14  ;;  %v8936_v38 = vrot.slane %v8935_v35, 4 }
 0x4b2   :  { %v8864_v13 = vmax.f32 %v8862_v28, %v8863_v43  ;;  %v7265_v15 = vcombine.high %v7263_v9, %v7263_v9  ;;  %v8942_v48 = vsel %vm8066_vm3, %v7264_v18, -inf  ;;  %v8949_v4 = vsel %vm8066_vm3, %v7263_v9, -inf }
 0x4b3   :  { %v8871_v42 = vmax.f32 %v8869_v25, %v8870_v27  ;;  %v8877_v54 = vrot.slane %v8876_v12, 1  ;;  %v20090_v33 = vsel %vm9859_vm4, %v8857_v55, -inf  ;;  %v8937_v23 = vmax.f32 %v8935_v35, %v8936_v38 }
 0x4b4   :  { %v20093_v39 = vsel %vm9859_vm4, %v8864_v13, -inf  ;;  %v8943_v36 = vrot.slane %v8942_v48, 4  ;;  %v8950_v19 = vrot.slane %v8949_v4, 4  ;;  %v8956_v3 = vsel %vm8066_vm3, %v7265_v15, -inf }
 0x4b5   :  { %v8878_v17 = vmax.f32 %v8876_v12, %v8877_v54  ;;  %v20097_v24 = vsel %vm9859_vm4, %v8871_v42, -inf  ;;  %v8938_v62 = vrot.slane %v8937_v23, 2  ;;  %v8957_v53 = vrot.slane %v8956_v3, 4 }
 0x4b6   :  { %v8944_v63 = vmax.f32 %v8942_v48, %v8943_v36  ;;  %v8951_v57 = vmax.f32 %v8949_v4, %v8950_v19  ;;  %v7232_v32 = vcombine.high %v6624_v11, %v6624_v11  ;;  %v7239_v59 = vrot.slane %v6624_v11, %v19211_v21 }
 0x4b7   :  { %v20102_v37 = vsel %vm9859_vm4, %v8878_v17, -inf  ;;  %v8939_v58 = vmax.f32 %v8937_v23, %v8938_v62  ;;  %v8958_v45 = vmax.f32 %v8956_v3, %v8957_v53  ;;  %v6627_v6 = vmax.f32 %v6563_v16, 0.0 }
 0x4b8   :  { %v8945_v22 = vrot.slane %v8944_v63, 2  ;;  %v8952_v49 = vrot.slane %v8951_v57, 2  ;;  %v7246_v8 = vrot.slane %v7232_v32, %v19211_v21  ;;  %v7247_v60 = vcombine.high %v7239_v59, %v7239_v59 }
 0x4b9   :  { %v8940_v1 = vrot.slane %v8939_v58, 1  ;;  %v8959_v28 = vrot.slane %v8958_v45, 2  ;;  %v8907_v46 = vsel %vm8066_vm3, %v7239_v59, -inf  ;;  %v7283_v50 = vcombine.high %v6627_v6, %v6627_v6 }
 0x4ba   :  { %v8946_v11 = vmax.f32 %v8944_v63, %v8945_v22  ;;  %v8953_v20 = vmax.f32 %v8951_v57, %v8952_v49  ;;  %v7248_v25 = vcombine.high %v7246_v8, %v7246_v8  ;;  %v8908_v14 = vrot.slane %v8907_v46, 4 }
 0x4bb   :  { %v8941_v43 = vmax.f32 %v8939_v58, %v8940_v1  ;;  %v8960_v9 = vmax.f32 %v8958_v45, %v8959_v28  ;;  %v8914_v16 = vsel %vm8066_vm3, %v7247_v60, -inf  ;;  %v8921_v18 = vsel %vm8066_vm3, %v7246_v8, -inf  ;;  %v20132_v60 = vpop.f32.mrb[45].mxu0 }
 0x4bc   :  { %v8947_v35 = vrot.slane %v8946_v11, 1  ;;  %v8954_v55 = vrot.slane %v8953_v20, 1  ;;  %v8909_v27 = vmax.f32 %v8907_v46, %v8908_v14  ;;  %v8915_v12 = vrot.slane %v8914_v16, 4 }
 0x4bd   :  { %v8961_v38 = vrot.slane %v8960_v9, 1  ;;  %v20111_v13 = vsel %vm9859_vm4, %v8941_v43, -inf  ;;  %v8922_v15 = vrot.slane %v8921_v18, 4  ;;  %v8928_v48 = vsel %vm8066_vm3, %v7248_v25, -inf }
 0x4be   :  { %v8948_v4 = vmax.f32 %v8946_v11, %v8947_v35  ;;  %v8955_v42 = vmax.f32 %v8953_v20, %v8954_v55  ;;  %v10042_v54 = vmax.f32 %v20060_v40, %v20111_v13  ;;  %v8910_v23 = vrot.slane %v8909_v27, 2 }
 0x4bf   :  { %v8962_v36 = vmax.f32 %v8960_v9, %v8961_v38  ;;  %v8916_v19 = vmax.f32 %v8914_v16, %v8915_v12  ;;  %v8923_v3 = vmax.f32 %v8921_v18, %v8922_v15  ;;  %v8929_v17 = vrot.slane %v8928_v48, 4 }
 0x4c0   :  { %v20117_v62 = vsel %vm9859_vm4, %v8948_v4, -inf  ;;  %v20120_v53 = vsel %vm9859_vm4, %v8955_v42, -inf  ;;  %v8911_v47 = vmax.f32 %v8909_v27, %v8910_v23  ;;  %v7290_v63 = vrot.slane %v6627_v6, %v19211_v21 }
 0x4c1   :  { %v10045_v57 = vmax.f32 %v20067_v26, %v20117_v62  ;;  %v10048_v32 = vmax.f32 %v20064_v29, %v20120_v53  ;;  %v20128_v59 = vsel %vm9859_vm4, %v8962_v36, -inf  ;;  %v8917_v58 = vrot.slane %v8916_v19, 2 }
 0x4c2   :  { %v10051_v45 = vmax.f32 %v20072_v7, %v20128_v59  ;;  %v8912_v22 = vrot.slane %v8911_v47, 1  ;;  %v8924_v49 = vrot.slane %v8923_v3, 2  ;;  %v8930_v8 = vmax.f32 %v8928_v48, %v8929_v17 }
 0x4c3   :  { %v8918_v1 = vmax.f32 %v8916_v19, %v8917_v58  ;;  %v7297_v6 = vrot.slane %v7283_v50, %v19211_v21  ;;  %v7298_v28 = vcombine.high %v7290_v63, %v7290_v63  ;;  %v8991_v46 = vsel %vm8066_vm3, %v7290_v63, -inf }
 0x4c4   :  { %v8913_v11 = vmax.f32 %v8911_v47, %v8912_v22  ;;  %v8925_v20 = vmax.f32 %v8923_v3, %v8924_v49  ;;  %v8931_v25 = vrot.slane %v8930_v8, 2  ;;  %v8992_v14 = vrot.slane %v8991_v46, 4 }
 0x4c5   :  { %v8919_v43 = vrot.slane %v8918_v1, 1  ;;  %v7299_v9 = vcombine.high %v7297_v6, %v7297_v6  ;;  %v8998_v16 = vsel %vm8066_vm3, %v7298_v28, -inf  ;;  %v9005_v18 = vsel %vm8066_vm3, %v7297_v6, -inf }
 0x4c6   :  { %v8926_v35 = vrot.slane %v8925_v20, 1  ;;  %v8932_v55 = vmax.f32 %v8930_v8, %v8931_v25  ;;  %v10029_v27 = vsel %vm9859_vm4, %v8913_v11, -inf  ;;  %v8993_v12 = vmax.f32 %v8991_v46, %v8992_v14 }
 0x4c7   :  { %v8920_v38 = vmax.f32 %v8918_v1, %v8919_v43  ;;  %v10030_v50 = vmax.f32 %v20090_v33, %v10029_v27  ;;  %v8999_v15 = vrot.slane %v8998_v16, 4  ;;  %v9006_v48 = vrot.slane %v9005_v18, 4 }
 0x4c8   :  { %v8927_v4 = vmax.f32 %v8925_v20, %v8926_v35  ;;  %v8933_v42 = vrot.slane %v8932_v55, 1  ;;  %v8994_v23 = vrot.slane %v8993_v12, 2  ;;  %v9012_v36 = vsel %vm8066_vm3, %v7299_v9, -inf }
 0x4c9   :  { %v10032_v19 = vsel %vm9859_vm4, %v8920_v38, -inf  ;;  %v9000_v3 = vmax.f32 %v8998_v16, %v8999_v15  ;;  %v9007_v17 = vmax.f32 %v9005_v18, %v9006_v48  ;;  %v9013_v47 = vrot.slane %v9012_v36, 4  ;;  %v21950_v18 = vld [vmem:[#allocation25_spill] sm:$0xff]  ;;  %v21951_v38 = vld [vmem:[#allocation26_spill] sm:$0xff] }
 0x4ca   :  { %v8934_v63 = vmax.f32 %v8932_v55, %v8933_v42  ;;  %v10033_v58 = vmax.f32 %v20093_v39, %v10032_v19  ;;  %v10035_v22 = vsel %vm9859_vm4, %v8927_v4, -inf  ;;  %v8995_v49 = vmax.f32 %v8993_v12, %v8994_v23 }
 0x4cb   :  { %v10036_v33 = vmax.f32 %v20097_v24, %v10035_v22  ;;  %v9001_v8 = vrot.slane %v9000_v3, 2  ;;  %v9008_v1 = vrot.slane %v9007_v17, 2  ;;  %v9014_v6 = vmax.f32 %v9012_v36, %v9013_v47 }
 0x4cc   :  { %v10038_v28 = vsel %vm9859_vm4, %v8934_v63, -inf  ;;  %v10468_v46 = vsel %vm10412_vm5, %v10033_v58, %v10030_v50  ;;  %v8996_v11 = vrot.slane %v8995_v49, 1  ;;  %v6562_v20 = vadd.f32 %v19962_v61, %v20079_v2  ;;  %v20156_v2 = vpop.f32.mrb[46].mxu0 }
 0x4cd   :  { %v10039_v25 = vmax.f32 %v20102_v37, %v10038_v28  ;;  %v10469_v39 = vsel %vm10414_vm6, %v10036_v33, %v10468_v46  ;;  %v9002_v14 = vmax.f32 %v9000_v3, %v9001_v8  ;;  %v9009_v43 = vmax.f32 %v9007_v17, %v9008_v1 }
 0x4ce   :  { %v8997_v9 = vmax.f32 %v8995_v49, %v8996_v11  ;;  %v9015_v16 = vrot.slane %v9014_v6, 2  ;;  %v6626_v24 = vmax.f32 %v6562_v20, 0.0  ;;  %v16442_v35 = vadd.f32 %v19830_v44, %v21950_v18  ;;  %v21952_v11 = vld [vmem:[#allocation27_spill] sm:$0xff] }
 0x4cf   :  { %v10470_v55 = vsel %vm10416_vm7, %v10039_v25, %v10469_v39  ;;  %v9003_v27 = vrot.slane %v9002_v14, 1  ;;  %v9010_v12 = vrot.slane %v9009_v43, 1  ;;  %v16443_v50 = vadd.f32 %v19863_v30, %v21951_v38 }
 0x4d0   :  { %v10471_v37 = vsel %vm10418_vm8, %v10042_v54, %v10470_v55  ;;  %v9016_v15 = vmax.f32 %v9014_v6, %v9015_v16  ;;  %v20163_v48 = vsel %vm9859_vm4, %v8997_v9, -inf  ;;  %v7266_v4 = vcombine.high %v6626_v24, %v6626_v24  ;;  %v20199_v9 = vpop.f32.mrb[47].mxu0 }
 0x4d1   :  { %v10472_v44 = vsel %vm10420_vm9, %v10045_v57, %v10471_v37  ;;  %v9004_v42 = vmax.f32 %v9002_v14, %v9003_v27  ;;  %v9011_v23 = vmax.f32 %v9009_v43, %v9010_v12  ;;  %v7273_v30 = vrot.slane %v6626_v24, %v19211_v21 }
 0x4d2   :  { %v10473_v40 = vsel %vm10422_vm10, %v10048_v32, %v10472_v44  ;;  %v9017_v13 = vrot.slane %v9016_v15, 1  ;;  %v7280_v54 = vrot.slane %v7266_v4, %v19211_v21  ;;  %v6565_v36 = vadd.f32 %v19962_v61, %v16442_v35 }
 0x4d3   :  { %v10474_v26 = vsel %vm10424_vm11, %v10051_v45, %v10473_v40  ;;  %v20181_v62 = vsel %vm9859_vm4, %v9004_v42, -inf  ;;  %v20184_v57 = vsel %vm9859_vm4, %v9011_v23, -inf  ;;  %v7281_v19 = vcombine.high %v7273_v30, %v7273_v30 }
 0x4d4   :  { %10555 = vst.msk [vmem:[#allocation3 + $0x81] sm:$0xff] %vm9859_vm4, %v10474_v26  ;;  %v9018_v29 = vmax.f32 %v9016_v15, %v9017_v13  ;;  %v7282_v53 = vcombine.high %v7280_v54, %v7280_v54  ;;  %v8963_v32 = vsel %vm8066_vm3, %v7273_v30, -inf  ;;  %v8977_v3 = vsel %vm8066_vm3, %v7280_v54, -inf }
 0x4d5   :  { %v8964_v17 = vrot.slane %v8963_v32, 4  ;;  %v8970_v7 = vsel %vm8066_vm3, %v7281_v19, -inf  ;;  %v8978_v59 = vrot.slane %v8977_v3, 4  ;;  %v6629_v45 = vmax.f32 %v6565_v36, 0.0 }
 0x4d6   :  { %v20191_v47 = vsel %vm9859_vm4, %v9018_v29, -inf  ;;  %v8971_v63 = vrot.slane %v8970_v7, 4  ;;  %v8984_v58 = vsel %vm8066_vm3, %v7282_v53, -inf  ;;  %v6564_v22 = vadd.f32 %v19962_v61, %v16443_v50 }
 0x4d7   :  { %v8965_v49 = vmax.f32 %v8963_v32, %v8964_v17  ;;  %v8979_v33 = vmax.f32 %v8977_v3, %v8978_v59  ;;  %v8985_v8 = vrot.slane %v8984_v58, 4  ;;  %v7317_v1 = vcombine.high %v6629_v45, %v6629_v45 }
 0x4d8   :  { %v8972_v6 = vmax.f32 %v8970_v7, %v8971_v63  ;;  %v7324_v28 = vrot.slane %v6629_v45, %v19211_v21  ;;  %v6628_v46 = vmax.f32 %v6564_v22, 0.0  ;;  %v16444_v20 = vadd.f32 %v19897_v10, %v21952_v11 }
 0x4d9   :  { %v8966_v25 = vrot.slane %v8965_v49, 2  ;;  %v8980_v39 = vrot.slane %v8979_v33, 2  ;;  %v8986_v14 = vmax.f32 %v8984_v58, %v8985_v8  ;;  %v7331_v43 = vrot.slane %v7317_v1, %v19211_v21  ;;  %v10591_v58 = vld [vmem:[#allocation3 + $0x71] sm:$0xff] }
 0x4da   :  { %v8973_v16 = vrot.slane %v8972_v6, 2  ;;  %v7332_v24 = vcombine.high %v7324_v28, %v7324_v28  ;;  %v9047_v18 = vsel %vm8066_vm3, %v7324_v28, -inf  ;;  %v7300_v35 = vcombine.high %v6628_v46, %v6628_v46  ;;  %16064 = vmatmul.mubr.msk.f32.gmra.mrb[70].mxu1 %vm9859_vm4, %v10591_v58  ;;  %v21953_v58 = vld [vmem:[#allocation28_spill] sm:$0xff] }
 0x4db   :  { %v8967_v55 = vmax.f32 %v8965_v49, %v8966_v25  ;;  %v8981_v27 = vmax.f32 %v8979_v33, %v8980_v39  ;;  %v8987_v12 = vrot.slane %v8986_v14, 2  ;;  %v7333_v38 = vcombine.high %v7331_v43, %v7331_v43  ;;  %v20220_v25 = vpop.f32.mrb[48].mxu0 }
 0x4dc   :  { %v8974_v50 = vmax.f32 %v8972_v6, %v8973_v16  ;;  %v9048_v37 = vrot.slane %v9047_v18, 4  ;;  %v9054_v10 = vsel %vm8066_vm3, %v7332_v24, -inf  ;;  %v9061_v15 = vsel %vm8066_vm3, %v7331_v43, -inf }
 0x4dd   :  { %v8968_v4 = vrot.slane %v8967_v55, 1  ;;  %v8982_v44 = vrot.slane %v8981_v27, 1  ;;  %v8988_v42 = vmax.f32 %v8986_v14, %v8987_v12  ;;  %v9055_v23 = vrot.slane %v9054_v10, 4 }
 0x4de   :  { %v8975_v30 = vrot.slane %v8974_v50, 1  ;;  %v9049_v40 = vmax.f32 %v9047_v18, %v9048_v37  ;;  %v9062_v13 = vrot.slane %v9061_v15, 4  ;;  %v9068_v54 = vsel %vm8066_vm3, %v7333_v38, -inf }
 0x4df   :  { %v8969_v36 = vmax.f32 %v8967_v55, %v8968_v4  ;;  %v8983_v26 = vmax.f32 %v8981_v27, %v8982_v44  ;;  %v8989_v19 = vrot.slane %v8988_v42, 1  ;;  %v9056_v29 = vmax.f32 %v9054_v10, %v9055_v23 }
 0x4e0   :  { %v8976_v53 = vmax.f32 %v8974_v50, %v8975_v30  ;;  %v9050_v32 = vrot.slane %v9049_v40, 2  ;;  %v9063_v3 = vmax.f32 %v9061_v15, %v9062_v13  ;;  %v9069_v17 = vrot.slane %v9068_v54, 4 }
 0x4e1   :  { %v8990_v7 = vmax.f32 %v8988_v42, %v8989_v19  ;;  %v20206_v59 = vsel %vm9859_vm4, %v8969_v36, -inf  ;;  %v20209_v45 = vsel %vm9859_vm4, %v8983_v26, -inf  ;;  %v9057_v63 = vrot.slane %v9056_v29, 2 }
 0x4e2   :  { %v20212_v22 = vsel %vm9859_vm4, %v8976_v53, -inf  ;;  %v9051_v49 = vmax.f32 %v9049_v40, %v9050_v32  ;;  %v9064_v33 = vrot.slane %v9063_v3, 2  ;;  %v9070_v8 = vmax.f32 %v9068_v54, %v9069_v17 }
 0x4e3   :  { %v20216_v1 = vsel %vm9859_vm4, %v8990_v7, -inf  ;;  %v9058_v6 = vmax.f32 %v9056_v29, %v9057_v63  ;;  %v7307_v28 = vrot.slane %v6628_v46, %v19211_v21  ;;  %v7314_v11 = vrot.slane %v7300_v35, %v19211_v21 }
 0x4e4   :  { %v9052_v39 = vrot.slane %v9051_v49, 1  ;;  %v9065_v14 = vmax.f32 %v9063_v3, %v9064_v33  ;;  %v9071_v43 = vrot.slane %v9070_v8, 2  ;;  %v6567_v16 = vadd.f32 %v19962_v61, %v16444_v20 }
 0x4e5   :  { %v9059_v24 = vrot.slane %v9058_v6, 1  ;;  %v7315_v18 = vcombine.high %v7307_v28, %v7307_v28  ;;  %v7316_v55 = vcombine.high %v7314_v11, %v7314_v11  ;;  %v9019_v27 = vsel %vm8066_vm3, %v7307_v28, -inf }
 0x4e6   :  { %v9053_v12 = vmax.f32 %v9051_v49, %v9052_v39  ;;  %v9066_v38 = vrot.slane %v9065_v14, 1  ;;  %v9072_v50 = vmax.f32 %v9070_v8, %v9071_v43  ;;  %v9020_v37 = vrot.slane %v9019_v27, 4 }
 0x4e7   :  { %v9060_v10 = vmax.f32 %v9058_v6, %v9059_v24  ;;  %v9026_v46 = vsel %vm8066_vm3, %v7315_v18, -inf  ;;  %v9033_v35 = vsel %vm8066_vm3, %v7314_v11, -inf  ;;  %v9040_v15 = vsel %vm8066_vm3, %v7316_v55, -inf  ;;  %v20249_v11 = vpop.f32.mrb[49].mxu0 }
 0x4e8   :  { %v9067_v4 = vmax.f32 %v9065_v14, %v9066_v38  ;;  %v9073_v44 = vrot.slane %v9072_v50, 1  ;;  %v20228_v20 = vsel %vm9859_vm4, %v9053_v12, -inf  ;;  %v9021_v42 = vmax.f32 %v9019_v27, %v9020_v37  ;;  %v21954_v27 = vld [vmem:[#allocation29_spill] sm:$0xff] }
 0x4e9   :  { %v10066_v23 = vmax.f32 %v20163_v48, %v20228_v20  ;;  %v20233_v30 = vsel %vm9859_vm4, %v9060_v10, -inf  ;;  %v9027_v40 = vrot.slane %v9026_v46, 4  ;;  %v9034_v13 = vrot.slane %v9033_v35, 4 }
 0x4ea   :  { %v9074_v54 = vmax.f32 %v9072_v50, %v9073_v44  ;;  %v10069_v36 = vmax.f32 %v20181_v62, %v20233_v30  ;;  %v20238_v26 = vsel %vm9859_vm4, %v9067_v4, -inf  ;;  %v9022_v19 = vrot.slane %v9021_v42, 2 }
 0x4eb   :  { %v10072_v29 = vmax.f32 %v20184_v57, %v20238_v26  ;;  %v9028_v53 = vmax.f32 %v9026_v46, %v9027_v40  ;;  %v9035_v32 = vmax.f32 %v9033_v35, %v9034_v13  ;;  %v9041_v3 = vrot.slane %v9040_v15, 4 }
 0x4ec   :  { %v20243_v17 = vsel %vm9859_vm4, %v9074_v54, -inf  ;;  %v9023_v7 = vmax.f32 %v9021_v42, %v9022_v19  ;;  %v6631_v63 = vmax.f32 %v6567_v16, 0.0  ;;  %v16445_v49 = vadd.f32 %v19905_v56, %v21953_v58 }
 0x4ed   :  { %v10075_v33 = vmax.f32 %v20191_v47, %v20243_v17  ;;  %v9029_v8 = vrot.slane %v9028_v53, 2  ;;  %v9036_v6 = vrot.slane %v9035_v32, 2  ;;  %v9042_v28 = vmax.f32 %v9040_v15, %v9041_v3 }
 0x4ee   :  { %v9024_v39 = vrot.slane %v9023_v7, 1  ;;  %v7351_v14 = vcombine.high %v6631_v63, %v6631_v63  ;;  %v7358_v43 = vrot.slane %v6631_v63, %v19211_v21  ;;  %v6566_v24 = vadd.f32 %v19962_v61, %v16445_v49 }
 0x4ef   :  { %v9030_v18 = vmax.f32 %v9028_v53, %v9029_v8  ;;  %v9037_v55 = vmax.f32 %v9035_v32, %v9036_v6  ;;  %v9043_v16 = vrot.slane %v9042_v28, 2  ;;  %v20255_v56 = vadd.f32 %v19942_v34, %v21954_v27 }
 0x4f0   :  { %v9025_v12 = vmax.f32 %v9023_v7, %v9024_v39  ;;  %v7365_v38 = vrot.slane %v7351_v14, %v19211_v21  ;;  %v7366_v50 = vcombine.high %v7358_v43, %v7358_v43  ;;  %v9103_v37 = vsel %vm8066_vm3, %v7358_v43, -inf }
 0x4f1   :  { %v9031_v10 = vrot.slane %v9030_v18, 1  ;;  %v9038_v46 = vrot.slane %v9037_v55, 1  ;;  %v9044_v35 = vmax.f32 %v9042_v28, %v9043_v16  ;;  %v9104_v15 = vrot.slane %v9103_v37, 4 }
 0x4f2   :  { %v10053_v4 = vsel %vm9859_vm4, %v9025_v12, -inf  ;;  %v7367_v61 = vcombine.high %v7365_v38, %v7365_v38  ;;  %v9110_v44 = vsel %vm8066_vm3, %v7366_v50, -inf  ;;  %v9117_v42 = vsel %vm8066_vm3, %v7365_v38, -inf }
 0x4f3   :  { %v9032_v40 = vmax.f32 %v9030_v18, %v9031_v10  ;;  %v9039_v34 = vmax.f32 %v9037_v55, %v9038_v46  ;;  %v9045_v13 = vrot.slane %v9044_v35, 1  ;;  %v10054_v54 = vmax.f32 %v20206_v59, %v10053_v4 }
 0x4f4   :  { %v9105_v19 = vmax.f32 %v9103_v37, %v9104_v15  ;;  %v9111_v53 = vrot.slane %v9110_v44, 4  ;;  %v9118_v32 = vrot.slane %v9117_v42, 4  ;;  %v9124_v3 = vsel %vm8066_vm3, %v7367_v61, -inf }
 0x4f5   :  { %v9046_v7 = vmax.f32 %v9044_v35, %v9045_v13  ;;  %v10056_v63 = vsel %vm9859_vm4, %v9032_v40, -inf  ;;  %v10059_v58 = vsel %vm9859_vm4, %v9039_v34, -inf  ;;  %v9125_v49 = vrot.slane %v9124_v3, 4  ;;  %v20283_v34 = vpop.f32.mrb[50].mxu0 }
 0x4f6   :  { %v10057_v8 = vmax.f32 %v20212_v22, %v10056_v63  ;;  %v10060_v6 = vmax.f32 %v20209_v45, %v10059_v58  ;;  %v9106_v28 = vrot.slane %v9105_v19, 2  ;;  %v9112_v39 = vmax.f32 %v9110_v44, %v9111_v53  ;;  %v20310_v58 = vpop.f32.mrb[51].mxu0 }
 0x4f7   :  { %v10062_v14 = vsel %vm9859_vm4, %v9046_v7, -inf  ;;  %v9119_v59 = vmax.f32 %v9117_v42, %v9118_v32  ;;  %v9126_v43 = vmax.f32 %v9124_v3, %v9125_v49  ;;  %v6630_v18 = vmax.f32 %v6566_v24, 0.0 }
 0x4f8   :  { %v10063_v55 = vmax.f32 %v20216_v1, %v10062_v14  ;;  %v10475_v16 = vsel %vm10412_vm5, %v10057_v8, %v10054_v54  ;;  %v9107_v27 = vmax.f32 %v9105_v19, %v9106_v28  ;;  %v9113_v12 = vrot.slane %v9112_v39, 2 }
 0x4f9   :  { %v10476_v38 = vsel %vm10414_vm6, %v10060_v6, %v10475_v16  ;;  %v9120_v50 = vrot.slane %v9119_v59, 2  ;;  %v9127_v37 = vrot.slane %v9126_v43, 2  ;;  %v7334_v22 = vcombine.high %v6630_v18, %v6630_v18  ;;  %v20315_v6 = vld [vmem:[%s21822_s2] ss:$0 sm:$0xff]  ;;  %v21957_v16 = vld [vmem:[#allocation32_spill] sm:$0xff] }
 0x4fa   :  { %v10477_v45 = vsel %vm10416_vm7, %v10063_v55, %v10476_v38  ;;  %v9108_v10 = vrot.slane %v9107_v27, 1  ;;  %v9114_v46 = vmax.f32 %v9112_v39, %v9113_v12  ;;  %v7341_v35 = vrot.slane %v6630_v18, %v19211_v21  ;;  %v21955_v39 = vld [vmem:[#allocation30_spill] sm:$0xff]  ;;  %v21956_v18 = vld [vmem:[#allocation31_spill] sm:$0xff] }
 0x4fb   :  { %v10478_v1 = vsel %vm10418_vm8, %v10066_v23, %v10477_v45  ;;  %v9121_v24 = vmax.f32 %v9119_v59, %v9120_v50  ;;  %v9128_v15 = vmax.f32 %v9126_v43, %v9127_v37  ;;  %v7348_v4 = vrot.slane %v7334_v22, %v19211_v21 }
 0x4fc   :  { %v10479_v61 = vsel %vm10420_vm9, %v10069_v36, %v10478_v1  ;;  %v9109_v44 = vmax.f32 %v9107_v27, %v9108_v10  ;;  %v9115_v42 = vrot.slane %v9114_v46, 1  ;;  %v7349_v40 = vcombine.high %v7341_v35, %v7341_v35 }
 0x4fd   :  { %v10480_v48 = vsel %vm10422_vm10, %v10072_v29, %v10479_v61  ;;  %v9122_v20 = vrot.slane %v9121_v24, 1  ;;  %v9129_v23 = vrot.slane %v9128_v15, 1  ;;  %v7350_v13 = vcombine.high %v7348_v4, %v7348_v4 }
 0x4fe   :  { %v10481_v62 = vsel %vm10424_vm11, %v10075_v33, %v10480_v48  ;;  %v9116_v30 = vmax.f32 %v9114_v46, %v9115_v42  ;;  %v20294_v36 = vsel %vm9859_vm4, %v9109_v44, -inf  ;;  %v9075_v54 = vsel %vm8066_vm3, %v7341_v35, -inf }
 0x4ff   :  { %10556 = vst.msk [vmem:[#allocation3 + $0xb1] sm:$0xff] %vm9859_vm4, %v10481_v62  ;;  %v9123_v19 = vmax.f32 %v9121_v24, %v9122_v20  ;;  %v9130_v57 = vmax.f32 %v9128_v15, %v9129_v23  ;;  %v9076_v26 = vrot.slane %v9075_v54, 4  ;;  %v9082_v29 = vsel %vm8066_vm3, %v7349_v40, -inf }
 0x500   :  { %v20300_v53 = vsel %vm9859_vm4, %v9116_v30, -inf  ;;  %v9083_v32 = vrot.slane %v9082_v29, 4  ;;  %v9089_v47 = vsel %vm8066_vm3, %v7348_v4, -inf  ;;  %v9096_v17 = vsel %vm8066_vm3, %v7350_v13, -inf }
 0x501   :  { %v20305_v33 = vsel %vm9859_vm4, %v9123_v19, -inf  ;;  %v20308_v3 = vsel %vm9859_vm4, %v9130_v57, -inf  ;;  %v9077_v7 = vmax.f32 %v9075_v54, %v9076_v26  ;;  %v9090_v63 = vrot.slane %v9089_v47, 4 }
 0x502   :  { %v9084_v49 = vmax.f32 %v9082_v29, %v9083_v32  ;;  %v9097_v8 = vrot.slane %v9096_v17, 4  ;;  %v6569_v28 = vadd.f32 %v20315_v6, %v20255_v56  ;;  %v16447_v14 = vadd.f32 %v19972_v41, %v21955_v39 }
 0x503   :  { %v9078_v59 = vrot.slane %v9077_v7, 2  ;;  %v9091_v43 = vmax.f32 %v9089_v47, %v9090_v63  ;;  %v16448_v55 = vadd.f32 %v20007_v52, %v21956_v18  ;;  %v16449_v27 = vadd.f32 %v20018_v31, %v21957_v16 }
 0x504   :  { %v9085_v12 = vrot.slane %v9084_v49, 2  ;;  %v9098_v38 = vmax.f32 %v9096_v17, %v9097_v8  ;;  %v6633_v50 = vmax.f32 %v6569_v28, 0.0  ;;  %v6568_v37 = vadd.f32 %v20315_v6, %v16447_v14 }
 0x505   :  { %v9079_v22 = vmax.f32 %v9077_v7, %v9078_v59  ;;  %v9092_v45 = vrot.slane %v9091_v43, 2  ;;  %v6571_v56 = vadd.f32 %v20315_v6, %v16448_v55  ;;  %v20328_v10 = vadd.f32 %v20315_v6, %v16449_v27 }
 0x506   :  { %v9086_v41 = vmax.f32 %v9084_v49, %v9085_v12  ;;  %v9099_v46 = vrot.slane %v9098_v38, 2  ;;  %v7385_v35 = vcombine.high %v6633_v50, %v6633_v50  ;;  %v7392_v52 = vrot.slane %v6633_v50, %v19211_v21 }
 0x507   :  { %v9080_v1 = vrot.slane %v9079_v22, 1  ;;  %v9093_v24 = vmax.f32 %v9091_v43, %v9092_v45  ;;  %v6632_v31 = vmax.f32 %v6568_v37, 0.0  ;;  %v20331_v15 = vmax.f32 %v6571_v56, 0.0 }
 0x508   :  { %v9087_v4 = vrot.slane %v9086_v41, 1  ;;  %v9100_v61 = vmax.f32 %v9098_v38, %v9099_v46  ;;  %v7399_v44 = vrot.slane %v7385_v35, %v19211_v21  ;;  %v7400_v42 = vcombine.high %v7392_v52, %v7392_v52  ;;  %v20355_v46 = vpop.f32.mrb[52].mxu0 }
 0x509   :  { %v9081_v40 = vmax.f32 %v9079_v22, %v9080_v1  ;;  %v9094_v48 = vrot.slane %v9093_v24, 1  ;;  %v9159_v20 = vsel %vm8066_vm3, %v7392_v52, -inf  ;;  %v7368_v23 = vcombine.high %v6632_v31, %v6632_v31 }
 0x50a   :  { %v9088_v13 = vmax.f32 %v9086_v41, %v9087_v4  ;;  %v9101_v62 = vrot.slane %v9100_v61, 1  ;;  %v7401_v30 = vcombine.high %v7399_v44, %v7399_v44  ;;  %v9160_v54 = vrot.slane %v9159_v20, 4 }
 0x50b   :  { %v9095_v19 = vmax.f32 %v9093_v24, %v9094_v48  ;;  %v20336_v57 = vsel %vm9859_vm4, %v9081_v40, -inf  ;;  %v9166_v26 = vsel %vm8066_vm3, %v7400_v42, -inf  ;;  %v9173_v29 = vsel %vm8066_vm3, %v7399_v44, -inf }
 0x50c   :  { %v9102_v32 = vmax.f32 %v9100_v61, %v9101_v62  ;;  %v20341_v47 = vsel %vm9859_vm4, %v9088_v13, -inf  ;;  %v9161_v17 = vmax.f32 %v9159_v20, %v9160_v54  ;;  %v9167_v7 = vrot.slane %v9166_v26, 4 }
 0x50d   :  { %v20344_v63 = vsel %vm9859_vm4, %v9095_v19, -inf  ;;  %v9174_v49 = vrot.slane %v9173_v29, 4  ;;  %v9180_v8 = vsel %vm8066_vm3, %v7401_v30, -inf  ;;  %v7375_v28 = vrot.slane %v6632_v31, %v19211_v21 }
 0x50e   :  { %v20349_v39 = vsel %vm9859_vm4, %v9102_v32, -inf  ;;  %v9162_v14 = vrot.slane %v9161_v17, 2  ;;  %v9168_v59 = vmax.f32 %v9166_v26, %v9167_v7  ;;  %v9181_v43 = vrot.slane %v9180_v8, 4  ;;  %v20361_v32 = vpop.f32.mrb[53].mxu0 }
 0x50f   :  { %v9175_v18 = vmax.f32 %v9173_v29, %v9174_v49  ;;  %v7382_v55 = vrot.slane %v7368_v23, %v19211_v21  ;;  %v7383_v16 = vcombine.high %v7375_v28, %v7375_v28  ;;  %v9131_v27 = vsel %vm8066_vm3, %v7375_v28, -inf }
 0x510   :  { %v9163_v12 = vmax.f32 %v9161_v17, %v9162_v14  ;;  %v9169_v38 = vrot.slane %v9168_v59, 2  ;;  %v9182_v50 = vmax.f32 %v9180_v8, %v9181_v43  ;;  %v9132_v37 = vrot.slane %v9131_v27, 4 }
 0x511   :  { %v9176_v22 = vrot.slane %v9175_v18, 2  ;;  %v7384_v45 = vcombine.high %v7382_v55, %v7382_v55  ;;  %v9138_v56 = vsel %vm8066_vm3, %v7383_v16, -inf  ;;  %v9145_v41 = vsel %vm8066_vm3, %v7382_v55, -inf }
 0x512   :  { %v9164_v35 = vrot.slane %v9163_v12, 1  ;;  %v9170_v52 = vmax.f32 %v9168_v59, %v9169_v38  ;;  %v9183_v1 = vrot.slane %v9182_v50, 2  ;;  %v9133_v24 = vmax.f32 %v9131_v27, %v9132_v37 }
 0x513   :  { %v9177_v31 = vmax.f32 %v9175_v18, %v9176_v22  ;;  %v9139_v4 = vrot.slane %v9138_v56, 4  ;;  %v9146_v61 = vrot.slane %v9145_v41, 4  ;;  %v9152_v44 = vsel %vm8066_vm3, %v7384_v45, -inf }
 0x514   :  { %v9165_v42 = vmax.f32 %v9163_v12, %v9164_v35  ;;  %v9171_v40 = vrot.slane %v9170_v52, 1  ;;  %v9184_v48 = vmax.f32 %v9182_v50, %v9183_v1  ;;  %v9134_v20 = vrot.slane %v9133_v24, 2 }
 0x515   :  { %v9178_v23 = vrot.slane %v9177_v31, 1  ;;  %v9140_v13 = vmax.f32 %v9138_v56, %v9139_v4  ;;  %v9147_v62 = vmax.f32 %v9145_v41, %v9146_v61  ;;  %v9153_v30 = vrot.slane %v9152_v44, 4 }
 0x516   :  { %v9172_v54 = vmax.f32 %v9170_v52, %v9171_v40  ;;  %v9185_v19 = vrot.slane %v9184_v48, 1  ;;  %v20359_v26 = vsel %vm9859_vm4, %v9165_v42, -inf  ;;  %v9135_v29 = vmax.f32 %v9133_v24, %v9134_v20 }
 0x517   :  { %v9179_v17 = vmax.f32 %v9177_v31, %v9178_v23  ;;  %v10090_v7 = vmax.f32 %v20294_v36, %v20359_v26  ;;  %v9141_v49 = vrot.slane %v9140_v13, 2  ;;  %v9148_v8 = vrot.slane %v9147_v62, 2 }
 0x518   :  { %v9186_v28 = vmax.f32 %v9184_v48, %v9185_v19  ;;  %v10092_v14 = vsel %vm9859_vm4, %v9172_v54, -inf  ;;  %v9136_v59 = vrot.slane %v9135_v29, 1  ;;  %v9154_v43 = vmax.f32 %v9152_v44, %v9153_v30 }
 0x519   :  { %v10093_v18 = vmax.f32 %v20300_v53, %v10092_v14  ;;  %v10095_v55 = vsel %vm9859_vm4, %v9179_v17, -inf  ;;  %v9142_v16 = vmax.f32 %v9140_v13, %v9141_v49  ;;  %v9149_v27 = vmax.f32 %v9147_v62, %v9148_v8 }
 0x51a   :  { %v10096_v12 = vmax.f32 %v20305_v33, %v10095_v55  ;;  %v10098_v38 = vsel %vm9859_vm4, %v9186_v28, -inf  ;;  %v9137_v50 = vmax.f32 %v9135_v29, %v9136_v59  ;;  %v9155_v37 = vrot.slane %v9154_v43, 2 }
 0x51b   :  { %v10099_v36 = vmax.f32 %v20308_v3, %v10098_v38  ;;  %v9143_v22 = vrot.slane %v9142_v16, 1  ;;  %v9150_v45 = vrot.slane %v9149_v27, 1  ;;  %v7419_v56 = vcombine.high %v20331_v15, %v20331_v15  ;;  %v21958_v38 = vld [vmem:[#allocation33_spill] sm:$0xff] }
 0x51c   :  { %v9156_v41 = vmax.f32 %v9154_v43, %v9155_v37  ;;  %v10077_v53 = vsel %vm9859_vm4, %v9137_v50, -inf  ;;  %v7426_v35 = vrot.slane %v20331_v15, %v19211_v21  ;;  %v6634_v52 = vmax.f32 %v20328_v10, 0.0 }
 0x51d   :  { %v9144_v33 = vmax.f32 %v9142_v16, %v9143_v22  ;;  %v9151_v1 = vmax.f32 %v9149_v27, %v9150_v45  ;;  %v10078_v24 = vmax.f32 %v20336_v57, %v10077_v53  ;;  %v7433_v31 = vrot.slane %v7419_v56, %v19211_v21 }
 0x51e   :  { %v9157_v3 = vrot.slane %v9156_v41, 1  ;;  %v7434_v4 = vcombine.high %v7426_v35, %v7426_v35  ;;  %v9215_v61 = vsel %vm8066_vm3, %v7426_v35, -inf  ;;  %v7402_v44 = vcombine.high %v6634_v52, %v6634_v52 }
 0x51f   :  { %v10080_v42 = vsel %vm9859_vm4, %v9144_v33, -inf  ;;  %v10083_v40 = vsel %vm9859_vm4, %v9151_v1, -inf  ;;  %v7435_v48 = vcombine.high %v7433_v31, %v7433_v31  ;;  %v9216_v20 = vrot.slane %v9215_v61, 4 }
 0x520   :  { %v9158_v15 = vmax.f32 %v9156_v41, %v9157_v3  ;;  %v10081_v10 = vmax.f32 %v20341_v47, %v10080_v42  ;;  %v10084_v23 = vmax.f32 %v20344_v63, %v10083_v40  ;;  %v9222_v57 = vsel %vm8066_vm3, %v7434_v4, -inf }
 0x521   :  { %v9217_v13 = vmax.f32 %v9215_v61, %v9216_v20  ;;  %v9223_v62 = vrot.slane %v9222_v57, 4  ;;  %v9229_v30 = vsel %vm8066_vm3, %v7433_v31, -inf  ;;  %v9236_v54 = vsel %vm8066_vm3, %v7435_v48, -inf }
 0x522   :  { %v10086_v19 = vsel %vm9859_vm4, %v9158_v15, -inf  ;;  %v10482_v26 = vsel %vm10412_vm5, %v10081_v10, %v10078_v24  ;;  %v9230_v29 = vrot.slane %v9229_v30, 4  ;;  %v9237_v17 = vrot.slane %v9236_v54, 4 }
 0x523   :  { %v10087_v49 = vmax.f32 %v20349_v39, %v10086_v19  ;;  %v10483_v47 = vsel %vm10414_vm6, %v10084_v23, %v10482_v26  ;;  %v9218_v8 = vrot.slane %v9217_v13, 2  ;;  %v9224_v63 = vmax.f32 %v9222_v57, %v9223_v62 }
 0x524   :  { %v9231_v28 = vmax.f32 %v9229_v30, %v9230_v29  ;;  %v9238_v14 = vmax.f32 %v9236_v54, %v9237_v17  ;;  %v7409_v59 = vrot.slane %v6634_v52, %v19211_v21  ;;  %v7416_v43 = vrot.slane %v7402_v44, %v19211_v21 }
 0x525   :  { %v10484_v55 = vsel %vm10416_vm7, %v10087_v49, %v10483_v47  ;;  %v9219_v16 = vmax.f32 %v9217_v13, %v9218_v8  ;;  %v9225_v27 = vrot.slane %v9224_v63, 2  ;;  %v16450_v50 = vadd.f32 %v20051_v0, %v21958_v38 }
 0x526   :  { %v10485_v37 = vsel %vm10418_vm8, %v10090_v7, %v10484_v55  ;;  %v9232_v39 = vrot.slane %v9231_v28, 2  ;;  %v9239_v22 = vrot.slane %v9238_v14, 2  ;;  %v7417_v45 = vcombine.high %v7409_v59, %v7409_v59  ;;  %v20401_v7 = vpop.f32.mrb[54].mxu0 }
 0x527   :  { %v10486_v56 = vsel %vm10420_vm9, %v10093_v18, %v10485_v37  ;;  %v9220_v41 = vrot.slane %v9219_v16, 1  ;;  %v9226_v53 = vmax.f32 %v9224_v63, %v9225_v27  ;;  %v7418_v35 = vcombine.high %v7416_v43, %v7416_v43  ;;  %v20410_v57 = vpop.f32.mrb[55].mxu0  ;;  %v21959_v63 = vld [vmem:[#allocation34_spill] sm:$0xff] }
 0x528   :  { %v10487_v52 = vsel %vm10422_vm10, %v10096_v12, %v10486_v56  ;;  %v9233_v33 = vmax.f32 %v9231_v28, %v9232_v39  ;;  %v9240_v1 = vmax.f32 %v9238_v14, %v9239_v22  ;;  %v9187_v24 = vsel %vm8066_vm3, %v7409_v59, -inf }
 0x529   :  { %v10488_v31 = vsel %vm10424_vm11, %v10099_v36, %v10487_v52  ;;  %v9221_v3 = vmax.f32 %v9219_v16, %v9220_v41  ;;  %v9227_v0 = vrot.slane %v9226_v53, 1  ;;  %v9188_v4 = vrot.slane %v9187_v24, 4  ;;  %v21961_v16 = vld [vmem:[#allocation36_spill] sm:$0xff] }
 0x52a   :  { %10557 = vst.msk [vmem:[#allocation3 + $0xc1] sm:$0xff] %vm9859_vm4, %v10488_v31  ;;  %v9234_v61 = vrot.slane %v9233_v33, 1  ;;  %v9241_v18 = vrot.slane %v9240_v1, 1  ;;  %v9194_v44 = vsel %vm8066_vm3, %v7417_v45, -inf  ;;  %v9201_v42 = vsel %vm8066_vm3, %v7416_v43, -inf  ;;  %v21960_v43 = vld [vmem:[#allocation35_spill] sm:$0xff] }
 0x52b   :  { %v9228_v12 = vmax.f32 %v9226_v53, %v9227_v0  ;;  %v20407_v40 = vsel %vm9859_vm4, %v9221_v3, -inf  ;;  %v9189_v48 = vmax.f32 %v9187_v24, %v9188_v4  ;;  %v9195_v20 = vrot.slane %v9194_v44, 4 }
 0x52c   :  { %v9235_v36 = vmax.f32 %v9233_v33, %v9234_v61  ;;  %v9242_v15 = vmax.f32 %v9240_v1, %v9241_v18  ;;  %v9202_v10 = vrot.slane %v9201_v42, 4  ;;  %v9208_v23 = vsel %vm8066_vm3, %v7418_v35, -inf }
 0x52d   :  { %v20413_v13 = vsel %vm9859_vm4, %v9228_v12, -inf  ;;  %v9190_v62 = vrot.slane %v9189_v48, 2  ;;  %v9196_v30 = vmax.f32 %v9194_v44, %v9195_v20  ;;  %v9209_v54 = vrot.slane %v9208_v23, 4 }
 0x52e   :  { %v20416_v19 = vsel %vm9859_vm4, %v9235_v36, -inf  ;;  %v20419_v26 = vsel %vm9859_vm4, %v9242_v15, -inf  ;;  %v9203_v29 = vmax.f32 %v9201_v42, %v9202_v10  ;;  %v6573_v17 = vadd.f32 %v20315_v6, %v16450_v50 }
 0x52f   :  { %v9191_v49 = vmax.f32 %v9189_v48, %v9190_v62  ;;  %v9197_v47 = vrot.slane %v9196_v30, 2  ;;  %v9210_v8 = vmax.f32 %v9208_v23, %v9209_v54  ;;  %v16451_v28 = vadd.f32 %v20081_v5, %v21959_v63  ;;  %v10592_v63 = vld [vmem:[#allocation3 + $0xa1] sm:$0xff] }
 0x530   :  { %v9204_v14 = vrot.slane %v9203_v29, 2  ;;  %v6637_v59 = vmax.f32 %v6573_v17, 0.0  ;;  %v16452_v55 = vadd.f32 %v20104_v51, %v21960_v43  ;;  %v16453_v27 = vadd.f32 %v20132_v60, %v21961_v16  ;;  %16066 = vmatprep.mubr.msk.f32.mxu1 %vm9859_vm4, %v10592_v63 }
 0x531   :  { %v9192_v38 = vrot.slane %v9191_v49, 1  ;;  %v9198_v37 = vmax.f32 %v9196_v30, %v9197_v47  ;;  %v9211_v39 = vrot.slane %v9210_v8, 2  ;;  %v6572_v22 = vadd.f32 %v20315_v6, %v16451_v28 }
 0x532   :  { %v9205_v50 = vmax.f32 %v9203_v29, %v9204_v14  ;;  %v7453_v45 = vcombine.high %v6637_v59, %v6637_v59  ;;  %v7460_v56 = vrot.slane %v6637_v59, %v19211_v21  ;;  %v6575_v41 = vadd.f32 %v20315_v6, %v16452_v55  ;;  %v10593_v55 = vld [vmem:[#allocation3 + $0xb1] sm:$0xff] }
 0x533   :  { %v9193_v5 = vmax.f32 %v9191_v49, %v9192_v38  ;;  %v9199_v53 = vrot.slane %v9198_v37, 1  ;;  %v9212_v35 = vmax.f32 %v9210_v8, %v9211_v39  ;;  %v6636_v52 = vmax.f32 %v6572_v22, 0.0  ;;  %16067 = vmatmul.mubr.msk.f32.gmra.mrb[72].mxu1 %vm9859_vm4, %v10593_v55 }
 0x534   :  { %v9206_v33 = vrot.slane %v9205_v50, 1  ;;  %v7467_v51 = vrot.slane %v7453_v45, %v19211_v21  ;;  %v7468_v1 = vcombine.high %v7460_v56, %v7460_v56  ;;  %v9271_v60 = vsel %vm8066_vm3, %v7460_v56, -inf }
 0x535   :  { %v9200_v24 = vmax.f32 %v9198_v37, %v9199_v53  ;;  %v9213_v31 = vrot.slane %v9212_v35, 1  ;;  %v20434_v3 = vsel %vm9859_vm4, %v9193_v5, -inf  ;;  %v9272_v0 = vrot.slane %v9271_v60, 4 }
 0x536   :  { %v9207_v4 = vmax.f32 %v9205_v50, %v9206_v33  ;;  %v7469_v61 = vcombine.high %v7467_v51, %v7467_v51  ;;  %v9278_v18 = vsel %vm8066_vm3, %v7468_v1, -inf  ;;  %v9285_v44 = vsel %vm8066_vm3, %v7467_v51, -inf }
 0x537   :  { %v9214_v42 = vmax.f32 %v9212_v35, %v9213_v31  ;;  %v20439_v12 = vsel %vm9859_vm4, %v9200_v24, -inf  ;;  %v9273_v48 = vmax.f32 %v9271_v60, %v9272_v0  ;;  %v9279_v20 = vrot.slane %v9278_v18, 4 }
 0x538   :  { %v20442_v36 = vsel %vm9859_vm4, %v9207_v4, -inf  ;;  %v9286_v15 = vrot.slane %v9285_v44, 4  ;;  %v9292_v10 = vsel %vm8066_vm3, %v7469_v61, -inf  ;;  %v7436_v23 = vcombine.high %v6636_v52, %v6636_v52 }
 0x539   :  { %v20446_v62 = vsel %vm9859_vm4, %v9214_v42, -inf  ;;  %v9274_v30 = vrot.slane %v9273_v48, 2  ;;  %v9280_v54 = vmax.f32 %v9278_v18, %v9279_v20  ;;  %v9293_v29 = vrot.slane %v9292_v10, 4 }
 0x53a   :  { %v9287_v17 = vmax.f32 %v9285_v44, %v9286_v15  ;;  %v7443_v49 = vrot.slane %v6636_v52, %v19211_v21  ;;  %v7450_v47 = vrot.slane %v7436_v23, %v19211_v21  ;;  %v6639_v8 = vmax.f32 %v6575_v41, 0.0  ;;  %v20454_v41 = vpop.f32.mrb[56].mxu0 }
 0x53b   :  { %v9275_v28 = vmax.f32 %v9273_v48, %v9274_v30  ;;  %v9281_v14 = vrot.slane %v9280_v54, 2  ;;  %v9294_v59 = vmax.f32 %v9292_v10, %v9293_v29  ;;  %v6574_v43 = vadd.f32 %v20315_v6, %v16453_v27  ;;  %v20464_v10 = vpop.f32.mrb[57].mxu0 }
 0x53c   :  { %v9288_v16 = vrot.slane %v9287_v17, 2  ;;  %v7451_v38 = vcombine.high %v7443_v49, %v7443_v49  ;;  %v7452_v37 = vcombine.high %v7450_v47, %v7450_v47  ;;  %v9243_v39 = vsel %vm8066_vm3, %v7443_v49, -inf }
 0x53d   :  { %v9276_v22 = vrot.slane %v9275_v28, 1  ;;  %v9282_v50 = vmax.f32 %v9280_v54, %v9281_v14  ;;  %v9295_v45 = vrot.slane %v9294_v59, 2  ;;  %v9244_v56 = vrot.slane %v9243_v39, 4 }
 0x53e   :  { %v9289_v5 = vmax.f32 %v9287_v17, %v9288_v16  ;;  %v9250_v53 = vsel %vm8066_vm3, %v7451_v38, -inf  ;;  %v9257_v27 = vsel %vm8066_vm3, %v7450_v47, -inf  ;;  %v9264_v35 = vsel %vm8066_vm3, %v7452_v37, -inf }
 0x53f   :  { %v9277_v52 = vmax.f32 %v9275_v28, %v9276_v22  ;;  %v9283_v33 = vrot.slane %v9282_v50, 1  ;;  %v9296_v51 = vmax.f32 %v9294_v59, %v9295_v45  ;;  %v9245_v1 = vmax.f32 %v9243_v39, %v9244_v56 }
 0x540   :  { %v9290_v60 = vrot.slane %v9289_v5, 1  ;;  %v9251_v24 = vrot.slane %v9250_v53, 4  ;;  %v9258_v31 = vrot.slane %v9257_v27, 4  ;;  %v9265_v0 = vrot.slane %v9264_v35, 4 }
 0x541   :  { %v9284_v4 = vmax.f32 %v9282_v50, %v9283_v33  ;;  %v9297_v61 = vrot.slane %v9296_v51, 1  ;;  %v20460_v18 = vsel %vm9859_vm4, %v9277_v52, -inf  ;;  %v9246_v44 = vrot.slane %v9245_v1, 2 }
 0x542   :  { %v9291_v42 = vmax.f32 %v9289_v5, %v9290_v60  ;;  %v10114_v48 = vmax.f32 %v20407_v40, %v20460_v18  ;;  %v9252_v20 = vmax.f32 %v9250_v53, %v9251_v24  ;;  %v9259_v15 = vmax.f32 %v9257_v27, %v9258_v31  ;;  %v21962_v53 = vld [vmem:[#allocation37_spill] sm:$0xff] }
 0x543   :  { %v9298_v23 = vmax.f32 %v9296_v51, %v9297_v61  ;;  %v20467_v30 = vsel %vm9859_vm4, %v9284_v4, -inf  ;;  %v9247_v54 = vmax.f32 %v9245_v1, %v9246_v44  ;;  %v9266_v29 = vmax.f32 %v9264_v35, %v9265_v0 }
 0x544   :  { %v10117_v17 = vmax.f32 %v20413_v13, %v20467_v30  ;;  %v20472_v49 = vsel %vm9859_vm4, %v9291_v42, -inf  ;;  %v9253_v47 = vrot.slane %v9252_v20, 2  ;;  %v9260_v63 = vrot.slane %v9259_v15, 2 }
 0x545   :  { %v10120_v28 = vmax.f32 %v20416_v19, %v20472_v49  ;;  %v20477_v14 = vsel %vm9859_vm4, %v9298_v23, -inf  ;;  %v9248_v59 = vrot.slane %v9247_v54, 1  ;;  %v9267_v55 = vrot.slane %v9266_v29, 2 }
 0x546   :  { %v10123_v16 = vmax.f32 %v20419_v26, %v20477_v14  ;;  %v9254_v38 = vmax.f32 %v9252_v20, %v9253_v47  ;;  %v9261_v37 = vmax.f32 %v9259_v15, %v9260_v63  ;;  %v7487_v39 = vcombine.high %v6639_v8, %v6639_v8 }
 0x547   :  { %v9249_v13 = vmax.f32 %v9247_v54, %v9248_v59  ;;  %v9268_v22 = vmax.f32 %v9266_v29, %v9267_v55  ;;  %v7494_v50 = vrot.slane %v6639_v8, %v19211_v21  ;;  %v6638_v45 = vmax.f32 %v6574_v43, 0.0 }
 0x548   :  { %v9255_v56 = vrot.slane %v9254_v38, 1  ;;  %v9262_v5 = vrot.slane %v9261_v37, 1  ;;  %v7501_v19 = vrot.slane %v7487_v39, %v19211_v21  ;;  %v20485_v27 = vadd.f32 %v20156_v2, %v21962_v53 }
 0x549   :  { %v9269_v35 = vrot.slane %v9268_v22, 1  ;;  %v10101_v52 = vsel %vm9859_vm4, %v9249_v13, -inf  ;;  %v7502_v26 = vcombine.high %v7494_v50, %v7494_v50  ;;  %v9327_v33 = vsel %vm8066_vm3, %v7494_v50, -inf }
 0x54a   :  { %v9256_v51 = vmax.f32 %v9254_v38, %v9255_v56  ;;  %v9263_v1 = vmax.f32 %v9261_v37, %v9262_v5  ;;  %v10102_v60 = vmax.f32 %v20434_v3, %v10101_v52  ;;  %v7503_v8 = vcombine.high %v7501_v19, %v7501_v19 }
 0x54b   :  { %v9270_v43 = vmax.f32 %v9268_v22, %v9269_v35  ;;  %v9328_v24 = vrot.slane %v9327_v33, 4  ;;  %v9334_v31 = vsel %vm8066_vm3, %v7502_v26, -inf  ;;  %v9341_v0 = vsel %vm8066_vm3, %v7501_v19, -inf }
 0x54c   :  { %v10104_v2 = vsel %vm9859_vm4, %v9256_v51, -inf  ;;  %v10107_v4 = vsel %vm9859_vm4, %v9263_v1, -inf  ;;  %v9335_v61 = vrot.slane %v9334_v31, 4  ;;  %v9342_v44 = vrot.slane %v9341_v0, 4  ;;  %v20511_v51 = vpop.f32.mrb[58].mxu0 }
 0x54d   :  { %v10105_v42 = vmax.f32 %v20439_v12, %v10104_v2  ;;  %v10108_v20 = vmax.f32 %v20442_v36, %v10107_v4  ;;  %v10110_v15 = vsel %vm9859_vm4, %v9270_v43, -inf  ;;  %v9329_v3 = vmax.f32 %v9327_v33, %v9328_v24 }
 0x54e   :  { %v10111_v23 = vmax.f32 %v20446_v62, %v10110_v15  ;;  %v9336_v30 = vmax.f32 %v9334_v31, %v9335_v61  ;;  %v9343_v54 = vmax.f32 %v9341_v0, %v9342_v44  ;;  %v9348_v29 = vsel %vm8066_vm3, %v7503_v8, -inf  ;;  %v20527_v44 = vpop.f32.mrb[59].mxu0 }
 0x54f   :  { %v10489_v49 = vsel %vm10412_vm5, %v10105_v42, %v10102_v60  ;;  %v9330_v47 = vrot.slane %v9329_v3, 2  ;;  %v9349_v63 = vrot.slane %v9348_v29, 4  ;;  %v7470_v14 = vcombine.high %v6638_v45, %v6638_v45 }
 0x550   :  { %v10490_v59 = vsel %vm10414_vm6, %v10108_v20, %v10489_v49  ;;  %v9337_v55 = vrot.slane %v9336_v30, 2  ;;  %v9344_v12 = vrot.slane %v9343_v54, 2  ;;  %v7477_v36 = vrot.slane %v6638_v45, %v19211_v21  ;;  %v21964_v49 = vld [vmem:[#allocation39_spill] sm:$0xff] }
 0x551   :  { %v10491_v38 = vsel %vm10416_vm7, %v10111_v23, %v10490_v59  ;;  %v9331_v37 = vmax.f32 %v9329_v3, %v9330_v47  ;;  %v9350_v39 = vmax.f32 %v9348_v29, %v9349_v63  ;;  %v7484_v62 = vrot.slane %v7470_v14, %v19211_v21 }
 0x552   :  { %v10492_v13 = vsel %vm10418_vm8, %v10114_v48, %v10491_v38  ;;  %v9338_v22 = vmax.f32 %v9336_v30, %v9337_v55  ;;  %v9345_v50 = vmax.f32 %v9343_v54, %v9344_v12  ;;  %v7485_v56 = vcombine.high %v7477_v36, %v7477_v36  ;;  %v21963_v54 = vld [vmem:[#allocation38_spill] sm:$0xff] }
 0x553   :  { %v10493_v5 = vsel %vm10420_vm9, %v10117_v17, %v10492_v13  ;;  %v9332_v19 = vrot.slane %v9331_v37, 1  ;;  %v9351_v53 = vrot.slane %v9350_v39, 2  ;;  %v7486_v35 = vcombine.high %v7484_v62, %v7484_v62  ;;  %v21965_v13 = vld [vmem:[#allocation40_spill] sm:$0xff] }
 0x554   :  { %v10494_v45 = vsel %vm10422_vm10, %v10120_v28, %v10493_v5  ;;  %v9339_v52 = vrot.slane %v9338_v22, 1  ;;  %v9346_v26 = vrot.slane %v9345_v50, 1  ;;  %v9299_v33 = vsel %vm8066_vm3, %v7477_v36, -inf }
 0x555   :  { %v10495_v40 = vsel %vm10424_vm11, %v10123_v16, %v10494_v45  ;;  %v9333_v18 = vmax.f32 %v9331_v37, %v9332_v19  ;;  %v9352_v48 = vmax.f32 %v9350_v39, %v9351_v53  ;;  %v9300_v1 = vrot.slane %v9299_v33, 4 }
 0x556   :  { %10558 = vst.msk [vmem:[#allocation3 + $0xd1] sm:$0xff] %vm9859_vm4, %v10495_v40  ;;  %v9340_v60 = vmax.f32 %v9338_v22, %v9339_v52  ;;  %v9347_v17 = vmax.f32 %v9345_v50, %v9346_v26  ;;  %v9306_v8 = vsel %vm8066_vm3, %v7485_v56, -inf  ;;  %v9313_v43 = vsel %vm8066_vm3, %v7484_v62, -inf }
 0x557   :  { %v9353_v28 = vrot.slane %v9352_v48, 1  ;;  %v20518_v24 = vsel %vm9859_vm4, %v9333_v18, -inf  ;;  %v9301_v31 = vmax.f32 %v9299_v33, %v9300_v1  ;;  %v9307_v0 = vrot.slane %v9306_v8, 4 }
 0x558   :  { %v20521_v2 = vsel %vm9859_vm4, %v9340_v60, -inf  ;;  %v20524_v16 = vsel %vm9859_vm4, %v9347_v17, -inf  ;;  %v9314_v4 = vrot.slane %v9313_v43, 4  ;;  %v9320_v61 = vsel %vm8066_vm3, %v7486_v35, -inf }
 0x559   :  { %v9354_v42 = vmax.f32 %v9352_v48, %v9353_v28  ;;  %v9302_v20 = vrot.slane %v9301_v31, 2  ;;  %v9308_v15 = vmax.f32 %v9306_v8, %v9307_v0  ;;  %v9321_v3 = vrot.slane %v9320_v61, 4 }
 0x55a   :  { %v9315_v23 = vmax.f32 %v9313_v43, %v9314_v4  ;;  %v6577_v30 = vadd.f32 %v20315_v6, %v20485_v27  ;;  %v16455_v29 = vadd.f32 %v20199_v9, %v21963_v54  ;;  %v16456_v47 = vadd.f32 %v20220_v25, %v21964_v49 }
 0x55b   :  { %v20536_v63 = vsel %vm9859_vm4, %v9354_v42, -inf  ;;  %v9303_v14 = vmax.f32 %v9301_v31, %v9302_v20  ;;  %v9309_v59 = vrot.slane %v9308_v15, 2  ;;  %v9322_v55 = vmax.f32 %v9320_v61, %v9321_v3 }
 0x55c   :  { %v9316_v12 = vrot.slane %v9315_v23, 2  ;;  %v6641_v36 = vmax.f32 %v6577_v30, 0.0  ;;  %v6576_v38 = vadd.f32 %v20315_v6, %v16455_v29  ;;  %v6579_v37 = vadd.f32 %v20315_v6, %v16456_v47 }
 0x55d   :  { %v9304_v39 = vrot.slane %v9303_v14, 1  ;;  %v9310_v27 = vmax.f32 %v9308_v15, %v9309_v59  ;;  %v9323_v62 = vrot.slane %v9322_v55, 2  ;;  %v20542_v9 = vadd.f32 %v20249_v11, %v21965_v13 }
 0x55e   :  { %v9317_v25 = vmax.f32 %v9315_v23, %v9316_v12  ;;  %v7521_v22 = vcombine.high %v6641_v36, %v6641_v36  ;;  %v7528_v50 = vrot.slane %v6641_v36, %v19211_v21  ;;  %v6640_v56 = vmax.f32 %v6576_v38, 0.0  ;;  %v10594_v36 = vld [vmem:[#allocation3 + $0xc1] sm:$0xff] }
 0x55f   :  { %v9305_v5 = vmax.f32 %v9303_v14, %v9304_v39  ;;  %v9311_v19 = vrot.slane %v9310_v27, 1  ;;  %v9324_v53 = vmax.f32 %v9322_v55, %v9323_v62  ;;  %v20545_v35 = vmax.f32 %v6579_v37, 0.0  ;;  %16069 = vmatprep.mubr.msk.f32.mxu1 %vm9859_vm4, %v10594_v36 }
 0x560   :  { %v9318_v45 = vrot.slane %v9317_v25, 1  ;;  %v7535_v52 = vrot.slane %v7521_v22, %v19211_v21  ;;  %v7536_v26 = vcombine.high %v7528_v50, %v7528_v50  ;;  %v9383_v33 = vsel %vm8066_vm3, %v7528_v50, -inf  ;;  %v20572_v50 = vpop.f32.mrb[60].mxu0 }
 0x561   :  { %v9312_v40 = vmax.f32 %v9310_v27, %v9311_v19  ;;  %v9325_v18 = vrot.slane %v9324_v53, 1  ;;  %v20550_v11 = vsel %vm9859_vm4, %v9305_v5, -inf  ;;  %v9384_v48 = vrot.slane %v9383_v33, 4 }
 0x562   :  { %v9319_v1 = vmax.f32 %v9317_v25, %v9318_v45  ;;  %v7537_v60 = vcombine.high %v7535_v52, %v7535_v52  ;;  %v9390_v17 = vsel %vm8066_vm3, %v7536_v26, -inf  ;;  %v9397_v8 = vsel %vm8066_vm3, %v7535_v52, -inf }
 0x563   :  { %v9326_v43 = vmax.f32 %v9324_v53, %v9325_v18  ;;  %v20555_v28 = vsel %vm9859_vm4, %v9312_v40, -inf  ;;  %v9385_v31 = vmax.f32 %v9383_v33, %v9384_v48  ;;  %v9391_v0 = vrot.slane %v9390_v17, 4 }
 0x564   :  { %v20558_v4 = vsel %vm9859_vm4, %v9319_v1, -inf  ;;  %v9398_v61 = vrot.slane %v9397_v8, 4  ;;  %v9404_v42 = vsel %vm8066_vm3, %v7537_v60, -inf  ;;  %v7504_v20 = vcombine.high %v6640_v56, %v6640_v56 }
 0x565   :  { %v20562_v15 = vsel %vm9859_vm4, %v9326_v43, -inf  ;;  %v9386_v3 = vrot.slane %v9385_v31, 2  ;;  %v9392_v23 = vmax.f32 %v9390_v17, %v9391_v0  ;;  %v9405_v30 = vrot.slane %v9404_v42, 4 }
 0x566   :  { %v9399_v54 = vmax.f32 %v9397_v8, %v9398_v61  ;;  %v7511_v29 = vrot.slane %v6640_v56, %v19211_v21  ;;  %v7518_v49 = vrot.slane %v7504_v20, %v19211_v21  ;;  %v7555_v47 = vcombine.high %v20545_v35, %v20545_v35 }
 0x567   :  { %v9387_v14 = vmax.f32 %v9385_v31, %v9386_v3  ;;  %v9393_v59 = vrot.slane %v9392_v23, 2  ;;  %v9406_v55 = vmax.f32 %v9404_v42, %v9405_v30  ;;  %v7562_v12 = vrot.slane %v20545_v35, %v19211_v21 }
 0x568   :  { %v9400_v38 = vrot.slane %v9399_v54, 2  ;;  %v7519_v37 = vcombine.high %v7511_v29, %v7511_v29  ;;  %v7520_v39 = vcombine.high %v7518_v49, %v7518_v49  ;;  %v9355_v27 = vsel %vm8066_vm3, %v7511_v29, -inf }
 0x569   :  { %v9388_v62 = vrot.slane %v9387_v14, 1  ;;  %v9394_v13 = vmax.f32 %v9392_v23, %v9393_v59  ;;  %v9407_v25 = vrot.slane %v9406_v55, 2  ;;  %v9356_v22 = vrot.slane %v9355_v27, 4 }
 0x56a   :  { %v9401_v56 = vmax.f32 %v9399_v54, %v9400_v38  ;;  %v9362_v5 = vsel %vm8066_vm3, %v7519_v37, -inf  ;;  %v9369_v19 = vsel %vm8066_vm3, %v7518_v49, -inf  ;;  %v9376_v53 = vsel %vm8066_vm3, %v7520_v39, -inf }
 0x56b   :  { %v9389_v35 = vmax.f32 %v9387_v14, %v9388_v62  ;;  %v9395_v45 = vrot.slane %v9394_v13, 1  ;;  %v9408_v52 = vmax.f32 %v9406_v55, %v9407_v25  ;;  %v9357_v26 = vmax.f32 %v9355_v27, %v9356_v22  ;;  %v20590_v14 = vpop.f32.mrb[61].mxu0 }
 0x56c   :  { %v9402_v33 = vrot.slane %v9401_v56, 1  ;;  %v9363_v40 = vrot.slane %v9362_v5, 4  ;;  %v9370_v18 = vrot.slane %v9369_v19, 4  ;;  %v9377_v48 = vrot.slane %v9376_v53, 4 }
 0x56d   :  { %v9396_v1 = vmax.f32 %v9394_v13, %v9395_v45  ;;  %v9409_v60 = vrot.slane %v9408_v52, 1  ;;  %v20578_v17 = vsel %vm9859_vm4, %v9389_v35, -inf  ;;  %v9358_v8 = vrot.slane %v9357_v26, 2 }
 0x56e   :  { %v9403_v43 = vmax.f32 %v9401_v56, %v9402_v33  ;;  %v10138_v31 = vmax.f32 %v20518_v24, %v20578_v17  ;;  %v9364_v0 = vmax.f32 %v9362_v5, %v9363_v40  ;;  %v9371_v61 = vmax.f32 %v9369_v19, %v9370_v18 }
 0x56f   :  { %v9410_v42 = vmax.f32 %v9408_v52, %v9409_v60  ;;  %v20583_v20 = vsel %vm9859_vm4, %v9396_v1, -inf  ;;  %v9359_v3 = vmax.f32 %v9357_v26, %v9358_v8  ;;  %v9378_v23 = vmax.f32 %v9376_v53, %v9377_v48 }
 0x570   :  { %v10141_v30 = vmax.f32 %v20521_v2, %v20583_v20  ;;  %v20588_v54 = vsel %vm9859_vm4, %v9403_v43, -inf  ;;  %v9365_v29 = vrot.slane %v9364_v0, 2  ;;  %v9372_v49 = vrot.slane %v9371_v61, 2 }
 0x571   :  { %v10144_v59 = vmax.f32 %v20524_v16, %v20588_v54  ;;  %v20595_v55 = vsel %vm9859_vm4, %v9410_v42, -inf  ;;  %v9360_v36 = vrot.slane %v9359_v3, 1  ;;  %v9379_v38 = vrot.slane %v9378_v23, 2 }
 0x572   :  { %v10147_v37 = vmax.f32 %v20536_v63, %v20595_v55  ;;  %v9366_v39 = vmax.f32 %v9364_v0, %v9365_v29  ;;  %v9373_v2 = vmax.f32 %v9371_v61, %v9372_v49  ;;  %v7569_v27 = vrot.slane %v7555_v47, %v19211_v21 }
 0x573   :  { %v9361_v62 = vmax.f32 %v9359_v3, %v9360_v36  ;;  %v9380_v13 = vmax.f32 %v9378_v23, %v9379_v38  ;;  %v7570_v25 = vcombine.high %v7562_v12, %v7562_v12  ;;  %v9439_v22 = vsel %vm8066_vm3, %v7562_v12, -inf  ;;  %v21966_v36 = vld [vmem:[#allocation41_spill] sm:$0xff] }
 0x574   :  { %v9367_v56 = vrot.slane %v9366_v39, 1  ;;  %v9374_v5 = vrot.slane %v9373_v2, 1  ;;  %v7571_v16 = vcombine.high %v7569_v27, %v7569_v27  ;;  %v9440_v19 = vrot.slane %v9439_v22, 4 }
 0x575   :  { %v9381_v53 = vrot.slane %v9380_v13, 1  ;;  %v10125_v35 = vsel %vm9859_vm4, %v9361_v62, -inf  ;;  %v9446_v45 = vsel %vm8066_vm3, %v7570_v25, -inf  ;;  %v9453_v63 = vsel %vm8066_vm3, %v7569_v27, -inf }
 0x576   :  { %v9368_v52 = vmax.f32 %v9366_v39, %v9367_v56  ;;  %v9375_v26 = vmax.f32 %v9373_v2, %v9374_v5  ;;  %v10126_v47 = vmax.f32 %v20550_v11, %v10125_v35  ;;  %v9441_v33 = vmax.f32 %v9439_v22, %v9440_v19 }
 0x577   :  { %v9382_v40 = vmax.f32 %v9380_v13, %v9381_v53  ;;  %v9447_v18 = vrot.slane %v9446_v45, 4  ;;  %v9454_v48 = vrot.slane %v9453_v63, 4  ;;  %v9460_v12 = vsel %vm8066_vm3, %v7571_v16, -inf  ;;  %v20626_v53 = vpop.f32.mrb[62].mxu0 }
 0x578   :  { %v10128_v1 = vsel %vm9859_vm4, %v9368_v52, -inf  ;;  %v10131_v60 = vsel %vm9859_vm4, %v9375_v26, -inf  ;;  %v9442_v8 = vrot.slane %v9441_v33, 2  ;;  %v9461_v43 = vrot.slane %v9460_v12, 4 }
 0x579   :  { %v10129_v0 = vmax.f32 %v20555_v28, %v10128_v1  ;;  %v10132_v61 = vmax.f32 %v20558_v4, %v10131_v60  ;;  %v10134_v42 = vsel %vm9859_vm4, %v9382_v40, -inf  ;;  %v9448_v20 = vmax.f32 %v9446_v45, %v9447_v18 }
 0x57a   :  { %v10135_v11 = vmax.f32 %v20562_v15, %v10134_v42  ;;  %v9443_v3 = vmax.f32 %v9441_v33, %v9442_v8  ;;  %v9455_v23 = vmax.f32 %v9453_v63, %v9454_v48  ;;  %v9462_v54 = vmax.f32 %v9460_v12, %v9461_v43  ;;  %v20648_v42 = vpop.f32.mrb[63].mxu0 }
 0x57b   :  { %v10496_v29 = vsel %vm10412_vm5, %v10129_v0, %v10126_v47  ;;  %v9449_v49 = vrot.slane %v9448_v20, 2  ;;  %v6578_v55 = vadd.f32 %v20315_v6, %v20542_v9  ;;  %v16458_v38 = vadd.f32 %v20283_v34, %v21966_v36  ;;  %v21968_v36 = vld [vmem:[#allocation43_spill] sm:$0xff] }
 0x57c   :  { %v10497_v28 = vsel %vm10414_vm6, %v10132_v61, %v10496_v29  ;;  %v9444_v4 = vrot.slane %v9443_v3, 1  ;;  %v9456_v39 = vrot.slane %v9455_v23, 2  ;;  %v9463_v2 = vrot.slane %v9462_v54, 2 }
 0x57d   :  { %v10498_v27 = vsel %vm10416_vm7, %v10135_v11, %v10497_v28  ;;  %v9450_v15 = vmax.f32 %v9448_v20, %v9449_v49  ;;  %v6642_v62 = vmax.f32 %v6578_v55, 0.0  ;;  %v6581_v13 = vadd.f32 %v20315_v6, %v16458_v38 }
 0x57e   :  { %v10499_v25 = vsel %vm10418_vm8, %v10138_v31, %v10498_v27  ;;  %v9445_v9 = vmax.f32 %v9443_v3, %v9444_v4  ;;  %v9457_v22 = vmax.f32 %v9455_v23, %v9456_v39  ;;  %v9464_v56 = vmax.f32 %v9462_v54, %v9463_v2  ;;  %v21967_v23 = vld [vmem:[#allocation42_spill] sm:$0xff] }
 0x57f   :  { %v10500_v34 = vsel %vm10420_vm9, %v10141_v30, %v10499_v25  ;;  %v9451_v5 = vrot.slane %v9450_v15, 1  ;;  %v7538_v16 = vcombine.high %v6642_v62, %v6642_v62  ;;  %v7545_v19 = vrot.slane %v6642_v62, %v19211_v21 }
 0x580   :  { %v10501_v35 = vsel %vm10422_vm10, %v10144_v59, %v10500_v34  ;;  %v9458_v45 = vrot.slane %v9457_v22, 1  ;;  %v9465_v6 = vrot.slane %v9464_v56, 1  ;;  %v20630_v63 = vsel %vm9859_vm4, %v9445_v9, -inf }
 0x581   :  { %v10502_v24 = vsel %vm10424_vm11, %v10147_v37, %v10501_v35  ;;  %v9452_v17 = vmax.f32 %v9450_v15, %v9451_v5  ;;  %v7552_v31 = vrot.slane %v7538_v16, %v19211_v21  ;;  %v7553_v52 = vcombine.high %v7545_v19, %v7545_v19 }
 0x582   :  { %10559 = vst.msk [vmem:[#allocation3 + $0xe1] sm:$0xff] %vm9859_vm4, %v10502_v24  ;;  %v9459_v30 = vmax.f32 %v9457_v22, %v9458_v45  ;;  %v9466_v26 = vmax.f32 %v9464_v56, %v9465_v6  ;;  %v9411_v47 = vsel %vm8066_vm3, %v7545_v19, -inf  ;;  %v6645_v33 = vmax.f32 %v6581_v13, 0.0 }
 0x583   :  { %v20637_v59 = vsel %vm9859_vm4, %v9452_v17, -inf  ;;  %v7554_v40 = vcombine.high %v7552_v31, %v7552_v31  ;;  %v9412_v18 = vrot.slane %v9411_v47, 4  ;;  %v9418_v48 = vsel %vm8066_vm3, %v7553_v52, -inf }
 0x584   :  { %v20641_v37 = vsel %vm9859_vm4, %v9459_v30, -inf  ;;  %v20644_v12 = vsel %vm9859_vm4, %v9466_v26, -inf  ;;  %v9419_v1 = vrot.slane %v9418_v48, 4  ;;  %v9425_v60 = vsel %vm8066_vm3, %v7552_v31, -inf }
 0x585   :  { %v9413_v8 = vmax.f32 %v9411_v47, %v9412_v18  ;;  %v9426_v43 = vrot.slane %v9425_v60, 4  ;;  %v9432_v0 = vsel %vm8066_vm3, %v7554_v40, -inf  ;;  %v7589_v61 = vcombine.high %v6645_v33, %v6645_v33 }
 0x586   :  { %v9420_v20 = vmax.f32 %v9418_v48, %v9419_v1  ;;  %v9433_v11 = vrot.slane %v9432_v0, 4  ;;  %v7596_v3 = vrot.slane %v6645_v33, %v19211_v21  ;;  %v16459_v54 = vadd.f32 %v20310_v58, %v21967_v23 }
 0x587   :  { %v9414_v29 = vrot.slane %v9413_v8, 2  ;;  %v9427_v49 = vmax.f32 %v9425_v60, %v9426_v43  ;;  %v7603_v55 = vrot.slane %v7589_v61, %v19211_v21  ;;  %v16460_v38 = vadd.f32 %v20355_v46, %v21968_v36  ;;  %v10595_v36 = vld [vmem:[#allocation3 + $0xd1] sm:$0xff] }
 0x588   :  { %v9421_v28 = vrot.slane %v9420_v20, 2  ;;  %v9434_v4 = vmax.f32 %v9432_v0, %v9433_v11  ;;  %v7604_v39 = vcombine.high %v7596_v3, %v7596_v3  ;;  %v9495_v2 = vsel %vm8066_vm3, %v7596_v3, -inf  ;;  %v20672_v11 = vld [vmem:[%s21822_s2] ss:$0 sm:$0xff]  ;;  %16070 = vmatmul.mubr.msk.f32.gmra.mrb[74].mxu1 %vm9859_vm4, %v10595_v36 }
 0x589   :  { %v9415_v27 = vmax.f32 %v9413_v8, %v9414_v29  ;;  %v9428_v15 = vrot.slane %v9427_v49, 2  ;;  %v7605_v62 = vcombine.high %v7603_v55, %v7603_v55  ;;  %v9496_v13 = vrot.slane %v9495_v2, 4 }
 0x58a   :  { %v9422_v25 = vmax.f32 %v9420_v20, %v9421_v28  ;;  %v9435_v9 = vrot.slane %v9434_v4, 2  ;;  %v9502_v58 = vsel %vm8066_vm3, %v7604_v39, -inf  ;;  %v9509_v22 = vsel %vm8066_vm3, %v7603_v55, -inf }
 0x58b   :  { %v9416_v56 = vrot.slane %v9415_v27, 1  ;;  %v9429_v34 = vmax.f32 %v9427_v49, %v9428_v15  ;;  %v9497_v5 = vmax.f32 %v9495_v2, %v9496_v13  ;;  %v9503_v16 = vrot.slane %v9502_v58, 4  ;;  %v21969_v2 = vld [vmem:[#allocation44_spill] sm:$0xff]  ;;  %v21970_v13 = vld [vmem:[#allocation45_spill] sm:$0xff] }
 0x58c   :  { %v9423_v46 = vrot.slane %v9422_v25, 1  ;;  %v9436_v19 = vmax.f32 %v9434_v4, %v9435_v9  ;;  %v9510_v35 = vrot.slane %v9509_v22, 4  ;;  %v9516_v45 = vsel %vm8066_vm3, %v7605_v62, -inf }
 0x58d   :  { %v9417_v6 = vmax.f32 %v9415_v27, %v9416_v56  ;;  %v9430_v24 = vrot.slane %v9429_v34, 1  ;;  %v9498_v17 = vrot.slane %v9497_v5, 2  ;;  %v9504_v31 = vmax.f32 %v9502_v58, %v9503_v16 }
 0x58e   :  { %v9424_v52 = vmax.f32 %v9422_v25, %v9423_v46  ;;  %v9437_v30 = vrot.slane %v9436_v19, 1  ;;  %v9511_v26 = vmax.f32 %v9509_v22, %v9510_v35  ;;  %v9517_v47 = vrot.slane %v9516_v45, 4 }
 0x58f   :  { %v9431_v33 = vmax.f32 %v9429_v34, %v9430_v24  ;;  %v20661_v40 = vsel %vm9859_vm4, %v9417_v6, -inf  ;;  %v9499_v18 = vmax.f32 %v9497_v5, %v9498_v17  ;;  %v9505_v48 = vrot.slane %v9504_v31, 2 }
 0x590   :  { %v9438_v1 = vmax.f32 %v9436_v19, %v9437_v30  ;;  %v20664_v60 = vsel %vm9859_vm4, %v9424_v52, -inf  ;;  %v9512_v8 = vrot.slane %v9511_v26, 2  ;;  %v9518_v43 = vmax.f32 %v9516_v45, %v9517_v47 }
 0x591   :  { %v20667_v0 = vsel %vm9859_vm4, %v9431_v33, -inf  ;;  %v9500_v61 = vrot.slane %v9499_v18, 1  ;;  %v9506_v20 = vmax.f32 %v9504_v31, %v9505_v48  ;;  %v6580_v3 = vadd.f32 %v20672_v11, %v16459_v54  ;;  %v10596_v48 = vld [vmem:[#allocation3 + $0xe1] sm:$0xff] }
 0x592   :  { %v20676_v23 = vsel %vm9859_vm4, %v9438_v1, -inf  ;;  %v9513_v29 = vmax.f32 %v9511_v26, %v9512_v8  ;;  %v9519_v49 = vrot.slane %v9518_v43, 2  ;;  %v6583_v55 = vadd.f32 %v20672_v11, %v16460_v38  ;;  %16072 = vmatprep.mubr.msk.f32.mxu1 %vm9859_vm4, %v10596_v48 }
 0x593   :  { %v9501_v28 = vmax.f32 %v9499_v18, %v9500_v61  ;;  %v9507_v4 = vrot.slane %v9506_v20, 1  ;;  %v6644_v39 = vmax.f32 %v6580_v3, 0.0  ;;  %v20681_v27 = vadd.f32 %v20361_v32, %v21969_v2 }
 0x594   :  { %v9514_v15 = vrot.slane %v9513_v29, 1  ;;  %v9520_v62 = vmax.f32 %v9518_v43, %v9519_v49  ;;  %v6647_v54 = vmax.f32 %v6583_v55, 0.0  ;;  %v20686_v25 = vadd.f32 %v20401_v7, %v21970_v13 }
 0x595   :  { %v9508_v9 = vmax.f32 %v9506_v20, %v9507_v4  ;;  %v20689_v38 = vsel %vm9859_vm4, %v9501_v28, -inf  ;;  %v7572_v58 = vcombine.high %v6644_v39, %v6644_v39  ;;  %v7579_v22 = vrot.slane %v6644_v39, %v19211_v21 }
 0x596   :  { %v9515_v56 = vmax.f32 %v9513_v29, %v9514_v15  ;;  %v9521_v34 = vrot.slane %v9520_v62, 1  ;;  %v10162_v32 = vmax.f32 %v20630_v63, %v20689_v38  ;;  %v7623_v5 = vcombine.high %v6647_v54, %v6647_v54 }
 0x597   :  { %v20695_v16 = vsel %vm9859_vm4, %v9508_v9, -inf  ;;  %v7586_v46 = vrot.slane %v7572_v58, %v19211_v21  ;;  %v7587_v7 = vcombine.high %v7579_v22, %v7579_v22  ;;  %v9467_v19 = vsel %vm8066_vm3, %v7579_v22, -inf }
 0x598   :  { %v9522_v35 = vmax.f32 %v9520_v62, %v9521_v34  ;;  %v10165_v45 = vmax.f32 %v20637_v59, %v20695_v16  ;;  %v20702_v6 = vsel %vm9859_vm4, %v9515_v56, -inf  ;;  %v9468_v24 = vrot.slane %v9467_v19, 4 }
 0x599   :  { %v10168_v17 = vmax.f32 %v20641_v37, %v20702_v6  ;;  %v7588_v31 = vcombine.high %v7586_v46, %v7586_v46  ;;  %v9474_v52 = vsel %vm8066_vm3, %v7587_v7, -inf  ;;  %v9481_v30 = vsel %vm8066_vm3, %v7586_v46, -inf }
 0x59a   :  { %v20709_v26 = vsel %vm9859_vm4, %v9522_v35, -inf  ;;  %v9469_v47 = vmax.f32 %v9467_v19, %v9468_v24  ;;  %v9475_v33 = vrot.slane %v9474_v52, 4  ;;  %v9482_v18 = vrot.slane %v9481_v30, 4 }
 0x59b   :  { %v10171_v1 = vmax.f32 %v20644_v12, %v20709_v26  ;;  %v9488_v8 = vsel %vm8066_vm3, %v7588_v31, -inf  ;;  %v7630_v43 = vrot.slane %v6647_v54, %v19211_v21  ;;  %v7637_v61 = vrot.slane %v7623_v5, %v19211_v21 }
 0x59c   :  { %v9470_v20 = vrot.slane %v9469_v47, 2  ;;  %v9476_v3 = vmax.f32 %v9474_v52, %v9475_v33  ;;  %v9483_v29 = vmax.f32 %v9481_v30, %v9482_v18  ;;  %v9489_v49 = vrot.slane %v9488_v8, 4 }
 0x59d   :  { %v7638_v55 = vcombine.high %v7630_v43, %v7630_v43  ;;  %v7639_v36 = vcombine.high %v7637_v61, %v7637_v61  ;;  %v9551_v28 = vsel %vm8066_vm3, %v7630_v43, -inf  ;;  %v9565_v4 = vsel %vm8066_vm3, %v7637_v61, -inf }
 0x59e   :  { %v9471_v39 = vmax.f32 %v9469_v47, %v9470_v20  ;;  %v9477_v2 = vrot.slane %v9476_v3, 2  ;;  %v9484_v15 = vrot.slane %v9483_v29, 2  ;;  %v9490_v62 = vmax.f32 %v9488_v8, %v9489_v49 }
 0x59f   :  { %v9552_v13 = vrot.slane %v9551_v28, 4  ;;  %v9558_v54 = vsel %vm8066_vm3, %v7638_v55, -inf  ;;  %v9566_v9 = vrot.slane %v9565_v4, 4  ;;  %v9572_v58 = vsel %vm8066_vm3, %v7639_v36, -inf }
 0x5a0   :  { %v9472_v22 = vrot.slane %v9471_v39, 1  ;;  %v9478_v56 = vmax.f32 %v9476_v3, %v9477_v2  ;;  %v9485_v34 = vmax.f32 %v9483_v29, %v9484_v15  ;;  %v9491_v5 = vrot.slane %v9490_v62, 2 }
 0x5a1   :  { %v9553_v46 = vmax.f32 %v9551_v28, %v9552_v13  ;;  %v9559_v7 = vrot.slane %v9558_v54, 4  ;;  %v9567_v19 = vmax.f32 %v9565_v4, %v9566_v9  ;;  %v9573_v35 = vrot.slane %v9572_v58, 4 }
 0x5a2   :  { %v9473_v24 = vmax.f32 %v9471_v39, %v9472_v22  ;;  %v9479_v31 = vrot.slane %v9478_v56, 1  ;;  %v9486_v52 = vrot.slane %v9485_v34, 1  ;;  %v9492_v30 = vmax.f32 %v9490_v62, %v9491_v5 }
 0x5a3   :  { %v9554_v47 = vrot.slane %v9553_v46, 2  ;;  %v9560_v33 = vmax.f32 %v9558_v54, %v9559_v7  ;;  %v9568_v18 = vrot.slane %v9567_v19, 2  ;;  %v9574_v48 = vmax.f32 %v9572_v58, %v9573_v35 }
 0x5a4   :  { %v9480_v8 = vmax.f32 %v9478_v56, %v9479_v31  ;;  %v9487_v43 = vmax.f32 %v9485_v34, %v9486_v52  ;;  %v9493_v61 = vrot.slane %v9492_v30, 1  ;;  %v10149_v20 = vsel %vm9859_vm4, %v9473_v24, -inf }
 0x5a5   :  { %v10150_v3 = vmax.f32 %v20661_v40, %v10149_v20  ;;  %v9555_v29 = vmax.f32 %v9553_v46, %v9554_v47  ;;  %v9561_v49 = vrot.slane %v9560_v33, 2  ;;  %v9569_v55 = vmax.f32 %v9567_v19, %v9568_v18 }
 0x5a6   :  { %v9494_v36 = vmax.f32 %v9492_v30, %v9493_v61  ;;  %v10152_v28 = vsel %vm9859_vm4, %v9480_v8, -inf  ;;  %v10155_v4 = vsel %vm9859_vm4, %v9487_v43, -inf  ;;  %v9575_v39 = vrot.slane %v9574_v48, 2 }
 0x5a7   :  { %v10153_v2 = vmax.f32 %v20664_v60, %v10152_v28  ;;  %v10156_v15 = vmax.f32 %v20667_v0, %v10155_v4  ;;  %v9556_v62 = vrot.slane %v9555_v29, 1  ;;  %v9562_v13 = vmax.f32 %v9560_v33, %v9561_v49 }
 0x5a8   :  { %v10158_v54 = vsel %vm9859_vm4, %v9494_v36, -inf  ;;  %v9570_v9 = vrot.slane %v9569_v55, 1  ;;  %v9576_v58 = vmax.f32 %v9574_v48, %v9575_v39  ;;  %v6582_v40 = vadd.f32 %v20672_v11, %v20681_v27  ;;  %v21971_v48 = vld [vmem:[#allocation46_spill] sm:$0xff] }
 0x5a9   :  { %v10159_v22 = vmax.f32 %v20676_v23, %v10158_v54  ;;  %v10503_v56 = vsel %vm10412_vm5, %v10153_v2, %v10150_v3  ;;  %v9557_v34 = vmax.f32 %v9555_v29, %v9556_v62  ;;  %v9563_v5 = vrot.slane %v9562_v13, 1 }
 0x5aa   :  { %v10504_v46 = vsel %vm10414_vm6, %v10156_v15, %v10503_v56  ;;  %v9571_v60 = vmax.f32 %v9569_v55, %v9570_v9  ;;  %v9577_v7 = vrot.slane %v9576_v58, 1  ;;  %v6646_v0 = vmax.f32 %v6582_v40, 0.0 }
 0x5ab   :  { %v10505_v19 = vsel %vm10416_vm7, %v10159_v22, %v10504_v46  ;;  %v9564_v35 = vmax.f32 %v9562_v13, %v9563_v5  ;;  %v20735_v24 = vsel %vm9859_vm4, %v9557_v34, -inf  ;;  %v6585_v27 = vadd.f32 %v20672_v11, %v20686_v25 }
 0x5ac   :  { %v10506_v23 = vsel %vm10418_vm8, %v10162_v32, %v10505_v19  ;;  %v9578_v31 = vmax.f32 %v9576_v58, %v9577_v7  ;;  %v20744_v52 = vsel %vm9859_vm4, %v9571_v60, -inf  ;;  %v7606_v30 = vcombine.high %v6646_v0, %v6646_v0 }
 0x5ad   :  { %v10507_v47 = vsel %vm10420_vm9, %v10165_v45, %v10506_v23  ;;  %v20751_v33 = vsel %vm9859_vm4, %v9564_v35, -inf  ;;  %v7613_v25 = vrot.slane %v6646_v0, %v19211_v21  ;;  %v6649_v18 = vmax.f32 %v6585_v27, 0.0 }
 0x5ae   :  { %v10508_v63 = vsel %vm10422_vm10, %v10168_v17, %v10507_v47  ;;  %v20759_v38 = vsel %vm9859_vm4, %v9578_v31, -inf  ;;  %v7620_v32 = vrot.slane %v7606_v30, %v19211_v21  ;;  %v16463_v59 = vadd.f32 %v20410_v57, %v21971_v48 }
 0x5af   :  { %v10509_v16 = vsel %vm10424_vm11, %v10171_v1, %v10508_v63  ;;  %v7621_v45 = vcombine.high %v7613_v25, %v7613_v25  ;;  %v9523_v8 = vsel %vm8066_vm3, %v7613_v25, -inf  ;;  %v7657_v43 = vcombine.high %v6649_v18, %v6649_v18 }
 0x5b0   :  { %10560 = vst.msk [vmem:[#allocation3 + $0xf1] sm:$0xff] %vm9859_vm4, %v10509_v16  ;;  %v7622_v37 = vcombine.high %v7620_v32, %v7620_v32  ;;  %v9524_v6 = vrot.slane %v9523_v8, 4  ;;  %v9537_v17 = vsel %vm8066_vm3, %v7620_v32, -inf  ;;  %v7664_v61 = vrot.slane %v6649_v18, %v19211_v21 }
 0x5b1   :  { %v9530_v20 = vsel %vm8066_vm3, %v7621_v45, -inf  ;;  %v9538_v57 = vrot.slane %v9537_v17, 4  ;;  %v7671_v3 = vrot.slane %v7657_v43, %v19211_v21  ;;  %v6584_v12 = vadd.f32 %v20672_v11, %v16463_v59 }
 0x5b2   :  { %v9525_v26 = vmax.f32 %v9523_v8, %v9524_v6  ;;  %v9531_v1 = vrot.slane %v9530_v20, 4  ;;  %v9544_v29 = vsel %vm8066_vm3, %v7622_v37, -inf  ;;  %v7672_v49 = vcombine.high %v7664_v61, %v7664_v61 }
 0x5b3   :  { %v9539_v55 = vmax.f32 %v9537_v17, %v9538_v57  ;;  %v9545_v36 = vrot.slane %v9544_v29, 4  ;;  %v7673_v28 = vcombine.high %v7671_v3, %v7671_v3  ;;  %v9607_v4 = vsel %vm8066_vm3, %v7664_v61, -inf }
 0x5b4   :  { %v9526_v39 = vrot.slane %v9525_v26, 2  ;;  %v9532_v2 = vmax.f32 %v9530_v20, %v9531_v1  ;;  %v9608_v15 = vrot.slane %v9607_v4, 4  ;;  %v9614_v62 = vsel %vm8066_vm3, %v7672_v49, -inf }
 0x5b5   :  { %v9540_v13 = vrot.slane %v9539_v55, 2  ;;  %v9546_v54 = vmax.f32 %v9544_v29, %v9545_v36  ;;  %v9615_v9 = vrot.slane %v9614_v62, 4  ;;  %v9621_v58 = vsel %vm8066_vm3, %v7671_v3, -inf }
 0x5b6   :  { %v9527_v40 = vmax.f32 %v9525_v26, %v9526_v39  ;;  %v9533_v22 = vrot.slane %v9532_v2, 2  ;;  %v9609_v56 = vmax.f32 %v9607_v4, %v9608_v15  ;;  %v9622_v34 = vrot.slane %v9621_v58, 4  ;;  %v21972_v4 = vld [vmem:[#allocation47_spill] sm:$0xff] }
 0x5b7   :  { %v9541_v5 = vmax.f32 %v9539_v55, %v9540_v13  ;;  %v9547_v46 = vrot.slane %v9546_v54, 2  ;;  %v9616_v60 = vmax.f32 %v9614_v62, %v9615_v9  ;;  %v9628_v7 = vsel %vm8066_vm3, %v7673_v28, -inf  ;;  %v10597_v0 = vld [vmem:[#allocation3 + $0xf1] sm:$0xff] }
 0x5b8   :  { %v9528_v19 = vrot.slane %v9527_v40, 1  ;;  %v9534_v35 = vmax.f32 %v9532_v2, %v9533_v22  ;;  %v9610_v27 = vrot.slane %v9609_v56, 2  ;;  %v9623_v23 = vmax.f32 %v9621_v58, %v9622_v34  ;;  %16073 = vmatmul.mubr.msk.f32.gmra.mrb[76].mxu1 %vm9859_vm4, %v10597_v0 }
 0x5b9   :  { %v9542_v31 = vrot.slane %v9541_v5, 1  ;;  %v9548_v30 = vmax.f32 %v9546_v54, %v9547_v46  ;;  %v9617_v47 = vrot.slane %v9616_v60, 2  ;;  %v9629_v25 = vrot.slane %v9628_v7, 4 }
 0x5ba   :  { %v9529_v18 = vmax.f32 %v9527_v40, %v9528_v19  ;;  %v9535_v63 = vrot.slane %v9534_v35, 1  ;;  %v9611_v32 = vmax.f32 %v9609_v56, %v9610_v27  ;;  %v9624_v48 = vrot.slane %v9623_v23, 2 }
 0x5bb   :  { %v9543_v59 = vmax.f32 %v9541_v5, %v9542_v31  ;;  %v9549_v16 = vrot.slane %v9548_v30, 1  ;;  %v9618_v45 = vmax.f32 %v9616_v60, %v9617_v47  ;;  %v9630_v8 = vmax.f32 %v9628_v7, %v9629_v25 }
 0x5bc   :  { %v9536_v43 = vmax.f32 %v9534_v35, %v9535_v63  ;;  %v20782_v37 = vsel %vm9859_vm4, %v9529_v18, -inf  ;;  %v9612_v6 = vrot.slane %v9611_v32, 1  ;;  %v9625_v17 = vmax.f32 %v9623_v23, %v9624_v48 }
 0x5bd   :  { %v9550_v61 = vmax.f32 %v9548_v30, %v9549_v16  ;;  %v20785_v20 = vsel %vm9859_vm4, %v9543_v59, -inf  ;;  %v9619_v57 = vrot.slane %v9618_v45, 1  ;;  %v9631_v3 = vrot.slane %v9630_v8, 2 }
 0x5be   :  { %v20788_v26 = vsel %vm9859_vm4, %v9536_v43, -inf  ;;  %v9613_v1 = vmax.f32 %v9611_v32, %v9612_v6  ;;  %v9626_v29 = vrot.slane %v9625_v17, 1  ;;  %v6648_v49 = vmax.f32 %v6584_v12, 0.0  ;;  %v21973_v6 = vld [vmem:[#allocation48_spill] sm:$0xff] }
 0x5bf   :  { %v20791_v55 = vsel %vm9859_vm4, %v9550_v61, -inf  ;;  %v9620_v36 = vmax.f32 %v9618_v45, %v9619_v57  ;;  %v9632_v28 = vmax.f32 %v9630_v8, %v9631_v3  ;;  %v16464_v39 = vadd.f32 %v20454_v41, %v21972_v4 }
 0x5c0   :  { %v9627_v2 = vmax.f32 %v9625_v17, %v9626_v29  ;;  %v20796_v15 = vsel %vm9859_vm4, %v9613_v1, -inf  ;;  %v7640_v62 = vcombine.high %v6648_v49, %v6648_v49  ;;  %v7647_v13 = vrot.slane %v6648_v49, %v19211_v21 }
 0x5c1   :  { %v9633_v54 = vrot.slane %v9632_v28, 1  ;;  %v10186_v9 = vmax.f32 %v20735_v24, %v20796_v15  ;;  %v20802_v12 = vsel %vm9859_vm4, %v9620_v36, -inf  ;;  %v6587_v58 = vadd.f32 %v20672_v11, %v16464_v39 }
 0x5c2   :  { %v10189_v40 = vmax.f32 %v20751_v33, %v20802_v12  ;;  %v20808_v41 = vsel %vm9859_vm4, %v9627_v2, -inf  ;;  %v7654_v22 = vrot.slane %v7640_v62, %v19211_v21  ;;  %v7655_v56 = vcombine.high %v7647_v13, %v7647_v13 }
 0x5c3   :  { %v9634_v34 = vmax.f32 %v9632_v28, %v9633_v54  ;;  %v10192_v5 = vmax.f32 %v20744_v52, %v20808_v41  ;;  %v9579_v46 = vsel %vm8066_vm3, %v7647_v13, -inf  ;;  %v6651_v60 = vmax.f32 %v6587_v58, 0.0 }
 0x5c4   :  { %v7656_v7 = vcombine.high %v7654_v22, %v7654_v22  ;;  %v9580_v0 = vrot.slane %v9579_v46, 4  ;;  %v9586_v19 = vsel %vm8066_vm3, %v7655_v56, -inf  ;;  %v9593_v35 = vsel %vm8066_vm3, %v7654_v22, -inf }
 0x5c5   :  { %v20817_v27 = vsel %vm9859_vm4, %v9634_v34, -inf  ;;  %v9587_v23 = vrot.slane %v9586_v19, 4  ;;  %v9594_v31 = vrot.slane %v9593_v35, 4  ;;  %v7691_v30 = vcombine.high %v6651_v60, %v6651_v60 }
 0x5c6   :  { %v10195_v47 = vmax.f32 %v20759_v38, %v20817_v27  ;;  %v9581_v25 = vmax.f32 %v9579_v46, %v9580_v0  ;;  %v9600_v18 = vsel %vm8066_vm3, %v7656_v7, -inf  ;;  %v7698_v63 = vrot.slane %v6651_v60, %v19211_v21 }
 0x5c7   :  { %v9588_v32 = vmax.f32 %v9586_v19, %v9587_v23  ;;  %v9595_v48 = vmax.f32 %v9593_v35, %v9594_v31  ;;  %v9601_v59 = vrot.slane %v9600_v18, 4  ;;  %v7705_v16 = vrot.slane %v7691_v30, %v19211_v21 }
 0x5c8   :  { %v9582_v45 = vrot.slane %v9581_v25, 2  ;;  %v7706_v8 = vcombine.high %v7698_v63, %v7698_v63  ;;  %v9663_v43 = vsel %vm8066_vm3, %v7698_v63, -inf  ;;  %v16465_v17 = vadd.f32 %v20464_v10, %v21973_v6 }
 0x5c9   :  { %v9589_v61 = vrot.slane %v9588_v32, 2  ;;  %v9596_v57 = vrot.slane %v9595_v48, 2  ;;  %v9602_v3 = vmax.f32 %v9600_v18, %v9601_v59  ;;  %v7707_v1 = vcombine.high %v7705_v16, %v7705_v16 }
 0x5ca   :  { %v9583_v29 = vmax.f32 %v9581_v25, %v9582_v45  ;;  %v9664_v49 = vrot.slane %v9663_v43, 4  ;;  %v9670_v36 = vsel %vm8066_vm3, %v7706_v8, -inf  ;;  %v9677_v28 = vsel %vm8066_vm3, %v7705_v16, -inf }
 0x5cb   :  { %v9590_v4 = vmax.f32 %v9588_v32, %v9589_v61  ;;  %v9597_v39 = vmax.f32 %v9595_v48, %v9596_v57  ;;  %v9603_v2 = vrot.slane %v9602_v3, 2  ;;  %v9671_v62 = vrot.slane %v9670_v36, 4 }
 0x5cc   :  { %v9584_v13 = vrot.slane %v9583_v29, 1  ;;  %v9665_v54 = vmax.f32 %v9663_v43, %v9664_v49  ;;  %v9678_v58 = vrot.slane %v9677_v28, 4  ;;  %v9684_v22 = vsel %vm8066_vm3, %v7707_v1, -inf }
 0x5cd   :  { %v9591_v10 = vrot.slane %v9590_v4, 1  ;;  %v9598_v56 = vrot.slane %v9597_v39, 1  ;;  %v9604_v34 = vmax.f32 %v9602_v3, %v9603_v2  ;;  %v9672_v46 = vmax.f32 %v9670_v36, %v9671_v62  ;;  %v21974_v2 = vld [vmem:[#allocation49_spill] sm:$0xff] }
 0x5ce   :  { %v9585_v60 = vmax.f32 %v9583_v29, %v9584_v13  ;;  %v9666_v7 = vrot.slane %v9665_v54, 2  ;;  %v9679_v0 = vmax.f32 %v9677_v28, %v9678_v58  ;;  %v9685_v19 = vrot.slane %v9684_v22, 4 }
 0x5cf   :  { %v9592_v35 = vmax.f32 %v9590_v4, %v9591_v10  ;;  %v9599_v23 = vmax.f32 %v9597_v39, %v9598_v56  ;;  %v9605_v31 = vrot.slane %v9604_v34, 1  ;;  %v9673_v30 = vrot.slane %v9672_v46, 2 }
 0x5d0   :  { %v10173_v25 = vsel %vm9859_vm4, %v9585_v60, -inf  ;;  %v9667_v18 = vmax.f32 %v9665_v54, %v9666_v7  ;;  %v9680_v63 = vrot.slane %v9679_v0, 2  ;;  %v9686_v32 = vmax.f32 %v9684_v22, %v9685_v19  ;;  %v21975_v19 = vld [vmem:[#allocation50_spill] sm:$0xff] }
 0x5d1   :  { %v9606_v48 = vmax.f32 %v9604_v34, %v9605_v31  ;;  %v10174_v59 = vmax.f32 %v20782_v37, %v10173_v25  ;;  %v10176_v16 = vsel %vm9859_vm4, %v9592_v35, -inf  ;;  %v10179_v45 = vsel %vm9859_vm4, %v9599_v23, -inf }
 0x5d2   :  { %v10177_v8 = vmax.f32 %v20788_v26, %v10176_v16  ;;  %v10180_v43 = vmax.f32 %v20785_v20, %v10179_v45  ;;  %v9668_v6 = vrot.slane %v9667_v18, 1  ;;  %v9674_v61 = vmax.f32 %v9672_v46, %v9673_v30 }
 0x5d3   :  { %v10182_v57 = vsel %vm9859_vm4, %v9606_v48, -inf  ;;  %v9681_v3 = vmax.f32 %v9679_v0, %v9680_v63  ;;  %v9687_v1 = vrot.slane %v9686_v32, 2  ;;  %v6586_v29 = vadd.f32 %v20672_v11, %v16465_v17 }
 0x5d4   :  { %v10183_v49 = vmax.f32 %v20791_v55, %v10182_v57  ;;  %v10510_v37 = vsel %vm10412_vm5, %v10177_v8, %v10174_v59  ;;  %v9675_v36 = vrot.slane %v9674_v61, 1  ;;  %v9669_v4 = vmax.f32 %v9667_v18, %v9668_v6 }
 0x5d5   :  { %v10511_v28 = vsel %vm10414_vm6, %v10180_v43, %v10510_v37  ;;  %v9682_v39 = vrot.slane %v9681_v3, 1  ;;  %v6650_v26 = vmax.f32 %v6586_v29, 0.0  ;;  %v16466_v62 = vadd.f32 %v20511_v51, %v21974_v2 }
 0x5d6   :  { %v10512_v20 = vsel %vm10416_vm7, %v10183_v49, %v10511_v28  ;;  %v9688_v13 = vmax.f32 %v9686_v32, %v9687_v1  ;;  %v9676_v58 = vmax.f32 %v9674_v61, %v9675_v36  ;;  %v20859_v15 = vsel %vm9859_vm4, %v9669_v4, -inf }
 0x5d7   :  { %v10513_v17 = vsel %vm10418_vm8, %v10186_v9, %v10512_v20  ;;  %v7674_v55 = vcombine.high %v6650_v26, %v6650_v26  ;;  %v7681_v22 = vrot.slane %v6650_v26, %v19211_v21  ;;  %v6589_v10 = vadd.f32 %v20672_v11, %v16466_v62 }
 0x5d8   :  { %v10514_v54 = vsel %vm10420_vm9, %v10189_v40, %v10513_v17  ;;  %v9683_v24 = vmax.f32 %v9681_v3, %v9682_v39  ;;  %v9689_v52 = vrot.slane %v9688_v13, 1  ;;  %v16467_v35 = vadd.f32 %v20527_v44, %v21975_v19 }
 0x5d9   :  { %v10515_v51 = vsel %vm10422_vm10, %v10192_v5, %v10514_v54  ;;  %v7688_v9 = vrot.slane %v7674_v55, %v19211_v21  ;;  %v7689_v12 = vcombine.high %v7681_v22, %v7681_v22  ;;  %v9635_v40 = vsel %vm8066_vm3, %v7681_v22, -inf }
 0x5da   :  { %v10516_v33 = vsel %vm10424_vm11, %v10195_v47, %v10515_v51  ;;  %v6653_v56 = vmax.f32 %v6589_v10, 0.0  ;;  %v9636_v5 = vrot.slane %v9635_v40, 4  ;;  %v9690_v18 = vmax.f32 %v9688_v13, %v9689_v52 }
 0x5db   :  { %10561 = vst.msk [vmem:[#allocation3 + $0x101] sm:$0xff] %vm9859_vm4, %v10516_v33  ;;  %v7690_v41 = vcombine.high %v7688_v9, %v7688_v9  ;;  %v9649_v34 = vsel %vm8066_vm3, %v7688_v9, -inf  ;;  %v9642_v46 = vsel %vm8066_vm3, %v7689_v12, -inf  ;;  %v6588_v55 = vadd.f32 %v20672_v11, %v16467_v35 }
 0x5dc   :  { %v9650_v60 = vrot.slane %v9649_v34, 4  ;;  %v7725_v7 = vcombine.high %v6653_v56, %v6653_v56  ;;  %v7732_v0 = vrot.slane %v6653_v56, %v19211_v21  ;;  %v9637_v38 = vmax.f32 %v9635_v40, %v9636_v5 }
 0x5dd   :  { %v9643_v27 = vrot.slane %v9642_v46, 4  ;;  %v9656_v47 = vsel %vm8066_vm3, %v7690_v41, -inf  ;;  %v20885_v54 = vsel %vm9859_vm4, %v9676_v58, -inf  ;;  %v20888_v9 = vsel %vm9859_vm4, %v9683_v24, -inf }
 0x5de   :  { %v9651_v23 = vmax.f32 %v9649_v34, %v9650_v60  ;;  %v9657_v31 = vrot.slane %v9656_v47, 4  ;;  %v7739_v30 = vrot.slane %v7725_v7, %v19211_v21  ;;  %v7740_v25 = vcombine.high %v7732_v0, %v7732_v0 }
 0x5df   :  { %v9638_v63 = vrot.slane %v9637_v38, 2  ;;  %v9644_v32 = vmax.f32 %v9642_v46, %v9643_v27  ;;  %v9719_v48 = vsel %vm8066_vm3, %v7732_v0, -inf  ;;  %v20891_v33 = vsel %vm9859_vm4, %v9690_v18, -inf  ;;  %v21977_v18 = vld [vmem:[#allocation52_spill] sm:$0xff] }
 0x5e0   :  { %v9652_v59 = vrot.slane %v9651_v23, 2  ;;  %v9658_v16 = vmax.f32 %v9656_v47, %v9657_v31  ;;  %v7741_v45 = vcombine.high %v7739_v30, %v7739_v30  ;;  %v9720_v8 = vrot.slane %v9719_v48, 4 }
 0x5e1   :  { %v9639_v43 = vmax.f32 %v9637_v38, %v9638_v63  ;;  %v9645_v6 = vrot.slane %v9644_v32, 2  ;;  %v9726_v61 = vsel %vm8066_vm3, %v7740_v25, -inf  ;;  %v9733_v44 = vsel %vm8066_vm3, %v7739_v30, -inf  ;;  %v21976_v38 = vld [vmem:[#allocation51_spill] sm:$0xff] }
 0x5e2   :  { %v9653_v57 = vmax.f32 %v9651_v23, %v9652_v59  ;;  %v9659_v3 = vrot.slane %v9658_v16, 2  ;;  %v9721_v1 = vmax.f32 %v9719_v48, %v9720_v8  ;;  %v9727_v29 = vrot.slane %v9726_v61, 4  ;;  %v20878_v49 = vld [vmem:[#allocation3 + $0x101] sm:$0xff] }
 0x5e3   :  { %v9640_v37 = vrot.slane %v9639_v43, 1  ;;  %v9646_v36 = vmax.f32 %v9644_v32, %v9645_v6  ;;  %v9734_v28 = vrot.slane %v9733_v44, 4  ;;  %v9740_v4 = vsel %vm8066_vm3, %v7741_v45, -inf  ;;  %16075 = vmatprep.mubr.msk.f32.mxu1 %vm9859_vm4, %v20878_v49 }
 0x5e4   :  { %v9654_v39 = vrot.slane %v9653_v57, 1  ;;  %v9660_v26 = vmax.f32 %v9658_v16, %v9659_v3  ;;  %v9722_v20 = vrot.slane %v9721_v1, 2  ;;  %v9728_v2 = vmax.f32 %v9726_v61, %v9727_v29 }
 0x5e5   :  { %v9647_v62 = vrot.slane %v9646_v36, 1  ;;  %v9735_v17 = vmax.f32 %v9733_v44, %v9734_v28  ;;  %v9741_v13 = vrot.slane %v9740_v4, 4  ;;  %v9641_v22 = vmax.f32 %v9639_v43, %v9640_v37 }
 0x5e6   :  { %v9723_v10 = vmax.f32 %v9721_v1, %v9722_v20  ;;  %v9729_v51 = vrot.slane %v9728_v2, 2  ;;  %v20893_v56 = vmax.f32 %v9653_v57, %v9654_v39  ;;  %v9661_v52 = vrot.slane %v9660_v26, 1 }
 0x5e7   :  { %v9736_v12 = vrot.slane %v9735_v17, 2  ;;  %v9742_v40 = vmax.f32 %v9740_v4, %v9741_v13  ;;  %v20895_v34 = vmax.f32 %v9646_v36, %v9647_v62  ;;  %v6652_v60 = vmax.f32 %v6588_v55, 0.0 }
 0x5e8   :  { %v9724_v41 = vrot.slane %v9723_v10, 1  ;;  %v9730_v5 = vmax.f32 %v9728_v2, %v9729_v51  ;;  %v20898_v7 = vsel %vm9859_vm4, %v9641_v22, -inf  ;;  %v16468_v27 = vadd.f32 %v20572_v50, %v21976_v38 }
 0x5e9   :  { %v9737_v58 = vmax.f32 %v9735_v17, %v9736_v12  ;;  %v9743_v46 = vrot.slane %v9742_v40, 2  ;;  %v7708_v35 = vcombine.high %v6652_v60, %v6652_v60  ;;  %v7715_v23 = vrot.slane %v6652_v60, %v19211_v21 }
 0x5ea   :  { %v9725_v24 = vmax.f32 %v9723_v10, %v9724_v41  ;;  %v9731_v0 = vrot.slane %v9730_v5, 1  ;;  %v6591_v25 = vadd.f32 %v20672_v11, %v16468_v27  ;;  %v20909_v63 = vadd.f32 %v20590_v14, %v21977_v18 }
 0x5eb   :  { %v9738_v47 = vrot.slane %v9737_v58, 1  ;;  %v9744_v19 = vmax.f32 %v9742_v40, %v9743_v46  ;;  %v7722_v59 = vrot.slane %v7708_v35, %v19211_v21  ;;  %v7723_v45 = vcombine.high %v7715_v23, %v7715_v23  ;;  %v21978_v40 = vld [vmem:[#allocation53_spill] sm:$0xff] }
 0x5ec   :  { %v9732_v31 = vmax.f32 %v9730_v5, %v9731_v0  ;;  %v20904_v30 = vsel %vm9859_vm4, %v9725_v24, -inf  ;;  %v9691_v8 = vsel %vm8066_vm3, %v7715_v23, -inf  ;;  %v6655_v43 = vmax.f32 %v6591_v25, 0.0 }
 0x5ed   :  { %v9739_v32 = vmax.f32 %v9737_v58, %v9738_v47  ;;  %v9745_v48 = vrot.slane %v9744_v19, 1  ;;  %v10210_v50 = vmax.f32 %v20859_v15, %v20904_v30  ;;  %v7724_v44 = vcombine.high %v7722_v59, %v7722_v59 }
 0x5ee   :  { %v20915_v16 = vsel %vm9859_vm4, %v9732_v31, -inf  ;;  %v9692_v3 = vrot.slane %v9691_v8, 4  ;;  %v9698_v1 = vsel %vm8066_vm3, %v7723_v45, -inf  ;;  %v9705_v29 = vsel %vm8066_vm3, %v7722_v59, -inf }
 0x5ef   :  { %v9746_v6 = vmax.f32 %v9744_v19, %v9745_v48  ;;  %v10213_v61 = vmax.f32 %v20885_v54, %v20915_v16  ;;  %v20921_v14 = vsel %vm9859_vm4, %v9739_v32, -inf  ;;  %v9699_v36 = vrot.slane %v9698_v1, 4 }
 0x5f0   :  { %v10216_v57 = vmax.f32 %v20888_v9, %v20921_v14  ;;  %v9706_v28 = vrot.slane %v9705_v29, 4  ;;  %v9712_v4 = vsel %vm8066_vm3, %v7724_v44, -inf  ;;  %v9693_v20 = vmax.f32 %v9691_v8, %v9692_v3 }
 0x5f1   :  { %v20928_v37 = vsel %vm9859_vm4, %v9746_v6, -inf  ;;  %v9713_v2 = vrot.slane %v9712_v4, 4  ;;  %v7759_v62 = vcombine.high %v6655_v43, %v6655_v43  ;;  %v9662_v17 = vmax.f32 %v9660_v26, %v9661_v52 }
 0x5f2   :  { %v10219_v39 = vmax.f32 %v20891_v33, %v20928_v37  ;;  %v9700_v13 = vmax.f32 %v9698_v1, %v9699_v36  ;;  %v9707_v55 = vmax.f32 %v9705_v29, %v9706_v28  ;;  %v7766_v22 = vrot.slane %v6655_v43, %v19211_v21  ;;  %v10580_v33 = vld [vmem:[%s21823_s3] sm:$0xff]  ;;  %v10581_v37 = vld [vmem:[%s21823_s3 + $0x8] sm:$0xff] }
 0x5f3   :  { %v9694_v10 = vrot.slane %v9693_v20, 2  ;;  %v9714_v51 = vmax.f32 %v9712_v4, %v9713_v2  ;;  %v7773_v12 = vrot.slane %v7759_v62, %v19211_v21  ;;  %v16470_v41 = vadd.f32 %v20626_v53, %v21978_v40 }
 0x5f4   :  { %v9701_v5 = vrot.slane %v9700_v13, 2  ;;  %v9708_v58 = vrot.slane %v9707_v55, 2  ;;  %v7774_v46 = vcombine.high %v7766_v22, %v7766_v22  ;;  %v9775_v60 = vsel %vm8066_vm3, %v7766_v22, -inf }
 0x5f5   :  { %v9695_v24 = vmax.f32 %v9693_v20, %v9694_v10  ;;  %v9715_v0 = vrot.slane %v9714_v51, 2  ;;  %v7775_v38 = vcombine.high %v7773_v12, %v7773_v12  ;;  %v9776_v26 = vrot.slane %v9775_v60, 4 }
 0x5f6   :  { %v9702_v52 = vmax.f32 %v9700_v13, %v9701_v5  ;;  %v9709_v27 = vmax.f32 %v9707_v55, %v9708_v58  ;;  %v9782_v47 = vsel %vm8066_vm3, %v7774_v46, -inf  ;;  %v9789_v19 = vsel %vm8066_vm3, %v7773_v12, -inf }
 0x5f7   :  { %v9696_v35 = vrot.slane %v9695_v24, 1  ;;  %v9716_v23 = vmax.f32 %v9714_v51, %v9715_v0  ;;  %v9777_v31 = vmax.f32 %v9775_v60, %v9776_v26  ;;  %v9783_v25 = vrot.slane %v9782_v47, 4 }
 0x5f8   :  { %v9703_v53 = vrot.slane %v9702_v52, 1  ;;  %v9710_v18 = vrot.slane %v9709_v27, 1  ;;  %v9790_v32 = vrot.slane %v9789_v19, 4  ;;  %v9796_v48 = vsel %vm8066_vm3, %v7775_v38, -inf }
 0x5f9   :  { %v10199_v59 = vsel %vm9859_vm4, %v20895_v34, -inf  ;;  %v10202_v45 = vsel %vm9859_vm4, %v20893_v56, -inf  ;;  %v9697_v8 = vmax.f32 %v9695_v24, %v9696_v35  ;;  %v9717_v43 = vrot.slane %v9716_v23, 1 }
 0x5fa   :  { %v9704_v6 = vmax.f32 %v9702_v52, %v9703_v53  ;;  %v9711_v44 = vmax.f32 %v9709_v27, %v9710_v18  ;;  %v9778_v3 = vrot.slane %v9777_v31, 2  ;;  %v9797_v1 = vrot.slane %v9796_v48, 4 }
 0x5fb   :  { %v9718_v29 = vmax.f32 %v9716_v23, %v9717_v43  ;;  %v10197_v36 = vsel %vm9859_vm4, %v9697_v8, -inf  ;;  %v9784_v28 = vmax.f32 %v9782_v47, %v9783_v25  ;;  %v6590_v4 = vadd.f32 %v20672_v11, %v20909_v63 }
 0x5fc   :  { %v10198_v20 = vmax.f32 %v20898_v7, %v10197_v36  ;;  %v10200_v34 = vsel %vm9859_vm4, %v9704_v6, -inf  ;;  %v10203_v2 = vsel %vm9859_vm4, %v9711_v44, -inf  ;;  %v9791_v56 = vmax.f32 %v9789_v19, %v9790_v32 }
 0x5fd   :  { %v10205_v62 = vsel %vm9859_vm4, %v9662_v17, -inf  ;;  %v10201_v13 = vmax.f32 %v10199_v59, %v10200_v34  ;;  %v10204_v55 = vmax.f32 %v10202_v45, %v10203_v2  ;;  %v10206_v22 = vsel %vm9859_vm4, %v9718_v29, -inf }
 0x5fe   :  { %v10207_v10 = vmax.f32 %v10205_v62, %v10206_v22  ;;  %v9779_v51 = vmax.f32 %v9777_v31, %v9778_v3  ;;  %v9798_v12 = vmax.f32 %v9796_v48, %v9797_v1  ;;  %v6654_v5 = vmax.f32 %v6590_v4, 0.0 }
 0x5ff   :  { %v10517_v40 = vsel %vm10412_vm5, %v10201_v13, %v10198_v20  ;;  %v9785_v7 = vrot.slane %v9784_v28, 2  ;;  %v9792_v58 = vrot.slane %v9791_v56, 2  ;;  %v6593_v26 = vadd.f32 %v20672_v11, %v16470_v41  ;;  %v10564_v20 = vld [vmem:[#allocation3] sm:$0xff] }
 0x600   :  { %v10518_v63 = vsel %vm10414_vm6, %v10204_v55, %v10517_v40  ;;  %v9799_v60 = vrot.slane %v9798_v12, 2  ;;  %v7742_v24 = vcombine.high %v6654_v5, %v6654_v5  ;;  %v7749_v17 = vrot.slane %v6654_v5, %v19211_v21 }
 0x601   :  { %v10519_v46 = vsel %vm10416_vm7, %v10207_v10, %v10518_v63  ;;  %v9780_v38 = vrot.slane %v9779_v51, 1  ;;  %v9786_v30 = vmax.f32 %v9784_v28, %v9785_v7  ;;  %v6657_v9 = vmax.f32 %v6593_v26, 0.0  ;;  %v17058_v63 = vld [vmem:[%s21822_s2] ss:$0 sm:$0xff] }
 0x602   :  { %v10520_v0 = vsel %vm10418_vm8, %v10210_v50, %v10519_v46  ;;  %v7756_v27 = vrot.slane %v7742_v24, %v19211_v21  ;;  %v7757_v47 = vcombine.high %v7749_v17, %v7749_v17  ;;  %v9747_v19 = vsel %vm8066_vm3, %v7749_v17, -inf }
 0x603   :  { %v10521_v52 = vsel %vm10420_vm9, %v10213_v61, %v10520_v0  ;;  %v9793_v50 = vmax.f32 %v9791_v56, %v9792_v58  ;;  %v9800_v54 = vmax.f32 %v9798_v12, %v9799_v60  ;;  %v9748_v41 = vrot.slane %v9747_v19, 4 }
 0x604   :  { %v10522_v15 = vsel %vm10422_vm10, %v10216_v57, %v10521_v52  ;;  %v7758_v16 = vcombine.high %v7756_v27, %v7756_v27  ;;  %v9754_v61 = vsel %vm8066_vm3, %v7757_v47, -inf  ;;  %v9761_v23 = vsel %vm8066_vm3, %v7756_v27, -inf  ;;  %v21979_v57 = vld [vmem:[#allocation54_spill] sm:$0xff]  ;;  %v10582_v52 = vld [vmem:[%s21823_s3 + $0x10] sm:$0xff] }
 0x605   :  { %v10523_v11 = vsel %vm10424_vm11, %v10219_v39, %v10522_v15  ;;  %v9755_v35 = vrot.slane %v9754_v61, 4  ;;  %v9781_v14 = vmax.f32 %v9779_v51, %v9780_v38  ;;  %v16471_v31 = vadd.f32 %v20648_v42, %v21979_v57  ;;  %v10583_v27 = vld [vmem:[%s21823_s3 + $0x18] sm:$0xff] }
 0x606   :  { %10562 = vst.msk [vmem:[#allocation3 + $0x111] sm:$0xff] %vm9859_vm4, %v10523_v11  ;;  %v9787_v39 = vrot.slane %v9786_v30, 1  ;;  %v9762_v25 = vrot.slane %v9761_v23, 4  ;;  %v9768_v53 = vsel %vm8066_vm3, %v7758_v16, -inf  ;;  %v7793_v18 = vcombine.high %v6657_v9, %v6657_v9 }
 0x607   :  { %v9794_v32 = vrot.slane %v9793_v50, 1  ;;  %v9801_v48 = vrot.slane %v9800_v54, 1  ;;  %v7800_v59 = vrot.slane %v6657_v9, %v19211_v21  ;;  %v9749_v45 = vmax.f32 %v9747_v19, %v9748_v41  ;;  %v14259_v41 = vld [vmem:[%s21823_s3 + $0x48] sm:$0xff] }
 0x608   :  { %v9756_v8 = vmax.f32 %v9754_v61, %v9755_v35  ;;  %v7807_v42 = vrot.slane %v7793_v18, %v19211_v21  ;;  %v16342_v43 = vpack.c.bf16 %v10581_v37, %v10580_v33  ;;  %v20991_v6 = vsel %vm9859_vm4, %v9781_v14, -inf  ;;  %v14260_v35 = vld [vmem:[%s21823_s3 + $0x50] sm:$0xff]  ;;  %v14279_v18 = vld [vmem:[%s21823_s3 + $0x68] sm:$0xff] }
 0x609   :  { %v9769_v44 = vrot.slane %v9768_v53, 4  ;;  %v7808_v3 = vcombine.high %v7800_v59, %v7800_v59  ;;  %v9831_v1 = vsel %vm8066_vm3, %v7800_v59, -inf  ;;  %v9788_v29 = vmax.f32 %v9786_v30, %v9787_v39 }
 0x60a   :  { %v9763_v36 = vmax.f32 %v9761_v23, %v9762_v25  ;;  %v7809_v28 = vcombine.high %v7807_v42, %v7807_v42  ;;  %v9832_v4 = vrot.slane %v9831_v1, 4  ;;  %16343 = vmatprep.subr.bf16.mxu1 %v16342_v43  ;;  %v9795_v34 = vmax.f32 %v9793_v50, %v9794_v32  ;;  %v14258_v50 = vld [vmem:[%s21823_s3 + $0x40] sm:$0xff]  ;;  %v14261_v23 = vld [vmem:[%s21823_s3 + $0x58] sm:$0xff] }
 0x60b   :  { %v9802_v2 = vmax.f32 %v9800_v54, %v9801_v48  ;;  %v9838_v56 = vsel %vm8066_vm3, %v7808_v3, -inf  ;;  %v9845_v62 = vsel %vm8066_vm3, %v7807_v42, -inf  ;;  %16345 = vmatpush3.bf16.msra.mxu1 %v16342_v43  ;;  %v9750_v55 = vrot.slane %v9749_v45, 2 }
 0x60c   :  { %v9757_v22 = vrot.slane %v9756_v8, 2  ;;  %v9833_v10 = vmax.f32 %v9831_v1, %v9832_v4  ;;  %v9839_v51 = vrot.slane %v9838_v56, 4  ;;  %v21000_v12 = vmax.f32 %v9768_v53, %v9769_v44  ;;  %v14278_v53 = vld [vmem:[%s21823_s3 + $0x60] sm:$0xff] }
 0x60d   :  { %v20996_v13 = vld [vmem:[#allocation3 + $0x111] sm:$0xff]  ;;  %v9846_v40 = vrot.slane %v9845_v62, 4  ;;  %v9852_v5 = vsel %vm8066_vm3, %v7809_v28, -inf  ;;  %v6592_v7 = vadd.f32 %v17058_v63, %v16471_v31  ;;  %v21008_v58 = vsel %vm9859_vm4, %v9788_v29, -inf }
 0x60e   :  { %16076 = vmatmul.mubr.msk.f32.gmra.mrb[78].mxu1 %vm9859_vm4, %v20996_v13  ;;  %v9764_v46 = vrot.slane %v9763_v36, 2  ;;  %v9834_v60 = vrot.slane %v9833_v10, 2  ;;  %v9840_v24 = vmax.f32 %v9838_v56, %v9839_v51  ;;  %v21011_v17 = vsel %vm9859_vm4, %v9795_v34, -inf }
 0x60f   :  { %16086 = vmatprep.mubr.msk.f32.mxu1 %vm9859_vm4, %v10564_v20  ;;  %v21014_v0 = vsel %vm9859_vm4, %v9802_v2, -inf  ;;  %v9847_v38 = vmax.f32 %v9845_v62, %v9846_v40  ;;  %v9853_v26 = vrot.slane %v9852_v5, 4  ;;  %v21022_v47 = vmax.f32 %v9749_v45, %v9750_v55  ;;  %v21057_v2 = vld [vmem:[#allocation3 + $0x10] sm:$0xff] }
 0x610   :  { %v21024_v19 = vmax.f32 %v9756_v8, %v9757_v22  ;;  %v9835_v15 = vmax.f32 %v9833_v10, %v9834_v60  ;;  %v9841_v30 = vrot.slane %v9840_v24, 2  ;;  %v9771_v11 = vrot.slane %v21000_v12, 2  ;;  %v21066_v10 = vld [vmem:[#allocation3 + $0x20] sm:$0xff] }
 0x611   :  { %v9848_v54 = vrot.slane %v9847_v38, 2  ;;  %v9854_v16 = vmax.f32 %v9852_v5, %v9853_v26  ;;  %v6656_v61 = vmax.f32 %v6592_v7, 0.0  ;;  %v21039_v9 = vmax.f32 %v9763_v36, %v9764_v46 }
 0x612   :  { %v9836_v14 = vrot.slane %v9835_v15, 1  ;;  %v9842_v57 = vmax.f32 %v9840_v24, %v9841_v30  ;;  %v16346_v31 = vpack.c.bf16 %v10583_v27, %v10582_v52  ;;  %v16350_v59 = vpack.c.bf16 %v14259_v41, %v14258_v50 }
 0x613   :  { %v9849_v33 = vmax.f32 %v9847_v38, %v9848_v54  ;;  %v9855_v37 = vrot.slane %v9854_v16, 2  ;;  %v7776_v39 = vcombine.high %v6656_v61, %v6656_v61  ;;  %v7783_v25 = vrot.slane %v6656_v61, %v19211_v21  ;;  %v21089_v61 = vld [vmem:[#allocation3 + $0x40] sm:$0xff] }
 0x614   :  { %v9837_v32 = vmax.f32 %v9835_v15, %v9836_v14  ;;  %v9843_v48 = vrot.slane %v9842_v57, 1  ;;  %16347 = vmatprep.subr.bf16.mxu1 %v16346_v31  ;;  %v16354_v45 = vpack.c.bf16 %v14261_v23, %v14260_v35  ;;  %v21053_v36 = vpack.c.bf16 %v14279_v18, %v14278_v53  ;;  %v21082_v15 = vld [vmem:[#allocation3 + $0x30] sm:$0xff]  ;;  %v21101_v18 = vld [vmem:[#allocation3 + $0x60] sm:$0xff] }
 0x615   :  { %v9850_v8 = vrot.slane %v9849_v33, 1  ;;  %v9856_v42 = vmax.f32 %v9854_v16, %v9855_v37  ;;  %v7790_v43 = vrot.slane %v7776_v39, %v19211_v21  ;;  %v7791_v44 = vcombine.high %v7783_v25, %v7783_v25  ;;  %16349 = vmatpush3.bf16.msra.mxu1 %v16346_v31  ;;  %v21096_v37 = vld [vmem:[#allocation3 + $0x50] sm:$0xff] }
 0x616   :  { %v9844_v3 = vmax.f32 %v9842_v57, %v9843_v48  ;;  %v21050_v1 = vsel %vm9859_vm4, %v9837_v32, -inf  ;;  %v9803_v29 = vsel %vm8066_vm3, %v7783_v25, -inf  ;;  %16351 = vmatprep.subr.bf16.mxu1 %v16350_v59  ;;  %v9772_v38 = vmax.f32 %v21000_v12, %v9771_v11 }
 0x617   :  { %v9851_v28 = vmax.f32 %v9849_v33, %v9850_v8  ;;  %v9857_v4 = vrot.slane %v9856_v42, 1  ;;  %v10234_v20 = vmax.f32 %v20991_v6, %v21050_v1  ;;  %v7792_v34 = vcombine.high %v7790_v43, %v7790_v43  ;;  %v21160_v1 = vld [vmem:[#allocation3 + $0x100] sm:$0xff] }
 0x618   :  { %v21060_v56 = vsel %vm9859_vm4, %v9844_v3, -inf  ;;  %v9804_v62 = vrot.slane %v9803_v29, 4  ;;  %v9810_v55 = vsel %vm8066_vm3, %v7791_v44, -inf  ;;  %v9817_v22 = vsel %vm8066_vm3, %v7790_v43, -inf  ;;  %16087 = vmatmul.mubr.msk.f32.vlgmr.msra.gmra.mrb[64].mxu1 %vm9859_vm4, %v21057_v2  ;;  %v10572_v43 = vld [vmem:[#allocation3 + $0xa0] sm:$0xff] }
 0x619   :  { %v9858_v51 = vmax.f32 %v9856_v42, %v9857_v4  ;;  %v10237_v40 = vmax.f32 %v21008_v58, %v21060_v56  ;;  %v21071_v5 = vsel %vm9859_vm4, %v9851_v28, -inf  ;;  %v9811_v63 = vrot.slane %v9810_v55, 4  ;;  %16353 = vmatpush3.bf16.msra.mxu1 %v16350_v59  ;;  %16089 = vmatprep.mubr.msk.f32.mxu1 %vm9859_vm4, %v21066_v10  ;;  %v21156_v58 = vld [vmem:[#allocation3 + $0xf0] sm:$0xff]  ;;  %v14281_v56 = vld [vmem:[%s21823_s3 + $0x78] sm:$0xff] }
 0x61a   :  { %v10240_v7 = vmax.f32 %v21011_v17, %v21071_v5  ;;  %v9805_v46 = vmax.f32 %v9803_v29, %v9804_v62  ;;  %v9818_v60 = vrot.slane %v9817_v22, 4  ;;  %v9824_v24 = vsel %vm8066_vm3, %v7792_v34, -inf  ;;  %16355 = vmatprep.subr.bf16.mxu1 %v16354_v45  ;;  %v21107_v29 = vld [vmem:[#allocation3 + $0x70] sm:$0xff]  ;;  %v10991_v17 = vld [vmem:[#allocation3 + $0x2] sm:$0xff] }
 0x61b   :  { %v21080_v26 = vsel %vm9859_vm4, %v9858_v51, -inf  ;;  %v9812_v52 = vmax.f32 %v9810_v55, %v9811_v63  ;;  %v9825_v27 = vrot.slane %v9824_v24, 4  ;;  %v9752_v30 = vrot.slane %v21022_v47, 1  ;;  %v21175_v5 = vld [vmem:[#allocation3 + $0x12] sm:$0xff] }
 0x61c   :  { %v10243_v50 = vmax.f32 %v21014_v0, %v21080_v26  ;;  %v9806_v54 = vrot.slane %v9805_v46, 2  ;;  %v9819_v16 = vmax.f32 %v9817_v22, %v9818_v60  ;;  %16090 = vmatmul.mubr.msk.f32.gmra.mrb[66].mxu1 %vm9859_vm4, %v21082_v15  ;;  %v9759_v12 = vrot.slane %v21024_v19, 1  ;;  %v14280_v0 = vld [vmem:[%s21823_s3 + $0x70] sm:$0xff]  ;;  %v14299_v26 = vld [vmem:[%s21823_s3 + $0x88] sm:$0xff] }
 0x61d   :  { %v9813_v11 = vrot.slane %v9812_v52, 2  ;;  %v9826_v41 = vmax.f32 %v9824_v24, %v9825_v27  ;;  %16092 = vmatprep.mubr.msk.f32.mxu1 %vm9859_vm4, %v21089_v61  ;;  %16357 = vmatpush3.bf16.msra.mxu1 %v16354_v45  ;;  %v9766_v35 = vrot.slane %v21039_v9, 1  ;;  %v9773_v57 = vrot.slane %v9772_v38, 1 }
 0x61e   :  { %v9807_v23 = vmax.f32 %v9805_v46, %v9806_v54  ;;  %v9820_v14 = vrot.slane %v9819_v16, 2  ;;  %16359 = vmatprep.subr.bf16.mxu1 %v21053_v36  ;;  %v9753_v39 = vmax.f32 %v21022_v47, %v9752_v30  ;;  %v9760_v32 = vmax.f32 %v21024_v19, %v9759_v12  ;;  %v21125_v30 = vld [vmem:[#allocation3 + $0xc0] sm:$0xff] }
 0x61f   :  { %v9814_v31 = vmax.f32 %v9812_v52, %v9813_v11  ;;  %v9827_v33 = vrot.slane %v9826_v41, 2  ;;  %v9767_v45 = vmax.f32 %v21039_v9, %v9766_v35  ;;  %v9774_v47 = vmax.f32 %v9772_v38, %v9773_v57  ;;  %v21120_v38 = vld [vmem:[#allocation3 + $0xb0] sm:$0xff]  ;;  %v21143_v35 = vld [vmem:[#allocation3 + $0xe0] sm:$0xff] }
 0x620   :  { %v9808_v25 = vrot.slane %v9807_v23, 1  ;;  %v9821_v53 = vmax.f32 %v9819_v16, %v9820_v14  ;;  %16093 = vmatmul.mubr.msk.f32.gmra.mrb[68].mxu1 %vm9859_vm4, %v21096_v37  ;;  %v10220_v28 = vsel %vm9859_vm4, %v9753_v39, -inf  ;;  %v10223_v34 = vsel %vm9859_vm4, %v9760_v32, -inf  ;;  %v21135_v11 = vld [vmem:[#allocation3 + $0xd0] sm:$0xff]  ;;  %v10999_v39 = vld [vmem:[#allocation3 + $0xa2] sm:$0xff] }
 0x621   :  { %v9815_v48 = vrot.slane %v9814_v31, 1  ;;  %v9828_v59 = vmax.f32 %v9826_v41, %v9827_v33  ;;  %16095 = vmatprep.mubr.msk.f32.mxu1 %vm9859_vm4, %v21101_v18  ;;  %v10226_v22 = vsel %vm9859_vm4, %v9767_v45, -inf  ;;  %v10229_v46 = vsel %vm9859_vm4, %v9774_v47, -inf  ;;  %v21190_v57 = vld [vmem:[#allocation3 + $0x32] sm:$0xff]  ;;  %v21215_v32 = vld [vmem:[#allocation3 + $0xc2] sm:$0xff] }
 0x622   :  { %v9809_v8 = vmax.f32 %v9807_v23, %v9808_v25  ;;  %v9822_v42 = vrot.slane %v9821_v53, 1  ;;  %v21198_v33 = vld [vmem:[#allocation3 + $0x52] sm:$0xff] }
 0x623   :  { %v9816_v44 = vmax.f32 %v9814_v31, %v9815_v48  ;;  %v9829_v3 = vrot.slane %v9828_v59, 1  ;;  %v21194_v31 = vld [vmem:[#allocation3 + $0x42] sm:$0xff]  ;;  %v21206_v25 = vld [vmem:[#allocation3 + $0x72] sm:$0xff] }
 0x624   :  { %v9823_v4 = vmax.f32 %v9821_v53, %v9822_v42  ;;  %v10221_v19 = vsel %vm9859_vm4, %v9809_v8, -inf  ;;  %16096 = vmatmul.mubr.msk.f32.gmra.mrb[70].mxu1 %vm9859_vm4, %v21107_v29  ;;  %v21211_v53 = vld [vmem:[#allocation3 + $0xb2] sm:$0xff]  ;;  %v21231_v8 = vld [vmem:[#allocation3 + $0x102] sm:$0xff] }
 0x625   :  { %v9830_v62 = vmax.f32 %v9828_v59, %v9829_v3  ;;  %v10222_v9 = vmax.f32 %v10220_v28, %v10221_v19  ;;  %v10224_v55 = vsel %vm9859_vm4, %v9816_v44, -inf  ;;  %16098 = vmatprep.mubr.msk.f32.mxu1 %vm9859_vm4, %v10572_v43  ;;  %v21219_v48 = vld [vmem:[#allocation3 + $0xd2] sm:$0xff]  ;;  %v21223_v59 = vld [vmem:[#allocation3 + $0xe2] sm:$0xff] }
 0x626   :  { %v10225_v51 = vmax.f32 %v10223_v34, %v10224_v55  ;;  %v10227_v63 = vsel %vm9859_vm4, %v9823_v4, -inf  ;;  %v21227_v45 = vld [vmem:[#allocation3 + $0xf2] sm:$0xff]  ;;  %v14318_v3 = vld [vmem:[%s21823_s3 + $0xa0] sm:$0xff]  ;;  %v14319_v28 = vld [vmem:[%s21823_s3 + $0xa8] sm:$0xff] }
 0x627   :  { %v10228_v60 = vmax.f32 %v10226_v22, %v10227_v63  ;;  %v10230_v24 = vsel %vm9859_vm4, %v9830_v62, -inf  ;;  %v21235_v42 = vld [vmem:[#allocation3 + $0x112] sm:$0xff]  ;;  %v16374_v4 = vpack.c.bf16 %v14319_v28, %v14318_v3  ;;  %v21294_v22 = vld [vmem:[#allocation3 + $0x21] sm:$0xff] }
 0x628   :  { %v10231_v52 = vmax.f32 %v10229_v46, %v10230_v24  ;;  %v10524_v27 = vsel %vm10412_vm5, %v10225_v51, %v10222_v9  ;;  %16099 = vmatmul.mubr.msk.f32.gmra.mrb[72].mxu1 %vm9859_vm4, %v21120_v38  ;;  %v14300_v43 = vld [vmem:[%s21823_s3 + $0x90] sm:$0xff]  ;;  %v14301_v47 = vld [vmem:[%s21823_s3 + $0x98] sm:$0xff]  ;;  %v14338_v51 = vld [vmem:[%s21823_s3 + $0xc0] sm:$0xff] }
 0x629   :  { %v10525_v54 = vsel %vm10414_vm6, %v10228_v60, %v10524_v27  ;;  %16101 = vmatprep.mubr.msk.f32.mxu1 %vm9859_vm4, %v21125_v30  ;;  %v16370_v44 = vpack.c.bf16 %v14301_v47, %v14300_v43  ;;  %v14320_v34 = vld [vmem:[%s21823_s3 + $0xb0] sm:$0xff]  ;;  %v14321_v62 = vld [vmem:[%s21823_s3 + $0xb8] sm:$0xff]  ;;  %v14339_v63 = vld [vmem:[%s21823_s3 + $0xc8] sm:$0xff] }
 0x62a   :  { %v10526_v16 = vsel %vm10416_vm7, %v10231_v52, %v10525_v54  ;;  %v11451_v9 = vld [vmem:[#allocation3 + $0x11] sm:$0xff]  ;;  %v16378_v55 = vpack.c.bf16 %v14321_v62, %v14320_v34  ;;  %v16382_v60 = vpack.c.bf16 %v14339_v63, %v14338_v51  ;;  %v21308_v24 = vld [vmem:[#allocation3 + $0x41] sm:$0xff] }
 0x62b   :  { %v10527_v12 = vsel %vm10418_vm8, %v10234_v20, %v10526_v16  ;;  %v21164_v20 = vld [vmem:[#allocation3 + $0x110] sm:$0xff]  ;;  %v21316_v52 = vld [vmem:[#allocation3 + $0x61] sm:$0xff] }
 0x62c   :  { %v10528_v41 = vsel %vm10420_vm9, %v10237_v40, %v10527_v12  ;;  %16102 = vmatmul.mubr.msk.f32.gmra.mrb[74].mxu1 %vm9859_vm4, %v21135_v11  ;;  %v16362_v40 = vpack.c.bf16 %v14281_v56, %v14280_v0  ;;  %v21304_v46 = vld [vmem:[#allocation3 + $0x31] sm:$0xff]  ;;  %v21324_v54 = vld [vmem:[#allocation3 + $0x81] sm:$0xff] }
 0x62d   :  { %v10529_v23 = vsel %vm10422_vm10, %v10240_v7, %v10528_v41  ;;  %16104 = vmatprep.mubr.msk.f32.mxu1 %vm9859_vm4, %v21143_v35  ;;  %v14298_v7 = vld [vmem:[%s21823_s3 + $0x80] sm:$0xff]  ;;  %v21320_v27 = vld [vmem:[#allocation3 + $0x71] sm:$0xff] }
 0x62e   :  { %v10530_v6 = vsel %vm10424_vm11, %v10243_v50, %v10529_v23  ;;  %v21185_v50 = vld [vmem:[#allocation3 + $0x22] sm:$0xff]  ;;  %v16366_v14 = vpack.c.bf16 %v14299_v26, %v14298_v7  ;;  %v11459_v16 = vld [vmem:[#allocation3 + $0xb1] sm:$0xff] }
 0x62f   :  { %10563 = vst.msk [vmem:[#allocation3 + $0x121] sm:$0xff] %vm9859_vm4, %v10530_v6  ;;  %v21329_v12 = vld [vmem:[#allocation3 + $0xc1] sm:$0xff]  ;;  %v21333_v41 = vld [vmem:[#allocation3 + $0xd1] sm:$0xff] }
 0x630   :  { %16105 = vmatmul.mubr.msk.f32.gmra.mrb[76].mxu1 %vm9859_vm4, %v21156_v58  ;;  %v21337_v23 = vld [vmem:[#allocation3 + $0xe1] sm:$0xff]  ;;  %v21341_v6 = vld [vmem:[#allocation3 + $0xf1] sm:$0xff] }
 0x631   :  { %16107 = vmatprep.mubr.msk.f32.mxu1 %vm9859_vm4, %v21160_v1  ;;  %v14340_v0 = vld [vmem:[%s21823_s3 + $0xd0] sm:$0xff]  ;;  %v14341_v56 = vld [vmem:[%s21823_s3 + $0xd8] sm:$0xff]  ;;  %v14359_v7 = vld [vmem:[%s21823_s3 + $0xe8] sm:$0xff] }
 0x632   :  { %v14378_v47 = vld [vmem:[%s21823_s3 + $0x100] sm:$0xff] }
 0x634   :  { %16108 = vmatmul.mubr.msk.f32.gmra.mrb[78].mxu1 %vm9859_vm4, %v21164_v20 }
 0x635   :  { %16118 = vmatprep.mubr.msk.f32.mxu1 %vm9859_vm4, %v10991_v17 }
 0x636   :  { %v21283_v19 = vld [vmem:[#allocation3 + $0x120] sm:$0xff] }
 0x637   :  { %v21349_v17 = vld [vmem:[#allocation3 + $0x121] sm:$0xff] }
 0x638   :  { %16119 = vmatmul.mubr.msk.f32.vlgmr.msra.gmra.mrb[64].mxu1 %vm9859_vm4, %v21175_v5 }
 0x639   :  { %16361 = vmatpush3.bf16.msra.mxu1 %v21053_v36  ;;  %16121 = vmatprep.mubr.msk.f32.mxu1 %vm9859_vm4, %v21185_v50  ;;  %v21202_v36 = vld [vmem:[#allocation3 + $0x62] sm:$0xff] }
 0x63a   :  { %16363 = vmatprep.subr.bf16.mxu1 %v16362_v40 }
 0x63c   :  { %16122 = vmatmul.mubr.msk.f32.gmra.mrb[66].mxu1 %vm9859_vm4, %v21190_v57 }
 0x63d   :  { %16124 = vmatprep.mubr.msk.f32.mxu1 %vm9859_vm4, %v21194_v31  ;;  %16365 = vmatpush3.bf16.msra.mxu1 %v16362_v40  ;;  %v14358_v40 = vld [vmem:[%s21823_s3 + $0xe0] sm:$0xff] }
 0x63e   :  { %16367 = vmatprep.subr.bf16.mxu1 %v16366_v14  ;;  %v16390_v26 = vpack.c.bf16 %v14359_v7, %v14358_v40 }
 0x640   :  { %16125 = vmatmul.mubr.msk.f32.gmra.mrb[68].mxu1 %vm9859_vm4, %v21198_v33 }
 0x641   :  { %16127 = vmatprep.mubr.msk.f32.mxu1 %vm9859_vm4, %v21202_v36 }
 0x644   :  { %16128 = vmatmul.mubr.msk.f32.gmra.mrb[70].mxu1 %vm9859_vm4, %v21206_v25 }
 0x645   :  { %16130 = vmatprep.mubr.msk.f32.mxu1 %vm9859_vm4, %v10999_v39  ;;  %v14360_v39 = vld [vmem:[%s21823_s3 + $0xf0] sm:$0xff] }
 0x648   :  { %16131 = vmatmul.mubr.msk.f32.gmra.mrb[72].mxu1 %vm9859_vm4, %v21211_v53 }
 0x649   :  { %16133 = vmatprep.mubr.msk.f32.mxu1 %vm9859_vm4, %v21215_v32 }
 0x64c   :  { %16134 = vmatmul.mubr.msk.f32.gmra.mrb[74].mxu1 %vm9859_vm4, %v21219_v48 }
 0x64d   :  { %16136 = vmatprep.mubr.msk.f32.mxu1 %vm9859_vm4, %v21223_v59 }
 0x650   :  { %16137 = vmatmul.mubr.msk.f32.gmra.mrb[76].mxu1 %vm9859_vm4, %v21227_v45 }
 0x651   :  { %16139 = vmatprep.mubr.msk.f32.mxu1 %vm9859_vm4, %v21231_v8 }
 0x654   :  { %16140 = vmatmul.mubr.msk.f32.gmra.mrb[78].mxu1 %vm9859_vm4, %v21235_v42 }
 0x655   :  { %16150 = vmatprep.mubr.msk.f32.mxu1 %vm9859_vm4, %v21057_v2  ;;  %v21265_v2 = vld [vmem:[#allocation3 + $0x80] sm:$0xff] }
 0x658   :  { %16151 = vmatmul.mubr.msk.f32.vlgmr.msra.gmra.mrb[64].mxu1 %vm9859_vm4, %v21066_v10 }
 0x659   :  { %16369 = vmatpush3.bf16.msra.mxu1 %v16366_v14  ;;  %16153 = vmatprep.mubr.msk.f32.mxu1 %vm9859_vm4, %v21082_v15  ;;  %v21397_v14 = vld [vmem:[#allocation3 + $0x122] sm:$0xff] }
 0x65a   :  { %16371 = vmatprep.subr.bf16.mxu1 %v16370_v44 }
 0x65c   :  { %16154 = vmatmul.mubr.msk.f32.gmra.mrb[66].mxu1 %vm9859_vm4, %v21089_v61 }
 0x65d   :  { %16156 = vmatprep.mubr.msk.f32.mxu1 %vm9859_vm4, %v21096_v37  ;;  %16373 = vmatpush3.bf16.msra.mxu1 %v16370_v44  ;;  %v14379_v44 = vld [vmem:[%s21823_s3 + $0x108] sm:$0xff] }
 0x65e   :  { %16375 = vmatprep.subr.bf16.mxu1 %v16374_v4  ;;  %v16398_v3 = vpack.c.bf16 %v14379_v44, %v14378_v47 }
 0x660   :  { %16157 = vmatmul.mubr.msk.f32.gmra.mrb[68].mxu1 %vm9859_vm4, %v21101_v18 }
 0x661   :  { %16159 = vmatprep.mubr.msk.f32.mxu1 %vm9859_vm4, %v21107_v29 }
 0x664   :  { %16160 = vmatmul.mubr.msk.f32.gmra.mrb[70].mxu1 %vm9859_vm4, %v21265_v2 }
 0x665   :  { %16162 = vmatprep.mubr.msk.f32.mxu1 %vm9859_vm4, %v21120_v38  ;;  %v21312_v38 = vld [vmem:[#allocation3 + $0x51] sm:$0xff] }
 0x668   :  { %16163 = vmatmul.mubr.msk.f32.gmra.mrb[72].mxu1 %vm9859_vm4, %v21125_v30 }
 0x669   :  { %16165 = vmatprep.mubr.msk.f32.mxu1 %vm9859_vm4, %v21135_v11 }
 0x66c   :  { %16166 = vmatmul.mubr.msk.f32.gmra.mrb[74].mxu1 %vm9859_vm4, %v21143_v35 }
 0x66d   :  { %16168 = vmatprep.mubr.msk.f32.mxu1 %vm9859_vm4, %v21156_v58 }
 0x670   :  { %16169 = vmatmul.mubr.msk.f32.gmra.mrb[76].mxu1 %vm9859_vm4, %v21160_v1 }
 0x671   :  { %16171 = vmatprep.mubr.msk.f32.mxu1 %vm9859_vm4, %v21164_v20 }
 0x674   :  { %16172 = vmatmul.mubr.msk.f32.gmra.mrb[78].mxu1 %vm9859_vm4, %v21283_v19 }
 0x675   :  { %16182 = vmatprep.mubr.msk.f32.mxu1 %vm9859_vm4, %v11451_v9 }
 0x678   :  { %16183 = vmatmul.mubr.msk.f32.vlgmr.msra.gmra.mrb[64].mxu1 %vm9859_vm4, %v21294_v22 }
 0x679   :  { %16377 = vmatpush3.bf16.msra.mxu1 %v16374_v4  ;;  %16185 = vmatprep.mubr.msk.f32.mxu1 %vm9859_vm4, %v21304_v46 }
 0x67a   :  { %16379 = vmatprep.subr.bf16.mxu1 %v16378_v55 }
 0x67c   :  { %16186 = vmatmul.mubr.msk.f32.gmra.mrb[66].mxu1 %vm9859_vm4, %v21308_v24 }
 0x67d   :  { %16188 = vmatprep.mubr.msk.f32.mxu1 %vm9859_vm4, %v21312_v38  ;;  %16381 = vmatpush3.bf16.msra.mxu1 %v16378_v55 }
 0x67e   :  { %16383 = vmatprep.subr.bf16.mxu1 %v16382_v60 }
 0x680   :  { %16189 = vmatmul.mubr.msk.f32.gmra.mrb[68].mxu1 %vm9859_vm4, %v21316_v52 }
 0x681   :  { %16191 = vmatprep.mubr.msk.f32.mxu1 %vm9859_vm4, %v21320_v27 }
 0x684   :  { %16192 = vmatmul.mubr.msk.f32.gmra.mrb[70].mxu1 %vm9859_vm4, %v21324_v54 }
 0x685   :  { %16194 = vmatprep.mubr.msk.f32.mxu1 %vm9859_vm4, %v11459_v16 }
 0x688   :  { %16195 = vmatmul.mubr.msk.f32.gmra.mrb[72].mxu1 %vm9859_vm4, %v21329_v12 }
 0x689   :  { %16197 = vmatprep.mubr.msk.f32.mxu1 %vm9859_vm4, %v21333_v41 }
 0x68c   :  { %16198 = vmatmul.mubr.msk.f32.gmra.mrb[74].mxu1 %vm9859_vm4, %v21337_v23 }
 0x68d   :  { %16200 = vmatprep.mubr.msk.f32.mxu1 %vm9859_vm4, %v21341_v6 }
 0x690   :  { %16201 = vmatmul.mubr.msk.f32.gmra.mrb[76].mxu1 %vm9859_vm4, %v20878_v49  ;;  %v16386_v49 = vpack.c.bf16 %v14341_v56, %v14340_v0 }
 0x691   :  { %16203 = vmatprep.mubr.msk.f32.mxu1 %vm9859_vm4, %v20996_v13 }
 0x694   :  { %16204 = vmatmul.mubr.msk.f32.gmra.mrb[78].mxu1 %vm9859_vm4, %v21349_v17 }
 0x695   :  { %16214 = vmatprep.mubr.msk.f32.mxu1 %vm9859_vm4, %v21175_v5  ;;  %v21379_v5 = vld [vmem:[#allocation3 + $0x82] sm:$0xff] }
 0x698   :  { %16215 = vmatmul.mubr.msk.f32.vlgmr.msra.gmra.mrb[64].mxu1 %vm9859_vm4, %v21185_v50 }
 0x699   :  { %16385 = vmatpush3.bf16.msra.mxu1 %v16382_v60  ;;  %16217 = vmatprep.mubr.msk.f32.mxu1 %vm9859_vm4, %v21190_v57 }
 0x69a   :  { %16387 = vmatprep.subr.bf16.mxu1 %v16386_v49 }
 0x69c   :  { %16218 = vmatmul.mubr.msk.f32.gmra.mrb[66].mxu1 %vm9859_vm4, %v21194_v31 }
 0x69d   :  { %16220 = vmatprep.mubr.msk.f32.mxu1 %vm9859_vm4, %v21198_v33  ;;  %16389 = vmatpush3.bf16.msra.mxu1 %v16386_v49 }
 0x69e   :  { %16391 = vmatprep.subr.bf16.mxu1 %v16390_v26 }
 0x6a0   :  { %16221 = vmatmul.mubr.msk.f32.gmra.mrb[68].mxu1 %vm9859_vm4, %v21202_v36 }
 0x6a1   :  { %16223 = vmatprep.mubr.msk.f32.mxu1 %vm9859_vm4, %v21206_v25 }
 0x6a4   :  { %16224 = vmatmul.mubr.msk.f32.gmra.mrb[70].mxu1 %vm9859_vm4, %v21379_v5 }
 0x6a5   :  { %16226 = vmatprep.mubr.msk.f32.mxu1 %vm9859_vm4, %v21211_v53  ;;  %v14361_v53 = vld [vmem:[%s21823_s3 + $0xf8] sm:$0xff] }
 0x6a6   :  { %v16394_v43 = vpack.c.bf16 %v14361_v53, %v14360_v39 }
 0x6a8   :  { %16227 = vmatmul.mubr.msk.f32.gmra.mrb[72].mxu1 %vm9859_vm4, %v21215_v32 }
 0x6a9   :  { %16229 = vmatprep.mubr.msk.f32.mxu1 %vm9859_vm4, %v21219_v48 }
 0x6ac   :  { %16230 = vmatmul.mubr.msk.f32.gmra.mrb[74].mxu1 %vm9859_vm4, %v21223_v59 }
 0x6ad   :  { %16232 = vmatprep.mubr.msk.f32.mxu1 %vm9859_vm4, %v21227_v45 }
 0x6b0   :  { %16233 = vmatmul.mubr.msk.f32.gmra.mrb[76].mxu1 %vm9859_vm4, %v21231_v8 }
 0x6b1   :  { %16235 = vmatprep.mubr.msk.f32.mxu1 %vm9859_vm4, %v21235_v42 }
 0x6b4   :  { %16236 = vmatmul.mubr.msk.f32.gmra.mrb[78].mxu1 %vm9859_vm4, %v21397_v14 }
 0x6b5   :  { %16246 = vmatprep.mubr.msk.f32.mxu1 %vm9859_vm4, %v21066_v10  ;;  %v11919_v10 = vld [vmem:[#allocation3 + $0x90] sm:$0xff] }
 0x6b8   :  { %16247 = vmatmul.mubr.msk.f32.vlgmr.msra.gmra.mrb[64].mxu1 %vm9859_vm4, %v21082_v15  ;;  %v11927_v15 = vld [vmem:[#allocation3 + $0x130] sm:$0xff] }
 0x6b9   :  { %16393 = vmatpush3.bf16.msra.mxu1 %v16390_v26  ;;  %16249 = vmatprep.mubr.msk.f32.mxu1 %vm9859_vm4, %v21089_v61  ;;  %v14380_v61 = vld [vmem:[%s21823_s3 + $0x110] sm:$0xff] }
 0x6ba   :  { %16395 = vmatprep.subr.bf16.mxu1 %v16394_v43 }
 0x6bc   :  { %16250 = vmatmul.mubr.msk.f32.gmra.mrb[66].mxu1 %vm9859_vm4, %v21096_v37  ;;  %v14381_v37 = vld [vmem:[%s21823_s3 + $0x118] sm:$0xff] }
 0x6bd   :  { %16252 = vmatprep.mubr.msk.f32.mxu1 %vm9859_vm4, %v21101_v18  ;;  %16397 = vmatpush3.bf16.msra.mxu1 %v16394_v43  ;;  %v16402_v18 = vpack.c.bf16 %v14381_v37, %v14380_v61 }
 0x6be   :  { %16399 = vmatprep.subr.bf16.mxu1 %v16398_v3 }
 0x6c0   :  { %16253 = vmatmul.mubr.msk.f32.gmra.mrb[68].mxu1 %vm9859_vm4, %v21107_v29  ;;  %v12149_v29 = vld [vmem:[#allocation3 + $0x91] sm:$0xff] }
 0x6c1   :  { %16255 = vmatprep.mubr.msk.f32.mxu1 %vm9859_vm4, %v21265_v2 }
 0x6c4   :  { %16256 = vmatmul.mubr.msk.f32.gmra.mrb[70].mxu1 %vm9859_vm4, %v11919_v10 }
 0x6c5   :  { %16258 = vmatprep.mubr.msk.f32.mxu1 %vm9859_vm4, %v21125_v30  ;;  %v17063_v30 = vld [vmem:[#allocation3 + $0x101] sm:$0xff] }
 0x6c8   :  { %16259 = vmatmul.mubr.msk.f32.gmra.mrb[72].mxu1 %vm9859_vm4, %v21135_v11  ;;  %v12157_v11 = vld [vmem:[#allocation3 + $0x131] sm:$0xff] }
 0x6c9   :  { %16261 = vmatprep.mubr.msk.f32.mxu1 %vm9859_vm4, %v21143_v35  ;;  %v12387_v35 = vld [vmem:[#allocation3 + $0x132] sm:$0xff] }
 0x6cc   :  { %16262 = vmatmul.mubr.msk.f32.gmra.mrb[74].mxu1 %vm9859_vm4, %v21156_v58  ;;  %v21511_v58 = vld [vmem:[%s21824_s4] ss:$0 sm:$0xff] }
 0x6cd   :  { %16264 = vmatprep.mubr.msk.f32.mxu1 %vm9859_vm4, %v21160_v1 }
 0x6d0   :  { %16265 = vmatmul.mubr.msk.f32.gmra.mrb[76].mxu1 %vm9859_vm4, %v21164_v20 }
 0x6d1   :  { %16267 = vmatprep.mubr.msk.f32.mxu1 %vm9859_vm4, %v21283_v19 }
 0x6d4   :  { %16268 = vmatmul.mubr.msk.f32.gmra.mrb[78].mxu1 %vm9859_vm4, %v11927_v15 }
 0x6d5   :  { %16278 = vmatprep.mubr.msk.f32.mxu1 %vm9859_vm4, %v21294_v22 }
 0x6d8   :  { %16279 = vmatmul.mubr.msk.f32.vlgmr.msra.gmra.mrb[64].mxu1 %vm9859_vm4, %v21304_v46 }
 0x6d9   :  { %16401 = vmatpush3.bf16.msra.mxu1 %v16398_v3  ;;  %16281 = vmatprep.mubr.msk.f32.mxu1 %vm9859_vm4, %v21308_v24 }
 0x6da   :  { %16403 = vmatprep.subr.bf16.mxu1 %v16402_v18 }
 0x6dc   :  { %16282 = vmatmul.mubr.msk.f32.gmra.mrb[66].mxu1 %vm9859_vm4, %v21312_v38 }
 0x6dd   :  { %16284 = vmatprep.mubr.msk.f32.mxu1 %vm9859_vm4, %v21316_v52  ;;  %16405 = vmatpush3.bf16.msra.mxu1 %v16402_v18 }
 0x6e0   :  { %16285 = vmatmul.mubr.msk.f32.gmra.mrb[68].mxu1 %vm9859_vm4, %v21320_v27 }
 0x6e1   :  { %16287 = vmatprep.mubr.msk.f32.mxu1 %vm9859_vm4, %v21324_v54 }
 0x6e4   :  { %16288 = vmatmul.mubr.msk.f32.gmra.mrb[70].mxu1 %vm9859_vm4, %v12149_v29 }
 0x6e5   :  { %16290 = vmatprep.mubr.msk.f32.mxu1 %vm9859_vm4, %v21329_v12 }
 0x6e8   :  { %16291 = vmatmul.mubr.msk.f32.gmra.mrb[72].mxu1 %vm9859_vm4, %v21333_v41 }
 0x6e9   :  { %16293 = vmatprep.mubr.msk.f32.mxu1 %vm9859_vm4, %v21337_v23 }
 0x6ec   :  { %16294 = vmatmul.mubr.msk.f32.gmra.mrb[74].mxu1 %vm9859_vm4, %v21341_v6 }
 0x6ed   :  { %16296 = vmatprep.mubr.msk.f32.mxu1 %vm9859_vm4, %v17063_v30 }
 0x6f0   :  { %16297 = vmatmul.mubr.msk.f32.gmra.mrb[76].mxu1 %vm9859_vm4, %v20996_v13  ;;  %v12379_v13 = vld [vmem:[#allocation3 + $0x92] sm:$0xff] }
 0x6f1   :  { %16299 = vmatprep.mubr.msk.f32.mxu1 %vm9859_vm4, %v21349_v17 }
 0x6f4   :  { %16300 = vmatmul.mubr.msk.f32.gmra.mrb[78].mxu1 %vm9859_vm4, %v12157_v11 }
 0x6f5   :  { %16310 = vmatprep.mubr.msk.f32.mxu1 %vm9859_vm4, %v21185_v50 }
 0x6f8   :  { %16311 = vmatmul.mubr.msk.f32.vlgmr.msra.gmra.mrb[64].mxu1 %vm9859_vm4, %v21190_v57 }
 0x6f9   :  { %16313 = vmatprep.mubr.msk.f32.mxu1 %vm9859_vm4, %v21194_v31 }
 0x6fc   :  { %16314 = vmatmul.mubr.msk.f32.gmra.mrb[66].mxu1 %vm9859_vm4, %v21198_v33 }
 0x6fd   :  { %16316 = vmatprep.mubr.msk.f32.mxu1 %vm9859_vm4, %v21202_v36 }
 0x700   :  { %16317 = vmatmul.mubr.msk.f32.gmra.mrb[68].mxu1 %vm9859_vm4, %v21206_v25 }
 0x701   :  { %16319 = vmatprep.mubr.msk.f32.mxu1 %vm9859_vm4, %v21379_v5 }
 0x704   :  { %16320 = vmatmul.mubr.msk.f32.gmra.mrb[70].mxu1 %vm9859_vm4, %v12379_v13 }
 0x705   :  { %16322 = vmatprep.mubr.msk.f32.mxu1 %vm9859_vm4, %v21215_v32 }
 0x708   :  { %16323 = vmatmul.mubr.msk.f32.gmra.mrb[72].mxu1 %vm9859_vm4, %v21219_v48 }
 0x709   :  { %16325 = vmatprep.mubr.msk.f32.mxu1 %vm9859_vm4, %v21223_v59 }
 0x70c   :  { %16326 = vmatmul.mubr.msk.f32.gmra.mrb[74].mxu1 %vm9859_vm4, %v21227_v45 }
 0x70d   :  { %16328 = vmatprep.mubr.msk.f32.mxu1 %vm9859_vm4, %v21231_v8 }
 0x710   :  { %16329 = vmatmul.mubr.msk.f32.gmra.mrb[76].mxu1 %vm9859_vm4, %v21235_v42 }
 0x711   :  { %16331 = vmatprep.mubr.msk.f32.mxu1 %vm9859_vm4, %v21397_v14 }
 0x714   :  { %16332 = vmatmul.mubr.msk.f32.gmra.mrb[78].mxu1 %vm9859_vm4, %v12387_v35 }
 0x7cb   :  { %v16312_v1 = vpop.f32.mrb[64].mxu1 }
 0x7cc   :  { %v12610_v20 = vadd.f32 %v16312_v1, %v21511_v58  ;;  %v12507_v50 = vpop.f32.mrb[65].mxu1 }
 0x7cd   :  { %v12609_v57 = vadd.f32 %v21511_v58, %v12507_v50 }
 0x7ce   :  { %v12626_v31 = vmax.f32 %v12610_v20, 0.0 }
 0x7cf   :  { %v12625_v33 = vmax.f32 %v12609_v57, 0.0  ;;  %v16315_v36 = vpop.f32.mrb[66].mxu1 }
 0x7d0   :  { %v12674_v25 = vcombine.high %v12626_v31, %v12626_v31  ;;  %v12681_v32 = vrot.slane %v12626_v31, %v19211_v21  ;;  %v12612_v48 = vadd.f32 %v16315_v36, %v21511_v58  ;;  %v12517_v59 = vpop.f32.mrb[67].mxu1 }
 0x7d1   :  { %v12657_v45 = vcombine.high %v12625_v33, %v12625_v33  ;;  %v12664_v8 = vrot.slane %v12625_v33, %v19211_v21  ;;  %v21519_v42 = vadd.f32 %v21511_v58, %v12517_v59 }
 0x7d2   :  { %v12688_v28 = vrot.slane %v12674_v25, %v19211_v21  ;;  %v12689_v4 = vcombine.high %v12681_v32, %v12681_v32  ;;  %v13022_v2 = vsel %vm12993_vm12, %v12681_v32, -inf  ;;  %v21523_v19 = vmax.f32 %v12612_v48, 0.0 }
 0x7d3   :  { %v13023_v34 = vrot.slane %v13022_v2, 4  ;;  %v12671_v62 = vrot.slane %v12657_v45, %v19211_v21  ;;  %v12672_v9 = vcombine.high %v12664_v8, %v12664_v8  ;;  %v12994_v55 = vsel %vm12993_vm12, %v12664_v8, -inf  ;;  %v21527_v22 = vpop.f32.mrb[68].mxu1 }
 0x7d4   :  { %v12690_v51 = vcombine.high %v12688_v28, %v12688_v28  ;;  %v13029_v63 = vsel %vm12993_vm12, %v12689_v4, -inf  ;;  %v13036_v46 = vsel %vm12993_vm12, %v12688_v28, -inf  ;;  %v12995_v60 = vrot.slane %v12994_v55, 4  ;;  %v21531_v24 = vpop.f32.mrb[69].mxu1 }
 0x7d5   :  { %v13024_v38 = vmax.f32 %v13022_v2, %v13023_v34  ;;  %v13030_v52 = vrot.slane %v13029_v63, 4  ;;  %v13037_v27 = vrot.slane %v13036_v46, 4  ;;  %v12673_v54 = vcombine.high %v12671_v62, %v12671_v62 }
 0x7d6   :  { %v13043_v16 = vsel %vm12993_vm12, %v12690_v51, -inf  ;;  %v12996_v12 = vmax.f32 %v12994_v55, %v12995_v60  ;;  %v13001_v41 = vsel %vm12993_vm12, %v12672_v9, -inf  ;;  %v13008_v23 = vsel %vm12993_vm12, %v12671_v62, -inf }
 0x7d7   :  { %v13025_v6 = vrot.slane %v13024_v38, 2  ;;  %v13031_v17 = vmax.f32 %v13029_v63, %v13030_v52  ;;  %v13038_v0 = vmax.f32 %v13036_v46, %v13037_v27  ;;  %v13044_v56 = vrot.slane %v13043_v16, 4  ;;  %v21536_v49 = vpop.f32.mrb[70].mxu1 }
 0x7d8   :  { %v12997_v40 = vrot.slane %v12996_v12, 2  ;;  %v13002_v7 = vrot.slane %v13001_v41, 4  ;;  %v13009_v26 = vrot.slane %v13008_v23, 4  ;;  %v13015_v5 = vsel %vm12993_vm12, %v12673_v54, -inf  ;;  %v21539_v14 = vpop.f32.mrb[71].mxu1 }
 0x7d9   :  { %v13026_v39 = vmax.f32 %v13024_v38, %v13025_v6  ;;  %v13032_v53 = vrot.slane %v13031_v17, 2  ;;  %v13039_v43 = vrot.slane %v13038_v0, 2  ;;  %v13045_v47 = vmax.f32 %v13043_v16, %v13044_v56 }
 0x7da   :  { %v12998_v44 = vmax.f32 %v12996_v12, %v12997_v40  ;;  %v13003_v3 = vmax.f32 %v13001_v41, %v13002_v7  ;;  %v13010_v10 = vmax.f32 %v13008_v23, %v13009_v26  ;;  %v13016_v15 = vrot.slane %v13015_v5, 4 }
 0x7db   :  { %v13027_v61 = vrot.slane %v13026_v39, 1  ;;  %v13033_v37 = vmax.f32 %v13031_v17, %v13032_v53  ;;  %v13040_v18 = vmax.f32 %v13038_v0, %v13039_v43  ;;  %v13046_v29 = vrot.slane %v13045_v47, 2  ;;  %v21541_v30 = vpop.f32.mrb[72].mxu1 }
 0x7dc   :  { %v12999_v11 = vrot.slane %v12998_v44, 1  ;;  %v13004_v13 = vrot.slane %v13003_v3, 2  ;;  %v13011_v35 = vrot.slane %v13010_v10, 2  ;;  %v13017_v1 = vmax.f32 %v13015_v5, %v13016_v15  ;;  %v21543_v20 = vpop.f32.mrb[73].mxu1 }
 0x7dd   :  { %v13028_v50 = vmax.f32 %v13026_v39, %v13027_v61  ;;  %v13034_v57 = vrot.slane %v13033_v37, 1  ;;  %v13041_v31 = vrot.slane %v13040_v18, 1  ;;  %v13047_v33 = vmax.f32 %v13045_v47, %v13046_v29 }
 0x7de   :  { %v13000_v36 = vmax.f32 %v12998_v44, %v12999_v11  ;;  %v13005_v25 = vmax.f32 %v13003_v3, %v13004_v13  ;;  %v13012_v32 = vmax.f32 %v13010_v10, %v13011_v35  ;;  %v13018_v48 = vrot.slane %v13017_v1, 2 }
 0x7df   :  { %v13035_v59 = vmax.f32 %v13033_v37, %v13034_v57  ;;  %v13042_v45 = vmax.f32 %v13040_v18, %v13041_v31  ;;  %v13048_v8 = vrot.slane %v13047_v33, 1  ;;  %v13444_v28 = vsel %vm13442_vm13, %v13028_v50, -inf  ;;  %v21546_v4 = vpop.f32.mrb[74].mxu1 }
 0x7e0   :  { %v13006_v2 = vrot.slane %v13005_v25, 1  ;;  %v13013_v34 = vrot.slane %v13012_v32, 1  ;;  %v13019_v62 = vmax.f32 %v13017_v1, %v13018_v48  ;;  %v13443_v9 = vsel %vm13442_vm13, %v13000_v36, -inf  ;;  %v21549_v55 = vpop.f32.mrb[75].mxu1 }
 0x7e1   :  { %v13049_v51 = vmax.f32 %v13047_v33, %v13048_v8  ;;  %v13447_v63 = vsel %vm13442_vm13, %v13035_v59, -inf  ;;  %v13450_v46 = vsel %vm13442_vm13, %v13042_v45, -inf  ;;  %v13445_v60 = vmax.f32 %v13443_v9, %v13444_v28 }
 0x7e2   :  { %v13007_v38 = vmax.f32 %v13005_v25, %v13006_v2  ;;  %v13014_v52 = vmax.f32 %v13012_v32, %v13013_v34  ;;  %v13020_v27 = vrot.slane %v13019_v62, 1  ;;  %v12708_v54 = vcombine.high %v21523_v19, %v21523_v19 }
 0x7e3   :  { %v13453_v16 = vsel %vm13442_vm13, %v13049_v51, -inf  ;;  %v12715_v12 = vrot.slane %v21523_v19, %v19211_v21  ;;  %v12627_v41 = vmax.f32 %v21519_v42, 0.0  ;;  %v12614_v23 = vadd.f32 %v21527_v22, %v21511_v58  ;;  %v21561_v6 = vpop.f32.mrb[76].mxu1 }
 0x7e4   :  { %v13021_v17 = vmax.f32 %v13019_v62, %v13020_v27  ;;  %v13446_v0 = vsel %vm13442_vm13, %v13007_v38, -inf  ;;  %v13449_v56 = vsel %vm13442_vm13, %v13014_v52, -inf  ;;  %v12722_v40 = vrot.slane %v12708_v54, %v19211_v21  ;;  %v21566_v7 = vpop.f32.mrb[77].mxu1 }
 0x7e5   :  { %v13448_v26 = vmax.f32 %v13446_v0, %v13447_v63  ;;  %v13451_v5 = vmax.f32 %v13449_v56, %v13450_v46  ;;  %v12723_v39 = vcombine.high %v12715_v12, %v12715_v12  ;;  %v13078_v19 = vsel %vm12993_vm12, %v12715_v12, -inf }
 0x7e6   :  { %v13452_v42 = vsel %vm13442_vm13, %v13021_v17, -inf  ;;  %v12724_v53 = vcombine.high %v12722_v40, %v12722_v40  ;;  %v13079_v22 = vrot.slane %v13078_v19, 4  ;;  %v13092_v43 = vsel %vm12993_vm12, %v12722_v40, -inf }
 0x7e7   :  { %v13454_v47 = vmax.f32 %v13452_v42, %v13453_v16  ;;  %v13571_v44 = vsel %vm10412_vm5, %v13448_v26, %v13445_v60  ;;  %v13085_v3 = vsel %vm12993_vm12, %v12723_v39, -inf  ;;  %v13093_v10 = vrot.slane %v13092_v43, 4  ;;  %v21573_v15 = vpop.f32.mrb[78].mxu1 }
 0x7e8   :  { %v13572_v61 = vsel %vm10414_vm6, %v13451_v5, %v13571_v44  ;;  %v13080_v37 = vmax.f32 %v13078_v19, %v13079_v22  ;;  %v13086_v18 = vrot.slane %v13085_v3, 4  ;;  %v13099_v29 = vsel %vm12993_vm12, %v12724_v53, -inf  ;;  %v21577_v11 = vpop.f32.mrb[79].mxu1 }
 0x7e9   :  { %v13573_v13 = vsel %vm10416_vm7, %v13454_v47, %v13572_v61  ;;  %v13094_v35 = vmax.f32 %v13092_v43, %v13093_v10  ;;  %v13100_v1 = vrot.slane %v13099_v29, 4  ;;  %v12691_v50 = vcombine.high %v12627_v41, %v12627_v41 }
 0x7ea   :  { %13604 = vst.msk [vmem:[#allocation4] sm:$0xf] %vm13603_vm14, %v13573_v13  ;;  %v13081_v57 = vrot.slane %v13080_v37, 2  ;;  %v13087_v31 = vmax.f32 %v13085_v3, %v13086_v18  ;;  %v12698_v33 = vrot.slane %v12627_v41, %v19211_v21  ;;  %v12630_v36 = vmax.f32 %v12614_v23, 0.0 }
 0x7eb   :  { %v13095_v25 = vrot.slane %v13094_v35, 2  ;;  %v13101_v32 = vmax.f32 %v13099_v29, %v13100_v1  ;;  %v12705_v48 = vrot.slane %v12691_v50, %v19211_v21  ;;  %v12613_v59 = vadd.f32 %v21511_v58, %v21531_v24 }
 0x7ec   :  { %v13082_v45 = vmax.f32 %v13080_v37, %v13081_v57  ;;  %v13088_v8 = vrot.slane %v13087_v31, 2  ;;  %v12706_v28 = vcombine.high %v12698_v33, %v12698_v33  ;;  %v13050_v2 = vsel %vm12993_vm12, %v12698_v33, -inf }
 0x7ed   :  { %v13096_v34 = vmax.f32 %v13094_v35, %v13095_v25  ;;  %v13102_v62 = vrot.slane %v13101_v32, 2  ;;  %v12707_v9 = vcombine.high %v12705_v48, %v12705_v48  ;;  %v13051_v51 = vrot.slane %v13050_v2, 4 }
 0x7ee   :  { %v13083_v63 = vrot.slane %v13082_v45, 1  ;;  %v13089_v46 = vmax.f32 %v13087_v31, %v13088_v8  ;;  %v13057_v60 = vsel %vm12993_vm12, %v12706_v28, -inf  ;;  %v13064_v38 = vsel %vm12993_vm12, %v12705_v48, -inf }
 0x7ef   :  { %v13097_v52 = vrot.slane %v13096_v34, 1  ;;  %v13103_v27 = vmax.f32 %v13101_v32, %v13102_v62  ;;  %v13052_v54 = vmax.f32 %v13050_v2, %v13051_v51  ;;  %v13058_v16 = vrot.slane %v13057_v60, 4 }
 0x7f0   :  { %v13084_v24 = vmax.f32 %v13082_v45, %v13083_v63  ;;  %v13090_v12 = vrot.slane %v13089_v46, 1  ;;  %v13065_v41 = vrot.slane %v13064_v38, 4  ;;  %v13071_v23 = vsel %vm12993_vm12, %v12707_v9, -inf }
 0x7f1   :  { %v13098_v17 = vmax.f32 %v13096_v34, %v13097_v52  ;;  %v13104_v0 = vrot.slane %v13103_v27, 1  ;;  %v13053_v56 = vrot.slane %v13052_v54, 2  ;;  %v13059_v40 = vmax.f32 %v13057_v60, %v13058_v16 }
 0x7f2   :  { %v13091_v26 = vmax.f32 %v13089_v46, %v13090_v12  ;;  %v13456_v5 = vsel %vm13442_vm13, %v13084_v24, -inf  ;;  %v13066_v39 = vmax.f32 %v13064_v38, %v13065_v41  ;;  %v13072_v19 = vrot.slane %v13071_v23, 4 }
 0x7f3   :  { %v13105_v42 = vmax.f32 %v13103_v27, %v13104_v0  ;;  %v13462_v53 = vsel %vm13442_vm13, %v13098_v17, -inf  ;;  %v13054_v22 = vmax.f32 %v13052_v54, %v13053_v56  ;;  %v13060_v43 = vrot.slane %v13059_v40, 2 }
 0x7f4   :  { %v13459_v47 = vsel %vm13442_vm13, %v13091_v26, -inf  ;;  %v13067_v44 = vrot.slane %v13066_v39, 2  ;;  %v13073_v3 = vmax.f32 %v13071_v23, %v13072_v19  ;;  %v12742_v10 = vcombine.high %v12630_v36, %v12630_v36 }
 0x7f5   :  { %v13465_v61 = vsel %vm13442_vm13, %v13105_v42, -inf  ;;  %v13055_v37 = vrot.slane %v13054_v22, 1  ;;  %v13061_v18 = vmax.f32 %v13059_v40, %v13060_v43  ;;  %v12749_v29 = vrot.slane %v12630_v36, %v19211_v21 }
 0x7f6   :  { %v13068_v13 = vmax.f32 %v13066_v39, %v13067_v44  ;;  %v13074_v35 = vrot.slane %v13073_v3, 2  ;;  %v12756_v1 = vrot.slane %v12742_v10, %v19211_v21  ;;  %v12629_v50 = vmax.f32 %v12613_v59, 0.0 }
 0x7f7   :  { %v13056_v57 = vmax.f32 %v13054_v22, %v13055_v37  ;;  %v13062_v31 = vrot.slane %v13061_v18, 1  ;;  %v12757_v33 = vcombine.high %v12749_v29, %v12749_v29  ;;  %v13134_v25 = vsel %vm12993_vm12, %v12749_v29, -inf }
 0x7f8   :  { %v13069_v32 = vrot.slane %v13068_v13, 1  ;;  %v13075_v48 = vmax.f32 %v13073_v3, %v13074_v35  ;;  %v12758_v45 = vcombine.high %v12756_v1, %v12756_v1  ;;  %v13135_v8 = vrot.slane %v13134_v25, 4 }
 0x7f9   :  { %v13063_v28 = vmax.f32 %v13061_v18, %v13062_v31  ;;  %v13455_v2 = vsel %vm13442_vm13, %v13056_v57, -inf  ;;  %v13141_v34 = vsel %vm12993_vm12, %v12757_v33, -inf  ;;  %v13148_v36 = vsel %vm12993_vm12, %v12756_v1, -inf }
 0x7fa   :  { %v13070_v62 = vmax.f32 %v13068_v13, %v13069_v32  ;;  %v13076_v9 = vrot.slane %v13075_v48, 1  ;;  %v13457_v51 = vmax.f32 %v13455_v2, %v13456_v5  ;;  %v13136_v59 = vmax.f32 %v13134_v25, %v13135_v8 }
 0x7fb   :  { %v13458_v63 = vsel %vm13442_vm13, %v13063_v28, -inf  ;;  %v13142_v46 = vrot.slane %v13141_v34, 4  ;;  %v13149_v60 = vrot.slane %v13148_v36, 4  ;;  %v13155_v38 = vsel %vm12993_vm12, %v12758_v45, -inf }
 0x7fc   :  { %v13077_v52 = vmax.f32 %v13075_v48, %v13076_v9  ;;  %v13460_v27 = vmax.f32 %v13458_v63, %v13459_v47  ;;  %v13461_v54 = vsel %vm13442_vm13, %v13070_v62, -inf  ;;  %v13137_v16 = vrot.slane %v13136_v59, 2 }
 0x7fd   :  { %v13463_v24 = vmax.f32 %v13461_v54, %v13462_v53  ;;  %v13143_v12 = vmax.f32 %v13141_v34, %v13142_v46  ;;  %v13150_v41 = vmax.f32 %v13148_v36, %v13149_v60  ;;  %v13156_v23 = vrot.slane %v13155_v38, 4 }
 0x7fe   :  { %v13464_v17 = vsel %vm13442_vm13, %v13077_v52, -inf  ;;  %v13574_v0 = vsel %vm10412_vm5, %v13460_v27, %v13457_v51  ;;  %v13138_v56 = vmax.f32 %v13136_v59, %v13137_v16  ;;  %v12725_v40 = vcombine.high %v12629_v50, %v12629_v50 }
 0x7ff   :  { %v13466_v26 = vmax.f32 %v13464_v17, %v13465_v61  ;;  %v13575_v5 = vsel %vm10414_vm6, %v13463_v24, %v13574_v0  ;;  %v13144_v39 = vrot.slane %v13143_v12, 2  ;;  %v13151_v19 = vrot.slane %v13150_v41, 2 }
 0x800   :  { %v13139_v42 = vrot.slane %v13138_v56, 1  ;;  %v13157_v22 = vmax.f32 %v13155_v38, %v13156_v23  ;;  %v12732_v43 = vrot.slane %v12629_v50, %v19211_v21  ;;  %v12739_v53 = vrot.slane %v12725_v40, %v19211_v21 }
 0x801   :  { %v13576_v47 = vsel %vm10416_vm7, %v13466_v26, %v13575_v5  ;;  %v13145_v44 = vmax.f32 %v13143_v12, %v13144_v39  ;;  %v13152_v3 = vmax.f32 %v13150_v41, %v13151_v19  ;;  %v12616_v10 = vadd.f32 %v21536_v49, %v21511_v58 }
 0x802   :  { %13605 = vst.msk [vmem:[#allocation4 + $0x4] sm:$0xf] %vm13603_vm14, %v13576_v47  ;;  %v13140_v61 = vmax.f32 %v13138_v56, %v13139_v42  ;;  %v13158_v37 = vrot.slane %v13157_v22, 2  ;;  %v12740_v18 = vcombine.high %v12732_v43, %v12732_v43  ;;  %v12741_v29 = vcombine.high %v12739_v53, %v12739_v53 }
 0x803   :  { %v13146_v13 = vrot.slane %v13145_v44, 1  ;;  %v13153_v35 = vrot.slane %v13152_v3, 1  ;;  %v13106_v1 = vsel %vm12993_vm12, %v12732_v43, -inf  ;;  %v13120_v50 = vsel %vm12993_vm12, %v12739_v53, -inf }
 0x804   :  { %v13159_v57 = vmax.f32 %v13157_v22, %v13158_v37  ;;  %v21614_v31 = vsel %vm13442_vm13, %v13140_v61, -inf  ;;  %v13107_v33 = vrot.slane %v13106_v1, 4  ;;  %v13113_v25 = vsel %vm12993_vm12, %v12740_v18, -inf }
 0x805   :  { %v13147_v49 = vmax.f32 %v13145_v44, %v13146_v13  ;;  %v13154_v32 = vmax.f32 %v13152_v3, %v13153_v35  ;;  %v13114_v48 = vrot.slane %v13113_v25, 4  ;;  %v13121_v45 = vrot.slane %v13120_v50, 4 }
 0x806   :  { %v13160_v8 = vrot.slane %v13159_v57, 1  ;;  %v13108_v28 = vmax.f32 %v13106_v1, %v13107_v33  ;;  %v13127_v2 = vsel %vm12993_vm12, %v12741_v29, -inf  ;;  %v12632_v34 = vmax.f32 %v12616_v10, 0.0 }
 0x807   :  { %v13471_v36 = vsel %vm13442_vm13, %v13147_v49, -inf  ;;  %v13474_v62 = vsel %vm13442_vm13, %v13154_v32, -inf  ;;  %v13115_v9 = vmax.f32 %v13113_v25, %v13114_v48  ;;  %v13122_v51 = vmax.f32 %v13120_v50, %v13121_v45 }
 0x808   :  { %v13161_v59 = vmax.f32 %v13159_v57, %v13160_v8  ;;  %v13109_v63 = vrot.slane %v13108_v28, 2  ;;  %v13128_v46 = vrot.slane %v13127_v2, 4  ;;  %v12776_v60 = vcombine.high %v12632_v34, %v12632_v34 }
 0x809   :  { %v13116_v38 = vrot.slane %v13115_v9, 2  ;;  %v13123_v52 = vrot.slane %v13122_v51, 2  ;;  %v12783_v27 = vrot.slane %v12632_v34, %v19211_v21  ;;  %v12615_v54 = vadd.f32 %v21511_v58, %v21539_v14 }
 0x80a   :  { %v13477_v16 = vsel %vm13442_vm13, %v13161_v59, -inf  ;;  %v13110_v24 = vmax.f32 %v13108_v28, %v13109_v63  ;;  %v13129_v12 = vmax.f32 %v13127_v2, %v13128_v46  ;;  %v12790_v41 = vrot.slane %v12776_v60, %v19211_v21 }
 0x80b   :  { %v13117_v23 = vmax.f32 %v13115_v9, %v13116_v38  ;;  %v13124_v17 = vmax.f32 %v13122_v51, %v13123_v52  ;;  %v12791_v0 = vcombine.high %v12783_v27, %v12783_v27  ;;  %v13190_v56 = vsel %vm12993_vm12, %v12783_v27, -inf }
 0x80c   :  { %v13111_v40 = vrot.slane %v13110_v24, 1  ;;  %v13130_v26 = vrot.slane %v13129_v12, 2  ;;  %v12792_v5 = vcombine.high %v12790_v41, %v12790_v41  ;;  %v13191_v39 = vrot.slane %v13190_v56, 4 }
 0x80d   :  { %v13118_v19 = vrot.slane %v13117_v23, 1  ;;  %v13125_v42 = vrot.slane %v13124_v17, 1  ;;  %v13197_v22 = vsel %vm12993_vm12, %v12791_v0, -inf  ;;  %v13204_v14 = vsel %vm12993_vm12, %v12790_v41, -inf }
 0x80e   :  { %v13112_v43 = vmax.f32 %v13110_v24, %v13111_v40  ;;  %v13131_v53 = vmax.f32 %v13129_v12, %v13130_v26  ;;  %v13192_v47 = vmax.f32 %v13190_v56, %v13191_v39  ;;  %v13198_v44 = vrot.slane %v13197_v22, 4 }
 0x80f   :  { %v13119_v3 = vmax.f32 %v13117_v23, %v13118_v19  ;;  %v13126_v10 = vmax.f32 %v13124_v17, %v13125_v42  ;;  %v13205_v61 = vrot.slane %v13204_v14, 4  ;;  %v13211_v37 = vsel %vm12993_vm12, %v12792_v5, -inf }
 0x810   :  { %v13132_v18 = vrot.slane %v13131_v53, 1  ;;  %v13467_v29 = vsel %vm13442_vm13, %v13112_v43, -inf  ;;  %v13193_v13 = vrot.slane %v13192_v47, 2  ;;  %v13199_v35 = vmax.f32 %v13197_v22, %v13198_v44 }
 0x811   :  { %v13469_v1 = vmax.f32 %v13467_v29, %v21614_v31  ;;  %v13470_v50 = vsel %vm13442_vm13, %v13119_v3, -inf  ;;  %v13473_v57 = vsel %vm13442_vm13, %v13126_v10, -inf  ;;  %v13206_v33 = vmax.f32 %v13204_v14, %v13205_v61 }
 0x812   :  { %v13133_v25 = vmax.f32 %v13131_v53, %v13132_v18  ;;  %v13472_v49 = vmax.f32 %v13470_v50, %v13471_v36  ;;  %v13475_v32 = vmax.f32 %v13473_v57, %v13474_v62  ;;  %v13194_v48 = vmax.f32 %v13192_v47, %v13193_v13 }
 0x813   :  { %v13200_v45 = vrot.slane %v13199_v35, 2  ;;  %v13207_v8 = vrot.slane %v13206_v33, 2  ;;  %v13212_v28 = vrot.slane %v13211_v37, 4  ;;  %v12631_v2 = vmax.f32 %v12615_v54, 0.0 }
 0x814   :  { %v13476_v34 = vsel %vm13442_vm13, %v13133_v25, -inf  ;;  %v13577_v9 = vsel %vm10412_vm5, %v13472_v49, %v13469_v1  ;;  %v13195_v51 = vrot.slane %v13194_v48, 1  ;;  %v12618_v31 = vadd.f32 %v21541_v30, %v21511_v58 }
 0x815   :  { %v13478_v59 = vmax.f32 %v13476_v34, %v13477_v16  ;;  %v13578_v63 = vsel %vm10414_vm6, %v13475_v32, %v13577_v9  ;;  %v13201_v46 = vmax.f32 %v13199_v35, %v13200_v45  ;;  %v13208_v60 = vmax.f32 %v13206_v33, %v13207_v8 }
 0x816   :  { %v13196_v36 = vmax.f32 %v13194_v48, %v13195_v51  ;;  %v13213_v62 = vmax.f32 %v13211_v37, %v13212_v28  ;;  %v12759_v38 = vcombine.high %v12631_v2, %v12631_v2  ;;  %v12766_v52 = vrot.slane %v12631_v2, %v19211_v21 }
 0x817   :  { %v13579_v27 = vsel %vm10416_vm7, %v13478_v59, %v13578_v63  ;;  %v13202_v54 = vrot.slane %v13201_v46, 1  ;;  %v13209_v24 = vrot.slane %v13208_v60, 1  ;;  %v12634_v12 = vmax.f32 %v12618_v31, 0.0 }
 0x818   :  { %13606 = vst.msk [vmem:[#allocation4 + $0x8] sm:$0xf] %vm13603_vm14, %v13579_v27  ;;  %v13214_v41 = vrot.slane %v13213_v62, 2  ;;  %v21642_v30 = vsel %vm13442_vm13, %v13196_v36, -inf  ;;  %v12773_v16 = vrot.slane %v12759_v38, %v19211_v21  ;;  %v12774_v23 = vcombine.high %v12766_v52, %v12766_v52 }
 0x819   :  { %v13203_v17 = vmax.f32 %v13201_v46, %v13202_v54  ;;  %v13210_v0 = vmax.f32 %v13208_v60, %v13209_v24  ;;  %v13162_v56 = vsel %vm12993_vm12, %v12766_v52, -inf  ;;  %v12810_v40 = vcombine.high %v12634_v12, %v12634_v12 }
 0x81a   :  { %v13215_v26 = vmax.f32 %v13213_v62, %v13214_v41  ;;  %v12775_v5 = vcombine.high %v12773_v16, %v12773_v16  ;;  %v13163_v39 = vrot.slane %v13162_v56, 4  ;;  %v13169_v19 = vsel %vm12993_vm12, %v12774_v23, -inf }
 0x81b   :  { %v21648_v42 = vsel %vm13442_vm13, %v13203_v17, -inf  ;;  %v21651_v22 = vsel %vm13442_vm13, %v13210_v0, -inf  ;;  %v13170_v14 = vrot.slane %v13169_v19, 4  ;;  %v13176_v43 = vsel %vm12993_vm12, %v12773_v16, -inf }
 0x81c   :  { %v13216_v53 = vrot.slane %v13215_v26, 1  ;;  %v13164_v47 = vmax.f32 %v13162_v56, %v13163_v39  ;;  %v13177_v44 = vrot.slane %v13176_v43, 4  ;;  %v13183_v3 = vsel %vm12993_vm12, %v12775_v5, -inf }
 0x81d   :  { %v13171_v10 = vmax.f32 %v13169_v19, %v13170_v14  ;;  %v13184_v61 = vrot.slane %v13183_v3, 4  ;;  %v12817_v37 = vrot.slane %v12634_v12, %v19211_v21  ;;  %v12824_v18 = vrot.slane %v12810_v40, %v19211_v21 }
 0x81e   :  { %v13217_v29 = vmax.f32 %v13215_v26, %v13216_v53  ;;  %v13165_v13 = vrot.slane %v13164_v47, 2  ;;  %v13178_v35 = vmax.f32 %v13176_v43, %v13177_v44  ;;  %v12617_v1 = vadd.f32 %v21511_v58, %v21543_v20 }
 0x81f   :  { %v13172_v50 = vrot.slane %v13171_v10, 2  ;;  %v13185_v57 = vmax.f32 %v13183_v3, %v13184_v61  ;;  %v12825_v33 = vcombine.high %v12817_v37, %v12817_v37  ;;  %v12826_v25 = vcombine.high %v12824_v18, %v12824_v18 }
 0x820   :  { %v13489_v49 = vsel %vm13442_vm13, %v13217_v29, -inf  ;;  %v13166_v32 = vmax.f32 %v13164_v47, %v13165_v13  ;;  %v13179_v48 = vrot.slane %v13178_v35, 2  ;;  %v13246_v45 = vsel %vm12993_vm12, %v12817_v37, -inf }
 0x821   :  { %v13173_v8 = vmax.f32 %v13171_v10, %v13172_v50  ;;  %v13186_v28 = vrot.slane %v13185_v57, 2  ;;  %v13247_v2 = vrot.slane %v13246_v45, 4  ;;  %v13253_v34 = vsel %vm12993_vm12, %v12825_v33, -inf }
 0x822   :  { %v13167_v9 = vrot.slane %v13166_v32, 1  ;;  %v13180_v51 = vmax.f32 %v13178_v35, %v13179_v48  ;;  %v13254_v31 = vrot.slane %v13253_v34, 4  ;;  %v13260_v20 = vsel %vm12993_vm12, %v12824_v18, -inf }
 0x823   :  { %v13174_v59 = vrot.slane %v13173_v8, 1  ;;  %v13187_v63 = vmax.f32 %v13185_v57, %v13186_v28  ;;  %v13248_v46 = vmax.f32 %v13246_v45, %v13247_v2  ;;  %v13261_v60 = vrot.slane %v13260_v20, 4 }
 0x824   :  { %v13168_v36 = vmax.f32 %v13166_v32, %v13167_v9  ;;  %v13181_v62 = vrot.slane %v13180_v51, 1  ;;  %v13255_v38 = vmax.f32 %v13253_v34, %v13254_v31  ;;  %v13267_v52 = vsel %vm12993_vm12, %v12826_v25, -inf }
 0x825   :  { %v13175_v27 = vmax.f32 %v13173_v8, %v13174_v59  ;;  %v13188_v54 = vrot.slane %v13187_v63, 1  ;;  %v13249_v24 = vrot.slane %v13248_v46, 2  ;;  %v13262_v12 = vmax.f32 %v13260_v20, %v13261_v60 }
 0x826   :  { %v13182_v41 = vmax.f32 %v13180_v51, %v13181_v62  ;;  %v13479_v16 = vsel %vm13442_vm13, %v13168_v36, -inf  ;;  %v13256_v23 = vrot.slane %v13255_v38, 2  ;;  %v13268_v17 = vrot.slane %v13267_v52, 4 }
 0x827   :  { %v13189_v0 = vmax.f32 %v13187_v63, %v13188_v54  ;;  %v13481_v56 = vmax.f32 %v13479_v16, %v21642_v30  ;;  %v13482_v40 = vsel %vm13442_vm13, %v13175_v27, -inf  ;;  %v13250_v26 = vmax.f32 %v13248_v46, %v13249_v24 }
 0x828   :  { %v13484_v5 = vmax.f32 %v13482_v40, %v21648_v42  ;;  %v13485_v39 = vsel %vm13442_vm13, %v13182_v41, -inf  ;;  %v13257_v19 = vmax.f32 %v13255_v38, %v13256_v23  ;;  %v13263_v14 = vrot.slane %v13262_v12, 2 }
 0x829   :  { %v13487_v43 = vmax.f32 %v13485_v39, %v21651_v22  ;;  %v13488_v53 = vsel %vm13442_vm13, %v13189_v0, -inf  ;;  %v13251_v47 = vrot.slane %v13250_v26, 1  ;;  %v13269_v44 = vmax.f32 %v13267_v52, %v13268_v17 }
 0x82a   :  { %v13490_v3 = vmax.f32 %v13488_v53, %v13489_v49  ;;  %v13580_v10 = vsel %vm10412_vm5, %v13484_v5, %v13481_v56  ;;  %v13258_v61 = vrot.slane %v13257_v19, 1  ;;  %v13264_v30 = vmax.f32 %v13262_v12, %v13263_v14 }
 0x82b   :  { %v13581_v37 = vsel %vm10414_vm6, %v13487_v43, %v13580_v10  ;;  %v13252_v18 = vmax.f32 %v13250_v26, %v13251_v47  ;;  %v13270_v29 = vrot.slane %v13269_v44, 2  ;;  %v12633_v42 = vmax.f32 %v12617_v1, 0.0 }
 0x82c   :  { %v13582_v13 = vsel %vm10416_vm7, %v13490_v3, %v13581_v37  ;;  %v13259_v35 = vmax.f32 %v13257_v19, %v13258_v61  ;;  %v13265_v50 = vrot.slane %v13264_v30, 1  ;;  %v12620_v22 = vadd.f32 %v21546_v4, %v21511_v58 }
 0x82d   :  { %13607 = vst.msk [vmem:[#allocation4 + $0xc] sm:$0xf] %vm13603_vm14, %v13582_v13  ;;  %v13271_v57 = vmax.f32 %v13269_v44, %v13270_v29  ;;  %v21678_v33 = vsel %vm13442_vm13, %v13252_v18, -inf  ;;  %v12793_v25 = vcombine.high %v12633_v42, %v12633_v42  ;;  %v12800_v49 = vrot.slane %v12633_v42, %v19211_v21 }
 0x82e   :  { %v13266_v32 = vmax.f32 %v13264_v30, %v13265_v50  ;;  %v21682_v48 = vsel %vm13442_vm13, %v13259_v35, -inf  ;;  %v12636_v1 = vmax.f32 %v12620_v22, 0.0  ;;  %v21686_v45 = vadd.f32 %v21511_v58, %v21549_v55 }
 0x82f   :  { %v13272_v8 = vrot.slane %v13271_v57, 1  ;;  %v12807_v4 = vrot.slane %v12793_v25, %v19211_v21  ;;  %v12808_v28 = vcombine.high %v12800_v49, %v12800_v49  ;;  %v13218_v2 = vsel %vm12993_vm12, %v12800_v49, -inf }
 0x830   :  { %v21691_v34 = vsel %vm13442_vm13, %v13266_v32, -inf  ;;  %v13219_v9 = vrot.slane %v13218_v2, 4  ;;  %v12844_v51 = vcombine.high %v12636_v1, %v12636_v1  ;;  %v12851_v31 = vrot.slane %v12636_v1, %v19211_v21 }
 0x831   :  { %v13273_v20 = vmax.f32 %v13271_v57, %v13272_v8  ;;  %v12809_v59 = vcombine.high %v12807_v4, %v12807_v4  ;;  %v13225_v63 = vsel %vm12993_vm12, %v12808_v28, -inf  ;;  %v13232_v55 = vsel %vm12993_vm12, %v12807_v4, -inf }
 0x832   :  { %v13220_v46 = vmax.f32 %v13218_v2, %v13219_v9  ;;  %v13226_v60 = vrot.slane %v13225_v63, 4  ;;  %v13233_v36 = vrot.slane %v13232_v55, 4  ;;  %v12858_v62 = vrot.slane %v12844_v51, %v19211_v21 }
 0x833   :  { %v21698_v38 = vsel %vm13442_vm13, %v13273_v20, -inf  ;;  %v13239_v52 = vsel %vm12993_vm12, %v12809_v59, -inf  ;;  %v12859_v27 = vcombine.high %v12851_v31, %v12851_v31  ;;  %v13302_v54 = vsel %vm12993_vm12, %v12851_v31, -inf }
 0x834   :  { %v13221_v24 = vrot.slane %v13220_v46, 2  ;;  %v13227_v12 = vmax.f32 %v13225_v63, %v13226_v60  ;;  %v13234_v41 = vmax.f32 %v13232_v55, %v13233_v36  ;;  %v13240_v16 = vrot.slane %v13239_v52, 4 }
 0x835   :  { %v12860_v23 = vcombine.high %v12858_v62, %v12858_v62  ;;  %v13303_v17 = vrot.slane %v13302_v54, 4  ;;  %v13309_v0 = vsel %vm12993_vm12, %v12859_v27, -inf  ;;  %v13316_v56 = vsel %vm12993_vm12, %v12858_v62, -inf }
 0x836   :  { %v13222_v40 = vmax.f32 %v13220_v46, %v13221_v24  ;;  %v13228_v26 = vrot.slane %v13227_v12, 2  ;;  %v13235_v5 = vrot.slane %v13234_v41, 2  ;;  %v13241_v39 = vmax.f32 %v13239_v52, %v13240_v16 }
 0x837   :  { %v13304_v19 = vmax.f32 %v13302_v54, %v13303_v17  ;;  %v13310_v14 = vrot.slane %v13309_v0, 4  ;;  %v13317_v43 = vrot.slane %v13316_v56, 4  ;;  %v13323_v53 = vsel %vm12993_vm12, %v12860_v23, -inf }
 0x838   :  { %v13223_v47 = vrot.slane %v13222_v40, 1  ;;  %v13229_v44 = vmax.f32 %v13227_v12, %v13228_v26  ;;  %v13236_v3 = vmax.f32 %v13234_v41, %v13235_v5  ;;  %v13242_v10 = vrot.slane %v13241_v39, 2 }
 0x839   :  { %v13305_v61 = vrot.slane %v13304_v19, 2  ;;  %v13311_v30 = vmax.f32 %v13309_v0, %v13310_v14  ;;  %v13318_v37 = vmax.f32 %v13316_v56, %v13317_v43  ;;  %v13324_v18 = vrot.slane %v13323_v53, 4 }
 0x83a   :  { %v13224_v29 = vmax.f32 %v13222_v40, %v13223_v47  ;;  %v13230_v42 = vrot.slane %v13229_v44, 1  ;;  %v13237_v13 = vrot.slane %v13236_v3, 1  ;;  %v13243_v35 = vmax.f32 %v13241_v39, %v13242_v10 }
 0x83b   :  { %v13306_v50 = vmax.f32 %v13304_v19, %v13305_v61  ;;  %v13312_v22 = vrot.slane %v13311_v30, 2  ;;  %v13319_v57 = vrot.slane %v13318_v37, 2  ;;  %v13325_v25 = vmax.f32 %v13323_v53, %v13324_v18 }
 0x83c   :  { %v13231_v49 = vmax.f32 %v13229_v44, %v13230_v42  ;;  %v13238_v32 = vmax.f32 %v13236_v3, %v13237_v13  ;;  %v13244_v1 = vrot.slane %v13243_v35, 1  ;;  %v13491_v8 = vsel %vm13442_vm13, %v13224_v29, -inf }
 0x83d   :  { %v13493_v4 = vmax.f32 %v13491_v8, %v21678_v33  ;;  %v13307_v28 = vrot.slane %v13306_v50, 1  ;;  %v13313_v2 = vmax.f32 %v13311_v30, %v13312_v22  ;;  %v13320_v9 = vmax.f32 %v13318_v37, %v13319_v57 }
 0x83e   :  { %v13245_v51 = vmax.f32 %v13243_v35, %v13244_v1  ;;  %v13494_v31 = vsel %vm13442_vm13, %v13231_v49, -inf  ;;  %v13497_v20 = vsel %vm13442_vm13, %v13238_v32, -inf  ;;  %v13326_v59 = vrot.slane %v13325_v25, 2 }
 0x83f   :  { %v13496_v63 = vmax.f32 %v13494_v31, %v21682_v48  ;;  %v13499_v55 = vmax.f32 %v13497_v20, %v21691_v34  ;;  %v13308_v46 = vmax.f32 %v13306_v50, %v13307_v28  ;;  %v13314_v60 = vrot.slane %v13313_v2, 1 }
 0x840   :  { %v13500_v36 = vsel %vm13442_vm13, %v13245_v51, -inf  ;;  %v13321_v62 = vrot.slane %v13320_v9, 1  ;;  %v13327_v52 = vmax.f32 %v13325_v25, %v13326_v59  ;;  %v12635_v33 = vmax.f32 %v21686_v45, 0.0 }
 0x841   :  { %v13502_v27 = vmax.f32 %v13500_v36, %v21698_v38  ;;  %v13583_v54 = vsel %vm10412_vm5, %v13496_v63, %v13493_v4  ;;  %v13315_v24 = vmax.f32 %v13313_v2, %v13314_v60  ;;  %v21718_v23 = vsel %vm13442_vm13, %v13308_v46, -inf }
 0x842   :  { %v13584_v12 = vsel %vm10414_vm6, %v13499_v55, %v13583_v54  ;;  %v13322_v41 = vmax.f32 %v13320_v9, %v13321_v62  ;;  %v13328_v16 = vrot.slane %v13327_v52, 1  ;;  %v12827_v48 = vcombine.high %v12635_v33, %v12635_v33 }
 0x843   :  { %v13585_v34 = vsel %vm10416_vm7, %v13502_v27, %v13584_v12  ;;  %v12834_v17 = vrot.slane %v12635_v33, %v19211_v21  ;;  %v12622_v45 = vadd.f32 %v21561_v6, %v21511_v58  ;;  %v21725_v0 = vsel %vm13442_vm13, %v13315_v24, -inf }
 0x844   :  { %13608 = vst.msk [vmem:[#allocation4 + $0x10] sm:$0xf] %vm13603_vm14, %v13585_v34  ;;  %v13329_v38 = vmax.f32 %v13327_v52, %v13328_v16  ;;  %v12841_v56 = vrot.slane %v12827_v48, %v19211_v21  ;;  %v12621_v40 = vadd.f32 %v21511_v58, %v21566_v7  ;;  %v21731_v26 = vsel %vm13442_vm13, %v13322_v41, -inf }
 0x845   :  { %v12842_v5 = vcombine.high %v12834_v17, %v12834_v17  ;;  %v13274_v39 = vsel %vm12993_vm12, %v12834_v17, -inf  ;;  %v12638_v19 = vmax.f32 %v12622_v45, 0.0 }
 0x846   :  { %v21735_v6 = vsel %vm13442_vm13, %v13329_v38, -inf  ;;  %v12843_v14 = vcombine.high %v12841_v56, %v12841_v56  ;;  %v13275_v43 = vrot.slane %v13274_v39, 4  ;;  %v13288_v53 = vsel %vm12993_vm12, %v12841_v56, -inf }
 0x847   :  { %v13281_v47 = vsel %vm12993_vm12, %v12842_v5, -inf  ;;  %v13289_v44 = vrot.slane %v13288_v53, 4  ;;  %v12878_v3 = vcombine.high %v12638_v19, %v12638_v19  ;;  %v12885_v58 = vrot.slane %v12638_v19, %v19211_v21 }
 0x848   :  { %v13276_v7 = vmax.f32 %v13274_v39, %v13275_v43  ;;  %v13282_v10 = vrot.slane %v13281_v47, 4  ;;  %v13295_v61 = vsel %vm12993_vm12, %v12843_v14, -inf  ;;  %v12637_v30 = vmax.f32 %v12621_v40, 0.0 }
 0x849   :  { %v13290_v37 = vmax.f32 %v13288_v53, %v13289_v44  ;;  %v13296_v18 = vrot.slane %v13295_v61, 4  ;;  %v12892_v29 = vrot.slane %v12878_v3, %v19211_v21  ;;  %v12893_v42 = vcombine.high %v12885_v58, %v12885_v58 }
 0x84a   :  { %v13277_v13 = vrot.slane %v13276_v7, 2  ;;  %v13283_v35 = vmax.f32 %v13281_v47, %v13282_v10  ;;  %v13358_v50 = vsel %vm12993_vm12, %v12885_v58, -inf  ;;  %v12861_v22 = vcombine.high %v12637_v30, %v12637_v30 }
 0x84b   :  { %v13291_v57 = vrot.slane %v13290_v37, 2  ;;  %v13297_v25 = vmax.f32 %v13295_v61, %v13296_v18  ;;  %v12894_v49 = vcombine.high %v12892_v29, %v12892_v29  ;;  %v13359_v32 = vrot.slane %v13358_v50, 4 }
 0x84c   :  { %v13278_v1 = vmax.f32 %v13276_v7, %v13277_v13  ;;  %v13284_v8 = vrot.slane %v13283_v35, 2  ;;  %v13365_v4 = vsel %vm12993_vm12, %v12893_v42, -inf  ;;  %v13372_v28 = vsel %vm12993_vm12, %v12892_v29, -inf }
 0x84d   :  { %v13292_v2 = vmax.f32 %v13290_v37, %v13291_v57  ;;  %v13298_v9 = vrot.slane %v13297_v25, 2  ;;  %v13360_v51 = vmax.f32 %v13358_v50, %v13359_v32  ;;  %v13366_v31 = vrot.slane %v13365_v4, 4 }
 0x84e   :  { %v13279_v20 = vrot.slane %v13278_v1, 1  ;;  %v13285_v59 = vmax.f32 %v13283_v35, %v13284_v8  ;;  %v13373_v63 = vrot.slane %v13372_v28, 4  ;;  %v13379_v55 = vsel %vm12993_vm12, %v12894_v49, -inf }
 0x84f   :  { %v13293_v46 = vrot.slane %v13292_v2, 1  ;;  %v13299_v60 = vmax.f32 %v13297_v25, %v13298_v9  ;;  %v13361_v36 = vrot.slane %v13360_v51, 2  ;;  %v13367_v62 = vmax.f32 %v13365_v4, %v13366_v31 }
 0x850   :  { %v13280_v52 = vmax.f32 %v13278_v1, %v13279_v20  ;;  %v13286_v33 = vrot.slane %v13285_v59, 1  ;;  %v13374_v27 = vmax.f32 %v13372_v28, %v13373_v63  ;;  %v13380_v54 = vrot.slane %v13379_v55, 4 }
 0x851   :  { %v13294_v24 = vmax.f32 %v13292_v2, %v13293_v46  ;;  %v13300_v12 = vrot.slane %v13299_v60, 1  ;;  %v13362_v41 = vmax.f32 %v13360_v51, %v13361_v36  ;;  %v13368_v16 = vrot.slane %v13367_v62, 2 }
 0x852   :  { %v13287_v48 = vmax.f32 %v13285_v59, %v13286_v33  ;;  %v13503_v34 = vsel %vm13442_vm13, %v13280_v52, -inf  ;;  %v13375_v17 = vrot.slane %v13374_v27, 2  ;;  %v13381_v45 = vmax.f32 %v13379_v55, %v13380_v54 }
 0x853   :  { %v13301_v38 = vmax.f32 %v13299_v60, %v13300_v12  ;;  %v13505_v56 = vmax.f32 %v13503_v34, %v21718_v23  ;;  %v13509_v40 = vsel %vm13442_vm13, %v13294_v24, -inf  ;;  %v13363_v5 = vrot.slane %v13362_v41, 1 }
 0x854   :  { %v13506_v39 = vsel %vm13442_vm13, %v13287_v48, -inf  ;;  %v13511_v19 = vmax.f32 %v13509_v40, %v21731_v26  ;;  %v13369_v14 = vmax.f32 %v13367_v62, %v13368_v16  ;;  %v13376_v43 = vmax.f32 %v13374_v27, %v13375_v17  ;;  %v17064_v26 = vld [vmem:[%s21824_s4] ss:$0 sm:$0xff]  ;;  %s17091_s4 = smov [#allocation4]  }
 0x855   :  { %v13508_v53 = vmax.f32 %v13506_v39, %v21725_v0  ;;  %v13512_v47 = vsel %vm13442_vm13, %v13301_v38, -inf  ;;  %v13364_v44 = vmax.f32 %v13362_v41, %v13363_v5  ;;  %v13382_v3 = vrot.slane %v13381_v45, 2  ;;  %s13617_s17 = sshll.u32 %s17091_s4, 4  ;;  %s13618_s17 = int_to_ptr.vmem [resolvable:$true] %s13617_s17 }
 0x856   :  { %v13514_v58 = vmax.f32 %v13512_v47, %v21735_v6  ;;  %v13370_v7 = vrot.slane %v13369_v14, 1  ;;  %v13377_v10 = vrot.slane %v13376_v43, 1  ;;  %v12868_v23 = vrot.slane %v12637_v30, %v19211_v21  ;;  %s17065_s18 = scalar_lea.vmem %s13618_s17, 512  ;;  %p17070_p1 = scmp.lt.s32.totalorder %s13618_s17, %s13618_s17 }
 0x857   :  { %v13586_v61 = vsel %vm10412_vm5, %v13508_v53, %v13505_v56  ;;  %v13383_v37 = vmax.f32 %v13381_v45, %v13382_v3  ;;  %v12875_v18 = vrot.slane %v12861_v22, %v19211_v21  ;;  %v12624_v0 = vadd.f32 %v17064_v26, %v21573_v15  ;;  %p17066_p0 = scmp.ne.s32.totalorder %s13618_s17, %s17065_s18  ;;  %p17071_p2 = scmp.lt.s32.totalorder %s17065_s18, %s17065_s18 }
 0x858   :  { %v13587_v29 = vsel %vm10414_vm6, %v13511_v19, %v13586_v61  ;;  %v13371_v42 = vmax.f32 %v13369_v14, %v13370_v7  ;;  %v13378_v13 = vmax.f32 %v13376_v43, %v13377_v10  ;;  %v12876_v6 = vcombine.high %v12868_v23, %v12868_v23 }
 0x859   :  { %v13588_v35 = vsel %vm10416_vm7, %v13514_v58, %v13587_v29  ;;  %v13384_v50 = vrot.slane %v13383_v37, 1  ;;  %v12877_v30 = vcombine.high %v12875_v18, %v12875_v18  ;;  %v13330_v57 = vsel %vm12993_vm12, %v12868_v23, -inf  ;;  %p17072_p3 = por %p17071_p2, %p17070_p1 }
 0x85a   :  { %13609 = vst.msk [vmem:[#allocation4 + $0x14] sm:$0xf] %vm13603_vm14, %v13588_v35  ;;  %v21766_v22 = vsel %vm13442_vm13, %v13364_v44, -inf  ;;  %v13331_v25 = vrot.slane %v13330_v57, 4  ;;  %v13337_v49 = vsel %vm12993_vm12, %v12876_v6, -inf  ;;  %v13344_v1 = vsel %vm12993_vm12, %v12875_v18, -inf }
 0x85b   :  { %v13385_v15 = vmax.f32 %v13383_v37, %v13384_v50  ;;  %v13338_v32 = vrot.slane %v13337_v49, 4  ;;  %v13351_v8 = vsel %vm12993_vm12, %v12877_v30, -inf  ;;  %v13345_v28 = vrot.slane %v13344_v1, 4  ;;  %p17073_p4 = pnand %p17072_p3, %p17066_p0 }
 0x85c   :  { %v13332_v4 = vmax.f32 %v13330_v57, %v13331_v25  ;;  %v13352_v2 = vrot.slane %v13351_v8, 4  ;;  %v12640_v9 = vmax.f32 %v12624_v0, 0.0  ;;  %v13519_v51 = vsel %vm13442_vm13, %v13371_v42, -inf }
 0x85d   :  { %v13522_v31 = vsel %vm13442_vm13, %v13378_v13, -inf  ;;  %v13339_v20 = vmax.f32 %v13337_v49, %v13338_v32  ;;  %v12623_v59 = vadd.f32 %v17064_v26, %v21577_v11  ;;  %v13346_v55 = vmax.f32 %v13344_v1, %v13345_v28 }
 0x85e   :  { %v13333_v63 = vrot.slane %v13332_v4, 2  ;;  %v13353_v46 = vmax.f32 %v13351_v8, %v13352_v2  ;;  %v12912_v60 = vcombine.high %v12640_v9, %v12640_v9  ;;  %v13525_v36 = vsel %vm13442_vm13, %v13385_v15, -inf }
 0x85f   :  { %v13340_v62 = vrot.slane %v13339_v20, 2  ;;  %v12919_v52 = vrot.slane %v12640_v9, %v19211_v21  ;;  %v12639_v33 = vmax.f32 %v12623_v59, 0.0  ;;  %v13347_v54 = vrot.slane %v13346_v55, 2 }
 0x860   :  { %v13334_v27 = vmax.f32 %v13332_v4, %v13333_v63  ;;  %v13354_v24 = vrot.slane %v13353_v46, 2  ;;  %v12926_v12 = vrot.slane %v12912_v60, %v19211_v21 }
 0x861   :  { %v13341_v41 = vmax.f32 %v13339_v20, %v13340_v62  ;;  %v12927_v16 = vcombine.high %v12919_v52, %v12919_v52  ;;  %v13414_v48 = vsel %vm12993_vm12, %v12919_v52, -inf  ;;  %v12895_v11 = vcombine.high %v12639_v33, %v12639_v33 }
 0x862   :  { %v13335_v34 = vrot.slane %v13334_v27, 1  ;;  %v13348_v17 = vmax.f32 %v13346_v55, %v13347_v54  ;;  %v13355_v45 = vmax.f32 %v13353_v46, %v13354_v24  ;;  %v12928_v38 = vcombine.high %v12926_v12, %v12926_v12 }
 0x863   :  { %v13342_v56 = vrot.slane %v13341_v41, 1  ;;  %v13415_v40 = vrot.slane %v13414_v48, 4  ;;  %v13421_v5 = vsel %vm12993_vm12, %v12927_v16, -inf  ;;  %v13428_v39 = vsel %vm12993_vm12, %v12926_v12, -inf }
 0x864   :  { %v13336_v19 = vmax.f32 %v13334_v27, %v13335_v34  ;;  %v13349_v14 = vrot.slane %v13348_v17, 1  ;;  %v13356_v43 = vrot.slane %v13355_v45, 1  ;;  %v13422_v53 = vrot.slane %v13421_v5, 4 }
 0x865   :  { %v13343_v47 = vmax.f32 %v13341_v41, %v13342_v56  ;;  %v13416_v44 = vmax.f32 %v13414_v48, %v13415_v40  ;;  %v13429_v3 = vrot.slane %v13428_v39, 4  ;;  %v13435_v58 = vsel %vm12993_vm12, %v12928_v38, -inf }
 0x866   :  { %v13350_v7 = vmax.f32 %v13348_v17, %v13349_v14  ;;  %v13357_v10 = vmax.f32 %v13355_v45, %v13356_v43  ;;  %v13515_v23 = vsel %vm13442_vm13, %v13336_v19, -inf  ;;  %v13423_v61 = vmax.f32 %v13421_v5, %v13422_v53 }
 0x867   :  { %v13517_v37 = vmax.f32 %v13515_v23, %v21766_v22  ;;  %v13518_v18 = vsel %vm13442_vm13, %v13343_v47, -inf  ;;  %v13417_v26 = vrot.slane %v13416_v44, 2  ;;  %v13430_v0 = vmax.f32 %v13428_v39, %v13429_v3 }
 0x868   :  { %v13520_v29 = vmax.f32 %v13518_v18, %v13519_v51  ;;  %v13521_v42 = vsel %vm13442_vm13, %v13350_v7, -inf  ;;  %v13524_v13 = vsel %vm13442_vm13, %v13357_v10, -inf  ;;  %v13424_v50 = vrot.slane %v13423_v61, 2 }
 0x869   :  { %v13523_v6 = vmax.f32 %v13521_v42, %v13522_v31  ;;  %v13526_v35 = vmax.f32 %v13524_v13, %v13525_v36  ;;  %v13431_v57 = vrot.slane %v13430_v0, 2  ;;  %v13436_v25 = vrot.slane %v13435_v58, 4 }
 0x86a   :  { %v13589_v30 = vsel %vm10412_vm5, %v13520_v29, %v13517_v37  ;;  %v12902_v49 = vrot.slane %v12639_v33, %v19211_v21  ;;  %v13418_v15 = vmax.f32 %v13416_v44, %v13417_v26  ;;  %v12909_v32 = vrot.slane %v12895_v11, %v19211_v21 }
 0x86b   :  { %v13590_v22 = vsel %vm10414_vm6, %v13523_v6, %v13589_v30  ;;  %v13437_v8 = vmax.f32 %v13435_v58, %v13436_v25  ;;  %v13425_v28 = vmax.f32 %v13423_v61, %v13424_v50  ;;  %v13432_v51 = vmax.f32 %v13430_v0, %v13431_v57 }
 0x86c   :  { %v13591_v1 = vsel %vm10416_vm7, %v13526_v35, %v13590_v22  ;;  %v12910_v4 = vcombine.high %v12902_v49, %v12902_v49  ;;  %v12911_v2 = vcombine.high %v12909_v32, %v12909_v32  ;;  %v13386_v9 = vsel %vm12993_vm12, %v12902_v49, -inf }
 0x86d   :  { %13610 = vst.msk [vmem:[#allocation4 + $0x18] sm:$0xf] %vm13603_vm14, %v13591_v1  ;;  %v13438_v31 = vrot.slane %v13437_v8, 2  ;;  %v13387_v20 = vrot.slane %v13386_v9, 4  ;;  %v13419_v63 = vrot.slane %v13418_v15, 1  ;;  %v13400_v46 = vsel %vm12993_vm12, %v12909_v32, -inf }
 0x86e   :  { %v13393_v59 = vsel %vm12993_vm12, %v12910_v4, -inf  ;;  %v13401_v36 = vrot.slane %v13400_v46, 4  ;;  %v13426_v62 = vrot.slane %v13425_v28, 1  ;;  %v13407_v33 = vsel %vm12993_vm12, %v12911_v2, -inf }
 0x86f   :  { %v13394_v55 = vrot.slane %v13393_v59, 4  ;;  %v13439_v21 = vmax.f32 %v13437_v8, %v13438_v31  ;;  %v13388_v60 = vmax.f32 %v13386_v9, %v13387_v20  ;;  %v13433_v27 = vrot.slane %v13432_v51, 1 }
 0x870   :  { %v13402_v24 = vmax.f32 %v13400_v46, %v13401_v36  ;;  %v13408_v12 = vrot.slane %v13407_v33, 4  ;;  %v13420_v41 = vmax.f32 %v13418_v15, %v13419_v63  ;;  %v13427_v45 = vmax.f32 %v13425_v28, %v13426_v62 }
 0x871   :  { %v13395_v52 = vmax.f32 %v13393_v59, %v13394_v55  ;;  %v13389_v54 = vrot.slane %v13388_v60, 2  ;;  %v13440_v48 = vrot.slane %v13439_v21, 1  ;;  %v13434_v56 = vmax.f32 %v13432_v51, %v13433_v27 }
 0x872   :  { %v13403_v34 = vrot.slane %v13402_v24, 2  ;;  %v13409_v17 = vmax.f32 %v13407_v33, %v13408_v12  ;;  %v13528_v19 = vsel %vm13442_vm13, %v13420_v41, -inf  ;;  %v13531_v3 = vsel %vm13442_vm13, %v13427_v45, -inf }
 0x873   :  { %v13396_v16 = vrot.slane %v13395_v52, 2  ;;  %v13390_v11 = vmax.f32 %v13388_v60, %v13389_v54  ;;  %v13441_v43 = vmax.f32 %v13439_v21, %v13440_v48  ;;  %v13534_v7 = vsel %vm13442_vm13, %v13434_v56, -inf }
 0x874   :  { %v13404_v5 = vmax.f32 %v13402_v24, %v13403_v34  ;;  %v13410_v39 = vrot.slane %v13409_v17, 2 }
 0x875   :  { %v13397_v38 = vmax.f32 %v13395_v52, %v13396_v16  ;;  %v13391_v40 = vrot.slane %v13390_v11, 1  ;;  %v13537_v26 = vsel %vm13442_vm13, %v13441_v43, -inf }
 0x876   :  { %v13405_v47 = vrot.slane %v13404_v5, 1  ;;  %v13411_v44 = vmax.f32 %v13409_v17, %v13410_v39 }
 0x877   :  { %v13398_v14 = vrot.slane %v13397_v38, 1  ;;  %v13392_v53 = vmax.f32 %v13390_v11, %v13391_v40 }
 0x878   :  { %v13406_v10 = vmax.f32 %v13404_v5, %v13405_v47  ;;  %v13412_v23 = vrot.slane %v13411_v44, 1 }
 0x879   :  { %v13399_v58 = vmax.f32 %v13397_v38, %v13398_v14  ;;  %v13527_v61 = vsel %vm13442_vm13, %v13392_v53, -inf }
 0x87a   :  { %v13529_v37 = vmax.f32 %v13527_v61, %v13528_v19  ;;  %v13413_v0 = vmax.f32 %v13411_v44, %v13412_v23  ;;  %v13533_v42 = vsel %vm13442_vm13, %v13406_v10, -inf }
 0x87b   :  { %v13530_v18 = vsel %vm13442_vm13, %v13399_v58, -inf  ;;  %v13535_v13 = vmax.f32 %v13533_v42, %v13534_v7 }
 0x87c   :  { %v13532_v29 = vmax.f32 %v13530_v18, %v13531_v3  ;;  %v13536_v6 = vsel %vm13442_vm13, %v13413_v0, -inf }
 0x87d   :  { %v13538_v50 = vmax.f32 %v13536_v6, %v13537_v26 }
 0x87e   :  { %v13592_v35 = vsel %vm10412_vm5, %v13532_v29, %v13529_v37 }
 0x87f   :  { %v13593_v30 = vsel %vm10414_vm6, %v13535_v13, %v13592_v35 }
 0x880   :  { %v13594_v57 = vsel %vm10416_vm7, %v13538_v50, %v13593_v30 }
 0x881   :  { %13611 = vst.msk [vmem:[#allocation4 + $0x1c] sm:$0xf] %vm13603_vm14, %v13594_v57 }
 0x882   :  { %17076 = shalt.err (!%p17073_p4)
}
 0x883   :  { %s17077_s21 = scalar_lea.hbm %s21825_s5, 512 }
 0x884   :  { %p17078_p5 = scmp.ne.s32.totalorder %s21825_s5, %s17077_s21  ;;  %p17081_p6 = scmp.lt.u32.totalorder %s17077_s21, %s21825_s5 }
 0x886   :  { %p17083_p7 = pnand %p17081_p6, %p17078_p5 }
 0x888   :  { %17086 = shalt.err (!%p17083_p7)
}
 0x889   :  { %s17092_s26 = smov 64   ;;  %s17093_s27 = smov 4  }
 0x88a   :  { %13623 = dma.vmem_to_hbm [thread:$0]  %s13618_s17, 512, %s21825_s5, [#allocation5], %s17092_s26, %s17092_s26, %s17093_s27  }
 0x88b   :  { %17087 = dma.done.wait [#allocation5], 512  }
 0x88c   :  { %17088 = vsyncadd [#allocation5], 4294966784 }
 0x88d   :  { %13627 = vsyncpa [#allocation5], 1 }

</bundles_post_ra>
